<compile_context>
chip_gen: v6e
topology: v6e:2x2x1
jax: 0.10.0
libtpu: 0.0.40
codegen_flags: <defaults>
</compile_context>

<pallas_src>
import jax
import jax.numpy as jnp
from jax.experimental import pallas as pl
from jax.experimental.pallas import tpu as pltpu

LATENT_DIM = 100
LATENT_PAD = 128          # 100 -> 128 (lane-aligned K for the first matmul)
H1, H2, H3 = 256, 512, 1024
OUT_DIM = 28 * 28         # 784
OUT_PAD = 896             # 7 * 128 (lane-dense output slab, unmasked vst)


def _generator_kernel(z_ref,
                      w1_ref, b1_ref,
                      w2_ref, b2_ref,
                      w3_ref, b3_ref,
                      w4_ref, b4_ref,
                      out_ref):
    # bf16 matmul inputs (native MXU path), f32 accumulation + bias + nonlinearity,
    # bf16 re-cast of intermediates to halve VMEM staging between layers.
    x = z_ref[...].astype(jnp.bfloat16)                              # (TILE_B, 128)

    h = jnp.dot(x, w1_ref[...], preferred_element_type=jnp.float32) + b1_ref[...]
    h = jnp.maximum(h, 0.0).astype(jnp.bfloat16)                     # (TILE_B, 256)

    h = jnp.dot(h, w2_ref[...], preferred_element_type=jnp.float32) + b2_ref[...]
    h = jnp.maximum(h, 0.0).astype(jnp.bfloat16)                     # (TILE_B, 512)

    h = jnp.dot(h, w3_ref[...], preferred_element_type=jnp.float32) + b3_ref[...]
    h = jnp.maximum(h, 0.0).astype(jnp.bfloat16)                     # (TILE_B, 1024)

    h = jnp.dot(h, w4_ref[...], preferred_element_type=jnp.float32) + b4_ref[...]
    out_ref[...] = jnp.tanh(h).astype(jnp.bfloat16)                  # (TILE_B, 896)


def init_params(key):
    """PyTorch-style Linear init, then padded + bf16-cast for the kernel.

    Returns a list of (w, b) with:
      w1 (128, 256) bf16   (rows 100..127 zero)
      w2 (256, 512) bf16
      w3 (512, 1024) bf16
      w4 (1024, 896) bf16  (cols 784..895 zero -- keep zero if loading a checkpoint)
      b* (1, out_pad) f32  (padded bias entries zero)
    """
    dims = [(LATENT_DIM, H1), (H1, H2), (H2, H3), (H3, OUT_DIM)]
    pad_dims = [(LATENT_PAD, H1), (H1, H2), (H2, H3), (H3, OUT_PAD)]
    params = []
    for i, ((fan_in, fan_out), (pin, pout)) in enumerate(zip(dims, pad_dims)):
        kw, kb = jax.random.split(jax.random.fold_in(key, i))
        bound = 1.0 / jnp.sqrt(fan_in)
        w = jax.random.uniform(kw, (fan_in, fan_out), jnp.float32, -bound, bound)
        b = jax.random.uniform(kb, (1, fan_out), jnp.float32, -bound, bound)
        w_pad = jnp.zeros((pin, pout), jnp.float32).at[:fan_in, :fan_out].set(w)
        b_pad = jnp.zeros((1, pout), jnp.float32).at[:, :fan_out].set(b)
        params.append((w_pad.astype(jnp.bfloat16), b_pad))
    return params


def _pick_tile_b(batch):
    # >=512 rows: 256-row tiles -> fewer grid steps (amortizes ~0.35 us/step
    # overhead on v6e/v7x) while still giving >=2 tiles for the two v7x TCs.
    # Smaller batches: 128-row tiles (v5e is compute-bound per tile anyway).
    return 256 if batch >= 512 else 128


def generator_forward(z, params, *, return_padded=False):
    """z: (B, 100) f32 -> images (B, 1, 28, 28) bf16 in [-1, 1].

    With return_padded=True, returns the raw lane-dense (B_pad, 896) bf16 slab
    (rows >= B and cols >= 784 are padding) and skips the slice/reshape copy.
    """
    B = z.shape[0]
    (w1, b1), (w2, b2), (w3, b3), (w4, b4) = params

    tile_b = _pick_tile_b(B)
    n_tiles = max(1, pl.cdiv(B, tile_b))
    B_pad = n_tiles * tile_b
    z_pad = jnp.zeros((B_pad, LATENT_PAD), jnp.float32).at[:B, :LATENT_DIM].set(z)

    # Weights/biases: full-array blocks with constant index_map -> DMA'd once,
    # VMEM-resident across the batch grid. Only activations stream per tile.
    const_full = lambda shp: pl.BlockSpec(shp, lambda i: (0,) * len(shp))

    flat = pl.pallas_call(
        _generator_kernel,
        out_shape=jax.ShapeDtypeStruct((B_pad, OUT_PAD), jnp.bfloat16),
        grid=(n_tiles,),
        in_specs=[
            pl.BlockSpec((tile_b, LATENT_PAD), lambda i: (i, 0)),
            const_full(w1.shape), const_full(b1.shape),
            const_full(w2.shape), const_full(b2.shape),
            const_full(w3.shape), const_full(b3.shape),
            const_full(w4.shape), const_full(b4.shape),
        ],
        out_specs=pl.BlockSpec((tile_b, OUT_PAD), lambda i: (i, 0)),
        compiler_params=pltpu.CompilerParams(
            dimension_semantics=("parallel",),
            vmem_limit_bytes=32 << 20,
        ),
    )(z_pad, w1, b1, w2, b2, w3, b3, w4, b4)

    if return_padded:
        return flat
    # Slice padding away (bf16 -> half the copy traffic of the old f32 path)
    # and match PyTorch `.view(-1, 1, 28, 28)` (NCHW).
    return flat[:B, :OUT_DIM].reshape(B, 1, 28, 28)


def generator_ref(z, params):
    """Pure-JAX reference mirroring the kernel numerics (bf16 inputs/intermediates,
    f32 accumulation; final tanh kept in f32)."""
    B = z.shape[0]
    x = jnp.zeros((B, LATENT_PAD), jnp.float32).at[:, :LATENT_DIM].set(z)
    x = x.astype(jnp.bfloat16)
    for i, (w, b) in enumerate(params):
        y = jnp.dot(x, w, preferred_element_type=jnp.float32) + b
        if i < 3:
            x = jnp.maximum(y, 0.0).astype(jnp.bfloat16)
        else:
            x = jnp.tanh(y)
    return x[:, :OUT_DIM].reshape(B, 1, 28, 28)


if __name__ == "__main__":
    key = jax.random.PRNGKey(0)
    k_params, k_z = jax.random.split(key)

    params = init_params(k_params)

    B = 8  # small example batch (padded to one 128-row tile internally)
    z = jax.random.normal(k_z, (B, LATENT_DIM), jnp.float32)

    imgs = generator_forward(z, params)
    imgs = jax.block_until_ready(imgs)

    ref = generator_ref(z, params)
    assert imgs.shape == (B, 1, 28, 28), imgs.shape
    assert imgs.dtype == jnp.bfloat16, imgs.dtype
    # bf16 weights/intermediates/output => tolerance looser than an f32 pipeline.
    assert jnp.allclose(imgs.astype(jnp.float32), ref.astype(jnp.float32),
                        atol=2e-2, rtol=2e-2), "mismatch vs reference"
    assert bool(jnp.all(jnp.abs(imgs.astype(jnp.float32)) <= 1.0)), "tanh range violated"

    print("KERNEL_OK")
</pallas_src>

<mosaic_0001>
module attributes {stable_mosaic.version = 11 : i64} {
  func.func @_generator_kernel(%arg0: i32, %arg1: memref<128x128xf32, #tpu.memory_space<vmem>>, %arg2: memref<128x256xbf16, #tpu.memory_space<vmem>>, %arg3: memref<1x256xf32, #tpu.memory_space<vmem>>, %arg4: memref<256x512xbf16, #tpu.memory_space<vmem>>, %arg5: memref<1x512xf32, #tpu.memory_space<vmem>>, %arg6: memref<512x1024xbf16, #tpu.memory_space<vmem>>, %arg7: memref<1x1024xf32, #tpu.memory_space<vmem>>, %arg8: memref<1024x896xbf16, #tpu.memory_space<vmem>>, %arg9: memref<1x896xf32, #tpu.memory_space<vmem>>, %arg10: memref<128x896xbf16, #tpu.memory_space<vmem>>) attributes {dimension_semantics = [#tpu.dimension_semantics<parallel>], iteration_bounds = array<i64: 1>, scalar_prefetch = 0 : i64, scratch_operands = 0 : i64, tpu.core_type = #tpu.core_type<tc>, window_params = [{transform_indices = @transform_0, window_bounds = array<i64: 128, 128>}, {pipeline_mode = #tpu.pipeline_mode<synchronous>, transform_indices = @transform_1, window_bounds = array<i64: 128, 256>}, {pipeline_mode = #tpu.pipeline_mode<synchronous>, transform_indices = @transform_2, window_bounds = array<i64: 1, 256>}, {pipeline_mode = #tpu.pipeline_mode<synchronous>, transform_indices = @transform_3, window_bounds = array<i64: 256, 512>}, {pipeline_mode = #tpu.pipeline_mode<synchronous>, transform_indices = @transform_4, window_bounds = array<i64: 1, 512>}, {pipeline_mode = #tpu.pipeline_mode<synchronous>, transform_indices = @transform_5, window_bounds = array<i64: 512, 1024>}, {pipeline_mode = #tpu.pipeline_mode<synchronous>, transform_indices = @transform_6, window_bounds = array<i64: 1, 1024>}, {pipeline_mode = #tpu.pipeline_mode<synchronous>, transform_indices = @transform_7, window_bounds = array<i64: 1024, 896>}, {pipeline_mode = #tpu.pipeline_mode<synchronous>, transform_indices = @transform_8, window_bounds = array<i64: 1, 896>}, {transform_indices = @transform_9, window_bounds = array<i64: 128, 896>}]} {
    %c0 = arith.constant 0 : index
    %c0_0 = arith.constant 0 : index
    %0 = vector.load %arg1[%c0, %c0_0] : memref<128x128xf32, #tpu.memory_space<vmem>>, vector<128x128xf32>
    %1 = arith.truncf %0 : vector<128x128xf32> to vector<128x128xbf16>
    %c0_1 = arith.constant 0 : index
    %c0_2 = arith.constant 0 : index
    %2 = vector.load %arg2[%c0_1, %c0_2] : memref<128x256xbf16, #tpu.memory_space<vmem>>, vector<128x256xbf16>
    %cst = arith.constant dense<0.000000e+00> : vector<128x256xf32>
    %3 = tpu.matmul %1, %2, %cst {dimension_numbers = #tpu.dot_dimension_numbers<[1], [0], [0], [1], [0, 0, 1, 1], [], []>} : vector<128x128xbf16>, vector<128x256xbf16>, vector<128x256xf32> -> vector<128x256xf32>
    %c0_3 = arith.constant 0 : index
    %c0_4 = arith.constant 0 : index
    %4 = vector.load %arg3[%c0_3, %c0_4] : memref<1x256xf32, #tpu.memory_space<vmem>>, vector<1x256xf32>
    %5 = vector.broadcast %4 : vector<1x256xf32> to vector<128x256xf32>
    %6 = arith.addf %3, %5 : vector<128x256xf32>
    %cst_5 = arith.constant 0.000000e+00 : f32
    %7 = vector.broadcast %cst_5 : f32 to vector<128x256xf32>
    %8 = arith.maximumf %6, %7 : vector<128x256xf32>
    %9 = arith.truncf %8 : vector<128x256xf32> to vector<128x256xbf16>
    %c0_6 = arith.constant 0 : index
    %c0_7 = arith.constant 0 : index
    %10 = vector.load %arg4[%c0_6, %c0_7] : memref<256x512xbf16, #tpu.memory_space<vmem>>, vector<256x512xbf16>
    %cst_8 = arith.constant dense<0.000000e+00> : vector<128x512xf32>
    %11 = tpu.matmul %9, %10, %cst_8 {dimension_numbers = #tpu.dot_dimension_numbers<[1], [0], [0], [1], [0, 0, 1, 1], [], []>} : vector<128x256xbf16>, vector<256x512xbf16>, vector<128x512xf32> -> vector<128x512xf32>
    %c0_9 = arith.constant 0 : index
    %c0_10 = arith.constant 0 : index
    %12 = vector.load %arg5[%c0_9, %c0_10] : memref<1x512xf32, #tpu.memory_space<vmem>>, vector<1x512xf32>
    %13 = vector.broadcast %12 : vector<1x512xf32> to vector<128x512xf32>
    %14 = arith.addf %11, %13 : vector<128x512xf32>
    %cst_11 = arith.constant 0.000000e+00 : f32
    %15 = vector.broadcast %cst_11 : f32 to vector<128x512xf32>
    %16 = arith.maximumf %14, %15 : vector<128x512xf32>
    %17 = arith.truncf %16 : vector<128x512xf32> to vector<128x512xbf16>
    %c0_12 = arith.constant 0 : index
    %c0_13 = arith.constant 0 : index
    %18 = vector.load %arg6[%c0_12, %c0_13] : memref<512x1024xbf16, #tpu.memory_space<vmem>>, vector<512x1024xbf16>
    %cst_14 = arith.constant dense<0.000000e+00> : vector<128x1024xf32>
    %19 = tpu.matmul %17, %18, %cst_14 {dimension_numbers = #tpu.dot_dimension_numbers<[1], [0], [0], [1], [0, 0, 1, 1], [], []>} : vector<128x512xbf16>, vector<512x1024xbf16>, vector<128x1024xf32> -> vector<128x1024xf32>
    %c0_15 = arith.constant 0 : index
    %c0_16 = arith.constant 0 : index
    %20 = vector.load %arg7[%c0_15, %c0_16] : memref<1x1024xf32, #tpu.memory_space<vmem>>, vector<1x1024xf32>
    %21 = vector.broadcast %20 : vector<1x1024xf32> to vector<128x1024xf32>
    %22 = arith.addf %19, %21 : vector<128x1024xf32>
    %cst_17 = arith.constant 0.000000e+00 : f32
    %23 = vector.broadcast %cst_17 : f32 to vector<128x1024xf32>
    %24 = arith.maximumf %22, %23 : vector<128x1024xf32>
    %25 = arith.truncf %24 : vector<128x1024xf32> to vector<128x1024xbf16>
    %c0_18 = arith.constant 0 : index
    %c0_19 = arith.constant 0 : index
    %26 = vector.load %arg8[%c0_18, %c0_19] : memref<1024x896xbf16, #tpu.memory_space<vmem>>, vector<1024x896xbf16>
    %cst_20 = arith.constant dense<0.000000e+00> : vector<128x896xf32>
    %27 = tpu.matmul %25, %26, %cst_20 {dimension_numbers = #tpu.dot_dimension_numbers<[1], [0], [0], [1], [0, 0, 1, 1], [], []>} : vector<128x1024xbf16>, vector<1024x896xbf16>, vector<128x896xf32> -> vector<128x896xf32>
    %c0_21 = arith.constant 0 : index
    %c0_22 = arith.constant 0 : index
    %28 = vector.load %arg9[%c0_21, %c0_22] : memref<1x896xf32, #tpu.memory_space<vmem>>, vector<1x896xf32>
    %29 = vector.broadcast %28 : vector<1x896xf32> to vector<128x896xf32>
    %30 = arith.addf %27, %29 : vector<128x896xf32>
    %31 = math.tanh %30 : vector<128x896xf32>
    %32 = arith.truncf %31 : vector<128x896xf32> to vector<128x896xbf16>
    %c0_23 = arith.constant 0 : index
    %c0_24 = arith.constant 0 : index
    %33 = vector.load %arg10[%c0_23, %c0_24] : memref<128x896xbf16, #tpu.memory_space<vmem>>, vector<128x896xbf16>
    tpu.vector_store %arg10[%c0_23, %c0_24], %32 {strides = array<i32>} : memref<128x896xbf16, #tpu.memory_space<vmem>>, vector<128x896xbf16>,
    return
  }
  func.func @transform_0(%arg0: i32) -> (i32, i32) {
    %c0_i32 = arith.constant 0 : i32
    %c0_i32_0 = arith.constant 0 : i32
    return %arg0, %c0_i32 : i32, i32
  }
  func.func @transform_1(%arg0: i32) -> (i32, i32) {
    %c0_i32 = arith.constant 0 : i32
    %c0_i32_0 = arith.constant 0 : i32
    %c0_i32_1 = arith.constant 0 : i32
    return %c0_i32, %c0_i32_0 : i32, i32
  }
  func.func @transform_2(%arg0: i32) -> (i32, i32) {
    %c0_i32 = arith.constant 0 : i32
    %c0_i32_0 = arith.constant 0 : i32
    %c0_i32_1 = arith.constant 0 : i32
    return %c0_i32, %c0_i32_0 : i32, i32
  }
  func.func @transform_3(%arg0: i32) -> (i32, i32) {
    %c0_i32 = arith.constant 0 : i32
    %c0_i32_0 = arith.constant 0 : i32
    %c0_i32_1 = arith.constant 0 : i32
    return %c0_i32, %c0_i32_0 : i32, i32
  }
  func.func @transform_4(%arg0: i32) -> (i32, i32) {
    %c0_i32 = arith.constant 0 : i32
    %c0_i32_0 = arith.constant 0 : i32
    %c0_i32_1 = arith.constant 0 : i32
    return %c0_i32, %c0_i32_0 : i32, i32
  }
  func.func @transform_5(%arg0: i32) -> (i32, i32) {
    %c0_i32 = arith.constant 0 : i32
    %c0_i32_0 = arith.constant 0 : i32
    %c0_i32_1 = arith.constant 0 : i32
    return %c0_i32, %c0_i32_0 : i32, i32
  }
  func.func @transform_6(%arg0: i32) -> (i32, i32) {
    %c0_i32 = arith.constant 0 : i32
    %c0_i32_0 = arith.constant 0 : i32
    %c0_i32_1 = arith.constant 0 : i32
    return %c0_i32, %c0_i32_0 : i32, i32
  }
  func.func @transform_7(%arg0: i32) -> (i32, i32) {
    %c0_i32 = arith.constant 0 : i32
    %c0_i32_0 = arith.constant 0 : i32
    %c0_i32_1 = arith.constant 0 : i32
    return %c0_i32, %c0_i32_0 : i32, i32
  }
  func.func @transform_8(%arg0: i32) -> (i32, i32) {
    %c0_i32 = arith.constant 0 : i32
    %c0_i32_0 = arith.constant 0 : i32
    %c0_i32_1 = arith.constant 0 : i32
    return %c0_i32, %c0_i32_0 : i32, i32
  }
  func.func @transform_9(%arg0: i32) -> (i32, i32) {
    %c0_i32 = arith.constant 0 : i32
    %c0_i32_0 = arith.constant 0 : i32
    return %arg0, %c0_i32 : i32, i32
  }
}

</mosaic_0001>

<bundles_post_ra>
// kernel: tpu_custom_call.1
= control target key start
LH: loop header
LB: loop body
LE: loop exit
PB: predicated region body
PF: predicated region fallthrough
CT: control target
= control target key end

     0   :  { %14 = vsyncpa [#allocation3], 0  ;;  %s13962_s0 = inlined_call_operand.hbm [shape: f32[128,128], index: 0, kind: input, shape index: {}]   ;;  %s13963_s1 = inlined_call_operand.hbm [shape: bf16[128,256], index: 1, kind: input, shape index: {}]   ;;  %s13964_s2 = inlined_call_operand.hbm [shape: f32[1,256], index: 2, kind: input, shape index: {}]   ;;  %s13965_s3 = inlined_call_operand.hbm [shape: bf16[256,512], index: 3, kind: input, shape index: {}]   ;;  %s13966_s4 = inlined_call_operand.hbm [shape: f32[1,512], index: 4, kind: input, shape index: {}]   ;;  %s13967_s5 = inlined_call_operand.hbm [shape: bf16[512,1024], index: 5, kind: input, shape index: {}]   ;;  %s13968_s6 = inlined_call_operand.hbm [shape: f32[1,1024], index: 6, kind: input, shape index: {}]   ;;  %s13969_s7 = inlined_call_operand.hbm [shape: bf16[1024,896], index: 7, kind: input, shape index: {}]   ;;  %s13970_s8 = inlined_call_operand.hbm [shape: f32[1,896], index: 8, kind: input, shape index: {}]   ;;  %s13971_s9 = inlined_call_operand.hbm [shape: bf16[128,896], index: 9, kind: output, shape index: {}]  }
   0x1   :  { %15 = vsyncpa [#allocation6], 0 }
   0x2   :  { %16 = vsyncpa [#allocation9], 0 }
   0x3   :  { %17 = vsyncpa [#allocation12], 0 }
   0x4   :  { %18 = vsyncpa [#allocation15], 0 }
   0x5   :  { %19 = vsyncpa [#allocation4], 0  ;;  %s11391_s30 = smov [#allocation5]   ;;  %s11392_s11 = smov [#allocation8]  }
   0x6   :  { %s37_s10 = sshll.u32 %s11391_s30, 4  ;;  %s59_s12 = sshll.u32 %s11392_s11, 4  ;;  %s38_s10 = int_to_ptr.vmem [resolvable:$true] %s37_s10  ;;  %s60_s12 = int_to_ptr.vmem [resolvable:$true] %s59_s12 }
   0x7   :  { %s11187_s13 = scalar_lea.vmem %s38_s10, 2048  ;;  %p11192_p1 = scmp.lt.s32.totalorder %s38_s10, %s38_s10 }
   0x8   :  { %p11188_p0 = scmp.ne.s32.totalorder %s38_s10, %s11187_s13  ;;  %p11193_p2 = scmp.lt.s32.totalorder %s11187_s13, %s11187_s13 }
   0xa   :  { %p11194_p3 = por %p11193_p2, %p11192_p1 }
   0xc   :  { %p11195_p4 = pnand %p11194_p3, %p11188_p0 }
   0xe   :  { %11198 = shalt.err (!%p11195_p4)
}
   0xf   :  { %s11393_s14 = smov 128   ;;  %s11394_s15 = smov 8  }
  0x10   :  { %43 = dma.hbm_to_vmem [thread:$0]  %s13963_s1, 2048, %s38_s10, [#allocation6], %s11393_s14, %s11393_s14, %s11394_s15  }
  0x11   :  { %s11207_s18 = scalar_lea.vmem %s60_s12, 8192  ;;  %p11212_p6 = scmp.lt.s32.totalorder %s60_s12, %s60_s12 }
  0x12   :  { %p11208_p5 = scmp.ne.s32.totalorder %s60_s12, %s11207_s18  ;;  %p11213_p7 = scmp.lt.s32.totalorder %s11207_s18, %s11207_s18 }
  0x14   :  { %p11214_p8 = por %p11213_p7, %p11212_p6 }
  0x16   :  { %p11215_p9 = pnand %p11214_p8, %p11208_p5 }
  0x18   :  { %11218 = shalt.err (!%p11215_p9)
}
  0x19   :  { %s11395_s19 = smov 256   ;;  %s11396_s20 = smov 16  }
  0x1a   :  { %65 = dma.hbm_to_vmem [thread:$0]  %s13965_s3, 8192, %s60_s12, [#allocation9], %s11395_s19, %s11395_s19, %s11396_s20  }
  0x1b   :  { %s11397_s23 = smov [#allocation11]  }
  0x1c   :  { %s81_s24 = sshll.u32 %s11397_s23, 4  ;;  %s82_s24 = int_to_ptr.vmem [resolvable:$true] %s81_s24 }
  0x1d   :  { %s11227_s25 = scalar_lea.vmem %s82_s24, 32768  ;;  %p11232_p11 = scmp.lt.s32.totalorder %s82_s24, %s82_s24 }
  0x1e   :  { %p11228_p10 = scmp.ne.s32.totalorder %s82_s24, %s11227_s25  ;;  %p11233_p12 = scmp.lt.s32.totalorder %s11227_s25, %s11227_s25 }
  0x20   :  { %p11234_p13 = por %p11233_p12, %p11232_p11 }
  0x22   :  { %p11235_p0 = pnand %p11234_p13, %p11228_p10 }
  0x24   :  { %11238 = shalt.err (!%p11235_p0)
}
  0x25   :  { %s11398_s1 = smov 512   ;;  %s11399_s26 = smov 32  }
  0x26   :  { %87 = dma.hbm_to_vmem [thread:$0]  %s13967_s5, 32768, %s82_s24, [#allocation12], %s11398_s1, %s11398_s1, %s11399_s26  }
  0x27   :  { %s11400_s29 = smov [#allocation14]  }
  0x28   :  { %s103_s30 = sshll.u32 %s11400_s29, 4  ;;  %s104_s30 = int_to_ptr.vmem [resolvable:$true] %s103_s30 }
  0x29   :  { %s11247_s3 = scalar_lea.vmem %s104_s30, 57344  ;;  %p11252_p2 = scmp.lt.s32.totalorder %s104_s30, %s104_s30 }
  0x2a   :  { %p11248_p1 = scmp.ne.s32.totalorder %s104_s30, %s11247_s3  ;;  %p11253_p3 = scmp.lt.s32.totalorder %s11247_s3, %s11247_s3 }
  0x2c   :  { %p11254_p4 = por %p11253_p3, %p11252_p2 }
  0x2e   :  { %p11255_p5 = pnand %p11254_p4, %p11248_p1 }
  0x30   :  { %11258 = shalt.err (!%p11255_p5)
}
  0x31   :  { %s11401_s10 = smov 448   ;;  %s11402_s11 = smov 28  }
  0x32   :  { %109 = dma.hbm_to_vmem [thread:$0]  %s13969_s7, 57344, %s104_s30, [#allocation15], %s11401_s10, %s11401_s10, %s11402_s11  }
  0x33   :  { %s11403_s5 = smov [#allocation2]   ;;  %s11404_s17 = smov [#allocation7]  }
  0x34   :  { %s25_s16 = sshll.u32 %s11403_s5, 4  ;;  %s50_s18 = sshll.u32 %s11404_s17, 4  ;;  %s26_s16 = int_to_ptr.vmem [resolvable:$true] %s25_s16  ;;  %s51_s18 = int_to_ptr.vmem [resolvable:$true] %s50_s18 }
  0x35   :  { %s11267_s19 = scalar_lea.vmem %s26_s16, 2048  ;;  %p11272_p7 = scmp.lt.s32.totalorder %s26_s16, %s26_s16 }
  0x36   :  { %p11268_p6 = scmp.ne.s32.totalorder %s26_s16, %s11267_s19  ;;  %p11273_p8 = scmp.lt.s32.totalorder %s11267_s19, %s11267_s19 }
  0x38   :  { %p11274_p9 = por %p11273_p8, %p11272_p7 }
  0x3a   :  { %p11275_p10 = pnand %p11274_p9, %p11268_p6 }
  0x3c   :  { %11278 = shalt.err (!%p11275_p10)
}
  0x3d   :  { %31 = dma.hbm_to_vmem [thread:$0]  %s13962_s0, 2048, %s26_s16, [#allocation3], %s11393_s14, %s11393_s14, %s11394_s15  }
  0x3e   :  { %s11287_s7 = scalar_lea.vmem %s51_s18, 32  ;;  %p11292_p12 = scmp.lt.s32.totalorder %s51_s18, %s51_s18 }
  0x3f   :  { %p11288_p11 = scmp.ne.s32.totalorder %s51_s18, %s11287_s7  ;;  %p11293_p13 = scmp.lt.s32.totalorder %s11287_s7, %s11287_s7 }
  0x41   :  { %p11294_p0 = por %p11293_p13, %p11292_p12 }
  0x43   :  { %p11295_p1 = pnand %p11294_p0, %p11288_p11 }
  0x45   :  { %11298 = shalt.err (!%p11295_p1)
}
  0x46   :  { %53 = dma.hbm_to_vmem [thread:$0]  %s13964_s2, 32, %s51_s18, [#allocation6]  }
  0x47   :  { %s11405_s24 = smov [#allocation10]   ;;  %s11406_s1 = smov [#allocation13]  }
  0x48   :  { %s72_s25 = sshll.u32 %s11405_s24, 4  ;;  %s94_s26 = sshll.u32 %s11406_s1, 4  ;;  %s73_s25 = int_to_ptr.vmem [resolvable:$true] %s72_s25  ;;  %s95_s26 = int_to_ptr.vmem [resolvable:$true] %s94_s26 }
  0x49   :  { %s11307_s27 = scalar_lea.vmem %s73_s25, 64  ;;  %p11312_p3 = scmp.lt.s32.totalorder %s73_s25, %s73_s25 }
  0x4a   :  { %p11308_p2 = scmp.ne.s32.totalorder %s73_s25, %s11307_s27  ;;  %p11313_p4 = scmp.lt.s32.totalorder %s11307_s27, %s11307_s27 }
  0x4c   :  { %p11314_p5 = por %p11313_p4, %p11312_p3 }
  0x4e   :  { %p11315_p6 = pnand %p11314_p5, %p11308_p2 }
  0x50   :  { %11318 = shalt.err (!%p11315_p6)
}
  0x51   :  { %75 = dma.hbm_to_vmem [thread:$0]  %s13966_s4, 64, %s73_s25, [#allocation9]  }
  0x52   :  { %s11327_s15 = scalar_lea.vmem %s95_s26, 128  ;;  %p11332_p8 = scmp.lt.s32.totalorder %s95_s26, %s95_s26 }
  0x53   :  { %p11328_p7 = scmp.ne.s32.totalorder %s95_s26, %s11327_s15  ;;  %p11333_p9 = scmp.lt.s32.totalorder %s11327_s15, %s11327_s15 }
  0x55   :  { %p11334_p10 = por %p11333_p9, %p11332_p8 }
  0x57   :  { %p11335_p11 = pnand %p11334_p10, %p11328_p7 }
  0x59   :  { %11338 = shalt.err (!%p11335_p11)
}
  0x5a   :  { %97 = dma.hbm_to_vmem [thread:$0]  %s13968_s6, 128, %s95_s26, [#allocation12]  }
  0x5b   :  { %s11407_s29 = smov [#allocation16]  }
  0x5c   :  { %s116_s30 = sshll.u32 %s11407_s29, 4  ;;  %s117_s30 = int_to_ptr.vmem [resolvable:$true] %s116_s30 }
  0x5d   :  { %s11347_s3 = scalar_lea.vmem %s117_s30, 112  ;;  %s11351_s12 = scalar_lea.vmem %s117_s30, 128 }
  0x5e   :  { %p11348_p12 = scmp.ne.s32.totalorder %s117_s30, %s11347_s3  ;;  %p11352_p13 = scmp.lt.s32.totalorder %s117_s30, %s117_s30 }
  0x5f   :  { %p11353_p0 = scmp.lt.s32.totalorder %s11351_s12, %s11347_s3 }
  0x61   :  { %p11354_p1 = por %p11353_p0, %p11352_p13 }
  0x63   :  { %p11355_p2 = pnand %p11354_p1, %p11348_p12 }
  0x65   :  { %11358 = shalt.err (!%p11355_p2)
}
  0x66   :  { %119 = dma.hbm_to_vmem [thread:$0]  %s13970_s8, 112, %s117_s30, [#allocation15]  }
  0x67   :  { %11379 = dma.done.wait [#allocation3], 2048  }
  0x68   :  { %11380 = vsyncadd [#allocation3], 4294965248 }
  0x69   :  { %11381 = dma.done.wait [#allocation6], 2080  }
  0x6a   :  { %11382 = vsyncadd [#allocation6], 4294965216 }
  0x6b   :  { %11383 = dma.done.wait [#allocation9], 8256  }
  0x6c   :  { %11384 = vsyncadd [#allocation9], 4294959040 }
  0x6d   :  { %11385 = dma.done.wait [#allocation12], 32896  }
  0x6e   :  { %11386 = vsyncadd [#allocation12], 4294934400 }
  0x6f   :  { %11387 = dma.done.wait [#allocation15], 57456  }
  0x70   :  { %11388 = vsyncadd [#allocation15], 4294909840  ;;  %v11408_v0 = vmov 0   ;;  %v10192_v1 = vld [vmem:[#allocation5 + $0x74] ss:$8 sps:$4 sm:$0xff]   ;;  %v148_v24 = vld [vmem:[#allocation2] sm:$0xff] }
  0x71   :  { %312 = vmatprep.mubr.bf16.mxu0 %v11408_v0  ;;  %v10194_v2 = vld [vmem:[#allocation5 + $0x70] ss:$8 sps:$4 sm:$0xff]   ;;  %280 = vmatprep.subr.bf16.mxu0 %v10192_v1  ;;  %v10195_v3 = vld [vmem:[#allocation5 + $0x64] ss:$8 sps:$4 sm:$0xff]   ;;  %v10197_v4 = vld [vmem:[#allocation5 + $0x60] ss:$8 sps:$4 sm:$0xff]  }
  0x72   :  { %281 = vmatpush1.bf16.msra.mxu0 %v10194_v2  ;;  %v10198_v5 = vld [vmem:[#allocation5 + $0x54] ss:$8 sps:$4 sm:$0xff]   ;;  %v10200_v6 = vld [vmem:[#allocation5 + $0x50] ss:$8 sps:$4 sm:$0xff]   ;;  %v10201_v7 = vld [vmem:[#allocation5 + $0x44] ss:$8 sps:$4 sm:$0xff]  }
  0x73   :  { %282 = vmatprep.subr.bf16.mxu0 %v10195_v3  ;;  %v10203_v8 = vld [vmem:[#allocation5 + $0x40] ss:$8 sps:$4 sm:$0xff]   ;;  %v10204_v9 = vld [vmem:[#allocation5 + $0x34] ss:$8 sps:$4 sm:$0xff]   ;;  %v10206_v10 = vld [vmem:[#allocation5 + $0x30] ss:$8 sps:$4 sm:$0xff]  }
  0x74   :  { %v10207_v11 = vld [vmem:[#allocation5 + $0x24] ss:$8 sps:$4 sm:$0xff]   ;;  %v10209_v13 = vld [vmem:[#allocation5 + $0x20] ss:$8 sps:$4 sm:$0xff]   ;;  %v10210_v16 = vld [vmem:[#allocation5 + $0x14] ss:$8 sps:$4 sm:$0xff]  }
  0x75   :  { %v10216_v12 = vld [vmem:[#allocation8 + $0xe4] ss:$16 sps:$4 sm:$0xff]   ;;  %v10221_v14 = vld [vmem:[#allocation8 + $0xe0] ss:$16 sps:$4 sm:$0xff]   ;;  %v10220_v26 = vld [vmem:[#allocation8 + $0xec] ss:$16 sps:$4 sm:$0xff]  }
  0x76   :  { %283 = vmatpush1.bf16.msra.mxu0 %v10197_v4  ;;  %847 = vmatprep.subr.bf16.mxu1 %v10216_v12  ;;  %v10222_v15 = vld [vmem:[#allocation8 + $0xc4] ss:$16 sps:$4 sm:$0xff]   ;;  %v10227_v17 = vld [vmem:[#allocation8 + $0xc0] ss:$16 sps:$4 sm:$0xff]   ;;  %v10218_v30 = vld [vmem:[#allocation8 + $0xe8] ss:$16 sps:$4 sm:$0xff]  }
  0x77   :  { %284 = vmatprep.subr.bf16.mxu0 %v10198_v5  ;;  %848 = vmatpush1.bf16.msra.mxu1 %v10221_v14  ;;  %v10228_v18 = vld [vmem:[#allocation8 + $0xa4] ss:$16 sps:$4 sm:$0xff]   ;;  %v10233_v21 = vld [vmem:[#allocation8 + $0xa0] ss:$16 sps:$4 sm:$0xff]   ;;  %v10226_v31 = vld [vmem:[#allocation8 + $0xcc] ss:$16 sps:$4 sm:$0xff]  }
  0x78   :  { %849 = vmatprep.subr.bf16.mxu1 %v10222_v15  ;;  %v10212_v19 = vld [vmem:[#allocation5 + $0x10] ss:$8 sps:$4 sm:$0xff]   ;;  %v10213_v20 = vld [vmem:[#allocation5 + $0x4] ss:$8 sps:$4 sm:$0xff]   ;;  %v10215_v23 = vld [vmem:[#allocation5] ss:$8 sps:$4 sm:$0xff]  }
  0x79   :  { %v10234_v22 = vld [vmem:[#allocation8 + $0x84] ss:$16 sps:$4 sm:$0xff]   ;;  %v10239_v27 = vld [vmem:[#allocation8 + $0x80] ss:$16 sps:$4 sm:$0xff]   ;;  %v10224_v36 = vld [vmem:[#allocation8 + $0xc8] ss:$16 sps:$4 sm:$0xff]  }
  0x7a   :  { %285 = vmatpush1.bf16.msra.mxu0 %v10200_v6  ;;  %v149_v25 = vld [vmem:[#allocation2 + $0x8] sm:$0xff]  ;;  %v10245_v32 = vld [vmem:[#allocation8 + $0x60] ss:$16 sps:$4 sm:$0xff]   ;;  %v151_v35 = vld [vmem:[#allocation2 + $0x18] sm:$0xff]  ;;  %s11409_s6 = smov [#allocation17]  }
  0x7b   :  { %286 = vmatprep.subr.bf16.mxu0 %v10201_v7  ;;  %850 = vmatpush1.bf16.msra.mxu1 %v10227_v17  ;;  %v10240_v28 = vld [vmem:[#allocation8 + $0x64] ss:$16 sps:$4 sm:$0xff]   ;;  %v164_v29 = vpack.c.bf16 %v149_v25, %v148_v24  ;;  %v10232_v37 = vld [vmem:[#allocation8 + $0xac] ss:$16 sps:$4 sm:$0xff]   ;;  %v10251_v38 = vld [vmem:[#allocation8 + $0x40] ss:$16 sps:$4 sm:$0xff]  }
  0x7c   :  { %851 = vmatprep.subr.bf16.mxu1 %v10228_v18  ;;  %v10246_v33 = vld [vmem:[#allocation8 + $0x44] ss:$16 sps:$4 sm:$0xff]   ;;  %v10230_v41 = vld [vmem:[#allocation8 + $0xa8] ss:$16 sps:$4 sm:$0xff]   ;;  %v10238_v42 = vld [vmem:[#allocation8 + $0x8c] ss:$16 sps:$4 sm:$0xff]  }
  0x7d   :  { %v150_v34 = vld [vmem:[#allocation2 + $0x10] sm:$0xff]  ;;  %v152_v45 = vld [vmem:[#allocation2 + $0x20] sm:$0xff]  ;;  %v153_v46 = vld [vmem:[#allocation2 + $0x28] sm:$0xff]  ;;  %s8973_s8 = sshll.u32 %s11409_s6, 4  ;;  %s8974_s8 = int_to_ptr.vmem [resolvable:$true] %s8973_s8 }
  0x7e   :  { %287 = vmatpush1.bf16.msra.mxu0 %v10203_v8  ;;  %v10252_v39 = vld [vmem:[#allocation8 + $0x24] ss:$16 sps:$4 sm:$0xff]   ;;  %v165_v40 = vpack.c.bf16 %v151_v35, %v150_v34  ;;  %v10257_v43 = vld [vmem:[#allocation8 + $0x20] ss:$16 sps:$4 sm:$0xff]   ;;  %v10236_v47 = vld [vmem:[#allocation8 + $0x88] ss:$16 sps:$4 sm:$0xff]   ;;  %v166_v51 = vpack.c.bf16 %v153_v46, %v152_v45  ;;  %p11364_p4 = scmp.lt.s32.totalorder %s8974_s8, %s8974_s8 }
  0x7f   :  { %288 = vmatprep.subr.bf16.mxu0 %v10204_v9  ;;  %852 = vmatpush1.bf16.msra.mxu1 %v10233_v21  ;;  %v10258_v44 = vld [vmem:[#allocation8 + $0x4] ss:$16 sps:$4 sm:$0xff]   ;;  %v10244_v48 = vld [vmem:[#allocation8 + $0x6c] ss:$16 sps:$4 sm:$0xff]   ;;  %v10263_v49 = vld [vmem:[#allocation8] ss:$16 sps:$4 sm:$0xff]  }
  0x80   :  { %853 = vmatprep.subr.bf16.mxu1 %v10234_v22  ;;  %v10264_v50 = vld [vmem:[#allocation8 + $0x1e4] ss:$16 sps:$4 sm:$0xff]   ;;  %v10242_v52 = vld [vmem:[#allocation8 + $0x68] ss:$16 sps:$4 sm:$0xff]   ;;  %v10250_v53 = vld [vmem:[#allocation8 + $0x4c] ss:$16 sps:$4 sm:$0xff]  }
  0x81   :  { %v10269_v54 = vld [vmem:[#allocation8 + $0x1e0] ss:$16 sps:$4 sm:$0xff]   ;;  %v155_v56 = vld [vmem:[#allocation2 + $0x38] sm:$0xff]  ;;  %v157_v5 = vld [vmem:[#allocation2 + $0x48] sm:$0xff]  ;;  %s11359_s5 = scalar_lea.vmem %s8974_s8, 7168 }
  0x82   :  { %289 = vmatpush1.bf16.msra.mxu0 %v10206_v10  ;;  %v154_v55 = vld [vmem:[#allocation2 + $0x30] sm:$0xff]  ;;  %v10248_v58 = vld [vmem:[#allocation8 + $0x48] ss:$16 sps:$4 sm:$0xff]   ;;  %v156_v4 = vld [vmem:[#allocation2 + $0x40] sm:$0xff]  ;;  %p11360_p3 = scmp.ne.s32.totalorder %s8974_s8, %s11359_s5  ;;  %p11365_p5 = scmp.lt.s32.totalorder %s11359_s5, %s11359_s5 }
  0x83   :  { %290 = vmatprep.subr.bf16.mxu0 %v10207_v11  ;;  %854 = vmatpush1.bf16.msra.mxu1 %v10239_v27  ;;  %v10270_v57 = vld [vmem:[#allocation8 + $0x1c4] ss:$16 sps:$4 sm:$0xff]   ;;  %v10256_v59 = vld [vmem:[#allocation8 + $0x2c] ss:$16 sps:$4 sm:$0xff]   ;;  %v10275_v60 = vld [vmem:[#allocation8 + $0x1c0] ss:$16 sps:$4 sm:$0xff]   ;;  %v167_v63 = vpack.c.bf16 %v155_v56, %v154_v55  ;;  %v168_v11 = vpack.c.bf16 %v157_v5, %v156_v4 }
  0x84   :  { %855 = vmatprep.subr.bf16.mxu1 %v10240_v28  ;;  %v10276_v61 = vld [vmem:[#allocation8 + $0x1a4] ss:$16 sps:$4 sm:$0xff]   ;;  %v10254_v62 = vld [vmem:[#allocation8 + $0x28] ss:$16 sps:$4 sm:$0xff]   ;;  %v10262_v1 = vld [vmem:[#allocation8 + $0xc] ss:$16 sps:$4 sm:$0xff]   ;;  %p11366_p6 = por %p11365_p5, %p11364_p4 }
  0x85   :  { %v10281_v2 = vld [vmem:[#allocation8 + $0x1a0] ss:$16 sps:$4 sm:$0xff]   ;;  %v10282_v3 = vld [vmem:[#allocation8 + $0x184] ss:$16 sps:$4 sm:$0xff]   ;;  %v10260_v6 = vld [vmem:[#allocation8 + $0x8] ss:$16 sps:$4 sm:$0xff]  }
  0x86   :  { %291 = vmatpush1.bf16.msra.mxu0 %v10209_v13  ;;  %v10268_v7 = vld [vmem:[#allocation8 + $0x1ec] ss:$16 sps:$4 sm:$0xff]   ;;  %v10287_v8 = vld [vmem:[#allocation8 + $0x180] ss:$16 sps:$4 sm:$0xff]   ;;  %v10288_v9 = vld [vmem:[#allocation8 + $0x164] ss:$16 sps:$4 sm:$0xff]   ;;  %p11367_p7 = pnand %p11366_p6, %p11360_p3 }
  0x87   :  { %292 = vmatprep.subr.bf16.mxu0 %v10210_v16  ;;  %856 = vmatpush1.bf16.msra.mxu1 %v10245_v32  ;;  %v10266_v10 = vld [vmem:[#allocation8 + $0x1e8] ss:$16 sps:$4 sm:$0xff]   ;;  %v10274_v12 = vld [vmem:[#allocation8 + $0x1cc] ss:$16 sps:$4 sm:$0xff]   ;;  %v10293_v13 = vld [vmem:[#allocation8 + $0x160] ss:$16 sps:$4 sm:$0xff]  }
  0x88   :  { %857 = vmatprep.subr.bf16.mxu1 %v10246_v33  ;;  %v158_v14 = vld [vmem:[#allocation2 + $0x50] sm:$0xff]  ;;  %v159_v15 = vld [vmem:[#allocation2 + $0x58] sm:$0xff]  ;;  %v160_v21 = vld [vmem:[#allocation2 + $0x60] sm:$0xff] }
  0x89   :  { %v10272_v16 = vld [vmem:[#allocation8 + $0x1c8] ss:$16 sps:$4 sm:$0xff]   ;;  %v10280_v17 = vld [vmem:[#allocation8 + $0x1ac] ss:$16 sps:$4 sm:$0xff]   ;;  %v10299_v33 = vld [vmem:[#allocation8 + $0x140] ss:$16 sps:$4 sm:$0xff]  }
  0x8a   :  { %293 = vmatpush1.bf16.msra.mxu0 %v10212_v19  ;;  %v10278_v18 = vld [vmem:[#allocation8 + $0x1a8] ss:$16 sps:$4 sm:$0xff]   ;;  %v169_v19 = vpack.c.bf16 %v159_v15, %v158_v14  ;;  %v10292_v24 = vld [vmem:[#allocation8 + $0x16c] ss:$16 sps:$4 sm:$0xff]   ;;  %v10300_v34 = vld [vmem:[#allocation8 + $0x124] ss:$16 sps:$4 sm:$0xff]  }
  0x8b   :  { %294 = vmatprep.subr.bf16.mxu0 %v10213_v20  ;;  %858 = vmatpush1.bf16.msra.mxu1 %v10251_v38  ;;  %v10286_v20 = vld [vmem:[#allocation8 + $0x18c] ss:$16 sps:$4 sm:$0xff]   ;;  %v10290_v25 = vld [vmem:[#allocation8 + $0x168] ss:$16 sps:$4 sm:$0xff]  }
  0x8c   :  { %859 = vmatprep.subr.bf16.mxu1 %v10252_v39  ;;  %v161_v22 = vld [vmem:[#allocation2 + $0x68] sm:$0xff]  ;;  %v162_v27 = vld [vmem:[#allocation2 + $0x70] sm:$0xff]  ;;  %v163_v28 = vld [vmem:[#allocation2 + $0x78] sm:$0xff] }
  0x8d   :  { %v10296_v32 = vld [vmem:[#allocation8 + $0x148] ss:$16 sps:$4 sm:$0xff]   ;;  %v10304_v35 = vld [vmem:[#allocation8 + $0x12c] ss:$16 sps:$4 sm:$0xff]  }
  0x8e   :  { %295 = vmatpush1.bf16.msra.mxu0 %v10215_v23  ;;  %v10284_v23 = vld [vmem:[#allocation8 + $0x188] ss:$16 sps:$4 sm:$0xff]   ;;  %v10310_v38 = vld [vmem:[#allocation8 + $0x10c] ss:$16 sps:$4 sm:$0xff]  }
  0x8f   :  { %960 = vmatprep.subr.bf16.mxu0 %v10220_v26  ;;  %860 = vmatpush1.bf16.msra.mxu1 %v10257_v43  ;;  %v170_v26 = vpack.c.bf16 %v161_v22, %v160_v21  ;;  %v10308_v39 = vld [vmem:[#allocation8 + $0x108] ss:$16 sps:$4 sm:$0xff]  }
  0x90   :  { %861 = vmatprep.subr.bf16.mxu1 %v10258_v44  ;;  %v1353_v43 = vld [vmem:[#allocation11 + $0x5c0] sm:$0xff] }
  0x91   :  { %313 = vmatmul.mubr.bf16.vlgmr.msra.gmra.mxu0 %v164_v29  ;;  %v171_v29 = vpack.c.bf16 %v163_v28, %v162_v27  ;;  %v1357_v46 = vld [vmem:[#allocation11 + $0x5e0] sm:$0xff] }
  0x92   :  { %322 = vmatprep.mubr.bf16.mxu0 %v11408_v0  ;;  %961 = vmatpush1.bf16.msra.mxu0 %v10218_v30  ;;  %v10294_v30 = vld [vmem:[#allocation8 + $0x144] ss:$16 sps:$4 sm:$0xff]  }
  0x93   :  { %962 = vmatprep.subr.bf16.mxu0 %v10226_v31  ;;  %862 = vmatpush1.bf16.msra.mxu1 %v10263_v49  ;;  %v10298_v31 = vld [vmem:[#allocation8 + $0x14c] ss:$16 sps:$4 sm:$0xff]   ;;  %v190_v49 = vlaneseq  ;;  %v1221_v4 = vld [vmem:[#allocation11 + $0x1a0] sm:$0xff] }
  0x94   :  { %863 = vmatprep.subr.bf16.mxu1 %v10264_v50  ;;  %v1345_v5 = vld [vmem:[#allocation11 + $0x580] sm:$0xff] }
  0x95   :  { %v11504_v50 = vshrl.u32 %v190_v49, 7  ;;  %v1213_v14 = vld [vmem:[#allocation11 + $0x160] sm:$0xff] }
  0x96   :  { %963 = vmatpush1.bf16.msra.mxu0 %v10224_v36  ;;  %v10302_v36 = vld [vmem:[#allocation8 + $0x128] ss:$16 sps:$4 sm:$0xff]  }
  0x97   :  { %964 = vmatprep.subr.bf16.mxu0 %v10232_v37  ;;  %864 = vmatpush2.bf16.msra.mxu1 %v10269_v54  ;;  %v10305_v37 = vld [vmem:[#allocation8 + $0x120] ss:$16 sps:$4 sm:$0xff]   ;;  %14093 = vst [vmem:[#allocation24_spill] sm:$0xff] %v11504_v50  ;;  %v1337_v15 = vld [vmem:[#allocation11 + $0x540] sm:$0xff] }
  0x98   :  { %865 = vmatprep.subr.bf16.mxu1 %v10270_v57  ;;  %v1341_v22 = vld [vmem:[#allocation11 + $0x560] sm:$0xff] }
  0x99   :  { %323 = vmatmul.mubr.bf16.gmra.mxu0 %v165_v40  ;;  %v10311_v40 = vld [vmem:[#allocation8 + $0x100] ss:$16 sps:$4 sm:$0xff]  }
  0x9a   :  { %332 = vmatprep.mubr.bf16.mxu0 %v11408_v0  ;;  %965 = vmatpush1.bf16.msra.mxu0 %v10230_v41  ;;  %v1225_v41 = vld [vmem:[#allocation11 + $0x1c0] sm:$0xff] }
  0x9b   :  { %966 = vmatprep.subr.bf16.mxu0 %v10238_v42  ;;  %866 = vmatpush2.bf16.msra.mxu1 %v10275_v60  ;;  %v1229_v42 = vld [vmem:[#allocation11 + $0x1e0] sm:$0xff] }
  0x9c   :  { %867 = vmatprep.subr.bf16.mxu1 %v10276_v61  ;;  %v9125_v44 = vcombine.low %v1225_v41, %v1229_v42  ;;  %v9126_v45 = vcombine.high %v1225_v41, %v1229_v42  ;;  %v1193_v41 = vld [vmem:[#allocation11 + $0xc0] sm:$0xff] }
  0x9d   :  { %v1197_v42 = vld [vmem:[#allocation11 + $0xe0] sm:$0xff] }
  0x9e   :  { %967 = vmatpush1.bf16.msra.mxu0 %v10236_v47  ;;  %v9253_v47 = vcombine.low %v1353_v43, %v1357_v46 }
  0x9f   :  { %968 = vmatprep.subr.bf16.mxu0 %v10244_v48  ;;  %868 = vmatpush2.bf16.msra.mxu1 %v10281_v2  ;;  %v9254_v48 = vcombine.high %v1353_v43, %v1357_v46  ;;  %v1321_v43 = vld [vmem:[#allocation11 + $0x4c0] sm:$0xff] }
  0xa0   :  { %869 = vmatprep.subr.bf16.mxu1 %v10282_v3  ;;  %v1217_v3 = vld [vmem:[#allocation11 + $0x180] sm:$0xff] }
  0xa1   :  { %333 = vmatmul.mubr.bf16.gmra.mxu0 %v166_v51  ;;  %v11507_v51 = vsub.s32 0, %v11504_v50 }
  0xa2   :  { %342 = vmatprep.mubr.bf16.mxu0 %v11408_v0  ;;  %969 = vmatpush1.bf16.msra.mxu0 %v10242_v52  ;;  %v11510_v52 = vsub.s32 1, %v11504_v50 }
  0xa3   :  { %970 = vmatprep.subr.bf16.mxu0 %v10250_v53  ;;  %870 = vmatpush2.bf16.msra.mxu1 %v10287_v8  ;;  %14094 = vst [vmem:[#allocation25_spill] sm:$0xff] %v11507_v51  ;;  %v188_v53 = vld [vmem:[#allocation7] sm:$0x3] }
  0xa4   :  { %871 = vmatprep.subr.bf16.mxu1 %v10288_v9  ;;  %14095 = vst [vmem:[#allocation26_spill] sm:$0xff] %v11510_v52  ;;  %v11513_v54 = vrot.slane %v188_v53, %v11507_v51  ;;  %v11516_v56 = vrot.slane %v188_v53, %v11510_v52  ;;  %v1325_v53 = vld [vmem:[#allocation11 + $0x4e0] sm:$0xff] }
  0xa6   :  { %971 = vmatpush1.bf16.msra.mxu0 %v10248_v58 }
  0xa7   :  { %972 = vmatprep.subr.bf16.mxu0 %v10256_v59  ;;  %872 = vmatpush2.bf16.msra.mxu1 %v10293_v13  ;;  %v1209_v13 = vld [vmem:[#allocation11 + $0x140] sm:$0xff] }
  0xa8   :  { %873 = vmatprep.subr.bf16.mxu1 %v10294_v30  ;;  %v1205_v30 = vld [vmem:[#allocation11 + $0x120] sm:$0xff] }
  0xa9   :  { %343 = vmatmul.mubr.bf16.gmra.mxu0 %v167_v63 }
  0xaa   :  { %352 = vmatprep.mubr.bf16.mxu0 %v11408_v0  ;;  %973 = vmatpush1.bf16.msra.mxu0 %v10254_v62 }
  0xab   :  { %974 = vmatprep.subr.bf16.mxu0 %v10262_v1  ;;  %874 = vmatpush2.bf16.msra.mxu1 %v10299_v33 }
  0xac   :  { %875 = vmatprep.subr.bf16.mxu1 %v10300_v34  ;;  %v9110_v34 = vcombine.high %v1209_v13, %v1213_v14 }
  0xae   :  { %975 = vmatpush1.bf16.msra.mxu0 %v10260_v6  ;;  %v1349_v6 = vld [vmem:[#allocation11 + $0x5a0] sm:$0xff] }
  0xaf   :  { %976 = vmatprep.subr.bf16.mxu0 %v10268_v7  ;;  %876 = vmatpush2.bf16.msra.mxu1 %v10305_v37  ;;  %v9245_v28 = vcombine.low %v1345_v5, %v1349_v6 }
  0xb1   :  { %353 = vmatmul.mubr.bf16.gmra.mxu0 %v168_v11 }
  0xb2   :  { %362 = vmatprep.mubr.bf16.mxu0 %v11408_v0  ;;  %977 = vmatpush2.bf16.msra.mxu0 %v10266_v10 }
  0xb3   :  { %978 = vmatprep.subr.bf16.mxu0 %v10274_v12 }
  0xb6   :  { %979 = vmatpush2.bf16.msra.mxu0 %v10272_v16 }
  0xb7   :  { %980 = vmatprep.subr.bf16.mxu0 %v10280_v17 }
  0xb9   :  { %363 = vmatmul.mubr.bf16.gmra.mxu0 %v169_v19  ;;  %v9246_v19 = vcombine.high %v1345_v5, %v1349_v6  ;;  %v1189_v5 = vld [vmem:[#allocation11 + $0xa0] sm:$0xff] }
  0xba   :  { %372 = vmatprep.mubr.bf16.mxu0 %v11408_v0  ;;  %981 = vmatpush2.bf16.msra.mxu0 %v10278_v18  ;;  %v9118_v18 = vcombine.high %v1217_v3, %v1221_v4  ;;  %v1313_v6 = vld [vmem:[#allocation11 + $0x480] sm:$0xff] }
  0xbb   :  { %982 = vmatprep.subr.bf16.mxu0 %v10286_v20 }
  0xbe   :  { %983 = vmatpush2.bf16.msra.mxu0 %v10284_v23 }
  0xbf   :  { %984 = vmatprep.subr.bf16.mxu0 %v10292_v24  ;;  %v9117_v24 = vcombine.low %v1217_v3, %v1221_v4 }
  0xc1   :  { %373 = vmatmul.mubr.bf16.gmra.mxu0 %v170_v26 }
  0xc2   :  { %382 = vmatprep.mubr.bf16.mxu0 %v11408_v0  ;;  %985 = vmatpush2.bf16.msra.mxu0 %v10290_v25  ;;  %v10306_v0 = vld [vmem:[#allocation8 + $0x104] ss:$16 sps:$4 sm:$0xff]  }
  0xc3   :  { %986 = vmatprep.subr.bf16.mxu0 %v10298_v31  ;;  %877 = vmatprep.subr.bf16.mxu1 %v10306_v0  ;;  %v1329_v31 = vld [vmem:[#allocation11 + $0x500] sm:$0xff] }
  0xc4   :  { %878 = vmatpush2.bf16.msra.mxu1 %v10311_v40  ;;  %v9237_v40 = vcombine.low %v1337_v15, %v1341_v22 }
  0xc5   :  { %2747 = vmatprep.subr.bf16.mxu1 %v9126_v45 }
  0xc6   :  { %987 = vmatpush2.bf16.msra.mxu0 %v10296_v32  ;;  %v1333_v32 = vld [vmem:[#allocation11 + $0x520] sm:$0xff] }
  0xc7   :  { %988 = vmatprep.subr.bf16.mxu0 %v10304_v35  ;;  %v9238_v35 = vcombine.high %v1337_v15, %v1341_v22  ;;  %v1309_v22 = vld [vmem:[#allocation11 + $0x460] sm:$0xff] }
  0xc9   :  { %383 = vmatmul.mubr.bf16.gmra.mxu0 %v171_v29  ;;  %v1201_v29 = vld [vmem:[#allocation11 + $0x100] sm:$0xff] }
  0xca   :  { %989 = vmatpush2.bf16.msra.mxu0 %v10302_v36  ;;  %v9102_v46 = vcombine.high %v1201_v29, %v1205_v30 }
  0xcb   :  { %990 = vmatprep.subr.bf16.mxu0 %v10310_v38 }
  0xce   :  { %991 = vmatpush2.bf16.msra.mxu0 %v10308_v39  ;;  %v9109_v39 = vcombine.low %v1209_v13, %v1213_v14 }
  0xcf   :  { %2860 = vmatprep.subr.bf16.mxu0 %v9254_v48 }
 0x151   :  { %v314_v55 = vpop.f32.mrf.mxu0 }
 0x152   :  { %v315_v58 = vadd.f32 %v314_v55, %v11513_v54 }
 0x153   :  { %v316_v57 = vpop.f32.mrf.mxu0 }
 0x154   :  { %v317_v60 = vadd.f32 %v316_v57, %v11516_v56  ;;  %v393_v63 = vmax.f32 %v315_v58, 0.0 }
 0x155   :  { %v318_v59 = vpop.f32.mrf.mxu0 }
 0x156   :  { %v319_v61 = vadd.f32 %v318_v59, %v11513_v54  ;;  %v394_v8 = vmax.f32 %v317_v60, 0.0  ;;  %v9101_v60 = vcombine.low %v1201_v29, %v1205_v30 }
 0x157   :  { %v320_v62 = vpop.f32.mrf.mxu0 }
 0x158   :  { %v395_v1 = vmax.f32 %v319_v61, 0.0  ;;  %v321_v2 = vadd.f32 %v320_v62, %v11516_v56  ;;  %v9229_v61 = vcombine.low %v1329_v31, %v1333_v32  ;;  %v1185_v62 = vld [vmem:[#allocation11 + $0x80] sm:$0xff] }
 0x159   :  { %v324_v7 = vpop.f32.mrf.mxu0  ;;  %v9086_v15 = vcombine.high %v1185_v62, %v1189_v5 }
 0x15a   :  { %v396_v9 = vmax.f32 %v321_v2, 0.0  ;;  %v325_v11 = vadd.f32 %v324_v7, %v11513_v54  ;;  %v425_v16 = vpack.c.bf16 %v395_v1, %v393_v63  ;;  %v9094_v1 = vcombine.high %v1193_v41, %v1197_v42  ;;  %v1317_v7 = vld [vmem:[#allocation11 + $0x4a0] sm:$0xff] }
 0x15b   :  { %v326_v10 = vpop.f32.mrf.mxu0  ;;  %v9222_v2 = vcombine.high %v1321_v43, %v1325_v53 }
 0x15c   :  { %v426_v12 = vpack.c.bf16 %v396_v9, %v394_v8  ;;  %v327_v20 = vadd.f32 %v326_v10, %v11516_v56  ;;  %v397_v25 = vmax.f32 %v325_v11, 0.0  ;;  %v9093_v11 = vcombine.low %v1193_v41, %v1197_v42 }
 0x15d   :  { %v328_v17 = vpop.f32.mrf.mxu0 }
 0x15e   :  { %v329_v21 = vadd.f32 %v328_v17, %v11513_v54  ;;  %879 = vmatprep.mubr.bf16.mxu1 %v426_v12  ;;  %992 = vmatprep.mubr.bf16.mxu0 %v426_v12  ;;  %v398_v36 = vmax.f32 %v327_v20, 0.0  ;;  %v9221_v12 = vcombine.low %v1321_v43, %v1325_v53  ;;  %v1177_v17 = vld [vmem:[#allocation11 + $0x40] sm:$0xff] }
 0x15f   :  { %v330_v23 = vpop.f32.mrf.mxu0  ;;  %880 = vmatmul.mubr.bf16.vlgmr.msra.gmra.mxu1 %v425_v16  ;;  %993 = vmatmul.mubr.bf16.vlgmr.msra.gmra.mxu0 %v425_v16  ;;  %v9214_v16 = vcombine.high %v1313_v6, %v1317_v7  ;;  %v1181_v20 = vld [vmem:[#allocation11 + $0x60] sm:$0xff] }
 0x160   :  { %v399_v26 = vmax.f32 %v329_v21, 0.0  ;;  %v331_v27 = vadd.f32 %v330_v23, %v11516_v56  ;;  %2748 = vmatpush1.bf16.msra.mxu1 %v9125_v44  ;;  %2861 = vmatpush1.bf16.msra.mxu0 %v9253_v47  ;;  %v9230_v47 = vcombine.high %v1329_v31, %v1333_v32  ;;  %v1305_v21 = vld [vmem:[#allocation11 + $0x440] sm:$0xff]  ;;  %v9078_v30 = vcombine.high %v1177_v17, %v1181_v20 }
 0x161   :  { %v334_v33 = vpop.f32.mrf.mxu0  ;;  %2749 = vmatprep.subr.bf16.mxu1 %v9118_v18  ;;  %2862 = vmatprep.subr.bf16.mxu0 %v9246_v19  ;;  %v9206_v31 = vcombine.high %v1305_v21, %v1309_v22  ;;  %v1169_v32 = vld [vmem:[#allocation11] sm:$0xff]  ;;  %v9205_v41 = vcombine.low %v1305_v21, %v1309_v22 }
 0x162   :  { %v400_v37 = vmax.f32 %v331_v27, 0.0  ;;  %v427_v44 = vpack.c.bf16 %v399_v26, %v397_v25  ;;  %v335_v55 = vadd.f32 %v334_v33, %v11513_v54  ;;  %v9085_v26 = vcombine.low %v1185_v62, %v1189_v5  ;;  %v1417_v53 = vld [vmem:[#allocation11 + $0x7c0] sm:$0xff] }
 0x163   :  { %v336_v0 = vpop.f32.mrf.mxu0  ;;  %v9213_v27 = vcombine.low %v1313_v6, %v1317_v7  ;;  %v1285_v6 = vld [vmem:[#allocation11 + $0x3a0] sm:$0xff] }
 0x164   :  { %v428_v38 = vpack.c.bf16 %v400_v37, %v398_v36  ;;  %2750 = vmatpush1.bf16.msra.mxu1 %v9117_v24  ;;  %2863 = vmatpush1.bf16.msra.mxu0 %v9245_v28  ;;  %v337_v48 = vadd.f32 %v336_v0, %v11516_v56  ;;  %v401_v8 = vmax.f32 %v335_v55, 0.0  ;;  %v1297_v36 = vld [vmem:[#allocation11 + $0x400] sm:$0xff] }
 0x165   :  { %v338_v45 = vpop.f32.mrf.mxu0  ;;  %2751 = vmatprep.subr.bf16.mxu1 %v9110_v34  ;;  %2864 = vmatprep.subr.bf16.mxu0 %v9238_v35  ;;  %v1173_v35 = vld [vmem:[#allocation11 + $0x20] sm:$0xff] }
 0x166   :  { %v339_v49 = vadd.f32 %v338_v45, %v11513_v54  ;;  %889 = vmatprep.mubr.bf16.mxu1 %v428_v38  ;;  %1002 = vmatprep.mubr.bf16.mxu0 %v428_v38  ;;  %v402_v3 = vmax.f32 %v337_v48, 0.0  ;;  %v1301_v37 = vld [vmem:[#allocation11 + $0x420] sm:$0xff] }
 0x167   :  { %v340_v57 = vpop.f32.mrf.mxu0  ;;  %890 = vmatmul.mubr.bf16.gmra.mxu1 %v427_v44  ;;  %1003 = vmatmul.mubr.bf16.gmra.mxu0 %v427_v44  ;;  %v9070_v44 = vcombine.high %v1169_v32, %v1173_v35  ;;  %v9198_v45 = vcombine.high %v1297_v36, %v1301_v37  ;;  %v1421_v55 = vld [vmem:[#allocation11 + $0x7e0] sm:$0xff] }
 0x168   :  { %v403_v58 = vmax.f32 %v339_v49, 0.0  ;;  %v341_v59 = vadd.f32 %v340_v57, %v11516_v56  ;;  %2752 = vmatpush1.bf16.msra.mxu1 %v9109_v39  ;;  %2865 = vmatpush1.bf16.msra.mxu0 %v9237_v40  ;;  %v9077_v40 = vcombine.low %v1177_v17, %v1181_v20  ;;  %v1293_v49 = vld [vmem:[#allocation11 + $0x3e0] sm:$0xff] }
 0x169   :  { %v344_v63 = vpop.f32.mrf.mxu0  ;;  %2753 = vmatprep.subr.bf16.mxu1 %v9102_v46  ;;  %2866 = vmatprep.subr.bf16.mxu0 %v9230_v47  ;;  %v1289_v46 = vld [vmem:[#allocation11 + $0x3c0] sm:$0xff] }
 0x16a   :  { %v404_v4 = vmax.f32 %v341_v59, 0.0  ;;  %v429_v13 = vpack.c.bf16 %v403_v58, %v401_v8  ;;  %v345_v23 = vadd.f32 %v344_v63, %v11513_v54  ;;  %v1409_v7 = vld [vmem:[#allocation11 + $0x780] sm:$0xff] }
 0x16b   :  { %v346_v9 = vpop.f32.mrf.mxu0  ;;  %v1413_v8 = vld [vmem:[#allocation11 + $0x7a0] sm:$0xff] }
 0x16c   :  { %v430_v10 = vpack.c.bf16 %v404_v4, %v402_v3  ;;  %2754 = vmatpush1.bf16.msra.mxu1 %v9101_v60  ;;  %2867 = vmatpush1.bf16.msra.mxu0 %v9229_v61  ;;  %v347_v18 = vadd.f32 %v346_v9, %v11516_v56  ;;  %v405_v0 = vmax.f32 %v345_v23, 0.0  ;;  %v9069_v60 = vcombine.low %v1169_v32, %v1173_v35  ;;  %v1281_v3 = vld [vmem:[#allocation11 + $0x380] sm:$0xff] }
 0x16d   :  { %v348_v14 = vpop.f32.mrf.mxu0  ;;  %2755 = vmatprep.subr.bf16.mxu1 %v9094_v1  ;;  %2868 = vmatprep.subr.bf16.mxu0 %v9222_v2  ;;  %v9197_v61 = vcombine.low %v1297_v36, %v1301_v37  ;;  %v9190_v1 = vcombine.high %v1289_v46, %v1293_v49  ;;  %v9318_v2 = vcombine.high %v1417_v53, %v1421_v55  ;;  %v1277_v21 = vld [vmem:[#allocation11 + $0x360] sm:$0xff] }
 0x16e   :  { %v349_v19 = vadd.f32 %v348_v14, %v11513_v54  ;;  %899 = vmatprep.mubr.bf16.mxu1 %v430_v10  ;;  %1012 = vmatprep.mubr.bf16.mxu0 %v430_v10  ;;  %v406_v33 = vmax.f32 %v347_v18, 0.0  ;;  %v9310_v17 = vcombine.high %v1409_v7, %v1413_v8  ;;  %v1273_v18 = vld [vmem:[#allocation11 + $0x340] sm:$0xff] }
 0x16f   :  { %v350_v24 = vpop.f32.mrf.mxu0  ;;  %900 = vmatmul.mubr.bf16.gmra.mxu1 %v429_v13  ;;  %1013 = vmatmul.mubr.bf16.gmra.mxu0 %v429_v13  ;;  %v9317_v13 = vcombine.low %v1417_v53, %v1421_v55  ;;  %v1401_v22 = vld [vmem:[#allocation11 + $0x740] sm:$0xff] }
 0x170   :  { %v351_v25 = vadd.f32 %v350_v24, %v11516_v56  ;;  %2756 = vmatpush1.bf16.msra.mxu1 %v9093_v11  ;;  %2869 = vmatpush1.bf16.msra.mxu0 %v9221_v12  ;;  %v407_v28 = vmax.f32 %v349_v19, 0.0  ;;  %v9189_v12 = vcombine.low %v1289_v46, %v1293_v49  ;;  %v1405_v23 = vld [vmem:[#allocation11 + $0x760] sm:$0xff] }
 0x171   :  { %v354_v29 = vpop.f32.mrf.mxu0  ;;  %2757 = vmatprep.subr.bf16.mxu1 %v9086_v15  ;;  %2870 = vmatprep.subr.bf16.mxu0 %v9214_v16  ;;  %v9182_v16 = vcombine.high %v1281_v3, %v1285_v6  ;;  %v9302_v32 = vcombine.high %v1401_v22, %v1405_v23  ;;  %v1269_v36 = vld [vmem:[#allocation11 + $0x320] sm:$0xff] }
 0x172   :  { %v408_v34 = vmax.f32 %v351_v25, 0.0  ;;  %v431_v42 = vpack.c.bf16 %v407_v28, %v405_v0  ;;  %v355_v57 = vadd.f32 %v354_v29, %v11513_v54  ;;  %v9309_v28 = vcombine.low %v1409_v7, %v1413_v8  ;;  %v1393_v37 = vld [vmem:[#allocation11 + $0x700] sm:$0xff] }
 0x173   :  { %v356_v38 = vpop.f32.mrf.mxu0  ;;  %v1397_v0 = vld [vmem:[#allocation11 + $0x720] sm:$0xff] }
 0x174   :  { %v432_v39 = vpack.c.bf16 %v408_v34, %v406_v33  ;;  %2758 = vmatpush1.bf16.msra.mxu1 %v9085_v26  ;;  %2871 = vmatpush1.bf16.msra.mxu0 %v9213_v27  ;;  %v357_v47 = vadd.f32 %v356_v38, %v11516_v56  ;;  %v409_v9 = vmax.f32 %v355_v57, 0.0  ;;  %v9181_v27 = vcombine.low %v1281_v3, %v1285_v6  ;;  %v1265_v33 = vld [vmem:[#allocation11 + $0x300] sm:$0xff] }
 0x175   :  { %v358_v43 = vpop.f32.mrf.mxu0  ;;  %2759 = vmatprep.subr.bf16.mxu1 %v9078_v30  ;;  %2872 = vmatprep.subr.bf16.mxu0 %v9206_v31  ;;  %v9174_v31 = vcombine.high %v1273_v18, %v1277_v21  ;;  %v9294_v46 = vcombine.high %v1393_v37, %v1397_v0  ;;  %v1261_v53 = vld [vmem:[#allocation11 + $0x2e0] sm:$0xff] }
 0x176   :  { %v359_v48 = vadd.f32 %v358_v43, %v11513_v54  ;;  %909 = vmatprep.mubr.bf16.mxu1 %v432_v39  ;;  %1022 = vmatprep.mubr.bf16.mxu0 %v432_v39  ;;  %v410_v4 = vmax.f32 %v357_v47, 0.0  ;;  %v1257_v47 = vld [vmem:[#allocation11 + $0x2c0] sm:$0xff] }
 0x177   :  { %v360_v58 = vpop.f32.mrf.mxu0  ;;  %910 = vmatmul.mubr.bf16.gmra.mxu1 %v431_v42  ;;  %1023 = vmatmul.mubr.bf16.gmra.mxu0 %v431_v42  ;;  %v9301_v42 = vcombine.low %v1401_v22, %v1405_v23  ;;  %v1385_v55 = vld [vmem:[#allocation11 + $0x6c0] sm:$0xff] }
 0x178   :  { %v361_v59 = vadd.f32 %v360_v58, %v11516_v56  ;;  %2760 = vmatpush1.bf16.msra.mxu1 %v9077_v40  ;;  %2873 = vmatpush1.bf16.msra.mxu0 %v9205_v41  ;;  %v411_v62 = vmax.f32 %v359_v48, 0.0  ;;  %v9173_v41 = vcombine.low %v1273_v18, %v1277_v21  ;;  %v1389_v57 = vld [vmem:[#allocation11 + $0x6e0] sm:$0xff] }
 0x179   :  { %v364_v63 = vpop.f32.mrf.mxu0  ;;  %2761 = vmatprep.subr.bf16.mxu1 %v9070_v44  ;;  %2874 = vmatprep.subr.bf16.mxu0 %v9198_v45  ;;  %v9166_v45 = vcombine.high %v1265_v33, %v1269_v36  ;;  %v9286_v3 = vcombine.high %v1385_v55, %v1389_v57 }
 0x17a   :  { %v412_v5 = vmax.f32 %v361_v59, 0.0  ;;  %v433_v14 = vpack.c.bf16 %v411_v62, %v409_v9  ;;  %v365_v24 = vadd.f32 %v364_v63, %v11513_v54  ;;  %v9293_v62 = vcombine.low %v1393_v37, %v1397_v0  ;;  %v1233_v0 = vld [vmem:[#allocation11 + $0x200] sm:$0xff] }
 0x17b   :  { %v366_v10 = vpop.f32.mrf.mxu0  ;;  %v9157_v9 = vcombine.low %v1257_v47, %v1261_v53 }
 0x17c   :  { %v434_v11 = vpack.c.bf16 %v412_v5, %v410_v4  ;;  %2762 = vmatpush1.bf16.msra.mxu1 %v9069_v60  ;;  %2875 = vmatpush1.bf16.msra.mxu0 %v9197_v61  ;;  %v367_v19 = vadd.f32 %v366_v10, %v11516_v56  ;;  %v413_v38 = vmax.f32 %v365_v24, 0.0  ;;  %v9165_v61 = vcombine.low %v1265_v33, %v1269_v36  ;;  %v1249_v24 = vld [vmem:[#allocation11 + $0x280] sm:$0xff] }
 0x17d   :  { %v368_v15 = vpop.f32.mrf.mxu0  ;;  %2763 = vmatprep.subr.bf16.mxu1 %v9190_v1  ;;  %2876 = vmatprep.subr.bf16.mxu0 %v9318_v2  ;;  %v9158_v2 = vcombine.high %v1257_v47, %v1261_v53  ;;  %v9285_v10 = vcombine.low %v1385_v55, %v1389_v57  ;;  %v11554_v47 = vld [vmem:[#allocation11 + $0x5c8] sm:$0xff] }
 0x17e   :  { %v369_v20 = vadd.f32 %v368_v15, %v11513_v54  ;;  %919 = vmatprep.mubr.bf16.mxu1 %v434_v11  ;;  %1032 = vmatprep.mubr.bf16.mxu0 %v434_v11  ;;  %v414_v34 = vmax.f32 %v367_v19, 0.0 }
 0x17f   :  { %v370_v25 = vpop.f32.mrf.mxu0  ;;  %920 = vmatmul.mubr.bf16.gmra.mxu1 %v433_v14  ;;  %1033 = vmatmul.mubr.bf16.gmra.mxu0 %v433_v14 }
 0x180   :  { %v371_v26 = vadd.f32 %v370_v25, %v11516_v56  ;;  %2764 = vmatpush2.bf16.msra.mxu1 %v9189_v12  ;;  %2877 = vmatpush2.bf16.msra.mxu0 %v9317_v13  ;;  %v415_v29 = vmax.f32 %v369_v20, 0.0  ;;  %v1253_v25 = vld [vmem:[#allocation11 + $0x2a0] sm:$0xff] }
 0x181   :  { %v374_v30 = vpop.f32.mrf.mxu0  ;;  %2765 = vmatprep.subr.bf16.mxu1 %v9182_v16  ;;  %2878 = vmatprep.subr.bf16.mxu0 %v9310_v17 }
 0x182   :  { %v416_v35 = vmax.f32 %v371_v26, 0.0  ;;  %v435_v43 = vpack.c.bf16 %v415_v29, %v413_v38  ;;  %v375_v58 = vadd.f32 %v374_v30, %v11513_v54  ;;  %v9150_v26 = vcombine.high %v1249_v24, %v1253_v25  ;;  %v1241_v30 = vld [vmem:[#allocation11 + $0x240] sm:$0xff] }
 0x183   :  { %v376_v39 = vpop.f32.mrf.mxu0  ;;  %v1237_v38 = vld [vmem:[#allocation11 + $0x220] sm:$0xff] }
 0x184   :  { %v436_v40 = vpack.c.bf16 %v416_v35, %v414_v34  ;;  %2766 = vmatpush2.bf16.msra.mxu1 %v9181_v27  ;;  %2879 = vmatpush2.bf16.msra.mxu0 %v9309_v28  ;;  %v377_v48 = vadd.f32 %v376_v39, %v11516_v56  ;;  %v417_v6 = vmax.f32 %v375_v58, 0.0  ;;  %v1381_v27 = vld [vmem:[#allocation11 + $0x6a0] sm:$0xff]  ;;  %v9149_v28 = vcombine.low %v1249_v24, %v1253_v25 }
 0x185   :  { %v378_v44 = vpop.f32.mrf.mxu0  ;;  %2767 = vmatprep.subr.bf16.mxu1 %v9174_v31  ;;  %2880 = vmatprep.subr.bf16.mxu0 %v9302_v32  ;;  %v1245_v31 = vld [vmem:[#allocation11 + $0x260] sm:$0xff]  ;;  %v11567_v58 = vsub.s32 3, %v11504_v50 }
 0x186   :  { %v379_v49 = vadd.f32 %v378_v44, %v11513_v54  ;;  %929 = vmatprep.mubr.bf16.mxu1 %v436_v40  ;;  %1042 = vmatprep.mubr.bf16.mxu0 %v436_v40  ;;  %v418_v4 = vmax.f32 %v377_v48, 0.0  ;;  %v1369_v32 = vld [vmem:[#allocation11 + $0x640] sm:$0xff]  ;;  %v9142_v33 = vcombine.high %v1241_v30, %v1245_v31  ;;  %v9141_v35 = vcombine.low %v1241_v30, %v1245_v31 }
 0x187   :  { %v380_v59 = vpop.f32.mrf.mxu0  ;;  %930 = vmatmul.mubr.bf16.gmra.mxu1 %v435_v43  ;;  %1043 = vmatmul.mubr.bf16.gmra.mxu0 %v435_v43  ;;  %v1373_v34 = vld [vmem:[#allocation11 + $0x660] sm:$0xff]  ;;  %v9134_v40 = vcombine.high %v1233_v0, %v1237_v38  ;;  %14096 = vst [vmem:[#allocation27_spill] sm:$0xff] %v11567_v58 }
 0x188   :  { %v381_v60 = vadd.f32 %v380_v59, %v11516_v56  ;;  %2768 = vmatpush2.bf16.msra.mxu1 %v9173_v41  ;;  %2881 = vmatpush2.bf16.msra.mxu0 %v9301_v42  ;;  %v419_v63 = vmax.f32 %v379_v49, 0.0  ;;  %v9269_v36 = vcombine.low %v1369_v32, %v1373_v34  ;;  %v9270_v37 = vcombine.high %v1369_v32, %v1373_v34  ;;  %v1361_v39 = vld [vmem:[#allocation11 + $0x600] sm:$0xff]  ;;  %v11558_v49 = vld [vmem:[#allocation11 + $0x5e8] sm:$0xff] }
 0x189   :  { %v384_v1 = vpop.f32.mrf.mxu0  ;;  %2769 = vmatprep.subr.bf16.mxu1 %v9166_v45  ;;  %2882 = vmatprep.subr.bf16.mxu0 %v9294_v46  ;;  %v1365_v41 = vld [vmem:[#allocation11 + $0x620] sm:$0xff]  ;;  %v9133_v42 = vcombine.low %v1233_v0, %v1237_v38  ;;  %v11550_v45 = vld [vmem:[#allocation11 + $0x1c8] sm:$0xff]  ;;  %v9255_v55 = vcombine.low %v11554_v47, %v11558_v49  ;;  %v9256_v57 = vcombine.high %v11554_v47, %v11558_v49  ;;  %v11570_v59 = vsub.s32 2, %v11504_v50 }
 0x18a   :  { %v420_v5 = vmax.f32 %v381_v60, 0.0  ;;  %v437_v11 = vpack.c.bf16 %v419_v63, %v417_v6  ;;  %v385_v15 = vadd.f32 %v384_v1, %v11513_v54  ;;  %v9261_v43 = vcombine.low %v1361_v39, %v1365_v41  ;;  %v11552_v46 = vld [vmem:[#allocation11 + $0x1e8] sm:$0xff]  ;;  %v505_v60 = vld [vmem:[#allocation10] sm:$0xf] }
 0x18b   :  { %v386_v7 = vpop.f32.mrf.mxu0  ;;  %v9262_v44 = vcombine.high %v1361_v39, %v1365_v41  ;;  %v9128_v48 = vcombine.high %v11550_v45, %v11552_v46  ;;  %v9127_v53 = vcombine.low %v11550_v45, %v11552_v46  ;;  %14097 = vst [vmem:[#allocation28_spill] sm:$0xff] %v11570_v59  ;;  %v11573_v63 = vrot.slane %v505_v60, %v11510_v52  ;;  %v11644_v47 = vld [vmem:[#allocation11 + $0x128] sm:$0xff] }
 0x18c   :  { %v438_v8 = vpack.c.bf16 %v420_v5, %v418_v4  ;;  %2770 = vmatpush2.bf16.msra.mxu1 %v9165_v61  ;;  %2883 = vmatpush2.bf16.msra.mxu0 %v9293_v62  ;;  %v387_v13 = vadd.f32 %v386_v7, %v11516_v56  ;;  %v421_v21 = vmax.f32 %v385_v15, 0.0  ;;  %v11576_v1 = vrot.slane %v505_v60, %v11567_v58  ;;  %v11646_v49 = vld [vmem:[#allocation11 + $0x508] sm:$0xff] }
 0x18d   :  { %v388_v12 = vpop.f32.mrf.mxu0  ;;  %2771 = vmatprep.subr.bf16.mxu1 %v9158_v2  ;;  %2884 = vmatprep.subr.bf16.mxu0 %v9286_v3  ;;  %v11579_v2 = vrot.slane %v505_v60, %v11507_v51  ;;  %v11582_v3 = vrot.slane %v505_v60, %v11570_v59 }
 0x18e   :  { %v389_v14 = vadd.f32 %v388_v12, %v11513_v54  ;;  %939 = vmatprep.mubr.bf16.mxu1 %v438_v8  ;;  %1052 = vmatprep.mubr.bf16.mxu0 %v438_v8  ;;  %v422_v19 = vmax.f32 %v387_v13, 0.0  ;;  %v1377_v54 = vld [vmem:[#allocation11 + $0x680] sm:$0xff] }
 0x18f   :  { %v390_v16 = vpop.f32.mrf.mxu0  ;;  %940 = vmatmul.mubr.bf16.gmra.mxu1 %v437_v11  ;;  %1053 = vmatmul.mubr.bf16.gmra.mxu0 %v437_v11  ;;  %v9277_v29 = vcombine.low %v1377_v54, %v1381_v27 }
 0x190   :  { %v391_v17 = vadd.f32 %v390_v16, %v11516_v56  ;;  %2772 = vmatpush2.bf16.msra.mxu1 %v9157_v9  ;;  %2885 = vmatpush2.bf16.msra.mxu0 %v9285_v10  ;;  %v423_v18 = vmax.f32 %v389_v14, 0.0  ;;  %v9278_v56 = vcombine.high %v1377_v54, %v1381_v27  ;;  %v11596_v27 = vld [vmem:[#allocation11 + $0x588] sm:$0xff] }
 0x191   :  { %2773 = vmatprep.subr.bf16.mxu1 %v9150_v26 }
 0x192   :  { %v424_v20 = vmax.f32 %v391_v17, 0.0  ;;  %v439_v23 = vpack.c.bf16 %v423_v18, %v421_v21  ;;  %2886 = vmatprep.subr.bf16.mxu0 %v9278_v56 }
 0x194   :  { %v440_v22 = vpack.c.bf16 %v424_v20, %v422_v19  ;;  %2774 = vmatpush2.bf16.msra.mxu1 %v9149_v28  ;;  %2887 = vmatpush2.bf16.msra.mxu0 %v9277_v29  ;;  %v11598_v28 = vld [vmem:[#allocation11 + $0x5a8] sm:$0xff] }
 0x195   :  { %2775 = vmatprep.subr.bf16.mxu1 %v9142_v33  ;;  %2888 = vmatprep.subr.bf16.mxu0 %v9270_v37  ;;  %v9248_v39 = vcombine.high %v11596_v27, %v11598_v28 }
 0x196   :  { %949 = vmatprep.mubr.bf16.mxu1 %v440_v22  ;;  %1062 = vmatprep.mubr.bf16.mxu0 %v440_v22  ;;  %v11592_v22 = vld [vmem:[#allocation11 + $0x188] sm:$0xff] }
 0x197   :  { %950 = vmatmul.mubr.bf16.gmra.mxu1 %v439_v23  ;;  %1063 = vmatmul.mubr.bf16.gmra.mxu0 %v439_v23  ;;  %v11594_v23 = vld [vmem:[#allocation11 + $0x1a8] sm:$0xff] }
 0x198   :  { %2776 = vmatpush2.bf16.msra.mxu1 %v9141_v35  ;;  %2889 = vmatpush2.bf16.msra.mxu0 %v9269_v36  ;;  %v9120_v34 = vcombine.high %v11592_v22, %v11594_v23 }
 0x199   :  { %2777 = vmatprep.subr.bf16.mxu1 %v9134_v40  ;;  %2890 = vmatprep.subr.bf16.mxu0 %v9262_v44  ;;  %v11620_v44 = vld [vmem:[#allocation11 + $0x168] sm:$0xff] }
 0x19c   :  { %2778 = vmatpush2.bf16.msra.mxu1 %v9133_v42  ;;  %2891 = vmatpush2.bf16.msra.mxu0 %v9261_v43  ;;  %v11618_v43 = vld [vmem:[#allocation11 + $0x148] sm:$0xff] }
 0x19d   :  { %2973 = vmatprep.subr.bf16.mxu1 %v9128_v48  ;;  %3086 = vmatprep.subr.bf16.mxu0 %v9256_v57  ;;  %v9111_v45 = vcombine.low %v11618_v43, %v11620_v44  ;;  %v9112_v46 = vcombine.high %v11618_v43, %v11620_v44 }
 0x21f   :  { %v881_v61 = vpop.f32.mrf.mxu1  ;;  %v994_v62 = vpop.f32.mrf.mxu0 }
 0x220   :  { %v882_v12 = vadd.f32 %v881_v61, %v11579_v2  ;;  %v995_v13 = vadd.f32 %v994_v62, %v11582_v3  ;;  %v9119_v62 = vcombine.low %v11592_v22, %v11594_v23 }
 0x221   :  { %v883_v4 = vpop.f32.mrf.mxu1  ;;  %v996_v5 = vpop.f32.mrf.mxu0 }
 0x222   :  { %v884_v8 = vadd.f32 %v883_v4, %v11573_v63  ;;  %v997_v9 = vadd.f32 %v996_v5, %v11576_v1  ;;  %v1073_v29 = vmax.f32 %v882_v12, 0.0  ;;  %v1075_v56 = vmax.f32 %v995_v13, 0.0 }
 0x223   :  { %v885_v6 = vpop.f32.mrf.mxu1  ;;  %v998_v7 = vpop.f32.mrf.mxu0 }
 0x224   :  { %v886_v10 = vadd.f32 %v885_v6, %v11579_v2  ;;  %v999_v11 = vadd.f32 %v998_v7, %v11582_v3  ;;  %v1074_v24 = vmax.f32 %v884_v8, 0.0  ;;  %v1076_v25 = vmax.f32 %v997_v9, 0.0  ;;  %v1338_v7 = vld [vmem:[#allocation11 + $0x548] sm:$0xff] }
 0x225   :  { %v887_v14 = vpop.f32.mrf.mxu1  ;;  %v1000_v15 = vpop.f32.mrf.mxu0  ;;  %v9247_v6 = vcombine.low %v11596_v27, %v11598_v28  ;;  %v1342_v8 = vld [vmem:[#allocation11 + $0x568] sm:$0xff] }
 0x226   :  { %v888_v16 = vadd.f32 %v887_v14, %v11573_v63  ;;  %v1001_v17 = vadd.f32 %v1000_v15, %v11576_v1  ;;  %v1077_v18 = vmax.f32 %v886_v10, 0.0  ;;  %v1079_v19 = vmax.f32 %v999_v11, 0.0  ;;  %v11638_v9 = vld [vmem:[#allocation11 + $0x108] sm:$0xff] }
 0x227   :  { %v891_v20 = vpop.f32.mrf.mxu1  ;;  %v1004_v21 = vpop.f32.mrf.mxu0  ;;  %v9240_v22 = vcombine.high %v1338_v7, %v1342_v8 }
 0x228   :  { %v1078_v54 = vmax.f32 %v888_v16, 0.0  ;;  %v1080_v26 = vmax.f32 %v1001_v17, 0.0  ;;  %v11606_v35 = vpack.c.bf16 %v1077_v18, %v1073_v29  ;;  %v11608_v36 = vpack.c.bf16 %v1079_v19, %v1075_v56 }
 0x229   :  { %v893_v30 = vpop.f32.mrf.mxu1  ;;  %v1006_v31 = vpop.f32.mrf.mxu0  ;;  %v892_v48 = vadd.f32 %v891_v20, %v11579_v2  ;;  %v1005_v57 = vadd.f32 %v1004_v21, %v11582_v3  ;;  %v9239_v21 = vcombine.low %v1338_v7, %v1342_v8 }
 0x22a   :  { %v11600_v32 = vpack.c.bf16 %v1078_v54, %v1074_v24  ;;  %v11602_v33 = vpack.c.bf16 %v1080_v26, %v1076_v25  ;;  %v894_v37 = vadd.f32 %v893_v30, %v11573_v63  ;;  %v1007_v40 = vadd.f32 %v1006_v31, %v11576_v1 }
 0x22b   :  { %v895_v0 = vpop.f32.mrf.mxu1  ;;  %v1008_v38 = vpop.f32.mrf.mxu0  ;;  %v1081_v17 = vmax.f32 %v892_v48, 0.0  ;;  %v1083_v18 = vmax.f32 %v1005_v57, 0.0  ;;  %v9104_v25 = vcombine.high %v11638_v9, %v11644_v47  ;;  %v1322_v57 = vld [vmem:[#allocation11 + $0x4c8] sm:$0xff] }
 0x22c   :  { %v896_v41 = vadd.f32 %v895_v0, %v11579_v2  ;;  %v1009_v42 = vadd.f32 %v1008_v38, %v11582_v3  ;;  %2779 = vmatprep.mubr.bf16.mxu1 %v11600_v32  ;;  %2892 = vmatprep.mubr.bf16.mxu0 %v11602_v33  ;;  %v1084_v14 = vmax.f32 %v1007_v40, 0.0  ;;  %v11670_v0 = vld [vmem:[#allocation11 + $0xe8] sm:$0xff] }
 0x22d   :  { %v897_v60 = vpop.f32.mrf.mxu1  ;;  %v1010_v61 = vpop.f32.mrf.mxu0  ;;  %2780 = vmatmul.mubr.bf16.vlgmr.msra.gmra.mxu1 %v11606_v35  ;;  %2893 = vmatmul.mubr.bf16.vlgmr.msra.gmra.mxu0 %v11608_v36 }
 0x22e   :  { %v898_v4 = vadd.f32 %v897_v60, %v11573_v63  ;;  %v1011_v5 = vadd.f32 %v1010_v61, %v11576_v1  ;;  %2974 = vmatpush1.bf16.msra.mxu1 %v9127_v53  ;;  %3087 = vmatpush1.bf16.msra.mxu0 %v9255_v55  ;;  %v1085_v10 = vmax.f32 %v896_v41, 0.0  ;;  %v1087_v11 = vmax.f32 %v1009_v42, 0.0  ;;  %v11648_v53 = vld [vmem:[#allocation11 + $0x528] sm:$0xff] }
 0x22f   :  { %v901_v12 = vpop.f32.mrf.mxu1  ;;  %v1014_v13 = vpop.f32.mrf.mxu0  ;;  %2975 = vmatprep.subr.bf16.mxu1 %v9120_v34  ;;  %3088 = vmatprep.subr.bf16.mxu0 %v9248_v39  ;;  %v1082_v55 = vmax.f32 %v894_v37, 0.0  ;;  %v9232_v54 = vcombine.high %v11646_v49, %v11648_v53  ;;  %v11668_v37 = vld [vmem:[#allocation11 + $0xc8] sm:$0xff]  ;;  %v9103_v42 = vcombine.low %v11638_v9, %v11644_v47  ;;  %v9231_v48 = vcombine.low %v11646_v49, %v11648_v53 }
 0x230   :  { %v1086_v15 = vmax.f32 %v898_v4, 0.0  ;;  %v1088_v16 = vmax.f32 %v1011_v5, 0.0  ;;  %v11658_v26 = vpack.c.bf16 %v1085_v10, %v1081_v17  ;;  %v11660_v27 = vpack.c.bf16 %v1087_v11, %v1083_v18  ;;  %v1326_v60 = vld [vmem:[#allocation11 + $0x4e8] sm:$0xff] }
 0x231   :  { %v903_v19 = vpop.f32.mrf.mxu1  ;;  %v1016_v20 = vpop.f32.mrf.mxu0  ;;  %v902_v38 = vadd.f32 %v901_v12, %v11579_v2  ;;  %v1015_v39 = vadd.f32 %v1014_v13, %v11582_v3  ;;  %v11682_v61 = vld [vmem:[#allocation11 + $0x88] sm:$0xff]  ;;  %v9095_v7 = vcombine.low %v11668_v37, %v11670_v0  ;;  %v9096_v8 = vcombine.high %v11668_v37, %v11670_v0 }
 0x232   :  { %v11650_v23 = vpack.c.bf16 %v1086_v15, %v1082_v55  ;;  %v11652_v24 = vpack.c.bf16 %v1088_v16, %v1084_v14  ;;  %2976 = vmatpush1.bf16.msra.mxu1 %v9119_v62  ;;  %v904_v28 = vadd.f32 %v903_v19, %v11573_v63  ;;  %3089 = vmatpush1.bf16.msra.mxu0 %v9247_v6  ;;  %v11688_v9 = vld [vmem:[#allocation11 + $0xa8] sm:$0xff] }
 0x233   :  { %v905_v29 = vpop.f32.mrf.mxu1  ;;  %v1018_v56 = vpop.f32.mrf.mxu0  ;;  %2977 = vmatprep.subr.bf16.mxu1 %v9112_v46  ;;  %v1017_v30 = vadd.f32 %v1016_v20, %v11576_v1  ;;  %3090 = vmatprep.subr.bf16.mxu0 %v9240_v22  ;;  %v11690_v10 = vld [vmem:[#allocation11 + $0x488] sm:$0xff]  ;;  %v1089_v47 = vmax.f32 %v902_v38, 0.0  ;;  %v1091_v49 = vmax.f32 %v1015_v39, 0.0  ;;  %v9223_v14 = vcombine.low %v1322_v57, %v1326_v60 }
 0x234   :  { %v906_v31 = vadd.f32 %v905_v29, %v11579_v2  ;;  %v1019_v34 = vadd.f32 %v1018_v56, %v11582_v3  ;;  %2789 = vmatprep.mubr.bf16.mxu1 %v11650_v23  ;;  %2902 = vmatprep.mubr.bf16.mxu0 %v11652_v24  ;;  %v11692_v11 = vld [vmem:[#allocation11 + $0x4a8] sm:$0xff]  ;;  %v1090_v12 = vmax.f32 %v904_v28, 0.0  ;;  %v9224_v15 = vcombine.high %v1322_v57, %v1326_v60 }
 0x235   :  { %v907_v40 = vpop.f32.mrf.mxu1  ;;  %v1020_v41 = vpop.f32.mrf.mxu0  ;;  %2790 = vmatmul.mubr.bf16.gmra.mxu1 %v11658_v26  ;;  %2903 = vmatmul.mubr.bf16.gmra.mxu0 %v11660_v27  ;;  %v1092_v13 = vmax.f32 %v1017_v30, 0.0  ;;  %v9088_v18 = vcombine.high %v11682_v61, %v11688_v9  ;;  %v9216_v19 = vcombine.high %v11690_v10, %v11692_v11  ;;  %v11712_v30 = vld [vmem:[#allocation11 + $0x48] sm:$0xff]  ;;  %v9087_v39 = vcombine.low %v11682_v61, %v11688_v9 }
 0x236   :  { %v908_v43 = vadd.f32 %v907_v40, %v11573_v63  ;;  %v1021_v44 = vadd.f32 %v1020_v41, %v11576_v1  ;;  %2978 = vmatpush1.bf16.msra.mxu1 %v9111_v45  ;;  %v1093_v62 = vmax.f32 %v906_v31, 0.0  ;;  %v1095_v4 = vmax.f32 %v1019_v34, 0.0  ;;  %3091 = vmatpush1.bf16.msra.mxu0 %v9239_v21  ;;  %v11714_v31 = vld [vmem:[#allocation11 + $0x68] sm:$0xff] }
 0x237   :  { %v911_v5 = vpop.f32.mrf.mxu1  ;;  %v1024_v6 = vpop.f32.mrf.mxu0  ;;  %2979 = vmatprep.subr.bf16.mxu1 %v9104_v25  ;;  %3092 = vmatprep.subr.bf16.mxu0 %v9232_v54  ;;  %v9079_v61 = vcombine.low %v11712_v30, %v11714_v31 }
 0x238   :  { %v1094_v45 = vmax.f32 %v908_v43, 0.0  ;;  %v1096_v46 = vmax.f32 %v1021_v44, 0.0  ;;  %v11702_v20 = vpack.c.bf16 %v1093_v62, %v1089_v47  ;;  %v11704_v21 = vpack.c.bf16 %v1095_v4, %v1091_v49  ;;  %v1306_v43 = vld [vmem:[#allocation11 + $0x448] sm:$0xff] }
 0x239   :  { %v913_v53 = vpop.f32.mrf.mxu1  ;;  %v1026_v55 = vpop.f32.mrf.mxu0  ;;  %v912_v34 = vadd.f32 %v911_v5, %v11579_v2  ;;  %v1025_v37 = vadd.f32 %v1024_v6, %v11582_v3  ;;  %v1310_v44 = vld [vmem:[#allocation11 + $0x468] sm:$0xff]  ;;  %v9080_v5 = vcombine.high %v11712_v30, %v11714_v31 }
 0x23a   :  { %v11694_v16 = vpack.c.bf16 %v1094_v45, %v1090_v12  ;;  %v11696_v17 = vpack.c.bf16 %v1096_v46, %v1092_v13  ;;  %2980 = vmatpush1.bf16.msra.mxu1 %v9103_v42  ;;  %v914_v22 = vadd.f32 %v913_v53, %v11573_v63  ;;  %3093 = vmatpush1.bf16.msra.mxu0 %v9231_v48  ;;  %v11726_v48 = vld [vmem:[#allocation11 + $0x8] sm:$0xff] }
 0x23b   :  { %v915_v25 = vpop.f32.mrf.mxu1  ;;  %v1028_v54 = vpop.f32.mrf.mxu0  ;;  %2981 = vmatprep.subr.bf16.mxu1 %v9096_v8  ;;  %v1027_v28 = vadd.f32 %v1026_v55, %v11576_v1  ;;  %3094 = vmatprep.subr.bf16.mxu0 %v9224_v15  ;;  %v9215_v42 = vcombine.low %v11690_v10, %v11692_v11  ;;  %v11732_v6 = vld [vmem:[#allocation11 + $0x28] sm:$0xff]  ;;  %v1097_v13 = vmax.f32 %v912_v34, 0.0  ;;  %v1099_v45 = vmax.f32 %v1025_v37, 0.0 }
 0x23c   :  { %v916_v29 = vadd.f32 %v915_v25, %v11579_v2  ;;  %v1029_v56 = vadd.f32 %v1028_v54, %v11582_v3  ;;  %2799 = vmatprep.mubr.bf16.mxu1 %v11694_v16  ;;  %2912 = vmatprep.mubr.bf16.mxu0 %v11696_v17  ;;  %v11736_v8 = vld [vmem:[#allocation11 + $0x428] sm:$0xff]  ;;  %v1098_v9 = vmax.f32 %v914_v22, 0.0  ;;  %v9207_v49 = vcombine.low %v1306_v43, %v1310_v44 }
 0x23d   :  { %v917_v0 = vpop.f32.mrf.mxu1  ;;  %v1030_v38 = vpop.f32.mrf.mxu0  ;;  %2800 = vmatmul.mubr.bf16.gmra.mxu1 %v11702_v20  ;;  %2913 = vmatmul.mubr.bf16.gmra.mxu0 %v11704_v21  ;;  %v1100_v10 = vmax.f32 %v1027_v28, 0.0  ;;  %v9208_v53 = vcombine.high %v1306_v43, %v1310_v44  ;;  %v9072_v15 = vcombine.high %v11726_v48, %v11732_v6  ;;  %v11756_v31 = vld [vmem:[#allocation11 + $0x3c8] sm:$0xff] }
 0x23e   :  { %v918_v40 = vadd.f32 %v917_v0, %v11573_v63  ;;  %v1031_v41 = vadd.f32 %v1030_v38, %v11576_v1  ;;  %2982 = vmatpush1.bf16.msra.mxu1 %v9095_v7  ;;  %v1101_v57 = vmax.f32 %v916_v29, 0.0  ;;  %v1103_v60 = vmax.f32 %v1029_v56, 0.0  ;;  %3095 = vmatpush1.bf16.msra.mxu0 %v9223_v14  ;;  %v11734_v7 = vld [vmem:[#allocation11 + $0x408] sm:$0xff] }
 0x23f   :  { %v921_v62 = vpop.f32.mrf.mxu1  ;;  %v1034_v4 = vpop.f32.mrf.mxu0  ;;  %2983 = vmatprep.subr.bf16.mxu1 %v9088_v18  ;;  %3096 = vmatprep.subr.bf16.mxu0 %v9216_v19  ;;  %v9200_v18 = vcombine.high %v11734_v7, %v11736_v8  ;;  %v11758_v34 = vld [vmem:[#allocation11 + $0x3e8] sm:$0xff]  ;;  %v9199_v43 = vcombine.low %v11734_v7, %v11736_v8 }
 0x240   :  { %v1102_v11 = vmax.f32 %v918_v40, 0.0  ;;  %v1104_v12 = vmax.f32 %v1031_v41, 0.0  ;;  %v11746_v22 = vpack.c.bf16 %v1101_v57, %v1097_v13  ;;  %v11748_v19 = vpack.c.bf16 %v1103_v60, %v1099_v45  ;;  %v1418_v44 = vld [vmem:[#allocation11 + $0x7c8] sm:$0xff] }
 0x241   :  { %v923_v46 = vpop.f32.mrf.mxu1  ;;  %v1036_v47 = vpop.f32.mrf.mxu0  ;;  %v922_v37 = vadd.f32 %v921_v62, %v11579_v2  ;;  %v1035_v0 = vadd.f32 %v1034_v4, %v11582_v3  ;;  %v9071_v40 = vcombine.low %v11726_v48, %v11732_v6  ;;  %v1422_v57 = vld [vmem:[#allocation11 + $0x7e8] sm:$0xff]  ;;  %v9191_v48 = vcombine.low %v11756_v31, %v11758_v34 }
 0x242   :  { %v11738_v55 = vpack.c.bf16 %v1102_v11, %v1098_v9  ;;  %v11740_v14 = vpack.c.bf16 %v1104_v12, %v1100_v10  ;;  %2984 = vmatpush1.bf16.msra.mxu1 %v9087_v39  ;;  %v924_v25 = vadd.f32 %v923_v46, %v11573_v63  ;;  %3097 = vmatpush1.bf16.msra.mxu0 %v9215_v42  ;;  %v11770_v60 = vld [vmem:[#allocation11 + $0x388] sm:$0xff] }
 0x243   :  { %v925_v54 = vpop.f32.mrf.mxu1  ;;  %v1038_v28 = vpop.f32.mrf.mxu0  ;;  %2985 = vmatprep.subr.bf16.mxu1 %v9080_v5  ;;  %v1037_v29 = vadd.f32 %v1036_v47, %v11576_v1  ;;  %3098 = vmatprep.subr.bf16.mxu0 %v9208_v53  ;;  %v11776_v6 = vld [vmem:[#allocation11 + $0x3a8] sm:$0xff]  ;;  %v1105_v45 = vmax.f32 %v922_v37, 0.0  ;;  %v1107_v46 = vmax.f32 %v1035_v0, 0.0  ;;  %v9319_v53 = vcombine.low %v1418_v44, %v1422_v57 }
 0x244   :  { %v926_v56 = vadd.f32 %v925_v54, %v11579_v2  ;;  %v1039_v30 = vadd.f32 %v1038_v28, %v11582_v3  ;;  %2809 = vmatprep.mubr.bf16.mxu1 %v11738_v55  ;;  %2922 = vmatprep.mubr.bf16.mxu0 %v11740_v14  ;;  %v11778_v10 = vld [vmem:[#allocation11 + $0x788] sm:$0xff]  ;;  %v1106_v8 = vmax.f32 %v924_v25, 0.0 }
 0x245   :  { %v927_v38 = vpop.f32.mrf.mxu1  ;;  %v1040_v39 = vpop.f32.mrf.mxu0  ;;  %2810 = vmatmul.mubr.bf16.gmra.mxu1 %v11746_v22  ;;  %2923 = vmatmul.mubr.bf16.gmra.mxu0 %v11748_v19  ;;  %v11780_v7 = vld [vmem:[#allocation11 + $0x7a8] sm:$0xff]  ;;  %v1108_v11 = vmax.f32 %v1037_v29, 0.0 }
 0x246   :  { %v928_v41 = vadd.f32 %v927_v38, %v11573_v63  ;;  %v1041_v42 = vadd.f32 %v1040_v39, %v11576_v1  ;;  %2986 = vmatpush1.bf16.msra.mxu1 %v9079_v61  ;;  %v1109_v62 = vmax.f32 %v926_v56, 0.0  ;;  %v1111_v4 = vmax.f32 %v1039_v30, 0.0  ;;  %3099 = vmatpush1.bf16.msra.mxu0 %v9207_v49  ;;  %v11800_v39 = vld [vmem:[#allocation11 + $0x348] sm:$0xff] }
 0x247   :  { %v931_v5 = vpop.f32.mrf.mxu1  ;;  %v1044_v9 = vpop.f32.mrf.mxu0  ;;  %2987 = vmatprep.subr.bf16.mxu1 %v9072_v15  ;;  %v9192_v61 = vcombine.high %v11756_v31, %v11758_v34  ;;  %3100 = vmatprep.subr.bf16.mxu0 %v9200_v18  ;;  %v9320_v15 = vcombine.high %v1418_v44, %v1422_v57  ;;  %v9184_v56 = vcombine.high %v11770_v60, %v11776_v6 }
 0x248   :  { %v1110_v12 = vmax.f32 %v928_v41, 0.0  ;;  %v1112_v13 = vmax.f32 %v1041_v42, 0.0  ;;  %v9312_v25 = vcombine.high %v11778_v10, %v11780_v7  ;;  %v11790_v29 = vpack.c.bf16 %v1109_v62, %v1105_v45 }
 0x249   :  { %v933_v47 = vpop.f32.mrf.mxu1  ;;  %v1046_v49 = vpop.f32.mrf.mxu0  ;;  %v11792_v18 = vpack.c.bf16 %v1111_v4, %v1107_v46  ;;  %v932_v41 = vadd.f32 %v931_v5, %v11579_v2  ;;  %v1045_v42 = vadd.f32 %v1044_v9, %v11582_v3  ;;  %v9183_v57 = vcombine.low %v11770_v60, %v11776_v6  ;;  %v1406_v9 = vld [vmem:[#allocation11 + $0x768] sm:$0xff] }
 0x24a   :  { %v11782_v54 = vpack.c.bf16 %v1110_v12, %v1106_v8  ;;  %v11784_v28 = vpack.c.bf16 %v1112_v13, %v1108_v11  ;;  %2988 = vmatpush1.bf16.msra.mxu1 %v9071_v40  ;;  %v934_v30 = vadd.f32 %v933_v47, %v11573_v63  ;;  %3101 = vmatpush1.bf16.msra.mxu0 %v9199_v43  ;;  %v11802_v40 = vld [vmem:[#allocation11 + $0x368] sm:$0xff] }
 0x24b   :  { %v935_v31 = vpop.f32.mrf.mxu1  ;;  %v1048_v34 = vpop.f32.mrf.mxu0  ;;  %2989 = vmatprep.subr.bf16.mxu1 %v9192_v61  ;;  %v1047_v37 = vadd.f32 %v1046_v49, %v11576_v1  ;;  %3102 = vmatprep.subr.bf16.mxu0 %v9320_v15  ;;  %v9311_v5 = vcombine.low %v11778_v10, %v11780_v7  ;;  %v1402_v61 = vld [vmem:[#allocation11 + $0x748] sm:$0xff]  ;;  %v9175_v60 = vcombine.low %v11800_v39, %v11802_v40 }
 0x24c   :  { %v936_v0 = vadd.f32 %v935_v31, %v11579_v2  ;;  %v1049_v38 = vadd.f32 %v1048_v34, %v11582_v3  ;;  %2819 = vmatprep.mubr.bf16.mxu1 %v11782_v54  ;;  %2932 = vmatprep.mubr.bf16.mxu0 %v11784_v28  ;;  %v11814_v8 = vld [vmem:[#allocation11 + $0x308] sm:$0xff]  ;;  %v1114_v7 = vmax.f32 %v934_v30, 0.0  ;;  %v1115_v31 = vmax.f32 %v1045_v42, 0.0 }
 0x24d   :  { %v937_v43 = vpop.f32.mrf.mxu1  ;;  %v1050_v44 = vpop.f32.mrf.mxu0  ;;  %2820 = vmatmul.mubr.bf16.gmra.mxu1 %v11790_v29  ;;  %2933 = vmatmul.mubr.bf16.gmra.mxu0 %v11792_v18  ;;  %v11820_v6 = vld [vmem:[#allocation11 + $0x328] sm:$0xff]  ;;  %v1116_v47 = vmax.f32 %v1047_v37, 0.0 }
 0x24e   :  { %v938_v62 = vadd.f32 %v937_v43, %v11573_v63  ;;  %v1051_v4 = vadd.f32 %v1050_v44, %v11576_v1  ;;  %2990 = vmatpush2.bf16.msra.mxu1 %v9191_v48  ;;  %v1117_v11 = vmax.f32 %v936_v0, 0.0  ;;  %v1119_v12 = vmax.f32 %v1049_v38, 0.0  ;;  %3103 = vmatpush2.bf16.msra.mxu0 %v9319_v53  ;;  %v11822_v46 = vld [vmem:[#allocation11 + $0x708] sm:$0xff] }
 0x24f   :  { %v941_v13 = vpop.f32.mrf.mxu1  ;;  %v1054_v45 = vpop.f32.mrf.mxu0  ;;  %2991 = vmatprep.subr.bf16.mxu1 %v9184_v56  ;;  %v9176_v48 = vcombine.high %v11800_v39, %v11802_v40  ;;  %v11824_v10 = vld [vmem:[#allocation11 + $0x728] sm:$0xff]  ;;  %3104 = vmatprep.subr.bf16.mxu0 %v9312_v25  ;;  %v1113_v53 = vmax.f32 %v932_v41, 0.0  ;;  %v9303_v0 = vcombine.low %v1402_v61, %v1406_v9  ;;  %v9304_v38 = vcombine.high %v1402_v61, %v1406_v9 }
 0x250   :  { %v1118_v49 = vmax.f32 %v938_v62, 0.0  ;;  %v1120_v15 = vmax.f32 %v1051_v4, 0.0  ;;  %v9168_v40 = vcombine.high %v11814_v8, %v11820_v6  ;;  %v9296_v30 = vcombine.high %v11822_v46, %v11824_v10  ;;  %v11844_v61 = vld [vmem:[#allocation11 + $0x2c8] sm:$0xff] }
 0x251   :  { %v943_v56 = vpop.f32.mrf.mxu1  ;;  %v1056_v34 = vpop.f32.mrf.mxu0  ;;  %v11834_v37 = vpack.c.bf16 %v1117_v11, %v1113_v53  ;;  %v11836_v25 = vpack.c.bf16 %v1119_v12, %v1115_v31  ;;  %v11846_v9 = vld [vmem:[#allocation11 + $0x2e8] sm:$0xff]  ;;  %v942_v11 = vadd.f32 %v941_v13, %v11579_v2  ;;  %v9295_v13 = vcombine.low %v11822_v46, %v11824_v10 }
 0x252   :  { %v11826_v43 = vpack.c.bf16 %v1118_v49, %v1114_v7  ;;  %v11828_v39 = vpack.c.bf16 %v1120_v15, %v1116_v47  ;;  %2992 = vmatpush2.bf16.msra.mxu1 %v9183_v57  ;;  %v944_v41 = vadd.f32 %v943_v56, %v11573_v63  ;;  %3105 = vmatpush2.bf16.msra.mxu0 %v9311_v5  ;;  %v1386_v15 = vld [vmem:[#allocation11 + $0x6c8] sm:$0xff] }
 0x253   :  { %v945_v42 = vpop.f32.mrf.mxu1  ;;  %v1058_v44 = vpop.f32.mrf.mxu0  ;;  %2993 = vmatprep.subr.bf16.mxu1 %v9176_v48  ;;  %v1057_v62 = vadd.f32 %v1056_v34, %v11576_v1  ;;  %v1055_v5 = vadd.f32 %v1054_v45, %v11582_v3  ;;  %v9167_v7 = vcombine.low %v11814_v8, %v11820_v6  ;;  %3106 = vmatprep.subr.bf16.mxu0 %v9304_v38  ;;  %v1390_v45 = vld [vmem:[#allocation11 + $0x6e8] sm:$0xff] }
 0x254   :  { %v946_v57 = vadd.f32 %v945_v42, %v11579_v2  ;;  %v1059_v4 = vadd.f32 %v1058_v44, %v11582_v3  ;;  %2829 = vmatprep.mubr.bf16.mxu1 %v11826_v43  ;;  %2942 = vmatprep.mubr.bf16.mxu0 %v11828_v39  ;;  %v11858_v53 = vld [vmem:[#allocation11 + $0x288] sm:$0xff]  ;;  %v9159_v8 = vcombine.low %v11844_v61, %v11846_v9  ;;  %v1122_v10 = vmax.f32 %v944_v41, 0.0 }
 0x255   :  { %v947_v12 = vpop.f32.mrf.mxu1  ;;  %v1060_v48 = vpop.f32.mrf.mxu0  ;;  %2830 = vmatmul.mubr.bf16.gmra.mxu1 %v11834_v37  ;;  %2943 = vmatmul.mubr.bf16.gmra.mxu0 %v11836_v25  ;;  %v11864_v6 = vld [vmem:[#allocation11 + $0x2a8] sm:$0xff]  ;;  %v1124_v44 = vmax.f32 %v1057_v62, 0.0  ;;  %v9287_v50 = vcombine.low %v1386_v15, %v1390_v45  ;;  %v9288_v59 = vcombine.high %v1386_v15, %v1390_v45 }
 0x256   :  { %v948_v47 = vadd.f32 %v947_v12, %v11573_v63  ;;  %v1061_v49 = vadd.f32 %v1060_v48, %v11576_v1  ;;  %2994 = vmatpush2.bf16.msra.mxu1 %v9175_v60  ;;  %v1125_v31 = vmax.f32 %v946_v57, 0.0  ;;  %v1127_v56 = vmax.f32 %v1059_v4, 0.0  ;;  %3107 = vmatpush2.bf16.msra.mxu0 %v9303_v0  ;;  %v11866_v38 = vld [vmem:[#allocation11 + $0x688] sm:$0xff] }
 0x257   :  { %v951_v34 = vpop.f32.mrf.mxu1  ;;  %v1064_v42 = vpop.f32.mrf.mxu0  ;;  %2995 = vmatprep.subr.bf16.mxu1 %v9168_v40  ;;  %v9160_v60 = vcombine.high %v11844_v61, %v11846_v9  ;;  %v11868_v46 = vld [vmem:[#allocation11 + $0x6a8] sm:$0xff]  ;;  %3108 = vmatprep.subr.bf16.mxu0 %v9296_v30  ;;  %v1121_v0 = vmax.f32 %v942_v11, 0.0  ;;  %v1123_v12 = vmax.f32 %v1055_v5, 0.0  ;;  %v9152_v9 = vcombine.high %v11858_v53, %v11864_v6 }
 0x258   :  { %v1126_v57 = vmax.f32 %v948_v47, 0.0  ;;  %v1128_v4 = vmax.f32 %v1061_v49, 0.0  ;;  %v9280_v41 = vcombine.high %v11866_v38, %v11868_v46  ;;  %v1242_v45 = vld [vmem:[#allocation11 + $0x248] sm:$0xff] }
 0x259   :  { %v953_v40 = vpop.f32.mrf.mxu1  ;;  %v1066_v48 = vpop.f32.mrf.mxu0  ;;  %v11878_v62 = vpack.c.bf16 %v1125_v31, %v1121_v0  ;;  %v11880_v30 = vpack.c.bf16 %v1127_v56, %v1123_v12  ;;  %v1246_v31 = vld [vmem:[#allocation11 + $0x268] sm:$0xff]  ;;  %v952_v56 = vadd.f32 %v951_v34, %v11579_v2 }
 0x25a   :  { %v11870_v58 = vpack.c.bf16 %v1126_v57, %v1122_v10  ;;  %v11872_v61 = vpack.c.bf16 %v1128_v4, %v1124_v44  ;;  %2996 = vmatpush2.bf16.msra.mxu1 %v9167_v7  ;;  %v954_v11 = vadd.f32 %v953_v40, %v11573_v63  ;;  %3109 = vmatpush2.bf16.msra.mxu0 %v9295_v13  ;;  %v1370_v34 = vld [vmem:[#allocation11 + $0x648] sm:$0xff] }
 0x25b   :  { %v955_v5 = vpop.f32.mrf.mxu1  ;;  %v1068_v47 = vpop.f32.mrf.mxu0  ;;  %2997 = vmatprep.subr.bf16.mxu1 %v9160_v60  ;;  %v1067_v49 = vadd.f32 %v1066_v48, %v11576_v1  ;;  %v1065_v10 = vadd.f32 %v1064_v42, %v11582_v3  ;;  %3110 = vmatprep.subr.bf16.mxu0 %v9288_v59  ;;  %v9151_v4 = vcombine.low %v11858_v53, %v11864_v6  ;;  %v1374_v42 = vld [vmem:[#allocation11 + $0x668] sm:$0xff] }
 0x25c   :  { %v956_v7 = vadd.f32 %v955_v5, %v11579_v2  ;;  %v1069_v15 = vadd.f32 %v1068_v47, %v11582_v3  ;;  %2839 = vmatprep.mubr.bf16.mxu1 %v11870_v58  ;;  %2952 = vmatprep.mubr.bf16.mxu0 %v11872_v61  ;;  %v9279_v2 = vcombine.low %v11866_v38, %v11868_v46  ;;  %v1130_v40 = vmax.f32 %v954_v11, 0.0  ;;  %v1238_v47 = vld [vmem:[#allocation11 + $0x228] sm:$0xff] }
 0x25d   :  { %v957_v13 = vpop.f32.mrf.mxu1  ;;  %v1070_v44 = vpop.f32.mrf.mxu0  ;;  %2840 = vmatmul.mubr.bf16.gmra.mxu1 %v11878_v62  ;;  %2953 = vmatmul.mubr.bf16.gmra.mxu0 %v11880_v30  ;;  %v9144_v3 = vcombine.high %v1242_v45, %v1246_v31  ;;  %v1132_v48 = vmax.f32 %v1067_v49, 0.0  ;;  %v1131_v59 = vmax.f32 %v1065_v10, 0.0  ;;  %v1362_v38 = vld [vmem:[#allocation11 + $0x608] sm:$0xff]  ;;  %v1359_v10 = vld [vmem:[#allocation11 + $0x5f0] sm:$0xff] }
 0x25e   :  { %v958_v60 = vadd.f32 %v957_v13, %v11573_v63  ;;  %v1071_v57 = vadd.f32 %v1070_v44, %v11576_v1  ;;  %2998 = vmatpush2.bf16.msra.mxu1 %v9159_v8  ;;  %v1133_v0 = vmax.f32 %v956_v7, 0.0  ;;  %v1135_v12 = vmax.f32 %v1069_v15, 0.0  ;;  %3111 = vmatpush2.bf16.msra.mxu0 %v9287_v50  ;;  %v1234_v8 = vld [vmem:[#allocation11 + $0x208] sm:$0xff]  ;;  %v1227_v15 = vld [vmem:[#allocation11 + $0x1d0] sm:$0xff] }
 0x25f   :  { %2999 = vmatprep.subr.bf16.mxu1 %v9152_v9  ;;  %3112 = vmatprep.subr.bf16.mxu0 %v9280_v41  ;;  %v1129_v1 = vmax.f32 %v952_v56, 0.0  ;;  %v9143_v50 = vcombine.low %v1242_v45, %v1246_v31  ;;  %v9272_v9 = vcombine.high %v1370_v34, %v1374_v42  ;;  %v1366_v46 = vld [vmem:[#allocation11 + $0x628] sm:$0xff]  ;;  %v9271_v41 = vcombine.low %v1370_v34, %v1374_v42  ;;  %v1231_v56 = vld [vmem:[#allocation11 + $0x1f0] sm:$0xff] }
 0x260   :  { %v1134_v63 = vmax.f32 %v958_v60, 0.0  ;;  %v1136_v5 = vmax.f32 %v1071_v57, 0.0  ;;  %v11904_v11 = vpack.c.bf16 %v1135_v12, %v1131_v59  ;;  %v9136_v49 = vcombine.high %v1234_v8, %v1238_v47  ;;  %v1355_v31 = vld [vmem:[#allocation11 + $0x5d0] sm:$0xff] }
 0x261   :  { %v11902_v7 = vpack.c.bf16 %v1133_v0, %v1129_v1  ;;  %v9264_v45 = vcombine.high %v1362_v38, %v1366_v46  ;;  %v9135_v13 = vcombine.low %v1234_v8, %v1238_v47  ;;  %v9263_v44 = vcombine.low %v1362_v38, %v1366_v46  ;;  %v1223_v0 = vld [vmem:[#allocation11 + $0x1b0] sm:$0xff] }
 0x262   :  { %v11898_v53 = vpack.c.bf16 %v1134_v63, %v1130_v40  ;;  %v11900_v6 = vpack.c.bf16 %v1136_v5, %v1132_v48  ;;  %3000 = vmatpush2.bf16.msra.mxu1 %v9151_v4  ;;  %3113 = vmatpush2.bf16.msra.mxu0 %v9279_v2  ;;  %v9130_v60 = vcombine.high %v1227_v15, %v1231_v56  ;;  %v1219_v4 = vld [vmem:[#allocation11 + $0x190] sm:$0xff] }
 0x263   :  { %3001 = vmatprep.subr.bf16.mxu1 %v9144_v3  ;;  %3114 = vmatprep.subr.bf16.mxu0 %v9272_v9  ;;  %v9258_v57 = vcombine.high %v1355_v31, %v1359_v10  ;;  %v9129_v12 = vcombine.low %v1227_v15, %v1231_v56  ;;  %v1347_v2 = vld [vmem:[#allocation11 + $0x590] sm:$0xff]  ;;  %v9257_v34 = vcombine.low %v1355_v31, %v1359_v10 }
 0x264   :  { %2849 = vmatprep.mubr.bf16.mxu1 %v11898_v53  ;;  %2962 = vmatprep.mubr.bf16.mxu0 %v11900_v6  ;;  %v1351_v3 = vld [vmem:[#allocation11 + $0x5b0] sm:$0xff]  ;;  %v9122_v42 = vcombine.high %v1219_v4, %v1223_v0  ;;  %v9121_v5 = vcombine.low %v1219_v4, %v1223_v0 }
 0x265   :  { %2850 = vmatmul.mubr.bf16.gmra.mxu1 %v11902_v7  ;;  %2963 = vmatmul.mubr.bf16.gmra.mxu0 %v11904_v11  ;;  %v1211_v40 = vld [vmem:[#allocation11 + $0x150] sm:$0xff]  ;;  %v9250_v63 = vcombine.high %v1347_v2, %v1351_v3  ;;  %v9249_v47 = vcombine.low %v1347_v2, %v1351_v3 }
 0x266   :  { %3002 = vmatpush2.bf16.msra.mxu1 %v9143_v50  ;;  %3005 = vmatprep.mubr.bf16.mxu1 %v11600_v32  ;;  %v1215_v48 = vld [vmem:[#allocation11 + $0x170] sm:$0xff] }
 0x267   :  { %3115 = vmatpush2.bf16.msra.mxu0 %v9271_v41  ;;  %3118 = vmatprep.mubr.bf16.mxu0 %v11602_v33  ;;  %v1339_v1 = vld [vmem:[#allocation11 + $0x550] sm:$0xff]  ;;  %v9114_v8 = vcombine.high %v1211_v40, %v1215_v48  ;;  %v9113_v46 = vcombine.low %v1211_v40, %v1215_v48 }
 0x268   :  { %3003 = vmatprep.subr.bf16.mxu1 %v9136_v49  ;;  %3116 = vmatprep.subr.bf16.mxu0 %v9264_v45  ;;  %v1343_v59 = vld [vmem:[#allocation11 + $0x570] sm:$0xff] }
 0x269   :  { %v9242_v50 = vcombine.high %v1339_v1, %v1343_v59  ;;  %v1203_v9 = vld [vmem:[#allocation11 + $0x110] sm:$0xff]  ;;  %v9241_v15 = vcombine.low %v1339_v1, %v1343_v59 }
 0x26a   :  { %3004 = vmatpush2.bf16.msra.mxu1 %v9135_v13  ;;  %v1207_v38 = vld [vmem:[#allocation11 + $0x130] sm:$0xff] }
 0x26b   :  { %3117 = vmatpush2.bf16.msra.mxu0 %v9263_v44  ;;  %3199 = vmatprep.subr.bf16.mxu1 %v9130_v60  ;;  %v1331_v41 = vld [vmem:[#allocation11 + $0x510] sm:$0xff]  ;;  %v9106_v56 = vcombine.high %v1203_v9, %v1207_v38  ;;  %v9105_v13 = vcombine.low %v1203_v9, %v1207_v38 }
 0x26c   :  { %3312 = vmatprep.subr.bf16.mxu0 %v9258_v57  ;;  %v1335_v49 = vld [vmem:[#allocation11 + $0x530] sm:$0xff] }
 0x26d   :  { %3006 = vmatmul.mubr.bf16.vlgmr.msra.gmra.mxu1 %v11606_v35  ;;  %v1195_v45 = vld [vmem:[#allocation11 + $0xd0] sm:$0xff]  ;;  %v9234_v10 = vcombine.high %v1331_v41, %v1335_v49  ;;  %v9233_v4 = vcombine.low %v1331_v41, %v1335_v49 }
 0x26e   :  { %3119 = vmatmul.mubr.bf16.vlgmr.msra.gmra.mxu0 %v11608_v36  ;;  %3200 = vmatpush1.bf16.msra.mxu1 %v9129_v12  ;;  %v1199_v31 = vld [vmem:[#allocation11 + $0xf0] sm:$0xff] }
 0x26f   :  { %3015 = vmatprep.mubr.bf16.mxu1 %v11650_v23  ;;  %3128 = vmatprep.mubr.bf16.mxu0 %v11652_v24  ;;  %v1323_v44 = vld [vmem:[#allocation11 + $0x4d0] sm:$0xff]  ;;  %v9098_v57 = vcombine.high %v1195_v45, %v1199_v31  ;;  %v9097_v3 = vcombine.low %v1195_v45, %v1199_v31 }
 0x270   :  { %3313 = vmatpush1.bf16.msra.mxu0 %v9257_v34  ;;  %3201 = vmatprep.subr.bf16.mxu1 %v9122_v42  ;;  %v1327_v60 = vld [vmem:[#allocation11 + $0x4f0] sm:$0xff] }
 0x271   :  { %3314 = vmatprep.subr.bf16.mxu0 %v9250_v63  ;;  %v9226_v0 = vcombine.high %v1323_v44, %v1327_v60  ;;  %v1187_v12 = vld [vmem:[#allocation11 + $0x90] sm:$0xff]  ;;  %v9225_v40 = vcombine.low %v1323_v44, %v1327_v60 }
 0x272   :  { %3202 = vmatpush1.bf16.msra.mxu1 %v9121_v5  ;;  %v1191_v2 = vld [vmem:[#allocation11 + $0xb0] sm:$0xff] }
 0x273   :  { %3203 = vmatprep.subr.bf16.mxu1 %v9114_v8  ;;  %v1315_v34 = vld [vmem:[#allocation11 + $0x490] sm:$0xff]  ;;  %v9090_v48 = vcombine.high %v1187_v12, %v1191_v2  ;;  %v9089_v59 = vcombine.low %v1187_v12, %v1191_v2 }
 0x274   :  { %3315 = vmatpush1.bf16.msra.mxu0 %v9249_v47  ;;  %v1319_v42 = vld [vmem:[#allocation11 + $0x4b0] sm:$0xff] }
 0x275   :  { %3016 = vmatmul.mubr.bf16.gmra.mxu1 %v11658_v26  ;;  %3316 = vmatprep.subr.bf16.mxu0 %v9242_v50  ;;  %v1179_v63 = vld [vmem:[#allocation11 + $0x50] sm:$0xff]  ;;  %v9218_v1 = vcombine.high %v1315_v34, %v1319_v42  ;;  %v9217_v9 = vcombine.low %v1315_v34, %v1319_v42 }
 0x276   :  { %3129 = vmatmul.mubr.bf16.gmra.mxu0 %v11660_v27  ;;  %3204 = vmatpush1.bf16.msra.mxu1 %v9113_v46  ;;  %v1183_v5 = vld [vmem:[#allocation11 + $0x70] sm:$0xff] }
 0x277   :  { %3025 = vmatprep.mubr.bf16.mxu1 %v11694_v16  ;;  %3138 = vmatprep.mubr.bf16.mxu0 %v11696_v17  ;;  %v1307_v8 = vld [vmem:[#allocation11 + $0x450] sm:$0xff]  ;;  %v9082_v50 = vcombine.high %v1179_v63, %v1183_v5  ;;  %v9081_v49 = vcombine.low %v1179_v63, %v1183_v5 }
 0x278   :  { %3317 = vmatpush1.bf16.msra.mxu0 %v9241_v15  ;;  %3205 = vmatprep.subr.bf16.mxu1 %v9106_v56  ;;  %v1311_v47 = vld [vmem:[#allocation11 + $0x470] sm:$0xff] }
 0x279   :  { %3318 = vmatprep.subr.bf16.mxu0 %v9234_v10  ;;  %v9210_v38 = vcombine.high %v1307_v8, %v1311_v47  ;;  %v1171_v46 = vld [vmem:[#allocation11 + $0x10] sm:$0xff]  ;;  %v9209_v45 = vcombine.low %v1307_v8, %v1311_v47 }
 0x27a   :  { %3206 = vmatpush1.bf16.msra.mxu1 %v9105_v13  ;;  %v1175_v41 = vld [vmem:[#allocation11 + $0x30] sm:$0xff] }
 0x27b   :  { %3207 = vmatprep.subr.bf16.mxu1 %v9098_v57  ;;  %v1299_v15 = vld [vmem:[#allocation11 + $0x410] sm:$0xff]  ;;  %v9074_v31 = vcombine.high %v1171_v46, %v1175_v41  ;;  %v9073_v60 = vcombine.low %v1171_v46, %v1175_v41 }
 0x27c   :  { %3319 = vmatpush1.bf16.msra.mxu0 %v9233_v4  ;;  %v1303_v56 = vld [vmem:[#allocation11 + $0x430] sm:$0xff] }
 0x27d   :  { %3026 = vmatmul.mubr.bf16.gmra.mxu1 %v11702_v20  ;;  %3320 = vmatprep.subr.bf16.mxu0 %v9226_v0  ;;  %v1291_v10 = vld [vmem:[#allocation11 + $0x3d0] sm:$0xff]  ;;  %v9202_v44 = vcombine.high %v1299_v15, %v1303_v56  ;;  %v9201_v12 = vcombine.low %v1299_v15, %v1303_v56 }
 0x27e   :  { %3139 = vmatmul.mubr.bf16.gmra.mxu0 %v11704_v21  ;;  %3208 = vmatpush1.bf16.msra.mxu1 %v9097_v3  ;;  %v1295_v13 = vld [vmem:[#allocation11 + $0x3f0] sm:$0xff] }
 0x27f   :  { %3035 = vmatprep.mubr.bf16.mxu1 %v11738_v55  ;;  %3148 = vmatprep.mubr.bf16.mxu0 %v11740_v14  ;;  %v1419_v57 = vld [vmem:[#allocation11 + $0x7d0] sm:$0xff]  ;;  %v9194_v0 = vcombine.high %v1291_v10, %v1295_v13  ;;  %v9193_v42 = vcombine.low %v1291_v10, %v1295_v13 }
 0x280   :  { %3321 = vmatpush1.bf16.msra.mxu0 %v9225_v40  ;;  %3209 = vmatprep.subr.bf16.mxu1 %v9090_v48  ;;  %v1423_v4 = vld [vmem:[#allocation11 + $0x7f0] sm:$0xff] }
 0x281   :  { %3322 = vmatprep.subr.bf16.mxu0 %v9218_v1  ;;  %v9322_v2 = vcombine.high %v1419_v57, %v1423_v4  ;;  %v1283_v3 = vld [vmem:[#allocation11 + $0x390] sm:$0xff]  ;;  %v9321_v63 = vcombine.low %v1419_v57, %v1423_v4 }
 0x282   :  { %3210 = vmatpush1.bf16.msra.mxu1 %v9089_v59  ;;  %v1287_v34 = vld [vmem:[#allocation11 + $0x3b0] sm:$0xff] }
 0x283   :  { %3211 = vmatprep.subr.bf16.mxu1 %v9082_v50  ;;  %v1411_v40 = vld [vmem:[#allocation11 + $0x790] sm:$0xff]  ;;  %v9186_v5 = vcombine.high %v1283_v3, %v1287_v34  ;;  %v9185_v47 = vcombine.low %v1283_v3, %v1287_v34 }
 0x284   :  { %3323 = vmatpush1.bf16.msra.mxu0 %v9217_v9  ;;  %v1415_v48 = vld [vmem:[#allocation11 + $0x7b0] sm:$0xff] }
 0x285   :  { %3036 = vmatmul.mubr.bf16.gmra.mxu1 %v11746_v22  ;;  %3324 = vmatprep.subr.bf16.mxu0 %v9210_v38  ;;  %v1275_v1 = vld [vmem:[#allocation11 + $0x350] sm:$0xff]  ;;  %v9314_v8 = vcombine.high %v1411_v40, %v1415_v48  ;;  %v9313_v46 = vcombine.low %v1411_v40, %v1415_v48 }
 0x286   :  { %3149 = vmatmul.mubr.bf16.gmra.mxu0 %v11748_v19  ;;  %3212 = vmatpush1.bf16.msra.mxu1 %v9081_v49  ;;  %v1279_v59 = vld [vmem:[#allocation11 + $0x370] sm:$0xff] }
 0x287   :  { %3045 = vmatprep.mubr.bf16.mxu1 %v11782_v54  ;;  %3158 = vmatprep.mubr.bf16.mxu0 %v11784_v28  ;;  %v1403_v50 = vld [vmem:[#allocation11 + $0x750] sm:$0xff]  ;;  %v9178_v38 = vcombine.high %v1275_v1, %v1279_v59  ;;  %v9177_v56 = vcombine.low %v1275_v1, %v1279_v59 }
 0x288   :  { %3325 = vmatpush1.bf16.msra.mxu0 %v9209_v45  ;;  %3213 = vmatprep.subr.bf16.mxu1 %v9074_v31  ;;  %v1407_v9 = vld [vmem:[#allocation11 + $0x770] sm:$0xff] }
 0x289   :  { %3326 = vmatprep.subr.bf16.mxu0 %v9202_v44  ;;  %v9306_v41 = vcombine.high %v1403_v50, %v1407_v9  ;;  %v1267_v49 = vld [vmem:[#allocation11 + $0x310] sm:$0xff]  ;;  %v9305_v10 = vcombine.low %v1403_v50, %v1407_v9 }
 0x28a   :  { %3214 = vmatpush1.bf16.msra.mxu1 %v9073_v60  ;;  %v1271_v15 = vld [vmem:[#allocation11 + $0x330] sm:$0xff] }
 0x28b   :  { %3215 = vmatprep.subr.bf16.mxu1 %v9194_v0  ;;  %v1395_v45 = vld [vmem:[#allocation11 + $0x710] sm:$0xff]  ;;  %v9170_v13 = vcombine.high %v1267_v49, %v1271_v15  ;;  %v9169_v4 = vcombine.low %v1267_v49, %v1271_v15 }
 0x28c   :  { %3327 = vmatpush1.bf16.msra.mxu0 %v9201_v12  ;;  %v1399_v31 = vld [vmem:[#allocation11 + $0x730] sm:$0xff] }
 0x28d   :  { %3046 = vmatmul.mubr.bf16.gmra.mxu1 %v11790_v29  ;;  %3328 = vmatprep.subr.bf16.mxu0 %v9322_v2  ;;  %v1259_v44 = vld [vmem:[#allocation11 + $0x2d0] sm:$0xff]  ;;  %v9298_v57 = vcombine.high %v1395_v45, %v1399_v31  ;;  %v9297_v3 = vcombine.low %v1395_v45, %v1399_v31 }
 0x28e   :  { %3159 = vmatmul.mubr.bf16.gmra.mxu0 %v11792_v18  ;;  %3216 = vmatpush2.bf16.msra.mxu1 %v9193_v42  ;;  %v1263_v60 = vld [vmem:[#allocation11 + $0x2f0] sm:$0xff] }
 0x28f   :  { %3055 = vmatprep.mubr.bf16.mxu1 %v11826_v43  ;;  %3168 = vmatprep.mubr.bf16.mxu0 %v11828_v39  ;;  %v1387_v0 = vld [vmem:[#allocation11 + $0x6d0] sm:$0xff]  ;;  %v9162_v2 = vcombine.high %v1259_v44, %v1263_v60  ;;  %v9161_v48 = vcombine.low %v1259_v44, %v1263_v60 }
 0x290   :  { %3329 = vmatpush2.bf16.msra.mxu0 %v9321_v63  ;;  %3217 = vmatprep.subr.bf16.mxu1 %v9186_v5  ;;  %v1391_v12 = vld [vmem:[#allocation11 + $0x6f0] sm:$0xff] }
 0x291   :  { %3330 = vmatprep.subr.bf16.mxu0 %v9314_v8  ;;  %v9290_v34 = vcombine.high %v1387_v0, %v1391_v12  ;;  %v1251_v42 = vld [vmem:[#allocation11 + $0x290] sm:$0xff]  ;;  %v9289_v1 = vcombine.low %v1387_v0, %v1391_v12 }
 0x292   :  { %3218 = vmatpush2.bf16.msra.mxu1 %v9185_v47  ;;  %v1255_v40 = vld [vmem:[#allocation11 + $0x2b0] sm:$0xff] }
 0x293   :  { %3219 = vmatprep.subr.bf16.mxu1 %v9178_v38  ;;  %v1379_v63 = vld [vmem:[#allocation11 + $0x690] sm:$0xff]  ;;  %v9154_v59 = vcombine.high %v1251_v42, %v1255_v40  ;;  %v9153_v9 = vcombine.low %v1251_v42, %v1255_v40  ;;  %v1220_v40 = vld [vmem:[#allocation11 + $0x198] sm:$0xff] }
 0x294   :  { %3331 = vmatpush2.bf16.msra.mxu0 %v9313_v46  ;;  %v1383_v5 = vld [vmem:[#allocation11 + $0x6b0] sm:$0xff] }
 0x295   :  { %3056 = vmatmul.mubr.bf16.gmra.mxu1 %v11834_v37  ;;  %3332 = vmatprep.subr.bf16.mxu0 %v9306_v41  ;;  %v1243_v8 = vld [vmem:[#allocation11 + $0x250] sm:$0xff]  ;;  %v9282_v50 = vcombine.high %v1379_v63, %v1383_v5  ;;  %v9281_v49 = vcombine.low %v1379_v63, %v1383_v5 }
 0x296   :  { %3169 = vmatmul.mubr.bf16.gmra.mxu0 %v11836_v25  ;;  %3220 = vmatpush2.bf16.msra.mxu1 %v9177_v56  ;;  %v1247_v47 = vld [vmem:[#allocation11 + $0x270] sm:$0xff] }
 0x297   :  { %3065 = vmatprep.mubr.bf16.mxu1 %v11870_v58  ;;  %3178 = vmatprep.mubr.bf16.mxu0 %v11872_v61  ;;  %v1371_v38 = vld [vmem:[#allocation11 + $0x650] sm:$0xff]  ;;  %v9146_v41 = vcombine.high %v1243_v8, %v1247_v47  ;;  %v9145_v31 = vcombine.low %v1243_v8, %v1247_v47 }
 0x298   :  { %3333 = vmatpush2.bf16.msra.mxu0 %v9305_v10  ;;  %3221 = vmatprep.subr.bf16.mxu1 %v9170_v13  ;;  %v1375_v46 = vld [vmem:[#allocation11 + $0x670] sm:$0xff] }
 0x299   :  { %3334 = vmatprep.subr.bf16.mxu0 %v9298_v57  ;;  %v9274_v15 = vcombine.high %v1371_v38, %v1375_v46  ;;  %v1235_v56 = vld [vmem:[#allocation11 + $0x210] sm:$0xff]  ;;  %v9273_v44 = vcombine.low %v1371_v38, %v1375_v46  ;;  %v1228_v57 = vld [vmem:[#allocation11 + $0x1d8] sm:$0xff] }
 0x29a   :  { %3222 = vmatpush2.bf16.msra.mxu1 %v9169_v4  ;;  %v1239_v45 = vld [vmem:[#allocation11 + $0x230] sm:$0xff]  ;;  %v1232_v4 = vld [vmem:[#allocation11 + $0x1f8] sm:$0xff] }
 0x29b   :  { %3223 = vmatprep.subr.bf16.mxu1 %v9162_v2  ;;  %v1363_v10 = vld [vmem:[#allocation11 + $0x610] sm:$0xff]  ;;  %v9138_v60 = vcombine.high %v1235_v56, %v1239_v45  ;;  %v9137_v12 = vcombine.low %v1235_v56, %v1239_v45  ;;  %v1356_v2 = vld [vmem:[#allocation11 + $0x5d8] sm:$0xff]  ;;  %v9131_v5 = vcombine.low %v1228_v57, %v1232_v4 }
 0x29c   :  { %3335 = vmatpush2.bf16.msra.mxu0 %v9297_v3  ;;  %v1367_v13 = vld [vmem:[#allocation11 + $0x630] sm:$0xff]  ;;  %v1360_v3 = vld [vmem:[#allocation11 + $0x5f8] sm:$0xff] }
 0x29d   :  { %3066 = vmatmul.mubr.bf16.gmra.mxu1 %v11878_v62  ;;  %3336 = vmatprep.subr.bf16.mxu0 %v9290_v34  ;;  %v9266_v0 = vcombine.high %v1363_v10, %v1367_v13  ;;  %v9132_v34 = vcombine.high %v1228_v57, %v1232_v4  ;;  %v9265_v42 = vcombine.low %v1363_v10, %v1367_v13  ;;  %v1204_v45 = vld [vmem:[#allocation11 + $0x118] sm:$0xff] }
 0x29e   :  { %3179 = vmatmul.mubr.bf16.gmra.mxu0 %v11880_v30  ;;  %3224 = vmatpush2.bf16.msra.mxu1 %v9161_v48  ;;  %v1224_v48 = vld [vmem:[#allocation11 + $0x1b8] sm:$0xff]  ;;  %v9260_v63 = vcombine.high %v1356_v2, %v1360_v3  ;;  %v9259_v47 = vcombine.low %v1356_v2, %v1360_v3 }
 0x29f   :  { %3075 = vmatprep.mubr.bf16.mxu1 %v11898_v53  ;;  %3188 = vmatprep.mubr.bf16.mxu0 %v11900_v6  ;;  %v9124_v8 = vcombine.high %v1220_v40, %v1224_v48  ;;  %v9123_v46 = vcombine.low %v1220_v40, %v1224_v48 }
 0x2a0   :  { %3337 = vmatpush2.bf16.msra.mxu0 %v9289_v1  ;;  %3225 = vmatprep.subr.bf16.mxu1 %v9154_v59  ;;  %v1348_v1 = vld [vmem:[#allocation11 + $0x598] sm:$0xff] }
 0x2a1   :  { %3338 = vmatprep.subr.bf16.mxu0 %v9282_v50  ;;  %v1352_v59 = vld [vmem:[#allocation11 + $0x5b8] sm:$0xff] }
 0x2a2   :  { %3226 = vmatpush2.bf16.msra.mxu1 %v9153_v9  ;;  %v1212_v50 = vld [vmem:[#allocation11 + $0x158] sm:$0xff]  ;;  %v9252_v38 = vcombine.high %v1348_v1, %v1352_v59  ;;  %v9251_v56 = vcombine.low %v1348_v1, %v1352_v59 }
 0x2a3   :  { %3227 = vmatprep.subr.bf16.mxu1 %v9146_v41  ;;  %v1216_v9 = vld [vmem:[#allocation11 + $0x178] sm:$0xff] }
 0x2a4   :  { %3339 = vmatpush2.bf16.msra.mxu0 %v9281_v49  ;;  %v1340_v41 = vld [vmem:[#allocation11 + $0x558] sm:$0xff]  ;;  %v9115_v13 = vcombine.low %v1212_v50, %v1216_v9 }
 0x2a5   :  { %3076 = vmatmul.mubr.bf16.gmra.mxu1 %v11902_v7  ;;  %3340 = vmatprep.subr.bf16.mxu0 %v9274_v15  ;;  %v1344_v49 = vld [vmem:[#allocation11 + $0x578] sm:$0xff]  ;;  %v9116_v15 = vcombine.high %v1212_v50, %v1216_v9 }
 0x2a6   :  { %3189 = vmatmul.mubr.bf16.gmra.mxu0 %v11904_v11  ;;  %3228 = vmatpush2.bf16.msra.mxu1 %v9145_v31  ;;  %v1208_v31 = vld [vmem:[#allocation11 + $0x138] sm:$0xff]  ;;  %v9244_v10 = vcombine.high %v1340_v41, %v1344_v49  ;;  %v9243_v4 = vcombine.low %v1340_v41, %v1344_v49 }
 0x2a7   :  { %3231 = vmatprep.mubr.bf16.mxu1 %v11600_v32  ;;  %3344 = vmatprep.mubr.bf16.mxu0 %v11602_v33  ;;  %v9108_v57 = vcombine.high %v1204_v45, %v1208_v31  ;;  %v9107_v3 = vcombine.low %v1204_v45, %v1208_v31 }
 0x2a8   :  { %3341 = vmatpush2.bf16.msra.mxu0 %v9273_v44  ;;  %3229 = vmatprep.subr.bf16.mxu1 %v9138_v60  ;;  %v1332_v44 = vld [vmem:[#allocation11 + $0x518] sm:$0xff] }
 0x2a9   :  { %3342 = vmatprep.subr.bf16.mxu0 %v9266_v0  ;;  %v1336_v60 = vld [vmem:[#allocation11 + $0x538] sm:$0xff] }
 0x2aa   :  { %3230 = vmatpush2.bf16.msra.mxu1 %v9137_v12  ;;  %v1196_v0 = vld [vmem:[#allocation11 + $0xd8] sm:$0xff]  ;;  %v9236_v2 = vcombine.high %v1332_v44, %v1336_v60  ;;  %v9235_v48 = vcombine.low %v1332_v44, %v1336_v60 }
 0x2ab   :  { %3425 = vmatprep.subr.bf16.mxu1 %v9132_v34  ;;  %v1200_v12 = vld [vmem:[#allocation11 + $0xf8] sm:$0xff] }
 0x2ac   :  { %3343 = vmatpush2.bf16.msra.mxu0 %v9265_v42  ;;  %v1324_v34 = vld [vmem:[#allocation11 + $0x4d8] sm:$0xff]  ;;  %v9100_v40 = vcombine.high %v1196_v0, %v1200_v12  ;;  %v9099_v59 = vcombine.low %v1196_v0, %v1200_v12 }
 0x2ad   :  { %3232 = vmatmul.mubr.bf16.vlgmr.msra.gmra.mxu1 %v11606_v35  ;;  %3538 = vmatprep.subr.bf16.mxu0 %v9260_v63  ;;  %v1328_v42 = vld [vmem:[#allocation11 + $0x4f8] sm:$0xff] }
 0x2ae   :  { %3426 = vmatpush1.bf16.msra.mxu1 %v9131_v5  ;;  %3241 = vmatprep.mubr.bf16.mxu1 %v11650_v23  ;;  %v1188_v63 = vld [vmem:[#allocation11 + $0x98] sm:$0xff]  ;;  %v9228_v1 = vcombine.high %v1324_v34, %v1328_v42  ;;  %v9227_v9 = vcombine.low %v1324_v34, %v1328_v42 }
 0x2af   :  { %3345 = vmatmul.mubr.bf16.vlgmr.msra.gmra.mxu0 %v11608_v36  ;;  %3427 = vmatprep.subr.bf16.mxu1 %v9124_v8  ;;  %v1192_v5 = vld [vmem:[#allocation11 + $0xb8] sm:$0xff] }
 0x2b0   :  { %3354 = vmatprep.mubr.bf16.mxu0 %v11652_v24  ;;  %3539 = vmatpush1.bf16.msra.mxu0 %v9259_v47  ;;  %v1316_v8 = vld [vmem:[#allocation11 + $0x498] sm:$0xff]  ;;  %v9092_v50 = vcombine.high %v1188_v63, %v1192_v5  ;;  %v9091_v49 = vcombine.low %v1188_v63, %v1192_v5 }
 0x2b1   :  { %3540 = vmatprep.subr.bf16.mxu0 %v9252_v38  ;;  %v1320_v47 = vld [vmem:[#allocation11 + $0x4b8] sm:$0xff] }
 0x2b2   :  { %3428 = vmatpush1.bf16.msra.mxu1 %v9123_v46  ;;  %v1180_v38 = vld [vmem:[#allocation11 + $0x58] sm:$0xff]  ;;  %v9220_v41 = vcombine.high %v1316_v8, %v1320_v47  ;;  %v9219_v31 = vcombine.low %v1316_v8, %v1320_v47 }
 0x2b3   :  { %3429 = vmatprep.subr.bf16.mxu1 %v9116_v15  ;;  %v1184_v46 = vld [vmem:[#allocation11 + $0x78] sm:$0xff] }
 0x2b4   :  { %3541 = vmatpush1.bf16.msra.mxu0 %v9251_v56  ;;  %v1308_v15 = vld [vmem:[#allocation11 + $0x458] sm:$0xff]  ;;  %v9084_v45 = vcombine.high %v1180_v38, %v1184_v46  ;;  %v9083_v60 = vcombine.low %v1180_v38, %v1184_v46 }
 0x2b5   :  { %3242 = vmatmul.mubr.bf16.gmra.mxu1 %v11658_v26  ;;  %3542 = vmatprep.subr.bf16.mxu0 %v9244_v10  ;;  %v1312_v56 = vld [vmem:[#allocation11 + $0x478] sm:$0xff] }
 0x2b6   :  { %3430 = vmatpush1.bf16.msra.mxu1 %v9115_v13  ;;  %3251 = vmatprep.mubr.bf16.mxu1 %v11694_v16  ;;  %v1172_v10 = vld [vmem:[#allocation11 + $0x18] sm:$0xff]  ;;  %v9212_v44 = vcombine.high %v1308_v15, %v1312_v56  ;;  %v9211_v12 = vcombine.low %v1308_v15, %v1312_v56 }
 0x2b7   :  { %3355 = vmatmul.mubr.bf16.gmra.mxu0 %v11660_v27  ;;  %3431 = vmatprep.subr.bf16.mxu1 %v9108_v57  ;;  %v1176_v13 = vld [vmem:[#allocation11 + $0x38] sm:$0xff] }
 0x2b8   :  { %3364 = vmatprep.mubr.bf16.mxu0 %v11696_v17  ;;  %3543 = vmatpush1.bf16.msra.mxu0 %v9243_v4  ;;  %v1300_v57 = vld [vmem:[#allocation11 + $0x418] sm:$0xff]  ;;  %v9076_v0 = vcombine.high %v1172_v10, %v1176_v13  ;;  %v9075_v42 = vcombine.low %v1172_v10, %v1176_v13 }
 0x2b9   :  { %3544 = vmatprep.subr.bf16.mxu0 %v9236_v2  ;;  %v1304_v4 = vld [vmem:[#allocation11 + $0x438] sm:$0xff] }
 0x2ba   :  { %3432 = vmatpush1.bf16.msra.mxu1 %v9107_v3  ;;  %v1292_v2 = vld [vmem:[#allocation11 + $0x3d8] sm:$0xff]  ;;  %v9204_v34 = vcombine.high %v1300_v57, %v1304_v4  ;;  %v9203_v5 = vcombine.low %v1300_v57, %v1304_v4 }
 0x2bb   :  { %3433 = vmatprep.subr.bf16.mxu1 %v9100_v40  ;;  %v1296_v3 = vld [vmem:[#allocation11 + $0x3f8] sm:$0xff] }
 0x2bc   :  { %3545 = vmatpush1.bf16.msra.mxu0 %v9235_v48  ;;  %v1420_v40 = vld [vmem:[#allocation11 + $0x7d8] sm:$0xff]  ;;  %v9196_v63 = vcombine.high %v1292_v2, %v1296_v3  ;;  %v9195_v47 = vcombine.low %v1292_v2, %v1296_v3 }
 0x2bd   :  { %3252 = vmatmul.mubr.bf16.gmra.mxu1 %v11702_v20  ;;  %3546 = vmatprep.subr.bf16.mxu0 %v9228_v1  ;;  %v1424_v48 = vld [vmem:[#allocation11 + $0x7f8] sm:$0xff] }
 0x2be   :  { %3434 = vmatpush1.bf16.msra.mxu1 %v9099_v59  ;;  %3261 = vmatprep.mubr.bf16.mxu1 %v11738_v55  ;;  %v1284_v1 = vld [vmem:[#allocation11 + $0x398] sm:$0xff]  ;;  %v9324_v8 = vcombine.high %v1420_v40, %v1424_v48  ;;  %v9323_v46 = vcombine.low %v1420_v40, %v1424_v48 }
 0x2bf   :  { %3365 = vmatmul.mubr.bf16.gmra.mxu0 %v11704_v21  ;;  %3435 = vmatprep.subr.bf16.mxu1 %v9092_v50  ;;  %v1288_v59 = vld [vmem:[#allocation11 + $0x3b8] sm:$0xff] }
 0x2c0   :  { %3374 = vmatprep.mubr.bf16.mxu0 %v11740_v14  ;;  %3547 = vmatpush1.bf16.msra.mxu0 %v9227_v9  ;;  %v1412_v50 = vld [vmem:[#allocation11 + $0x798] sm:$0xff]  ;;  %v9188_v38 = vcombine.high %v1284_v1, %v1288_v59  ;;  %v9187_v56 = vcombine.low %v1284_v1, %v1288_v59 }
 0x2c1   :  { %3548 = vmatprep.subr.bf16.mxu0 %v9220_v41  ;;  %v1416_v9 = vld [vmem:[#allocation11 + $0x7b8] sm:$0xff] }
 0x2c2   :  { %3436 = vmatpush1.bf16.msra.mxu1 %v9091_v49  ;;  %v1276_v41 = vld [vmem:[#allocation11 + $0x358] sm:$0xff]  ;;  %v9316_v15 = vcombine.high %v1412_v50, %v1416_v9  ;;  %v9315_v13 = vcombine.low %v1412_v50, %v1416_v9 }
 0x2c3   :  { %3437 = vmatprep.subr.bf16.mxu1 %v9084_v45  ;;  %v1280_v49 = vld [vmem:[#allocation11 + $0x378] sm:$0xff] }
 0x2c4   :  { %3549 = vmatpush1.bf16.msra.mxu0 %v9219_v31  ;;  %v1404_v45 = vld [vmem:[#allocation11 + $0x758] sm:$0xff]  ;;  %v9180_v10 = vcombine.high %v1276_v41, %v1280_v49  ;;  %v9179_v4 = vcombine.low %v1276_v41, %v1280_v49 }
 0x2c5   :  { %3262 = vmatmul.mubr.bf16.gmra.mxu1 %v11746_v22  ;;  %3550 = vmatprep.subr.bf16.mxu0 %v9212_v44  ;;  %v1408_v31 = vld [vmem:[#allocation11 + $0x778] sm:$0xff] }
 0x2c6   :  { %3438 = vmatpush1.bf16.msra.mxu1 %v9083_v60  ;;  %3271 = vmatprep.mubr.bf16.mxu1 %v11782_v54  ;;  %v1268_v44 = vld [vmem:[#allocation11 + $0x318] sm:$0xff]  ;;  %v9308_v57 = vcombine.high %v1404_v45, %v1408_v31  ;;  %v9307_v3 = vcombine.low %v1404_v45, %v1408_v31 }
 0x2c7   :  { %3375 = vmatmul.mubr.bf16.gmra.mxu0 %v11748_v19  ;;  %3439 = vmatprep.subr.bf16.mxu1 %v9076_v0  ;;  %v1272_v60 = vld [vmem:[#allocation11 + $0x338] sm:$0xff] }
 0x2c8   :  { %3384 = vmatprep.mubr.bf16.mxu0 %v11784_v28  ;;  %3551 = vmatpush1.bf16.msra.mxu0 %v9211_v12  ;;  %v1396_v0 = vld [vmem:[#allocation11 + $0x718] sm:$0xff]  ;;  %v9172_v2 = vcombine.high %v1268_v44, %v1272_v60  ;;  %v9171_v48 = vcombine.low %v1268_v44, %v1272_v60 }
 0x2c9   :  { %3552 = vmatprep.subr.bf16.mxu0 %v9204_v34  ;;  %v1400_v12 = vld [vmem:[#allocation11 + $0x738] sm:$0xff] }
 0x2ca   :  { %3440 = vmatpush1.bf16.msra.mxu1 %v9075_v42  ;;  %v1260_v34 = vld [vmem:[#allocation11 + $0x2d8] sm:$0xff]  ;;  %v9300_v40 = vcombine.high %v1396_v0, %v1400_v12  ;;  %v9299_v59 = vcombine.low %v1396_v0, %v1400_v12 }
 0x2cb   :  { %3441 = vmatprep.subr.bf16.mxu1 %v9196_v63  ;;  %v1264_v42 = vld [vmem:[#allocation11 + $0x2f8] sm:$0xff] }
 0x2cc   :  { %3553 = vmatpush1.bf16.msra.mxu0 %v9203_v5  ;;  %v1388_v63 = vld [vmem:[#allocation11 + $0x6d8] sm:$0xff]  ;;  %v9164_v1 = vcombine.high %v1260_v34, %v1264_v42  ;;  %v9163_v9 = vcombine.low %v1260_v34, %v1264_v42 }
 0x2cd   :  { %3272 = vmatmul.mubr.bf16.gmra.mxu1 %v11790_v29  ;;  %3554 = vmatprep.subr.bf16.mxu0 %v9324_v8  ;;  %v1392_v5 = vld [vmem:[#allocation11 + $0x6f8] sm:$0xff] }
 0x2ce   :  { %3442 = vmatpush2.bf16.msra.mxu1 %v9195_v47  ;;  %3281 = vmatprep.mubr.bf16.mxu1 %v11826_v43  ;;  %v1252_v8 = vld [vmem:[#allocation11 + $0x298] sm:$0xff]  ;;  %v9292_v50 = vcombine.high %v1388_v63, %v1392_v5  ;;  %v9291_v49 = vcombine.low %v1388_v63, %v1392_v5  ;;  %v10314_v63 = vld [vmem:[#allocation14 + $0x18c] ss:$28 sps:$4 sm:$0xff]  }
 0x2cf   :  { %3385 = vmatmul.mubr.bf16.gmra.mxu0 %v11792_v18  ;;  %3443 = vmatprep.subr.bf16.mxu1 %v9188_v38  ;;  %v1256_v47 = vld [vmem:[#allocation11 + $0x2b8] sm:$0xff] }
 0x2d0   :  { %3394 = vmatprep.mubr.bf16.mxu0 %v11828_v39  ;;  %3555 = vmatpush2.bf16.msra.mxu0 %v9323_v46  ;;  %v1380_v38 = vld [vmem:[#allocation11 + $0x698] sm:$0xff]  ;;  %v9156_v41 = vcombine.high %v1252_v8, %v1256_v47  ;;  %v9155_v31 = vcombine.low %v1252_v8, %v1256_v47  ;;  %v10327_v47 = vld [vmem:[#allocation14 + $0x508] ss:$28 sps:$4 sm:$0xff]  }
 0x2d1   :  { %3556 = vmatprep.subr.bf16.mxu0 %v9316_v15  ;;  %v1384_v46 = vld [vmem:[#allocation11 + $0x6b8] sm:$0xff] }
 0x2d2   :  { %3444 = vmatpush2.bf16.msra.mxu1 %v9187_v56  ;;  %v1244_v15 = vld [vmem:[#allocation11 + $0x258] sm:$0xff]  ;;  %v9284_v45 = vcombine.high %v1380_v38, %v1384_v46  ;;  %v9283_v60 = vcombine.low %v1380_v38, %v1384_v46 }
 0x2d3   :  { %3445 = vmatprep.subr.bf16.mxu1 %v9180_v10  ;;  %v1248_v56 = vld [vmem:[#allocation11 + $0x278] sm:$0xff] }
 0x2d4   :  { %3557 = vmatpush2.bf16.msra.mxu0 %v9315_v13  ;;  %v1372_v10 = vld [vmem:[#allocation11 + $0x658] sm:$0xff]  ;;  %v9148_v44 = vcombine.high %v1244_v15, %v1248_v56  ;;  %v9147_v12 = vcombine.low %v1244_v15, %v1248_v56 }
 0x2d5   :  { %3282 = vmatmul.mubr.bf16.gmra.mxu1 %v11834_v37  ;;  %3558 = vmatprep.subr.bf16.mxu0 %v9308_v57  ;;  %v1376_v13 = vld [vmem:[#allocation11 + $0x678] sm:$0xff] }
 0x2d6   :  { %3446 = vmatpush2.bf16.msra.mxu1 %v9179_v4  ;;  %3291 = vmatprep.mubr.bf16.mxu1 %v11870_v58  ;;  %v1236_v57 = vld [vmem:[#allocation11 + $0x218] sm:$0xff]  ;;  %v9276_v0 = vcombine.high %v1372_v10, %v1376_v13  ;;  %v9275_v42 = vcombine.low %v1372_v10, %v1376_v13 }
 0x2d7   :  { %3395 = vmatmul.mubr.bf16.gmra.mxu0 %v11836_v25  ;;  %3447 = vmatprep.subr.bf16.mxu1 %v9172_v2  ;;  %v1240_v4 = vld [vmem:[#allocation11 + $0x238] sm:$0xff] }
 0x2d8   :  { %3404 = vmatprep.mubr.bf16.mxu0 %v11872_v61  ;;  %3559 = vmatpush2.bf16.msra.mxu0 %v9307_v3  ;;  %v1364_v2 = vld [vmem:[#allocation11 + $0x618] sm:$0xff]  ;;  %v9140_v34 = vcombine.high %v1236_v57, %v1240_v4 }
 0x2d9   :  { %3560 = vmatprep.subr.bf16.mxu0 %v9300_v40  ;;  %v1368_v3 = vld [vmem:[#allocation11 + $0x638] sm:$0xff] }
 0x2da   :  { %3448 = vmatpush2.bf16.msra.mxu1 %v9171_v48  ;;  %v9268_v40 = vcombine.high %v1364_v2, %v1368_v3  ;;  %v9139_v48 = vcombine.low %v1236_v57, %v1240_v4  ;;  %v9267_v5 = vcombine.low %v1364_v2, %v1368_v3  ;;  %v10317_v8 = vld [vmem:[#allocation14 + $0x154] ss:$28 sps:$4 sm:$0xff]   ;;  %v10324_v3 = vld [vmem:[#allocation14 + $0xa8] ss:$28 sps:$4 sm:$0xff]  }
 0x2db   :  { %3449 = vmatprep.subr.bf16.mxu1 %v9164_v1  ;;  %v10329_v1 = vld [vmem:[#allocation14 + $0x50c] ss:$28 sps:$4 sm:$0xff]   ;;  %v10318_v56 = vld [vmem:[#allocation14 + $0x118] ss:$28 sps:$4 sm:$0xff]  }
 0x2dc   :  { %3561 = vmatpush2.bf16.msra.mxu0 %v9299_v59  ;;  %v10312_v59 = vld [vmem:[#allocation14 + $0x188] ss:$28 sps:$4 sm:$0xff]   ;;  %v10339_v10 = vld [vmem:[#allocation14 + $0x498] ss:$28 sps:$4 sm:$0xff]  }
 0x2dd   :  { %3292 = vmatmul.mubr.bf16.gmra.mxu1 %v11878_v62  ;;  %3562 = vmatprep.subr.bf16.mxu0 %v9292_v50 }
 0x2de   :  { %3450 = vmatpush2.bf16.msra.mxu1 %v9163_v9  ;;  %3301 = vmatprep.mubr.bf16.mxu1 %v11898_v53  ;;  %v10335_v9 = vld [vmem:[#allocation14 + $0x4d4] ss:$28 sps:$4 sm:$0xff]  }
 0x2df   :  { %3405 = vmatmul.mubr.bf16.gmra.mxu0 %v11880_v30  ;;  %3451 = vmatprep.subr.bf16.mxu1 %v9156_v41  ;;  %v10320_v41 = vld [vmem:[#allocation14 + $0x11c] ss:$28 sps:$4 sm:$0xff]  }
 0x2e0   :  { %3414 = vmatprep.mubr.bf16.mxu0 %v11900_v6  ;;  %3563 = vmatpush2.bf16.msra.mxu0 %v9291_v49  ;;  %v10333_v49 = vld [vmem:[#allocation14 + $0x4d0] ss:$28 sps:$4 sm:$0xff]  }
 0x2e1   :  { %3564 = vmatprep.subr.bf16.mxu0 %v9284_v45 }
 0x2e2   :  { %3452 = vmatpush2.bf16.msra.mxu1 %v9155_v31  ;;  %v10323_v31 = vld [vmem:[#allocation14 + $0xe4] ss:$28 sps:$4 sm:$0xff]  }
 0x2e3   :  { %3453 = vmatprep.subr.bf16.mxu1 %v9148_v44  ;;  %v10347_v44 = vld [vmem:[#allocation14 + $0x464] ss:$28 sps:$4 sm:$0xff]  }
 0x2e4   :  { %3565 = vmatpush2.bf16.msra.mxu0 %v9283_v60  ;;  %v10321_v60 = vld [vmem:[#allocation14 + $0xe0] ss:$28 sps:$4 sm:$0xff]  }
 0x2e5   :  { %3302 = vmatmul.mubr.bf16.gmra.mxu1 %v11902_v7  ;;  %3566 = vmatprep.subr.bf16.mxu0 %v9276_v0  ;;  %v10326_v0 = vld [vmem:[#allocation14 + $0xac] ss:$28 sps:$4 sm:$0xff]  }
 0x2e6   :  { %3454 = vmatpush2.bf16.msra.mxu1 %v9147_v12  ;;  %3457 = vmatprep.mubr.bf16.mxu1 %v11600_v32  ;;  %v10345_v12 = vld [vmem:[#allocation14 + $0x460] ss:$28 sps:$4 sm:$0xff]  }
 0x2e7   :  { %3415 = vmatmul.mubr.bf16.gmra.mxu0 %v11904_v11  ;;  %3455 = vmatprep.subr.bf16.mxu1 %v9140_v34 }
 0x2e8   :  { %3567 = vmatpush2.bf16.msra.mxu0 %v9275_v42  ;;  %3570 = vmatprep.mubr.bf16.mxu0 %v11602_v33  ;;  %v10315_v33 = vld [vmem:[#allocation14 + $0x150] ss:$28 sps:$4 sm:$0xff]  }
 0x2e9   :  { %3568 = vmatprep.subr.bf16.mxu0 %v9268_v40  ;;  %v10332_v42 = vld [vmem:[#allocation14 + $0x74] ss:$28 sps:$4 sm:$0xff]   ;;  %v10351_v40 = vld [vmem:[#allocation14 + $0x428] ss:$28 sps:$4 sm:$0xff]  }
 0x2ea   :  { %3456 = vmatpush2.bf16.msra.mxu1 %v9139_v48 }
 0x2eb   :  { %6696 = vmatprep.subr.bf16.mxu1 %v10314_v63  ;;  %v10359_v63 = vld [vmem:[#allocation14 + $0x3f4] ss:$28 sps:$4 sm:$0xff]  }
 0x2ec   :  { %3569 = vmatpush2.bf16.msra.mxu0 %v9267_v5  ;;  %v10330_v5 = vld [vmem:[#allocation14 + $0x70] ss:$28 sps:$4 sm:$0xff]  }
 0x2ed   :  { %v11976_v50 = vpop.f32.mrf.mxu1  ;;  %v11978_v32 = vpop.f32.mrf.mxu0  ;;  %3458 = vmatmul.mubr.bf16.vlgmr.msra.gmra.mxu1 %v11606_v35  ;;  %6809 = vmatprep.subr.bf16.mxu0 %v10329_v1 }
 0x2ee   :  { %3467 = vmatprep.mubr.bf16.mxu1 %v11650_v23  ;;  %6697 = vmatpush1.bf16.msra.mxu1 %v10312_v59  ;;  %v10341_v23 = vld [vmem:[#allocation14 + $0x49c] ss:$28 sps:$4 sm:$0xff]  }
 0x2ef   :  { %3571 = vmatmul.mubr.bf16.vlgmr.msra.gmra.mxu0 %v11608_v36  ;;  %v11983_v38 = vpop.f32.mrf.mxu1  ;;  %v11985_v46 = vpop.f32.mrf.mxu0  ;;  %6698 = vmatprep.subr.bf16.mxu1 %v10317_v8  ;;  %v10338_v8 = vld [vmem:[#allocation14 + $0x3c] ss:$28 sps:$4 sm:$0xff]  }
 0x2f0   :  { %3580 = vmatprep.mubr.bf16.mxu0 %v11652_v24  ;;  %6810 = vmatpush1.bf16.msra.mxu0 %v10327_v47  ;;  %v10357_v47 = vld [vmem:[#allocation14 + $0x3f0] ss:$28 sps:$4 sm:$0xff]  }
 0x2f1   :  { %v11988_v15 = vpop.f32.mrf.mxu1  ;;  %v11990_v35 = vpop.f32.mrf.mxu0  ;;  %6811 = vmatprep.subr.bf16.mxu0 %v10335_v9 }
 0x2f2   :  { %6699 = vmatpush1.bf16.msra.mxu1 %v10315_v33  ;;  %v10336_v33 = vld [vmem:[#allocation14 + $0x38] ss:$28 sps:$4 sm:$0xff]  }
 0x2f3   :  { %v11992_v45 = vpop.f32.mrf.mxu1  ;;  %v11994_v36 = vpop.f32.mrf.mxu0  ;;  %6700 = vmatprep.subr.bf16.mxu1 %v10320_v41 }
 0x2f4   :  { %6812 = vmatpush1.bf16.msra.mxu0 %v10333_v49  ;;  %v10344_v49 = vld [vmem:[#allocation14 + $0x4] ss:$28 sps:$4 sm:$0xff]  }
 0x2f5   :  { %v11996_v13 = vpop.f32.mrf.mxu1  ;;  %v11998_v24 = vpop.f32.mrf.mxu0  ;;  %3468 = vmatmul.mubr.bf16.gmra.mxu1 %v11658_v26  ;;  %6813 = vmatprep.subr.bf16.mxu0 %v10341_v23  ;;  %v10363_v23 = vld [vmem:[#allocation14 + $0x3b8] ss:$28 sps:$4 sm:$0xff]  }
 0x2f6   :  { %3477 = vmatprep.mubr.bf16.mxu1 %v11694_v16  ;;  %6701 = vmatpush1.bf16.msra.mxu1 %v10318_v56  ;;  %v10353_v16 = vld [vmem:[#allocation14 + $0x42c] ss:$28 sps:$4 sm:$0xff]  }
 0x2f7   :  { %3581 = vmatmul.mubr.bf16.gmra.mxu0 %v11660_v27  ;;  %v12003_v57 = vpop.f32.mrf.mxu1  ;;  %v12005_v4 = vpop.f32.mrf.mxu0  ;;  %6702 = vmatprep.subr.bf16.mxu1 %v10323_v31  ;;  %v10371_v31 = vld [vmem:[#allocation14 + $0x384] ss:$28 sps:$4 sm:$0xff]  }
 0x2f8   :  { %3590 = vmatprep.mubr.bf16.mxu0 %v11696_v17  ;;  %6814 = vmatpush1.bf16.msra.mxu0 %v10339_v10  ;;  %v10342_v10 = vld [vmem:[#allocation14] ss:$28 sps:$4 sm:$0xff]  }
 0x2f9   :  { %v12008_v2 = vpop.f32.mrf.mxu1  ;;  %v12010_v26 = vpop.f32.mrf.mxu0  ;;  %6815 = vmatprep.subr.bf16.mxu0 %v10347_v44 }
 0x2fa   :  { %6703 = vmatpush1.bf16.msra.mxu1 %v10321_v60 }
 0x2fb   :  { %v12012_v34 = vpop.f32.mrf.mxu1  ;;  %v12014_v27 = vpop.f32.mrf.mxu0  ;;  %6704 = vmatprep.subr.bf16.mxu1 %v10326_v0  ;;  %v10350_v0 = vld [vmem:[#allocation14 + $0x34c] ss:$28 sps:$4 sm:$0xff]  }
 0x2fc   :  { %6816 = vmatpush1.bf16.msra.mxu0 %v10345_v12  ;;  %v10369_v12 = vld [vmem:[#allocation14 + $0x380] ss:$28 sps:$4 sm:$0xff]  }
 0x2fd   :  { %v12016_v48 = vpop.f32.mrf.mxu1  ;;  %v12018_v17 = vpop.f32.mrf.mxu0  ;;  %3478 = vmatmul.mubr.bf16.gmra.mxu1 %v11702_v20  ;;  %6817 = vmatprep.subr.bf16.mxu0 %v10353_v16 }
 0x2fe   :  { %3487 = vmatprep.mubr.bf16.mxu1 %v11738_v55  ;;  %6705 = vmatpush1.bf16.msra.mxu1 %v10324_v3  ;;  %v10365_v55 = vld [vmem:[#allocation14 + $0x3bc] ss:$28 sps:$4 sm:$0xff]   ;;  %v10348_v3 = vld [vmem:[#allocation14 + $0x348] ss:$28 sps:$4 sm:$0xff]  }
 0x2ff   :  { %3591 = vmatmul.mubr.bf16.gmra.mxu0 %v11704_v21  ;;  %v12023_v1 = vpop.f32.mrf.mxu1  ;;  %v12025_v59 = vpop.f32.mrf.mxu0  ;;  %6706 = vmatprep.subr.bf16.mxu1 %v10332_v42 }
 0x300   :  { %3600 = vmatprep.mubr.bf16.mxu0 %v11740_v14  ;;  %6818 = vmatpush1.bf16.msra.mxu0 %v10351_v40  ;;  %v10356_v40 = vld [vmem:[#allocation14 + $0x314] ss:$28 sps:$4 sm:$0xff]  }
 0x301   :  { %v12028_v9 = vpop.f32.mrf.mxu1  ;;  %v12030_v20 = vpop.f32.mrf.mxu0  ;;  %6819 = vmatprep.subr.bf16.mxu0 %v10359_v63  ;;  %v10375_v63 = vld [vmem:[#allocation14 + $0x6c8] ss:$28 sps:$4 sm:$0xff]  }
 0x302   :  { %6707 = vmatpush1.bf16.msra.mxu1 %v10330_v5 }
 0x303   :  { %v12032_v41 = vpop.f32.mrf.mxu1  ;;  %v12034_v21 = vpop.f32.mrf.mxu0  ;;  %6708 = vmatprep.subr.bf16.mxu1 %v10338_v8  ;;  %v10383_v8 = vld [vmem:[#allocation14 + $0x694] ss:$28 sps:$4 sm:$0xff]  }
 0x304   :  { %6820 = vmatpush1.bf16.msra.mxu0 %v10357_v47  ;;  %v10354_v47 = vld [vmem:[#allocation14 + $0x310] ss:$28 sps:$4 sm:$0xff]  }
 0x305   :  { %v12036_v56 = vpop.f32.mrf.mxu1  ;;  %v12038_v14 = vpop.f32.mrf.mxu0  ;;  %3488 = vmatmul.mubr.bf16.gmra.mxu1 %v11746_v22  ;;  %6821 = vmatprep.subr.bf16.mxu0 %v10365_v55 }
 0x306   :  { %3497 = vmatprep.mubr.bf16.mxu1 %v11782_v54  ;;  %6709 = vmatpush1.bf16.msra.mxu1 %v10336_v33  ;;  %v10377_v54 = vld [vmem:[#allocation14 + $0x6cc] ss:$28 sps:$4 sm:$0xff]  }
 0x307   :  { %3601 = vmatmul.mubr.bf16.gmra.mxu0 %v11748_v19  ;;  %v12043_v44 = vpop.f32.mrf.mxu1  ;;  %v12045_v60 = vpop.f32.mrf.mxu0  ;;  %6710 = vmatprep.subr.bf16.mxu1 %v10344_v49  ;;  %v10362_v49 = vld [vmem:[#allocation14 + $0x2dc] ss:$28 sps:$4 sm:$0xff]  }
 0x308   :  { %3610 = vmatprep.mubr.bf16.mxu0 %v11784_v28  ;;  %6822 = vmatpush1.bf16.msra.mxu0 %v10363_v23  ;;  %v10381_v23 = vld [vmem:[#allocation14 + $0x690] ss:$28 sps:$4 sm:$0xff]  }
 0x309   :  { %v12048_v16 = vpop.f32.mrf.mxu1  ;;  %v12050_v22 = vpop.f32.mrf.mxu0  ;;  %6823 = vmatprep.subr.bf16.mxu0 %v10371_v31 }
 0x30a   :  { %6711 = vmatpush1.bf16.msra.mxu1 %v10342_v10  ;;  %v10360_v10 = vld [vmem:[#allocation14 + $0x2d8] ss:$28 sps:$4 sm:$0xff]  }
 0x30b   :  { %v12052_v42 = vpop.f32.mrf.mxu1  ;;  %v12054_v19 = vpop.f32.mrf.mxu0  ;;  %6712 = vmatprep.subr.bf16.mxu1 %v10350_v0 }
 0x30c   :  { %6824 = vmatpush1.bf16.msra.mxu0 %v10369_v12  ;;  %v10368_v12 = vld [vmem:[#allocation14 + $0x2a4] ss:$28 sps:$4 sm:$0xff]  }
 0x30d   :  { %v12056_v5 = vpop.f32.mrf.mxu1  ;;  %v12058_v28 = vpop.f32.mrf.mxu0  ;;  %3498 = vmatmul.mubr.bf16.gmra.mxu1 %v11790_v29  ;;  %6825 = vmatprep.subr.bf16.mxu0 %v10377_v54  ;;  %v10387_v54 = vld [vmem:[#allocation14 + $0x658] ss:$28 sps:$4 sm:$0xff]  }
 0x30e   :  { %3507 = vmatprep.mubr.bf16.mxu1 %v11826_v43  ;;  %6713 = vmatpush2.bf16.msra.mxu1 %v10348_v3  ;;  %v10389_v43 = vld [vmem:[#allocation14 + $0x65c] ss:$28 sps:$4 sm:$0xff]  }
 0x30f   :  { %3611 = vmatmul.mubr.bf16.gmra.mxu0 %v11792_v18  ;;  %v12063_v55 = vpop.f32.mrf.mxu1  ;;  %v12065_v33 = vpop.f32.mrf.mxu0  ;;  %6714 = vmatprep.subr.bf16.mxu1 %v10356_v40  ;;  %v12076_v3 = vld [vmem:[#allocation13] sm:$0xff] }
 0x310   :  { %3620 = vmatprep.mubr.bf16.mxu0 %v11828_v39  ;;  %6826 = vmatpush2.bf16.msra.mxu0 %v10375_v63  ;;  %v10395_v63 = vld [vmem:[#allocation14 + $0x624] ss:$28 sps:$4 sm:$0xff]  }
 0x311   :  { %v12068_v31 = vpop.f32.mrf.mxu1  ;;  %v12070_v29 = vpop.f32.mrf.mxu0  ;;  %6827 = vmatprep.subr.bf16.mxu0 %v10383_v8  ;;  %v12085_v8 = vrot.slane %v12076_v3, %v11510_v52 }
 0x312   :  { %6715 = vmatpush2.bf16.msra.mxu1 %v10354_v47  ;;  %v10366_v47 = vld [vmem:[#allocation14 + $0x2a0] ss:$28 sps:$4 sm:$0xff]  }
 0x313   :  { %v12072_v0 = vpop.f32.mrf.mxu1  ;;  %v12074_v18 = vpop.f32.mrf.mxu0  ;;  %6716 = vmatprep.subr.bf16.mxu1 %v10362_v49 }
 0x314   :  { %6828 = vmatpush2.bf16.msra.mxu0 %v10381_v23 }
 0x315   :  { %v12078_v39 = vpop.f32.mrf.mxu1  ;;  %v12080_v40 = vpop.f32.mrf.mxu0  ;;  %3508 = vmatmul.mubr.bf16.gmra.mxu1 %v11834_v37  ;;  %6829 = vmatprep.subr.bf16.mxu0 %v10389_v43  ;;  %v2788_v37 = vadd.f32 %v11992_v45, %v12085_v8  ;;  %v10393_v43 = vld [vmem:[#allocation14 + $0x620] ss:$28 sps:$4 sm:$0xff]   ;;  %v10380_v45 = vld [vmem:[#allocation14 + $0x234] ss:$28 sps:$4 sm:$0xff]  }
 0x316   :  { %14098 = vst [vmem:[#allocation29_spill] sm:$0xff] %v12078_v39  ;;  %14099 = vst [vmem:[#allocation30_spill] sm:$0xff] %v12080_v40  ;;  %3517 = vmatprep.mubr.bf16.mxu1 %v11870_v58  ;;  %6717 = vmatpush2.bf16.msra.mxu1 %v10360_v10  ;;  %v10374_v40 = vld [vmem:[#allocation14 + $0x26c] ss:$28 sps:$4 sm:$0xff]  }
 0x317   :  { %3621 = vmatmul.mubr.bf16.gmra.mxu0 %v11836_v25  ;;  %v12089_v49 = vpop.f32.mrf.mxu1  ;;  %v12091_v23 = vpop.f32.mrf.mxu0  ;;  %6718 = vmatprep.subr.bf16.mxu1 %v10368_v12  ;;  %v10398_v10 = vld [vmem:[#allocation14 + $0x5ec] ss:$28 sps:$4 sm:$0xff]   ;;  %v2784_v25 = vadd.f32 %v11983_v38, %v12085_v8  ;;  %v10401_v38 = vld [vmem:[#allocation14 + $0x5b4] ss:$28 sps:$4 sm:$0xff]  }
 0x318   :  { %14100 = vst [vmem:[#allocation31_spill] sm:$0xff] %v12091_v23  ;;  %3630 = vmatprep.mubr.bf16.mxu0 %v11872_v61  ;;  %6830 = vmatpush2.bf16.msra.mxu0 %v10387_v54  ;;  %v10372_v39 = vld [vmem:[#allocation14 + $0x268] ss:$28 sps:$4 sm:$0xff]   ;;  %v2901_v61 = vadd.f32 %v11994_v36, %v2788_v37  ;;  %v10378_v36 = vld [vmem:[#allocation14 + $0x230] ss:$28 sps:$4 sm:$0xff]  }
 0x319   :  { %v12096_v52 = vpop.f32.mrf.mxu1  ;;  %v12098_v58 = vpop.f32.mrf.mxu0  ;;  %6831 = vmatprep.subr.bf16.mxu0 %v10395_v63  ;;  %v10396_v54 = vld [vmem:[#allocation14 + $0x5e8] ss:$28 sps:$4 sm:$0xff]  }
 0x31a   :  { %14101 = vst [vmem:[#allocation32_spill] sm:$0xff] %v12096_v52  ;;  %14102 = vst [vmem:[#allocation33_spill] sm:$0xff] %v12098_v58  ;;  %6719 = vmatpush2.bf16.msra.mxu1 %v10366_v47  ;;  %v12109_v58 = vrot.slane %v12076_v3, %v11507_v51  ;;  %v2897_v47 = vadd.f32 %v11985_v46, %v2784_v25  ;;  %v10386_v51 = vld [vmem:[#allocation14 + $0x1fc] ss:$28 sps:$4 sm:$0xff]  }
 0x31b   :  { %v12102_v12 = vpop.f32.mrf.mxu1  ;;  %v12104_v23 = vpop.f32.mrf.mxu0  ;;  %6720 = vmatprep.subr.bf16.mxu1 %v10374_v40 }
 0x31c   :  { %6832 = vmatpush2.bf16.msra.mxu0 %v10393_v43  ;;  %v2786_v40 = vadd.f32 %v11988_v15, %v12109_v58  ;;  %v2782_v46 = vadd.f32 %v11976_v50, %v12109_v58  ;;  %v3652_v25 = vmax.f32 %v2897_v47, 0.0  ;;  %v10392_v50 = vld [vmem:[#allocation14 + $0x1c4] ss:$28 sps:$4 sm:$0xff]  }
 0x31d   :  { %v12111_v63 = vpop.f32.mrf.mxu1  ;;  %v12113_v52 = vpop.f32.mrf.mxu0  ;;  %3518 = vmatmul.mubr.bf16.gmra.mxu1 %v11878_v62  ;;  %6833 = vmatprep.subr.bf16.mxu0 %v10398_v10  ;;  %v3660_v62 = vmax.f32 %v2901_v61, 0.0  ;;  %v2798_v10 = vadd.f32 %v12012_v34, %v12085_v8  ;;  %v10384_v61 = vld [vmem:[#allocation14 + $0x1f8] ss:$28 sps:$4 sm:$0xff]  }
 0x31e   :  { %14103 = vst [vmem:[#allocation34_spill] sm:$0xff] %v12113_v52  ;;  %3527 = vmatprep.mubr.bf16.mxu1 %v11898_v53  ;;  %6721 = vmatpush2.bf16.msra.mxu1 %v10372_v39  ;;  %v10399_v53 = vld [vmem:[#allocation14 + $0x5b0] ss:$28 sps:$4 sm:$0xff]   ;;  %v10404_v39 = vld [vmem:[#allocation14 + $0x57c] ss:$28 sps:$4 sm:$0xff]   ;;  %v2899_v34 = vadd.f32 %v11990_v35, %v2786_v40  ;;  %v2895_v47 = vadd.f32 %v11978_v32, %v2782_v46 }
 0x31f   :  { %3631 = vmatmul.mubr.bf16.gmra.mxu0 %v11880_v30  ;;  %v12121_v37 = vpop.f32.mrf.mxu1  ;;  %v12123_v43 = vpop.f32.mrf.mxu0  ;;  %6722 = vmatprep.subr.bf16.mxu1 %v10380_v45  ;;  %v2794_v45 = vadd.f32 %v12003_v57, %v12085_v8  ;;  %v12141_v52 = vpack.c.bf16 %v3660_v62, %v3652_v25  ;;  %v10407_v35 = vld [vmem:[#allocation14 + $0x544] ss:$28 sps:$4 sm:$0xff]  }
 0x320   :  { %3640 = vmatprep.mubr.bf16.mxu0 %v11900_v6  ;;  %6834 = vmatpush2.bf16.msra.mxu0 %v10396_v54  ;;  %v3659_v40 = vmax.f32 %v2899_v34, 0.0  ;;  %v3651_v46 = vmax.f32 %v2895_v47, 0.0 }
 0x321   :  { %v12130_v15 = vpop.f32.mrf.mxu1  ;;  %v12132_v30 = vpop.f32.mrf.mxu0  ;;  %6835 = vmatprep.subr.bf16.mxu0 %v10401_v38  ;;  %14106 = vst [vmem:[#allocation37_spill] sm:$0xff] %v12141_v52  ;;  %v10402_v38 = vld [vmem:[#allocation14 + $0x578] ss:$28 sps:$4 sm:$0xff]  }
 0x322   :  { %14104 = vst [vmem:[#allocation35_spill] sm:$0xff] %v12130_v15  ;;  %14105 = vst [vmem:[#allocation36_spill] sm:$0xff] %v12132_v30  ;;  %6723 = vmatpush2.bf16.msra.mxu1 %v10378_v36  ;;  %v2911_v30 = vadd.f32 %v12014_v27, %v2798_v10  ;;  %v2907_v36 = vadd.f32 %v12005_v4, %v2794_v45  ;;  %v2796_v27 = vadd.f32 %v12008_v2, %v12109_v58 }
 0x323   :  { %v12137_v6 = vpop.f32.mrf.mxu1  ;;  %v12139_v54 = vpop.f32.mrf.mxu0  ;;  %6724 = vmatprep.subr.bf16.mxu1 %v10386_v51  ;;  %v10390_v51 = vld [vmem:[#allocation14 + $0x1c0] ss:$28 sps:$4 sm:$0xff]   ;;  %v2808_v4 = vadd.f32 %v12032_v41, %v12085_v8  ;;  %v12169_v34 = vpack.c.bf16 %v3659_v40, %v3651_v46 }
 0x324   :  { %6836 = vmatpush2.bf16.msra.mxu0 %v10399_v53  ;;  %v3676_v10 = vmax.f32 %v2911_v30, 0.0  ;;  %v10405_v53 = vld [vmem:[#allocation14 + $0x540] ss:$28 sps:$4 sm:$0xff]   ;;  %v3668_v45 = vmax.f32 %v2907_v36, 0.0  ;;  %v10408_v30 = vld [vmem:[#allocation14 + $0x888] ss:$28 sps:$4 sm:$0xff]   ;;  %v2909_v41 = vadd.f32 %v12010_v26, %v2796_v27  ;;  %v2802_v27 = vadd.f32 %v12016_v48, %v12109_v58 }
 0x325   :  { %v12145_v15 = vpop.f32.mrf.mxu1  ;;  %v12147_v57 = vpop.f32.mrf.mxu0  ;;  %3528 = vmatmul.mubr.bf16.gmra.mxu1 %v11902_v7  ;;  %6837 = vmatprep.subr.bf16.mxu0 %v10404_v39  ;;  %v10410_v7 = vld [vmem:[#allocation14 + $0x88c] ss:$28 sps:$4 sm:$0xff]   ;;  %v2792_v39 = vadd.f32 %v11996_v13, %v12109_v58  ;;  %14107 = vst [vmem:[#allocation38_spill] sm:$0xff] %v12169_v34  ;;  %v10413_v13 = vld [vmem:[#allocation14 + $0x854] ss:$28 sps:$4 sm:$0xff]   ;;  %v14109_v36 = vld [vmem:[#allocation27_spill] sm:$0xff] }
 0x326   :  { %6725 = vmatpush2.bf16.msra.mxu1 %v10384_v61  ;;  %6728 = vmatprep.mubr.bf16.mxu1 %v12141_v52  ;;  %v2804_v61 = vadd.f32 %v12023_v1, %v12085_v8  ;;  %v12176_v47 = vpack.c.bf16 %v3676_v10, %v3668_v45  ;;  %v12181_v52 = vrot.slane %v12076_v3, %v14109_v36  ;;  %v10411_v10 = vld [vmem:[#allocation14 + $0x850] ss:$28 sps:$4 sm:$0xff]  }
 0x327   :  { %3641 = vmatmul.mubr.bf16.gmra.mxu0 %v11904_v11  ;;  %v12155_v32 = vpop.f32.mrf.mxu1  ;;  %v12157_v62 = vpop.f32.mrf.mxu0  ;;  %6726 = vmatprep.subr.bf16.mxu1 %v10392_v50  ;;  %v10458_v11 = vld [vmem:[#allocation14 + $0xc0c] ss:$28 sps:$4 sm:$0xff]   ;;  %v2905_v1 = vadd.f32 %v11998_v24, %v2792_v39  ;;  %v2806_v24 = vadd.f32 %v12028_v9, %v12109_v58  ;;  %v10416_v39 = vld [vmem:[#allocation14 + $0x81c] ss:$28 sps:$4 sm:$0xff]   ;;  %v2915_v36 = vadd.f32 %v12018_v17, %v2802_v27 }
 0x328   :  { %6838 = vmatpush2.bf16.msra.mxu0 %v10402_v38  ;;  %14108 = vst [vmem:[#allocation39_spill] sm:$0xff] %v12176_v47 }
 0x329   :  { %v12163_v25 = vpop.f32.mrf.mxu1  ;;  %v12165_v2 = vpop.f32.mrf.mxu0  ;;  %6839 = vmatprep.subr.bf16.mxu0 %v10407_v35  ;;  %v2921_v35 = vadd.f32 %v12034_v21, %v2808_v4  ;;  %v2917_v21 = vadd.f32 %v12025_v59, %v2804_v61  ;;  %v3675_v4 = vmax.f32 %v2909_v41, 0.0  ;;  %v3667_v59 = vmax.f32 %v2905_v1, 0.0 }
 0x32a   :  { %6727 = vmatpush2.bf16.msra.mxu1 %v10390_v51  ;;  %v14110_v51 = vld [vmem:[#allocation28_spill] sm:$0xff]  ;;  %v2814_v61 = vadd.f32 %v12043_v44, %v12085_v8  ;;  %v2816_v1 = vadd.f32 %v12048_v16, %v12109_v58  ;;  %v3683_v16 = vmax.f32 %v2915_v36, 0.0  ;;  %v2824_v36 = vadd.f32 %v12063_v55, %v12085_v8 }
 0x32b   :  { %v12172_v50 = vpop.f32.mrf.mxu1  ;;  %v12174_v38 = vpop.f32.mrf.mxu0  ;;  %6922 = vmatprep.subr.bf16.mxu1 %v10410_v7  ;;  %v12186_v26 = vrot.slane %v12076_v3, %v14110_v51  ;;  %v3684_v9 = vmax.f32 %v2917_v21, 0.0  ;;  %v10420_v55 = vld [vmem:[#allocation14 + $0x7a8] ss:$28 sps:$4 sm:$0xff]  }
 0x32c   :  { %6840 = vmatpush2.bf16.msra.mxu0 %v10405_v53  ;;  %v2818_v53 = vadd.f32 %v12052_v42, %v12085_v8 }
 0x32d   :  { %v3007_v40 = vpop.f32.mrf.mxu1  ;;  %6729 = vmatmul.mubr.bf16.vlgmr.msra.gmra.mxu1 %v12169_v34  ;;  %7035 = vmatprep.subr.bf16.mxu0 %v10458_v11  ;;  %v3692_v11 = vmax.f32 %v2921_v35, 0.0  ;;  %v2919_v35 = vadd.f32 %v12030_v20, %v2806_v24  ;;  %v2927_v20 = vadd.f32 %v12045_v60, %v2814_v61 }
 0x32e   :  { %v3120_v7 = vpop.f32.mrf.mxu0  ;;  %6738 = vmatprep.mubr.bf16.mxu1 %v12176_v47  ;;  %6923 = vmatpush1.bf16.msra.mxu1 %v10408_v30  ;;  %v3008_v30 = vadd.f32 %v3007_v40, %v12186_v26  ;;  %v12203_v47 = vpack.c.bf16 %v3675_v4, %v3667_v59  ;;  %v2931_v44 = vadd.f32 %v12054_v19, %v2818_v53  ;;  %v10419_v40 = vld [vmem:[#allocation14 + $0x7e4] ss:$28 sps:$4 sm:$0xff]  }
 0x32f   :  { %v3009_v46 = vpop.f32.mrf.mxu1  ;;  %6924 = vmatprep.subr.bf16.mxu1 %v10413_v13  ;;  %v10414_v13 = vld [vmem:[#allocation14 + $0x818] ss:$28 sps:$4 sm:$0xff]   ;;  %v12209_v34 = vpack.c.bf16 %v3692_v11, %v3684_v9  ;;  %v2812_v4 = vadd.f32 %v12036_v56, %v12109_v58  ;;  %v2828_v19 = vadd.f32 %v12072_v0, %v12085_v8  ;;  %v3691_v11 = vmax.f32 %v2919_v35, 0.0 }
 0x330   :  { %v3010_v48 = vadd.f32 %v3009_v46, %v12181_v52  ;;  %v3122_v45 = vpop.f32.mrf.mxu0  ;;  %14111 = vst [vmem:[#allocation40_spill] sm:$0xff] %v12203_v47  ;;  %v3121_v24 = vadd.f32 %v3120_v7, %v3008_v30  ;;  %v3708_v56 = vmax.f32 %v2931_v44, 0.0  ;;  %v10422_v7 = vld [vmem:[#allocation14 + $0x7ac] ss:$28 sps:$4 sm:$0xff]  }
 0x331   :  { %v3011_v41 = vpop.f32.mrf.mxu1  ;;  %14112 = vst [vmem:[#allocation41_spill] sm:$0xff] %v12209_v34  ;;  %v2925_v9 = vadd.f32 %v12038_v14, %v2812_v4  ;;  %v10425_v4 = vld [vmem:[#allocation14 + $0x774] ss:$28 sps:$4 sm:$0xff]  }
 0x332   :  { %v3012_v51 = vadd.f32 %v3011_v41, %v12186_v26  ;;  %v3124_v42 = vpop.f32.mrf.mxu0  ;;  %6925 = vmatpush1.bf16.msra.mxu1 %v10411_v10  ;;  %v3123_v17 = vadd.f32 %v3122_v45, %v3010_v48  ;;  %v2929_v48 = vadd.f32 %v12050_v22, %v2816_v1  ;;  %v2941_v1 = vadd.f32 %v12074_v18, %v2828_v19 }
 0x333   :  { %v3013_v46 = vpop.f32.mrf.mxu1  ;;  %6926 = vmatprep.subr.bf16.mxu1 %v10416_v39  ;;  %v2937_v18 = vadd.f32 %v12065_v33, %v2824_v36  ;;  %v2826_v33 = vadd.f32 %v12068_v31, %v12109_v58  ;;  %v10423_v36 = vld [vmem:[#allocation14 + $0x770] ss:$28 sps:$4 sm:$0xff]  }
 0x334   :  { %v3125_v27 = vadd.f32 %v3124_v42, %v3012_v51  ;;  %v3014_v21 = vadd.f32 %v3013_v46, %v12181_v52  ;;  %v3126_v10 = vpop.f32.mrf.mxu0  ;;  %v10417_v51 = vld [vmem:[#allocation14 + $0x7e0] ss:$28 sps:$4 sm:$0xff]   ;;  %v3654_v61 = vmax.f32 %v3123_v17, 0.0  ;;  %v3700_v42 = vmax.f32 %v2927_v20, 0.0  ;;  %v10456_v20 = vld [vmem:[#allocation14 + $0xc08] ss:$28 sps:$4 sm:$0xff]  }
 0x335   :  { %v3017_v59 = vpop.f32.mrf.mxu1  ;;  %6739 = vmatmul.mubr.bf16.gmra.mxu1 %v12203_v47  ;;  %v12229_v17 = vpack.c.bf16 %v3691_v11, %v3683_v16  ;;  %v10464_v16 = vld [vmem:[#allocation14 + $0xbd4] ss:$28 sps:$4 sm:$0xff]   ;;  %v2822_v11 = vadd.f32 %v12056_v5, %v12109_v58  ;;  %v2838_v5 = vadd.f32 %v12102_v12, %v12085_v8 }
 0x336   :  { %v3127_v53 = vadd.f32 %v3126_v10, %v3014_v21  ;;  %v3130_v39 = vpop.f32.mrf.mxu0  ;;  %6748 = vmatprep.mubr.bf16.mxu1 %v12209_v34  ;;  %6927 = vmatpush1.bf16.msra.mxu1 %v10414_v13  ;;  %v3661_v45 = vmax.f32 %v3125_v27, 0.0  ;;  %v3653_v13 = vmax.f32 %v3121_v24, 0.0  ;;  %v3018_v35 = vadd.f32 %v3017_v59, %v12186_v26 }
 0x337   :  { %v3019_v60 = vpop.f32.mrf.mxu1  ;;  %6928 = vmatprep.subr.bf16.mxu1 %v10419_v40  ;;  %14114 = vst [vmem:[#allocation43_spill] sm:$0xff] %v12229_v17  ;;  %v3707_v27 = vmax.f32 %v2929_v48, 0.0  ;;  %v12231_v21 = vpack.c.bf16 %v3708_v56, %v3700_v42 }
 0x338   :  { %v3662_v30 = vmax.f32 %v3127_v53, 0.0  ;;  %v3020_v0 = vadd.f32 %v3019_v60, %v12181_v52  ;;  %v3132_v41 = vpop.f32.mrf.mxu0  ;;  %v12233_v14 = vpack.c.bf16 %v3661_v45, %v3653_v13  ;;  %v3131_v48 = vadd.f32 %v3130_v39, %v3018_v35 }
 0x339   :  { %v3021_v22 = vpop.f32.mrf.mxu1  ;;  %14115 = vst [vmem:[#allocation44_spill] sm:$0xff] %v12231_v21  ;;  %v3724_v45 = vmax.f32 %v2941_v1, 0.0  ;;  %v2935_v1 = vadd.f32 %v12058_v28, %v2822_v11  ;;  %v14118_v28 = vld [vmem:[#allocation32_spill] sm:$0xff] }
 0x33a   :  { %v12226_v44 = vpack.c.bf16 %v3662_v30, %v3654_v61  ;;  %v3022_v46 = vadd.f32 %v3021_v22, %v12186_v26  ;;  %v3134_v40 = vpop.f32.mrf.mxu0  ;;  %6929 = vmatpush1.bf16.msra.mxu1 %v10417_v51  ;;  %v3133_v24 = vadd.f32 %v3132_v41, %v3020_v0  ;;  %v3699_v51 = vmax.f32 %v2925_v9, 0.0  ;;  %v10428_v0 = vld [vmem:[#allocation14 + $0x73c] ss:$28 sps:$4 sm:$0xff]   ;;  %v10462_v41 = vld [vmem:[#allocation14 + $0xbd0] ss:$28 sps:$4 sm:$0xff]  }
 0x33b   :  { %v3023_v10 = vpop.f32.mrf.mxu1  ;;  %6930 = vmatprep.subr.bf16.mxu1 %v10422_v7  ;;  %v3716_v9 = vmax.f32 %v2937_v18, 0.0  ;;  %v10470_v22 = vld [vmem:[#allocation14 + $0xb9c] ss:$28 sps:$4 sm:$0xff]   ;;  %v3669_v12 = vmax.f32 %v3131_v48, 0.0 }
 0x33c   :  { %14113 = vst [vmem:[#allocation42_spill] sm:$0xff] %v12226_v44  ;;  %v3135_v59 = vadd.f32 %v3134_v40, %v3022_v46  ;;  %v3024_v19 = vadd.f32 %v3023_v10, %v12181_v52  ;;  %v3136_v53 = vpop.f32.mrf.mxu0  ;;  %6841 = vmatprep.mubr.bf16.mxu0 %v12226_v44  ;;  %v12245_v61 = vpack.c.bf16 %v3707_v27, %v3699_v51  ;;  %v3670_v31 = vmax.f32 %v3133_v24, 0.0  ;;  %v10426_v24 = vld [vmem:[#allocation14 + $0x738] ss:$28 sps:$4 sm:$0xff]  }
 0x33d   :  { %v3027_v56 = vpop.f32.mrf.mxu1  ;;  %6749 = vmatmul.mubr.bf16.gmra.mxu1 %v12229_v17  ;;  %6842 = vmatmul.mubr.bf16.vlgmr.msra.gmra.mxu0 %v12233_v14  ;;  %v2834_v46 = vadd.f32 %v12089_v49, %v12085_v8  ;;  %v2939_v27 = vadd.f32 %v12070_v29, %v2826_v33  ;;  %v12255_v10 = vpack.c.bf16 %v3724_v45, %v3716_v9  ;;  %v10468_v29 = vld [vmem:[#allocation14 + $0xb98] ss:$28 sps:$4 sm:$0xff]   ;;  %v10476_v33 = vld [vmem:[#allocation14 + $0xb64] ss:$28 sps:$4 sm:$0xff]  }
 0x33e   :  { %v3137_v60 = vadd.f32 %v3136_v53, %v3024_v19  ;;  %v3140_v7 = vpop.f32.mrf.mxu0  ;;  %6758 = vmatprep.mubr.bf16.mxu1 %v12231_v21  ;;  %6931 = vmatpush1.bf16.msra.mxu1 %v10420_v55  ;;  %14116 = vst [vmem:[#allocation45_spill] sm:$0xff] %v12245_v61  ;;  %v3677_v39 = vmax.f32 %v3135_v59, 0.0  ;;  %v3028_v40 = vadd.f32 %v3027_v56, %v12186_v26  ;;  %v14119_v45 = vld [vmem:[#allocation31_spill] sm:$0xff] }
 0x33f   :  { %v3029_v30 = vpop.f32.mrf.mxu1  ;;  %6932 = vmatprep.subr.bf16.mxu1 %v10425_v4  ;;  %7036 = vmatpush1.bf16.msra.mxu0 %v10456_v20  ;;  %14117 = vst [vmem:[#allocation46_spill] sm:$0xff] %v12255_v10  ;;  %v2836_v59 = vadd.f32 %v14118_v28, %v12109_v58  ;;  %v2951_v49 = vadd.f32 %v12104_v23, %v2838_v5  ;;  %v3723_v5 = vmax.f32 %v2939_v27, 0.0  ;;  %v10429_v9 = vld [vmem:[#allocation14 + $0x700] ss:$28 sps:$4 sm:$0xff]  }
 0x340   :  { %v3678_v42 = vmax.f32 %v3137_v60, 0.0  ;;  %v3030_v13 = vadd.f32 %v3029_v30, %v12181_v52  ;;  %v3142_v35 = vpop.f32.mrf.mxu0  ;;  %7037 = vmatprep.subr.bf16.mxu0 %v10464_v16  ;;  %v12263_v19 = vpack.c.bf16 %v3677_v39, %v3669_v12  ;;  %v10431_v16 = vld [vmem:[#allocation14 + $0x704] ss:$28 sps:$4 sm:$0xff]   ;;  %v2947_v60 = vadd.f32 %v14119_v45, %v2834_v46  ;;  %v14120_v39 = vld [vmem:[#allocation29_spill] sm:$0xff] }
 0x341   :  { %v3031_v55 = vpop.f32.mrf.mxu1  ;;  %v2832_v30 = vadd.f32 %v14120_v39, %v12109_v58  ;;  %v10474_v46 = vld [vmem:[#allocation14 + $0xb60] ss:$28 sps:$4 sm:$0xff]   ;;  %v14121_v12 = vld [vmem:[#allocation33_spill] sm:$0xff] }
 0x342   :  { %v12257_v4 = vpack.c.bf16 %v3678_v42, %v3670_v31  ;;  %v3032_v20 = vadd.f32 %v3031_v55, %v12186_v26  ;;  %v3144_v18 = vpop.f32.mrf.mxu0  ;;  %6933 = vmatpush1.bf16.msra.mxu1 %v10423_v36  ;;  %v3143_v51 = vadd.f32 %v3142_v35, %v3030_v13  ;;  %v3141_v36 = vadd.f32 %v3140_v7, %v3028_v40  ;;  %v10434_v31 = vld [vmem:[#allocation14 + $0xa4c] ss:$28 sps:$4 sm:$0xff]  }
 0x343   :  { %v3033_v53 = vpop.f32.mrf.mxu1  ;;  %6934 = vmatprep.subr.bf16.mxu1 %v10428_v0  ;;  %7038 = vmatpush1.bf16.msra.mxu0 %v10462_v41  ;;  %v3715_v42 = vmax.f32 %v2935_v1, 0.0  ;;  %v3740_v13 = vmax.f32 %v2951_v49, 0.0  ;;  %v2848_v7 = vadd.f32 %v12137_v6, %v12085_v8  ;;  %v2949_v40 = vadd.f32 %v14121_v12, %v2836_v59 }
 0x344   :  { %v3145_v11 = vadd.f32 %v3144_v18, %v3032_v20  ;;  %v3034_v48 = vadd.f32 %v3033_v53, %v12181_v52  ;;  %v3146_v56 = vpop.f32.mrf.mxu0  ;;  %6851 = vmatprep.mubr.bf16.mxu0 %v12257_v4  ;;  %7039 = vmatprep.subr.bf16.mxu0 %v10470_v22  ;;  %v3686_v55 = vmax.f32 %v3143_v51, 0.0  ;;  %v3732_v28 = vmax.f32 %v2947_v60, 0.0 }
 0x345   :  { %v3037_v23 = vpop.f32.mrf.mxu1  ;;  %6759 = vmatmul.mubr.bf16.gmra.mxu1 %v12245_v61  ;;  %6852 = vmatmul.mubr.bf16.gmra.mxu0 %v12263_v19  ;;  %v2844_v1 = vadd.f32 %v12121_v37, %v12085_v8  ;;  %v3685_v49 = vmax.f32 %v3141_v36, 0.0  ;;  %v2961_v45 = vadd.f32 %v12139_v54, %v2848_v7  ;;  %v10437_v36 = vld [vmem:[#allocation14 + $0xa14] ss:$28 sps:$4 sm:$0xff]  }
 0x346   :  { %v3147_v0 = vadd.f32 %v3146_v56, %v3034_v48  ;;  %v3150_v41 = vpop.f32.mrf.mxu0  ;;  %6768 = vmatprep.mubr.bf16.mxu1 %v12255_v10  ;;  %6935 = vmatpush1.bf16.msra.mxu1 %v10426_v24  ;;  %v3693_v35 = vmax.f32 %v3145_v11, 0.0  ;;  %v10482_v24 = vld [vmem:[#allocation14 + $0xb2c] ss:$28 sps:$4 sm:$0xff]   ;;  %v3038_v6 = vadd.f32 %v3037_v23, %v12186_v26 }
 0x347   :  { %v3039_v22 = vpop.f32.mrf.mxu1  ;;  %6936 = vmatprep.subr.bf16.mxu1 %v10431_v16  ;;  %7040 = vmatpush1.bf16.msra.mxu0 %v10468_v29  ;;  %v12280_v16 = vpack.c.bf16 %v3723_v5, %v3715_v42  ;;  %v14123_v29 = vld [vmem:[#allocation30_spill] sm:$0xff]  ;;  %v10432_v56 = vld [vmem:[#allocation14 + $0xa48] ss:$28 sps:$4 sm:$0xff]   ;;  %v3739_v5 = vmax.f32 %v2949_v40, 0.0 }
 0x348   :  { %v3694_v27 = vmax.f32 %v3147_v0, 0.0  ;;  %v3040_v20 = vadd.f32 %v3039_v22, %v12181_v52  ;;  %v3152_v18 = vpop.f32.mrf.mxu0  ;;  %7041 = vmatprep.subr.bf16.mxu0 %v10476_v33  ;;  %v2945_v11 = vadd.f32 %v14123_v29, %v2832_v30  ;;  %v12286_v33 = vpack.c.bf16 %v3740_v13, %v3732_v28  ;;  %v10480_v23 = vld [vmem:[#allocation14 + $0xb28] ss:$28 sps:$4 sm:$0xff]  }
 0x349   :  { %v3041_v53 = vpop.f32.mrf.mxu1  ;;  %14122 = vst [vmem:[#allocation32_spill] sm:$0xff] %v12280_v16  ;;  %v12289_v37 = vpack.c.bf16 %v3693_v35, %v3685_v49  ;;  %v2957_v13 = vadd.f32 %v12123_v43, %v2844_v1  ;;  %v3151_v54 = vadd.f32 %v3150_v41, %v3038_v6  ;;  %v2842_v35 = vadd.f32 %v12111_v63, %v12109_v58  ;;  %v14125_v22 = vld [vmem:[#allocation35_spill] sm:$0xff] }
 0x34a   :  { %v12283_v59 = vpack.c.bf16 %v3694_v27, %v3686_v55  ;;  %v3042_v51 = vadd.f32 %v3041_v53, %v12186_v26  ;;  %v3154_v48 = vpop.f32.mrf.mxu0  ;;  %6937 = vmatpush1.bf16.msra.mxu1 %v10429_v9  ;;  %14124 = vst [vmem:[#allocation31_spill] sm:$0xff] %v12286_v33  ;;  %v3153_v39 = vadd.f32 %v3152_v18, %v3040_v20  ;;  %v10488_v9 = vld [vmem:[#allocation14 + $0xaf4] ss:$28 sps:$4 sm:$0xff]   ;;  %v3756_v43 = vmax.f32 %v2961_v45, 0.0  ;;  %v10440_v18 = vld [vmem:[#allocation14 + $0x9dc] ss:$28 sps:$4 sm:$0xff]  }
 0x34b   :  { %v3043_v60 = vpop.f32.mrf.mxu1  ;;  %6938 = vmatprep.subr.bf16.mxu1 %v10434_v31  ;;  %7042 = vmatpush1.bf16.msra.mxu0 %v10474_v46  ;;  %v3731_v31 = vmax.f32 %v2945_v11, 0.0  ;;  %v2846_v46 = vadd.f32 %v14125_v22, %v12109_v58  ;;  %v10435_v55 = vld [vmem:[#allocation14 + $0xa10] ss:$28 sps:$4 sm:$0xff]   ;;  %v2858_v41 = vadd.f32 %v12172_v50, %v12085_v8  ;;  %v10494_v53 = vld [vmem:[#allocation14 + $0xabc] ss:$28 sps:$4 sm:$0xff]   ;;  %v3748_v29 = vmax.f32 %v2957_v13, 0.0 }
 0x34c   :  { %v3155_v30 = vadd.f32 %v3154_v48, %v3042_v51  ;;  %v3044_v0 = vadd.f32 %v3043_v60, %v12181_v52  ;;  %v3156_v42 = vpop.f32.mrf.mxu0  ;;  %6861 = vmatprep.mubr.bf16.mxu0 %v12283_v59  ;;  %7043 = vmatprep.subr.bf16.mxu0 %v10482_v24  ;;  %v10486_v24 = vld [vmem:[#allocation14 + $0xaf0] ss:$28 sps:$4 sm:$0xff]   ;;  %v3702_v28 = vmax.f32 %v3153_v39, 0.0  ;;  %v2854_v11 = vadd.f32 %v12155_v32, %v12085_v8  ;;  %v10492_v13 = vld [vmem:[#allocation14 + $0xab8] ss:$28 sps:$4 sm:$0xff]  }
 0x34d   :  { %v3047_v7 = vpop.f32.mrf.mxu1  ;;  %6769 = vmatmul.mubr.bf16.gmra.mxu1 %v12280_v16  ;;  %6862 = vmatmul.mubr.bf16.gmra.mxu0 %v12289_v37  ;;  %v12303_v63 = vpack.c.bf16 %v3739_v5, %v3731_v31  ;;  %v3701_v50 = vmax.f32 %v3151_v54, 0.0  ;;  %v14128_v60 = vld [vmem:[#allocation36_spill] sm:$0xff]  ;;  %v10500_v22 = vld [vmem:[#allocation14 + $0xa84] ss:$28 sps:$4 sm:$0xff]  }
 0x34e   :  { %v3157_v12 = vadd.f32 %v3156_v42, %v3044_v0  ;;  %v3160_v40 = vpop.f32.mrf.mxu0  ;;  %6778 = vmatprep.mubr.bf16.mxu1 %v12286_v33  ;;  %6939 = vmatpush2.bf16.msra.mxu1 %v10432_v56  ;;  %v3709_v27 = vmax.f32 %v3155_v30, 0.0  ;;  %v3048_v51 = vadd.f32 %v3047_v7, %v12186_v26  ;;  %v14127_v56 = vld [vmem:[#allocation34_spill] sm:$0xff]  ;;  %v12314_v0 = vpack.c.bf16 %v3756_v43, %v3748_v29 }
 0x34f   :  { %v3049_v20 = vpop.f32.mrf.mxu1  ;;  %6940 = vmatprep.subr.bf16.mxu1 %v10437_v36  ;;  %7044 = vmatpush1.bf16.msra.mxu0 %v10480_v23  ;;  %14126 = vst [vmem:[#allocation29_spill] sm:$0xff] %v12303_v63  ;;  %v2955_v45 = vadd.f32 %v14127_v56, %v2842_v35  ;;  %v2959_v36 = vadd.f32 %v14128_v60, %v2846_v46  ;;  %v10438_v30 = vld [vmem:[#allocation14 + $0x9d8] ss:$28 sps:$4 sm:$0xff]  }
 0x350   :  { %v3710_v1 = vmax.f32 %v3157_v12, 0.0  ;;  %v3050_v49 = vadd.f32 %v3049_v20, %v12181_v52  ;;  %v3162_v6 = vpop.f32.mrf.mxu0  ;;  %7045 = vmatprep.subr.bf16.mxu0 %v10488_v9  ;;  %14129 = vst [vmem:[#allocation33_spill] sm:$0xff] %v12314_v0  ;;  %v2971_v42 = vadd.f32 %v12174_v38, %v2858_v41  ;;  %v12317_v8 = vpack.c.bf16 %v3709_v27, %v3701_v50  ;;  %v10443_v9 = vld [vmem:[#allocation14 + $0x9a4] ss:$28 sps:$4 sm:$0xff]  }
 0x351   :  { %v3051_v48 = vpop.f32.mrf.mxu1  ;;  %v2967_v46 = vadd.f32 %v12157_v62, %v2854_v11  ;;  %v3161_v12 = vadd.f32 %v3160_v40, %v3048_v51  ;;  %v10441_v27 = vld [vmem:[#allocation14 + $0x9a0] ss:$28 sps:$4 sm:$0xff]   ;;  %v2856_v20 = vadd.f32 %v12163_v25, %v12109_v58  ;;  %v10446_v62 = vld [vmem:[#allocation14 + $0x96c] ss:$28 sps:$4 sm:$0xff]   ;;  %v2852_v50 = vadd.f32 %v12145_v15, %v12109_v58  ;;  %v10449_v15 = vld [vmem:[#allocation14 + $0x934] ss:$28 sps:$4 sm:$0xff]  }
 0x352   :  { %v12311_v23 = vpack.c.bf16 %v3710_v1, %v3702_v28  ;;  %v3052_v5 = vadd.f32 %v3051_v48, %v12186_v26  ;;  %v3164_v39 = vpop.f32.mrf.mxu0  ;;  %6941 = vmatpush2.bf16.msra.mxu1 %v10435_v55  ;;  %14130 = vst [vmem:[#allocation30_spill] sm:$0xff] %v12317_v8  ;;  %v3163_v54 = vadd.f32 %v3162_v6, %v3050_v49  ;;  %v3755_v55 = vmax.f32 %v2959_v36, 0.0  ;;  %v10498_v40 = vld [vmem:[#allocation14 + $0xa80] ss:$28 sps:$4 sm:$0xff]   ;;  %v10506_v11 = vld [vmem:[#allocation14 + $0xdcc] ss:$28 sps:$4 sm:$0xff]  }
 0x353   :  { %v3053_v32 = vpop.f32.mrf.mxu1  ;;  %6942 = vmatprep.subr.bf16.mxu1 %v10440_v18  ;;  %7046 = vmatpush1.bf16.msra.mxu0 %v10486_v24  ;;  %v3772_v18 = vmax.f32 %v2971_v42, 0.0  ;;  %v3747_v1 = vmax.f32 %v2955_v45, 0.0  ;;  %v3764_v51 = vmax.f32 %v2967_v46, 0.0  ;;  %v3717_v25 = vmax.f32 %v3161_v12, 0.0 }
 0x354   :  { %v3165_v7 = vadd.f32 %v3164_v39, %v3052_v5  ;;  %v3054_v31 = vadd.f32 %v3053_v32, %v12181_v52  ;;  %v3166_v35 = vpop.f32.mrf.mxu0  ;;  %6871 = vmatprep.mubr.bf16.mxu0 %v12311_v23  ;;  %7047 = vmatprep.subr.bf16.mxu0 %v10494_v53  ;;  %v3718_v49 = vmax.f32 %v3163_v54, 0.0  ;;  %v10444_v39 = vld [vmem:[#allocation14 + $0x968] ss:$28 sps:$4 sm:$0xff]  }
 0x355   :  { %v3057_v38 = vpop.f32.mrf.mxu1  ;;  %6779 = vmatmul.mubr.bf16.gmra.mxu1 %v12303_v63  ;;  %6872 = vmatmul.mubr.bf16.gmra.mxu0 %v12317_v8  ;;  %v12331_v60 = vpack.c.bf16 %v3755_v55, %v3747_v1  ;;  %v12337_v42 = vpack.c.bf16 %v3772_v18, %v3764_v51  ;;  %v10447_v55 = vld [vmem:[#allocation14 + $0x930] ss:$28 sps:$4 sm:$0xff]   ;;  %v10452_v18 = vld [vmem:[#allocation14 + $0x8fc] ss:$28 sps:$4 sm:$0xff]  }
 0x356   :  { %v3167_v43 = vadd.f32 %v3166_v35, %v3054_v31  ;;  %v3170_v41 = vpop.f32.mrf.mxu0  ;;  %6788 = vmatprep.mubr.bf16.mxu1 %v12314_v0  ;;  %6943 = vmatpush2.bf16.msra.mxu1 %v10438_v30  ;;  %v3725_v24 = vmax.f32 %v3165_v7, 0.0  ;;  %v3058_v48 = vadd.f32 %v3057_v38, %v12186_v26  ;;  %v2969_v30 = vadd.f32 %v12165_v2, %v2856_v20  ;;  %v10512_v35 = vld [vmem:[#allocation14 + $0xd94] ss:$28 sps:$4 sm:$0xff]  }
 0x357   :  { %v3059_v28 = vpop.f32.mrf.mxu1  ;;  %6944 = vmatprep.subr.bf16.mxu1 %v10443_v9  ;;  %7048 = vmatpush1.bf16.msra.mxu0 %v10492_v13  ;;  %14131 = vst [vmem:[#allocation35_spill] sm:$0xff] %v12331_v60  ;;  %14133 = vst [vmem:[#allocation36_spill] sm:$0xff] %v12337_v42  ;;  %v10504_v9 = vld [vmem:[#allocation14 + $0xdc8] ss:$28 sps:$4 sm:$0xff]   ;;  %v2965_v2 = vadd.f32 %v12147_v57, %v2852_v50  ;;  %v10450_v51 = vld [vmem:[#allocation14 + $0x8f8] ss:$28 sps:$4 sm:$0xff]  }
 0x358   :  { %v3726_v6 = vmax.f32 %v3167_v43, 0.0  ;;  %v3060_v53 = vadd.f32 %v3059_v28, %v12181_v52  ;;  %v3172_v29 = vpop.f32.mrf.mxu0  ;;  %7049 = vmatprep.subr.bf16.mxu0 %v10500_v22  ;;  %v12339_v32 = vpack.c.bf16 %v3725_v24, %v3717_v25  ;;  %v3171_v22 = vadd.f32 %v3170_v41, %v3058_v48  ;;  %v10510_v24 = vld [vmem:[#allocation14 + $0xd90] ss:$28 sps:$4 sm:$0xff]  }
 0x359   :  { %v3061_v56 = vpop.f32.mrf.mxu1  ;;  %v3771_v43 = vmax.f32 %v2969_v30, 0.0  ;;  %v3763_v1 = vmax.f32 %v2965_v2, 0.0 }
 0x35a   :  { %v12333_v36 = vpack.c.bf16 %v3726_v6, %v3718_v49  ;;  %v3062_v45 = vadd.f32 %v3061_v56, %v12186_v26  ;;  %v3174_v5 = vpop.f32.mrf.mxu0  ;;  %6945 = vmatpush2.bf16.msra.mxu1 %v10441_v27  ;;  %14134 = vst [vmem:[#allocation47_spill] sm:$0xff] %v12339_v32  ;;  %v3173_v13 = vadd.f32 %v3172_v29, %v3060_v53  ;;  %v3733_v49 = vmax.f32 %v3171_v22, 0.0 }
 0x35b   :  { %v3063_v58 = vpop.f32.mrf.mxu1  ;;  %6946 = vmatprep.subr.bf16.mxu1 %v10446_v62  ;;  %7050 = vmatpush1.bf16.msra.mxu0 %v10498_v40  ;;  %v10518_v40 = vld [vmem:[#allocation14 + $0xd5c] ss:$28 sps:$4 sm:$0xff]   ;;  %v12352_v25 = vpack.c.bf16 %v3771_v43, %v3763_v1 }
 0x35c   :  { %14132 = vst [vmem:[#allocation34_spill] sm:$0xff] %v12333_v36  ;;  %v3175_v54 = vadd.f32 %v3174_v5, %v3062_v45  ;;  %v3064_v7 = vadd.f32 %v3063_v58, %v12181_v52  ;;  %v3176_v31 = vpop.f32.mrf.mxu0  ;;  %6881 = vmatprep.mubr.bf16.mxu0 %v12333_v36  ;;  %7051 = vmatprep.subr.bf16.mxu0 %v10506_v11  ;;  %v3734_v57 = vmax.f32 %v3173_v13, 0.0  ;;  %v10455_v45 = vld [vmem:[#allocation14 + $0x8c4] ss:$28 sps:$4 sm:$0xff]   ;;  %v10516_v5 = vld [vmem:[#allocation14 + $0xd58] ss:$28 sps:$4 sm:$0xff]  }
 0x35d   :  { %v3067_v46 = vpop.f32.mrf.mxu1  ;;  %6789 = vmatmul.mubr.bf16.gmra.mxu1 %v12331_v60  ;;  %6882 = vmatmul.mubr.bf16.gmra.mxu0 %v12339_v32  ;;  %14136 = vst [vmem:[#allocation49_spill] sm:$0xff] %v12352_v25  ;;  %v10522_v43 = vld [vmem:[#allocation14 + $0xd20] ss:$28 sps:$4 sm:$0xff]  }
 0x35e   :  { %v3177_v12 = vadd.f32 %v3176_v31, %v3064_v7  ;;  %v3180_v38 = vpop.f32.mrf.mxu0  ;;  %6798 = vmatprep.mubr.bf16.mxu1 %v12337_v42  ;;  %6947 = vmatpush2.bf16.msra.mxu1 %v10444_v39  ;;  %v3741_v27 = vmax.f32 %v3175_v54, 0.0  ;;  %v3068_v6 = vadd.f32 %v3067_v46, %v12186_v26  ;;  %v14138_v46 = vld [vmem:[#allocation24_spill] sm:$0xff] }
 0x35f   :  { %v3069_v20 = vpop.f32.mrf.mxu1  ;;  %6948 = vmatprep.subr.bf16.mxu1 %v10449_v15  ;;  %7052 = vmatpush2.bf16.msra.mxu0 %v10504_v9  ;;  %v10524_v9 = vld [vmem:[#allocation14 + $0xd24] ss:$28 sps:$4 sm:$0xff]  }
 0x360   :  { %v3742_v41 = vmax.f32 %v3177_v12, 0.0  ;;  %v3070_v28 = vadd.f32 %v3069_v20, %v12181_v52  ;;  %v3182_v62 = vpop.f32.mrf.mxu0  ;;  %7053 = vmatprep.subr.bf16.mxu0 %v10512_v35  ;;  %v12354_v48 = vpack.c.bf16 %v3741_v27, %v3733_v49  ;;  %v3181_v13 = vadd.f32 %v3180_v38, %v3068_v6  ;;  %v10453_v35 = vld [vmem:[#allocation14 + $0x8c0] ss:$28 sps:$4 sm:$0xff]  }
 0x361   :  { %v3071_v53 = vpop.f32.mrf.mxu1  ;;  %v13986_v12 = vsub.s32 5, %v14138_v46 }
 0x362   :  { %v12349_v29 = vpack.c.bf16 %v3742_v41, %v3734_v57  ;;  %v3072_v11 = vadd.f32 %v3071_v53, %v12186_v26  ;;  %v3184_v50 = vpop.f32.mrf.mxu0  ;;  %6949 = vmatpush2.bf16.msra.mxu1 %v10447_v55  ;;  %14137 = vst [vmem:[#allocation50_spill] sm:$0xff] %v12354_v48  ;;  %v3183_v39 = vadd.f32 %v3182_v62, %v3070_v28  ;;  %v10461_v55 = vld [vmem:[#allocation14 + $0x194] ss:$28 sps:$4 sm:$0xff]   ;;  %v3749_v57 = vmax.f32 %v3181_v13, 0.0 }
 0x363   :  { %v3073_v56 = vpop.f32.mrf.mxu1  ;;  %6950 = vmatprep.subr.bf16.mxu1 %v10452_v18  ;;  %7054 = vmatpush2.bf16.msra.mxu0 %v10510_v24  ;;  %v10530_v24 = vld [vmem:[#allocation14 + $0xcec] ss:$28 sps:$4 sm:$0xff]   ;;  %v13987_v62 = vsub.s32 4, %v14138_v46 }
 0x364   :  { %14135 = vst [vmem:[#allocation48_spill] sm:$0xff] %v12349_v29  ;;  %v3185_v30 = vadd.f32 %v3184_v50, %v3072_v11  ;;  %v3074_v58 = vadd.f32 %v3073_v56, %v12181_v52  ;;  %v3186_v15 = vpop.f32.mrf.mxu0  ;;  %6891 = vmatprep.mubr.bf16.mxu0 %v12349_v29  ;;  %7055 = vmatprep.subr.bf16.mxu0 %v10518_v40  ;;  %v3750_v27 = vmax.f32 %v3183_v39, 0.0  ;;  %v10528_v50 = vld [vmem:[#allocation14 + $0xce8] ss:$28 sps:$4 sm:$0xff]  }
 0x365   :  { %v3077_v54 = vpop.f32.mrf.mxu1  ;;  %6799 = vmatmul.mubr.bf16.gmra.mxu1 %v12352_v25  ;;  %6892 = vmatmul.mubr.bf16.gmra.mxu0 %v12354_v48  ;;  %v12372_v11 = vrot.slane %v12076_v3, %v13986_v12 }
 0x366   :  { %v3187_v7 = vadd.f32 %v3186_v15, %v3074_v58  ;;  %v3190_v31 = vpop.f32.mrf.mxu0  ;;  %6951 = vmatpush2.bf16.msra.mxu1 %v10450_v51  ;;  %v3757_v2 = vmax.f32 %v3185_v30, 0.0  ;;  %v3078_v41 = vadd.f32 %v3077_v54, %v12186_v26  ;;  %v12376_v30 = vld [vmem:[#allocation13] sm:$0xff]  ;;  %v10534_v54 = vld [vmem:[#allocation14 + $0xcb0] ss:$28 sps:$4 sm:$0xff]  }
 0x367   :  { %v3079_v22 = vpop.f32.mrf.mxu1  ;;  %6952 = vmatprep.subr.bf16.mxu1 %v10455_v45  ;;  %7056 = vmatpush2.bf16.msra.mxu0 %v10516_v5  ;;  %v12381_v3 = vrot.slane %v12376_v30, %v13987_v62 }
 0x368   :  { %v3758_v20 = vmax.f32 %v3187_v7, 0.0  ;;  %v3080_v38 = vadd.f32 %v3079_v22, %v12181_v52  ;;  %v3192_v18 = vpop.f32.mrf.mxu0  ;;  %7057 = vmatprep.subr.bf16.mxu0 %v10524_v9  ;;  %v12367_v6 = vpack.c.bf16 %v3757_v2, %v3749_v57  ;;  %v3191_v39 = vadd.f32 %v3190_v31, %v3078_v41  ;;  %v10542_v2 = vld [vmem:[#allocation14 + $0xc7c] ss:$28 sps:$4 sm:$0xff]  }
 0x369   :  { %v3081_v28 = vpop.f32.mrf.mxu1  ;;  %v10540_v41 = vld [vmem:[#allocation14 + $0xc78] ss:$28 sps:$4 sm:$0xff]  }
 0x36a   :  { %v12364_v40 = vpack.c.bf16 %v3758_v20, %v3750_v27  ;;  %v3082_v1 = vadd.f32 %v3081_v28, %v12186_v26  ;;  %v3194_v49 = vpop.f32.mrf.mxu0  ;;  %6953 = vmatpush2.bf16.msra.mxu1 %v10453_v35  ;;  %14140 = vst [vmem:[#allocation52_spill] sm:$0xff] %v12367_v6  ;;  %v3193_v51 = vadd.f32 %v3192_v18, %v3080_v38  ;;  %v10536_v26 = vld [vmem:[#allocation14 + $0xcb4] ss:$28 sps:$4 sm:$0xff]   ;;  %v3765_v22 = vmax.f32 %v3191_v39, 0.0 }
 0x36b   :  { %v3083_v53 = vpop.f32.mrf.mxu1  ;;  %7148 = vmatprep.subr.bf16.mxu1 %v10461_v55  ;;  %7058 = vmatpush2.bf16.msra.mxu0 %v10522_v43 }
 0x36c   :  { %14139 = vst [vmem:[#allocation51_spill] sm:$0xff] %v12364_v40  ;;  %v3195_v56 = vadd.f32 %v3194_v49, %v3082_v1  ;;  %v3084_v45 = vadd.f32 %v3083_v53, %v12181_v52  ;;  %v3196_v5 = vpop.f32.mrf.mxu0  ;;  %6901 = vmatprep.mubr.bf16.mxu0 %v12364_v40  ;;  %7059 = vmatprep.subr.bf16.mxu0 %v10530_v24  ;;  %v3766_v7 = vmax.f32 %v3193_v51, 0.0  ;;  %v10548_v53 = vld [vmem:[#allocation14 + $0xc44] ss:$28 sps:$4 sm:$0xff]  }
 0x36d   :  { %v3233_v58 = vpop.f32.mrf.mxu1  ;;  %6902 = vmatmul.mubr.bf16.gmra.mxu0 %v12367_v6 }
 0x36e   :  { %v3197_v15 = vadd.f32 %v3196_v5, %v3084_v45  ;;  %v3773_v9 = vmax.f32 %v3195_v56, 0.0  ;;  %v3234_v55 = vadd.f32 %v3233_v58, %v12381_v3  ;;  %v10546_v58 = vld [vmem:[#allocation14 + $0xc40] ss:$28 sps:$4 sm:$0xff]  }
 0x36f   :  { %v3346_v13 = vpop.f32.mrf.mxu0  ;;  %v3235_v52 = vpop.f32.mrf.mxu1  ;;  %7060 = vmatpush2.bf16.msra.mxu0 %v10528_v50 }
 0x370   :  { %v3774_v35 = vmax.f32 %v3197_v15, 0.0  ;;  %v3236_v31 = vadd.f32 %v3235_v52, %v12372_v11  ;;  %7061 = vmatprep.subr.bf16.mxu0 %v10536_v26  ;;  %v12389_v18 = vpack.c.bf16 %v3773_v9, %v3765_v22  ;;  %v3347_v50 = vadd.f32 %v3346_v13, %v3234_v55  ;;  %v10459_v55 = vld [vmem:[#allocation14 + $0x190] ss:$28 sps:$4 sm:$0xff]  }
 0x371   :  { %v3348_v43 = vpop.f32.mrf.mxu0  ;;  %v3237_v27 = vpop.f32.mrf.mxu1 }
 0x372   :  { %v12386_v20 = vpack.c.bf16 %v3774_v35, %v3766_v7  ;;  %v3238_v38 = vadd.f32 %v3237_v27, %v12381_v3  ;;  %14142 = vst [vmem:[#allocation54_spill] sm:$0xff] %v12389_v18  ;;  %v3349_v28 = vadd.f32 %v3348_v43, %v3236_v31  ;;  %v3655_v7 = vmax.f32 %v3347_v50, 0.0 }
 0x373   :  { %v3350_v24 = vpop.f32.mrf.mxu0  ;;  %v3239_v57 = vpop.f32.mrf.mxu1  ;;  %7062 = vmatpush2.bf16.msra.mxu0 %v10534_v54  ;;  %v10554_v54 = vld [vmem:[#allocation14 + $0x514] ss:$28 sps:$4 sm:$0xff]  }
 0x374   :  { %14141 = vst [vmem:[#allocation53_spill] sm:$0xff] %v12386_v20  ;;  %v3351_v1 = vadd.f32 %v3350_v24, %v3238_v38  ;;  %v3240_v49 = vadd.f32 %v3239_v57, %v12372_v11  ;;  %6911 = vmatprep.mubr.bf16.mxu0 %v12386_v20  ;;  %7063 = vmatprep.subr.bf16.mxu0 %v10542_v2  ;;  %v3656_v15 = vmax.f32 %v3349_v28, 0.0  ;;  %v10467_v24 = vld [vmem:[#allocation14 + $0x15c] ss:$28 sps:$4 sm:$0xff]  }
 0x375   :  { %v3352_v51 = vpop.f32.mrf.mxu0  ;;  %v3243_v56 = vpop.f32.mrf.mxu1  ;;  %6912 = vmatmul.mubr.bf16.gmra.mxu0 %v12389_v18 }
 0x376   :  { %v3353_v45 = vadd.f32 %v3352_v51, %v3240_v49  ;;  %v3663_v5 = vmax.f32 %v3351_v1, 0.0  ;;  %v3244_v35 = vadd.f32 %v3243_v56, %v12381_v3  ;;  %v10465_v51 = vld [vmem:[#allocation14 + $0x158] ss:$28 sps:$4 sm:$0xff]  }
 0x377   :  { %v3356_v26 = vpop.f32.mrf.mxu0  ;;  %v3245_v39 = vpop.f32.mrf.mxu1  ;;  %7064 = vmatpush2.bf16.msra.mxu0 %v10540_v41 }
 0x378   :  { %v3664_v9 = vmax.f32 %v3353_v45, 0.0  ;;  %v3246_v52 = vadd.f32 %v3245_v39, %v12372_v11  ;;  %7065 = vmatprep.subr.bf16.mxu0 %v10548_v53  ;;  %v12399_v43 = vpack.c.bf16 %v3663_v5, %v3655_v7  ;;  %v3357_v1 = vadd.f32 %v3356_v26, %v3244_v35  ;;  %v10473_v39 = vld [vmem:[#allocation14 + $0x124] ss:$28 sps:$4 sm:$0xff]  }
 0x379   :  { %v3358_v13 = vpop.f32.mrf.mxu0  ;;  %v3247_v31 = vpop.f32.mrf.mxu1 }
 0x37a   :  { %v12396_v2 = vpack.c.bf16 %v3664_v9, %v3656_v15  ;;  %v3248_v22 = vadd.f32 %v3247_v31, %v12381_v3  ;;  %v3359_v57 = vadd.f32 %v3358_v13, %v3246_v52  ;;  %v3671_v52 = vmax.f32 %v3357_v1, 0.0  ;;  %v10471_v31 = vld [vmem:[#allocation14 + $0x120] ss:$28 sps:$4 sm:$0xff]  }
 0x37b   :  { %v3360_v27 = vpop.f32.mrf.mxu0  ;;  %v3249_v38 = vpop.f32.mrf.mxu1  ;;  %7066 = vmatpush2.bf16.msra.mxu0 %v10546_v58 }
 0x37c   :  { %14143 = vst [vmem:[#allocation55_spill] sm:$0xff] %v12396_v2  ;;  %v3361_v41 = vadd.f32 %v3360_v27, %v3248_v22  ;;  %v3250_v28 = vadd.f32 %v3249_v38, %v12372_v11  ;;  %6954 = vmatprep.mubr.bf16.mxu1 %v12396_v2  ;;  %7261 = vmatprep.subr.bf16.mxu0 %v10554_v54  ;;  %v3672_v58 = vmax.f32 %v3359_v57, 0.0  ;;  %v10479_v38 = vld [vmem:[#allocation14 + $0xec] ss:$28 sps:$4 sm:$0xff]  }
 0x37d   :  { %v3362_v49 = vpop.f32.mrf.mxu0  ;;  %v3253_v53 = vpop.f32.mrf.mxu1  ;;  %6955 = vmatmul.mubr.bf16.vlgmr.msra.gmra.mxu1 %v12399_v43 }
 0x37e   :  { %v3363_v50 = vadd.f32 %v3362_v49, %v3250_v28  ;;  %7149 = vmatpush1.bf16.msra.mxu1 %v10459_v55  ;;  %v3679_v56 = vmax.f32 %v3361_v41, 0.0  ;;  %v3254_v54 = vadd.f32 %v3253_v53, %v12381_v3 }
 0x37f   :  { %v3366_v45 = vpop.f32.mrf.mxu0  ;;  %v3255_v5 = vpop.f32.mrf.mxu1  ;;  %7150 = vmatprep.subr.bf16.mxu1 %v10467_v24 }
 0x380   :  { %v3680_v15 = vmax.f32 %v3363_v50, 0.0  ;;  %v3256_v9 = vadd.f32 %v3255_v5, %v12372_v11  ;;  %v12409_v22 = vpack.c.bf16 %v3679_v56, %v3671_v52  ;;  %v3367_v28 = vadd.f32 %v3366_v45, %v3254_v54  ;;  %v10477_v50 = vld [vmem:[#allocation14 + $0xe8] ss:$28 sps:$4 sm:$0xff]  }
 0x381   :  { %v3368_v26 = vpop.f32.mrf.mxu0  ;;  %v3257_v7 = vpop.f32.mrf.mxu1 }
 0x382   :  { %v12406_v35 = vpack.c.bf16 %v3680_v15, %v3672_v58  ;;  %v3258_v13 = vadd.f32 %v3257_v7, %v12381_v3  ;;  %7151 = vmatpush1.bf16.msra.mxu1 %v10465_v51  ;;  %14144 = vst [vmem:[#allocation56_spill] sm:$0xff] %v12409_v22  ;;  %v3369_v24 = vadd.f32 %v3368_v26, %v3256_v9  ;;  %v3687_v52 = vmax.f32 %v3367_v28, 0.0 }
 0x383   :  { %v3370_v55 = vpop.f32.mrf.mxu0  ;;  %v3259_v27 = vpop.f32.mrf.mxu1  ;;  %7152 = vmatprep.subr.bf16.mxu1 %v10473_v39  ;;  %v10485_v39 = vld [vmem:[#allocation14 + $0xb4] ss:$28 sps:$4 sm:$0xff]  }
 0x384   :  { %v3371_v57 = vadd.f32 %v3370_v55, %v3258_v13  ;;  %v3260_v41 = vadd.f32 %v3259_v27, %v12372_v11  ;;  %6964 = vmatprep.mubr.bf16.mxu1 %v12406_v35  ;;  %v3688_v58 = vmax.f32 %v3369_v24, 0.0  ;;  %v10491_v24 = vld [vmem:[#allocation14 + $0x7c] ss:$28 sps:$4 sm:$0xff]  }
 0x385   :  { %v3372_v1 = vpop.f32.mrf.mxu0  ;;  %v3263_v49 = vpop.f32.mrf.mxu1  ;;  %6965 = vmatmul.mubr.bf16.gmra.mxu1 %v12409_v22 }
 0x386   :  { %v3373_v53 = vadd.f32 %v3372_v1, %v3260_v41  ;;  %7153 = vmatpush1.bf16.msra.mxu1 %v10471_v31  ;;  %v3695_v51 = vmax.f32 %v3371_v57, 0.0  ;;  %v3264_v26 = vadd.f32 %v3263_v49, %v12381_v3  ;;  %v10483_v31 = vld [vmem:[#allocation14 + $0xb0] ss:$28 sps:$4 sm:$0xff]  }
 0x387   :  { %v3376_v56 = vpop.f32.mrf.mxu0  ;;  %v3265_v5 = vpop.f32.mrf.mxu1  ;;  %7154 = vmatprep.subr.bf16.mxu1 %v10479_v38 }
 0x388   :  { %v3696_v15 = vmax.f32 %v3373_v53, 0.0  ;;  %v3266_v9 = vadd.f32 %v3265_v5, %v12372_v11  ;;  %v12419_v55 = vpack.c.bf16 %v3695_v51, %v3687_v52  ;;  %v3377_v1 = vadd.f32 %v3376_v56, %v3264_v26 }
 0x389   :  { %v3378_v45 = vpop.f32.mrf.mxu0  ;;  %v3267_v54 = vpop.f32.mrf.mxu1 }
 0x38a   :  { %v12416_v7 = vpack.c.bf16 %v3696_v15, %v3688_v58  ;;  %v3268_v13 = vadd.f32 %v3267_v54, %v12381_v3  ;;  %7155 = vmatpush1.bf16.msra.mxu1 %v10477_v50  ;;  %14146 = vst [vmem:[#allocation58_spill] sm:$0xff] %v12419_v55  ;;  %v3379_v57 = vadd.f32 %v3378_v45, %v3266_v9  ;;  %v10489_v50 = vld [vmem:[#allocation14 + $0x78] ss:$28 sps:$4 sm:$0xff]   ;;  %v3703_v54 = vmax.f32 %v3377_v1, 0.0 }
 0x38b   :  { %v3380_v27 = vpop.f32.mrf.mxu0  ;;  %v3269_v38 = vpop.f32.mrf.mxu1  ;;  %7156 = vmatprep.subr.bf16.mxu1 %v10485_v39  ;;  %v10497_v39 = vld [vmem:[#allocation14 + $0x44] ss:$28 sps:$4 sm:$0xff]  }
 0x38c   :  { %14145 = vst [vmem:[#allocation57_spill] sm:$0xff] %v12416_v7  ;;  %v3381_v41 = vadd.f32 %v3380_v27, %v3268_v13  ;;  %v3270_v28 = vadd.f32 %v3269_v38, %v12372_v11  ;;  %6974 = vmatprep.mubr.bf16.mxu1 %v12416_v7  ;;  %v3704_v52 = vmax.f32 %v3379_v57, 0.0  ;;  %v10503_v57 = vld [vmem:[#allocation14 + $0xc] ss:$28 sps:$4 sm:$0xff]  }
 0x38d   :  { %v3382_v49 = vpop.f32.mrf.mxu0  ;;  %v3273_v53 = vpop.f32.mrf.mxu1  ;;  %6975 = vmatmul.mubr.bf16.gmra.mxu1 %v12419_v55 }
 0x38e   :  { %v3383_v5 = vadd.f32 %v3382_v49, %v3270_v28  ;;  %7157 = vmatpush1.bf16.msra.mxu1 %v10483_v31  ;;  %v3711_v51 = vmax.f32 %v3381_v41, 0.0  ;;  %v3274_v13 = vadd.f32 %v3273_v53, %v12381_v3  ;;  %v10495_v31 = vld [vmem:[#allocation14 + $0x40] ss:$28 sps:$4 sm:$0xff]  }
 0x38f   :  { %v3386_v58 = vpop.f32.mrf.mxu0  ;;  %v3275_v15 = vpop.f32.mrf.mxu1  ;;  %7158 = vmatprep.subr.bf16.mxu1 %v10491_v24 }
 0x390   :  { %v3712_v9 = vmax.f32 %v3383_v5, 0.0  ;;  %v3276_v45 = vadd.f32 %v3275_v15, %v12372_v11  ;;  %v12429_v41 = vpack.c.bf16 %v3711_v51, %v3703_v54  ;;  %v3387_v53 = vadd.f32 %v3386_v58, %v3274_v13 }
 0x391   :  { %v3388_v56 = vpop.f32.mrf.mxu0  ;;  %v3277_v26 = vpop.f32.mrf.mxu1 }
 0x392   :  { %v12426_v27 = vpack.c.bf16 %v3712_v9, %v3704_v52  ;;  %v3278_v38 = vadd.f32 %v3277_v26, %v12381_v3  ;;  %7159 = vmatpush1.bf16.msra.mxu1 %v10489_v50  ;;  %14148 = vst [vmem:[#allocation60_spill] sm:$0xff] %v12429_v41  ;;  %v3389_v49 = vadd.f32 %v3388_v56, %v3276_v45  ;;  %v10501_v50 = vld [vmem:[#allocation14 + $0x8] ss:$28 sps:$4 sm:$0xff]  }
 0x393   :  { %v3390_v28 = vpop.f32.mrf.mxu0  ;;  %v3279_v24 = vpop.f32.mrf.mxu1  ;;  %7160 = vmatprep.subr.bf16.mxu1 %v10497_v39  ;;  %v10509_v39 = vld [vmem:[#allocation14 + $0x354] ss:$28 sps:$4 sm:$0xff]  }
 0x394   :  { %14147 = vst [vmem:[#allocation59_spill] sm:$0xff] %v12426_v27  ;;  %v3391_v5 = vadd.f32 %v3390_v28, %v3278_v38  ;;  %v3280_v1 = vadd.f32 %v3279_v24, %v12372_v11  ;;  %6984 = vmatprep.mubr.bf16.mxu1 %v12426_v27  ;;  %v3720_v12 = vmax.f32 %v3389_v49, 0.0  ;;  %v3719_v38 = vmax.f32 %v3387_v53, 0.0  ;;  %v10515_v49 = vld [vmem:[#allocation14 + $0x31c] ss:$28 sps:$4 sm:$0xff]  }
 0x395   :  { %v3392_v15 = vpop.f32.mrf.mxu0  ;;  %v3283_v52 = vpop.f32.mrf.mxu1  ;;  %6985 = vmatmul.mubr.bf16.gmra.mxu1 %v12429_v41 }
 0x396   :  { %v3393_v9 = vadd.f32 %v3392_v15, %v3280_v1  ;;  %7161 = vmatpush1.bf16.msra.mxu1 %v10495_v31  ;;  %v3727_v51 = vmax.f32 %v3391_v5, 0.0  ;;  %v3284_v28 = vadd.f32 %v3283_v52, %v12381_v3  ;;  %v10507_v31 = vld [vmem:[#allocation14 + $0x350] ss:$28 sps:$4 sm:$0xff]  }
 0x397   :  { %v3396_v54 = vpop.f32.mrf.mxu0  ;;  %v3285_v26 = vpop.f32.mrf.mxu1  ;;  %7162 = vmatprep.subr.bf16.mxu1 %v10503_v57 }
 0x398   :  { %v3728_v45 = vmax.f32 %v3393_v9, 0.0  ;;  %v3286_v56 = vadd.f32 %v3285_v26, %v12372_v11  ;;  %v12439_v5 = vpack.c.bf16 %v3727_v51, %v3719_v38  ;;  %v3397_v52 = vadd.f32 %v3396_v54, %v3284_v28 }
 0x399   :  { %v3398_v58 = vpop.f32.mrf.mxu0  ;;  %v3287_v13 = vpop.f32.mrf.mxu1 }
 0x39a   :  { %v12436_v24 = vpack.c.bf16 %v3728_v45, %v3720_v12  ;;  %v3288_v1 = vadd.f32 %v3287_v13, %v12381_v3  ;;  %7163 = vmatpush1.bf16.msra.mxu1 %v10501_v50  ;;  %14150 = vst [vmem:[#allocation62_spill] sm:$0xff] %v12439_v5  ;;  %v3399_v9 = vadd.f32 %v3398_v58, %v3286_v56  ;;  %v10513_v50 = vld [vmem:[#allocation14 + $0x318] ss:$28 sps:$4 sm:$0xff]  }
 0x39b   :  { %v3400_v15 = vpop.f32.mrf.mxu0  ;;  %v3289_v57 = vpop.f32.mrf.mxu1  ;;  %7164 = vmatprep.subr.bf16.mxu1 %v10509_v39  ;;  %v10521_v39 = vld [vmem:[#allocation14 + $0x2e4] ss:$28 sps:$4 sm:$0xff]  }
 0x39c   :  { %14149 = vst [vmem:[#allocation61_spill] sm:$0xff] %v12436_v24  ;;  %v3401_v62 = vadd.f32 %v3400_v15, %v3288_v1  ;;  %v3290_v53 = vadd.f32 %v3289_v57, %v12372_v11  ;;  %6994 = vmatprep.mubr.bf16.mxu1 %v12436_v24  ;;  %v3736_v18 = vmax.f32 %v3399_v9, 0.0  ;;  %v3735_v1 = vmax.f32 %v3397_v52, 0.0  ;;  %v10527_v9 = vld [vmem:[#allocation14 + $0x2ac] ss:$28 sps:$4 sm:$0xff]  }
 0x39d   :  { %v3402_v26 = vpop.f32.mrf.mxu0  ;;  %v3293_v12 = vpop.f32.mrf.mxu1  ;;  %6995 = vmatmul.mubr.bf16.gmra.mxu1 %v12439_v5 }
 0x39e   :  { %v3403_v45 = vadd.f32 %v3402_v26, %v3290_v53  ;;  %7165 = vmatpush2.bf16.msra.mxu1 %v10507_v31  ;;  %v3743_v51 = vmax.f32 %v3401_v62, 0.0  ;;  %v3294_v15 = vadd.f32 %v3293_v12, %v12381_v3  ;;  %v10519_v31 = vld [vmem:[#allocation14 + $0x2e0] ss:$28 sps:$4 sm:$0xff]  }
 0x39f   :  { %v3406_v38 = vpop.f32.mrf.mxu0  ;;  %v3295_v13 = vpop.f32.mrf.mxu1  ;;  %7166 = vmatprep.subr.bf16.mxu1 %v10515_v49 }
 0x3a0   :  { %v3744_v56 = vmax.f32 %v3403_v45, 0.0  ;;  %v3296_v58 = vadd.f32 %v3295_v13, %v12372_v11  ;;  %v12449_v62 = vpack.c.bf16 %v3743_v51, %v3735_v1  ;;  %v3407_v12 = vadd.f32 %v3406_v38, %v3294_v15 }
 0x3a1   :  { %v3408_v54 = vpop.f32.mrf.mxu0  ;;  %v3297_v28 = vpop.f32.mrf.mxu1 }
 0x3a2   :  { %v12446_v57 = vpack.c.bf16 %v3744_v56, %v3736_v18  ;;  %v3298_v53 = vadd.f32 %v3297_v28, %v12381_v3  ;;  %7167 = vmatpush2.bf16.msra.mxu1 %v10513_v50  ;;  %14152 = vst [vmem:[#allocation64_spill] sm:$0xff] %v12449_v62  ;;  %v3409_v45 = vadd.f32 %v3408_v54, %v3296_v58  ;;  %v10525_v50 = vld [vmem:[#allocation14 + $0x2a8] ss:$28 sps:$4 sm:$0xff]  }
 0x3a3   :  { %v3410_v26 = vpop.f32.mrf.mxu0  ;;  %v3299_v49 = vpop.f32.mrf.mxu1  ;;  %7168 = vmatprep.subr.bf16.mxu1 %v10521_v39  ;;  %v10533_v39 = vld [vmem:[#allocation14 + $0x274] ss:$28 sps:$4 sm:$0xff]  }
 0x3a4   :  { %14151 = vst [vmem:[#allocation63_spill] sm:$0xff] %v12446_v57  ;;  %v3411_v20 = vadd.f32 %v3410_v26, %v3298_v53  ;;  %v3300_v52 = vadd.f32 %v3299_v49, %v12372_v11  ;;  %7004 = vmatprep.mubr.bf16.mxu1 %v12446_v57  ;;  %v3752_v6 = vmax.f32 %v3409_v45, 0.0  ;;  %v1457_v53 = vsub.s32 7, %v14138_v46 }
 0x3a5   :  { %v3412_v13 = vpop.f32.mrf.mxu0  ;;  %v3303_v18 = vpop.f32.mrf.mxu1  ;;  %7005 = vmatmul.mubr.bf16.gmra.mxu1 %v12449_v62  ;;  %v3751_v26 = vmax.f32 %v3407_v12, 0.0 }
 0x3a6   :  { %v3413_v56 = vadd.f32 %v3412_v13, %v3300_v52  ;;  %7169 = vmatpush2.bf16.msra.mxu1 %v10519_v31  ;;  %v3759_v51 = vmax.f32 %v3411_v20, 0.0  ;;  %v3304_v38 = vadd.f32 %v3303_v18, %v12381_v3  ;;  %v12466_v52 = vrot.slane %v12376_v30, %v1457_v53 }
 0x3a7   :  { %v3416_v1 = vpop.f32.mrf.mxu0  ;;  %v3305_v28 = vpop.f32.mrf.mxu1  ;;  %7170 = vmatprep.subr.bf16.mxu1 %v10527_v9  ;;  %v10531_v9 = vld [vmem:[#allocation14 + $0x270] ss:$28 sps:$4 sm:$0xff]  }
 0x3a8   :  { %v3760_v58 = vmax.f32 %v3413_v56, 0.0  ;;  %v3306_v54 = vadd.f32 %v3305_v28, %v12372_v11  ;;  %v12461_v13 = vpack.c.bf16 %v3759_v51, %v3751_v26  ;;  %v10539_v28 = vld [vmem:[#allocation14 + $0x23c] ss:$28 sps:$4 sm:$0xff]  }
 0x3a9   :  { %v3418_v15 = vpop.f32.mrf.mxu0  ;;  %v3307_v49 = vpop.f32.mrf.mxu1 }
 0x3aa   :  { %v12458_v31 = vpack.c.bf16 %v3760_v58, %v3752_v6  ;;  %v3308_v20 = vadd.f32 %v3307_v49, %v12381_v3  ;;  %7171 = vmatpush2.bf16.msra.mxu1 %v10525_v50  ;;  %14154 = vst [vmem:[#allocation66_spill] sm:$0xff] %v12461_v13  ;;  %v3419_v40 = vadd.f32 %v3418_v15, %v3306_v54  ;;  %v14155_v3 = vsub.s32 6, %v14138_v46  ;;  %v10537_v54 = vld [vmem:[#allocation14 + $0x238] ss:$28 sps:$4 sm:$0xff]   ;;  %v10545_v49 = vld [vmem:[#allocation14 + $0x204] ss:$28 sps:$4 sm:$0xff]  }
 0x3ab   :  { %v3420_v45 = vpop.f32.mrf.mxu0  ;;  %v3309_v56 = vpop.f32.mrf.mxu1  ;;  %7172 = vmatprep.subr.bf16.mxu1 %v10533_v39  ;;  %v3417_v6 = vadd.f32 %v3416_v1, %v3304_v38 }
 0x3ac   :  { %14153 = vst [vmem:[#allocation65_spill] sm:$0xff] %v12458_v31  ;;  %v3421_v12 = vadd.f32 %v3420_v45, %v3308_v20  ;;  %v3310_v18 = vadd.f32 %v3309_v56, %v12372_v11  ;;  %7014 = vmatprep.mubr.bf16.mxu1 %v12458_v31  ;;  %v12471_v50 = vrot.slane %v12376_v30, %v14155_v3  ;;  %v3768_v53 = vmax.f32 %v3419_v40, 0.0  ;;  %v10551_v40 = vld [vmem:[#allocation14 + $0x1cc] ss:$28 sps:$4 sm:$0xff]  }
 0x3ad   :  { %v3422_v58 = vpop.f32.mrf.mxu0  ;;  %v3459_v51 = vpop.f32.mrf.mxu1  ;;  %7015 = vmatmul.mubr.bf16.gmra.mxu1 %v12461_v13  ;;  %v3767_v38 = vmax.f32 %v3417_v6, 0.0 }
 0x3ae   :  { %v3423_v39 = vadd.f32 %v3422_v58, %v3310_v18  ;;  %7173 = vmatpush2.bf16.msra.mxu1 %v10531_v9  ;;  %v3775_v26 = vmax.f32 %v3421_v12, 0.0  ;;  %v3460_v45 = vadd.f32 %v3459_v51, %v12471_v50  ;;  %v10543_v9 = vld [vmem:[#allocation14 + $0x200] ss:$28 sps:$4 sm:$0xff]  }
 0x3af   :  { %v3572_v11 = vpop.f32.mrf.mxu0  ;;  %v3461_v15 = vpop.f32.mrf.mxu1  ;;  %7174 = vmatprep.subr.bf16.mxu1 %v10539_v28 }
 0x3b0   :  { %v3776_v20 = vmax.f32 %v3423_v39, 0.0  ;;  %v3462_v1 = vadd.f32 %v3461_v15, %v12466_v52  ;;  %v12479_v12 = vpack.c.bf16 %v3775_v26, %v3767_v38  ;;  %v3573_v51 = vadd.f32 %v3572_v11, %v3460_v45  ;;  %v10549_v26 = vld [vmem:[#allocation14 + $0x1c8] ss:$28 sps:$4 sm:$0xff]  }
 0x3b1   :  { %v3574_v30 = vpop.f32.mrf.mxu0  ;;  %v3463_v56 = vpop.f32.mrf.mxu1 }
 0x3b2   :  { %v12476_v3 = vpack.c.bf16 %v3776_v20, %v3768_v53  ;;  %v3464_v18 = vadd.f32 %v3463_v56, %v12471_v50  ;;  %7175 = vmatpush2.bf16.msra.mxu1 %v10537_v54  ;;  %14157 = vst [vmem:[#allocation68_spill] sm:$0xff] %v12479_v12  ;;  %v3575_v39 = vadd.f32 %v3574_v30, %v3462_v1  ;;  %v14158_v54 = vld [vmem:[#allocation37_spill] sm:$0xff] }
 0x3b3   :  { %v3576_v58 = vpop.f32.mrf.mxu0  ;;  %v3465_v28 = vpop.f32.mrf.mxu1  ;;  %7176 = vmatprep.subr.bf16.mxu1 %v10545_v49  ;;  %v10557_v1 = vld [vmem:[#allocation14 + $0x894] ss:$28 sps:$4 sm:$0xff]  }
 0x3b4   :  { %14156 = vst [vmem:[#allocation67_spill] sm:$0xff] %v12476_v3  ;;  %v3577_v46 = vadd.f32 %v3576_v58, %v3464_v18  ;;  %v3466_v6 = vadd.f32 %v3465_v28, %v12466_v52  ;;  %7024 = vmatprep.mubr.bf16.mxu1 %v12476_v3  ;;  %v3658_v30 = vmax.f32 %v3575_v39, 0.0  ;;  %v3657_v28 = vmax.f32 %v3573_v51, 0.0  ;;  %v10560_v39 = vld [vmem:[#allocation14 + $0x4dc] ss:$28 sps:$4 sm:$0xff]  }
 0x3b5   :  { %v3578_v15 = vpop.f32.mrf.mxu0  ;;  %v3469_v53 = vpop.f32.mrf.mxu1  ;;  %7025 = vmatmul.mubr.bf16.gmra.mxu1 %v12479_v12 }
 0x3b6   :  { %v3579_v20 = vadd.f32 %v3578_v15, %v3466_v6  ;;  %7177 = vmatpush2.bf16.msra.mxu1 %v10543_v9  ;;  %7180 = vmatprep.mubr.bf16.mxu1 %v14158_v54  ;;  %v3665_v38 = vmax.f32 %v3577_v46, 0.0  ;;  %v3470_v11 = vadd.f32 %v3469_v53, %v12471_v50  ;;  %v10552_v6 = vld [vmem:[#allocation14 + $0x510] ss:$28 sps:$4 sm:$0xff]   ;;  %v10563_v53 = vld [vmem:[#allocation14 + $0x85c] ss:$28 sps:$4 sm:$0xff]  }
 0x3b7   :  { %v3582_v56 = vpop.f32.mrf.mxu0  ;;  %v3471_v49 = vpop.f32.mrf.mxu1  ;;  %7178 = vmatprep.subr.bf16.mxu1 %v10551_v40  ;;  %v10555_v54 = vld [vmem:[#allocation14 + $0x890] ss:$28 sps:$4 sm:$0xff]  }
 0x3b8   :  { %v3666_v18 = vmax.f32 %v3579_v20, 0.0  ;;  %v3472_v58 = vadd.f32 %v3471_v49, %v12466_v52  ;;  %v12490_v46 = vpack.c.bf16 %v3665_v38, %v3657_v28  ;;  %v14162_v38 = vld [vmem:[#allocation39_spill] sm:$0xff] }
 0x3b9   :  { %v3584_v45 = vpop.f32.mrf.mxu0  ;;  %v3473_v3 = vpop.f32.mrf.mxu1 }
 0x3ba   :  { %v12487_v12 = vpack.c.bf16 %v3666_v18, %v3658_v30  ;;  %v3474_v9 = vadd.f32 %v3473_v3, %v12471_v50  ;;  %7179 = vmatpush2.bf16.msra.mxu1 %v10549_v26  ;;  %14160 = vst [vmem:[#allocation70_spill] sm:$0xff] %v12490_v46  ;;  %v3585_v20 = vadd.f32 %v3584_v45, %v3472_v58  ;;  %v14161_v3 = vld [vmem:[#allocation38_spill] sm:$0xff] }
 0x3bb   :  { %v3586_v15 = vpop.f32.mrf.mxu0  ;;  %v3475_v40 = vpop.f32.mrf.mxu1  ;;  %7374 = vmatprep.subr.bf16.mxu1 %v10557_v1  ;;  %v3583_v30 = vadd.f32 %v3582_v56, %v3470_v11  ;;  %v10558_v1 = vld [vmem:[#allocation14 + $0x4d8] ss:$28 sps:$4 sm:$0xff]  }
 0x3bc   :  { %14159 = vst [vmem:[#allocation69_spill] sm:$0xff] %v12487_v12  ;;  %v3587_v49 = vadd.f32 %v3586_v15, %v3474_v9  ;;  %v3476_v51 = vadd.f32 %v3475_v40, %v12466_v52  ;;  %7067 = vmatprep.mubr.bf16.mxu0 %v12487_v12  ;;  %v10561_v9 = vld [vmem:[#allocation14 + $0x858] ss:$28 sps:$4 sm:$0xff]   ;;  %v10566_v15 = vld [vmem:[#allocation14 + $0x4a4] ss:$28 sps:$4 sm:$0xff]   ;;  %v3674_v40 = vmax.f32 %v3585_v20, 0.0 }
 0x3bd   :  { %v3588_v18 = vpop.f32.mrf.mxu0  ;;  %v3479_v13 = vpop.f32.mrf.mxu1  ;;  %7068 = vmatmul.mubr.bf16.vlgmr.msra.gmra.mxu0 %v12490_v46  ;;  %7181 = vmatmul.mubr.bf16.vlgmr.msra.gmra.mxu1 %v14161_v3  ;;  %v10569_v46 = vld [vmem:[#allocation14 + $0x824] ss:$28 sps:$4 sm:$0xff]   ;;  %v3673_v12 = vmax.f32 %v3583_v30, 0.0 }
 0x3be   :  { %v3589_v26 = vadd.f32 %v3588_v18, %v3476_v51  ;;  %7262 = vmatpush1.bf16.msra.mxu0 %v10552_v6  ;;  %7190 = vmatprep.mubr.bf16.mxu1 %v14162_v38  ;;  %v3681_v28 = vmax.f32 %v3587_v49, 0.0  ;;  %v3480_v51 = vadd.f32 %v3479_v13, %v12471_v50 }
 0x3bf   :  { %v3592_v58 = vpop.f32.mrf.mxu0  ;;  %7375 = vmatpush1.bf16.msra.mxu1 %v10555_v54  ;;  %v3481_v45 = vpop.f32.mrf.mxu1  ;;  %7263 = vmatprep.subr.bf16.mxu0 %v10560_v39  ;;  %v10564_v54 = vld [vmem:[#allocation14 + $0x4a0] ss:$28 sps:$4 sm:$0xff]  }
 0x3c0   :  { %v3682_v56 = vmax.f32 %v3589_v26, 0.0  ;;  %v3482_v11 = vadd.f32 %v3481_v45, %v12466_v52  ;;  %7376 = vmatprep.subr.bf16.mxu1 %v10563_v53  ;;  %v12502_v39 = vpack.c.bf16 %v3681_v28, %v3673_v12  ;;  %v10567_v26 = vld [vmem:[#allocation14 + $0x820] ss:$28 sps:$4 sm:$0xff]   ;;  %v10572_v53 = vld [vmem:[#allocation14 + $0x46c] ss:$28 sps:$4 sm:$0xff]  }
 0x3c1   :  { %v3594_v6 = vpop.f32.mrf.mxu0  ;;  %v3483_v18 = vpop.f32.mrf.mxu1  ;;  %v10570_v28 = vld [vmem:[#allocation14 + $0x468] ss:$28 sps:$4 sm:$0xff]  }
 0x3c2   :  { %v12499_v38 = vpack.c.bf16 %v3682_v56, %v3674_v40  ;;  %v3484_v49 = vadd.f32 %v3483_v18, %v12471_v50  ;;  %7264 = vmatpush1.bf16.msra.mxu0 %v10558_v1  ;;  %14164 = vst [vmem:[#allocation72_spill] sm:$0xff] %v12502_v39  ;;  %v3595_v45 = vadd.f32 %v3594_v6, %v3482_v11  ;;  %v10575_v40 = vld [vmem:[#allocation14 + $0x7ec] ss:$28 sps:$4 sm:$0xff]  }
 0x3c3   :  { %v3596_v3 = vpop.f32.mrf.mxu0  ;;  %7377 = vmatpush1.bf16.msra.mxu1 %v10561_v9  ;;  %v3485_v20 = vpop.f32.mrf.mxu1  ;;  %7265 = vmatprep.subr.bf16.mxu0 %v10566_v15  ;;  %v3593_v56 = vadd.f32 %v3592_v58, %v3480_v51  ;;  %v10573_v11 = vld [vmem:[#allocation14 + $0x7e8] ss:$28 sps:$4 sm:$0xff]  }
 0x3c4   :  { %14163 = vst [vmem:[#allocation71_spill] sm:$0xff] %v12499_v38  ;;  %v3597_v30 = vadd.f32 %v3596_v3, %v3484_v49  ;;  %v3486_v13 = vadd.f32 %v3485_v20, %v12466_v52  ;;  %7077 = vmatprep.mubr.bf16.mxu0 %v12499_v38  ;;  %7378 = vmatprep.subr.bf16.mxu1 %v10569_v46  ;;  %v10578_v46 = vld [vmem:[#allocation14 + $0x434] ss:$28 sps:$4 sm:$0xff]   ;;  %v3690_v6 = vmax.f32 %v3595_v45, 0.0 }
 0x3c5   :  { %v3598_v18 = vpop.f32.mrf.mxu0  ;;  %v3489_v1 = vpop.f32.mrf.mxu1  ;;  %7078 = vmatmul.mubr.bf16.gmra.mxu0 %v12502_v39  ;;  %7191 = vmatmul.mubr.bf16.gmra.mxu1 %v12203_v47  ;;  %v10581_v49 = vld [vmem:[#allocation14 + $0x7b4] ss:$28 sps:$4 sm:$0xff]   ;;  %v3689_v20 = vmax.f32 %v3593_v56, 0.0 }
 0x3c6   :  { %v3599_v12 = vadd.f32 %v3598_v18, %v3486_v13  ;;  %7266 = vmatpush1.bf16.msra.mxu0 %v10564_v54  ;;  %7200 = vmatprep.mubr.bf16.mxu1 %v12209_v34  ;;  %v3697_v9 = vmax.f32 %v3597_v30, 0.0  ;;  %v3490_v13 = vadd.f32 %v3489_v1, %v12471_v50 }
 0x3c7   :  { %v3602_v3 = vpop.f32.mrf.mxu0  ;;  %7379 = vmatpush1.bf16.msra.mxu1 %v10567_v26  ;;  %v3491_v15 = vpop.f32.mrf.mxu1  ;;  %7267 = vmatprep.subr.bf16.mxu0 %v10572_v53  ;;  %v10576_v26 = vld [vmem:[#allocation14 + $0x430] ss:$28 sps:$4 sm:$0xff]  }
 0x3c8   :  { %v3698_v58 = vmax.f32 %v3599_v12, 0.0  ;;  %v3492_v51 = vadd.f32 %v3491_v15, %v12466_v52  ;;  %7380 = vmatprep.subr.bf16.mxu1 %v10575_v40  ;;  %v12514_v53 = vpack.c.bf16 %v3697_v9, %v3689_v20  ;;  %v10579_v12 = vld [vmem:[#allocation14 + $0x7b0] ss:$28 sps:$4 sm:$0xff]   ;;  %v10584_v40 = vld [vmem:[#allocation14 + $0x3fc] ss:$28 sps:$4 sm:$0xff]  }
 0x3c9   :  { %v3604_v54 = vpop.f32.mrf.mxu0  ;;  %v3493_v18 = vpop.f32.mrf.mxu1  ;;  %v10585_v20 = vld [vmem:[#allocation14 + $0x778] ss:$28 sps:$4 sm:$0xff]  }
 0x3ca   :  { %v12511_v34 = vpack.c.bf16 %v3698_v58, %v3690_v6  ;;  %v3494_v30 = vadd.f32 %v3493_v18, %v12471_v50  ;;  %7268 = vmatpush1.bf16.msra.mxu0 %v10570_v28  ;;  %14166 = vst [vmem:[#allocation74_spill] sm:$0xff] %v12514_v53  ;;  %v3605_v15 = vadd.f32 %v3604_v54, %v3492_v51  ;;  %v10587_v6 = vld [vmem:[#allocation14 + $0x77c] ss:$28 sps:$4 sm:$0xff]  }
 0x3cb   :  { %v3606_v47 = vpop.f32.mrf.mxu0  ;;  %7381 = vmatpush1.bf16.msra.mxu1 %v10573_v11  ;;  %v3495_v45 = vpop.f32.mrf.mxu1  ;;  %7269 = vmatprep.subr.bf16.mxu0 %v10578_v46  ;;  %v3603_v58 = vadd.f32 %v3602_v3, %v3490_v13  ;;  %v10582_v11 = vld [vmem:[#allocation14 + $0x3f8] ss:$28 sps:$4 sm:$0xff]  }
 0x3cc   :  { %14165 = vst [vmem:[#allocation73_spill] sm:$0xff] %v12511_v34  ;;  %v3607_v56 = vadd.f32 %v3606_v47, %v3494_v30  ;;  %v3496_v1 = vadd.f32 %v3495_v45, %v12466_v52  ;;  %7087 = vmatprep.mubr.bf16.mxu0 %v12511_v34  ;;  %7382 = vmatprep.subr.bf16.mxu1 %v10581_v49  ;;  %v10590_v49 = vld [vmem:[#allocation14 + $0x3c4] ss:$28 sps:$4 sm:$0xff]   ;;  %v3706_v54 = vmax.f32 %v3605_v15, 0.0 }
 0x3cd   :  { %v3608_v18 = vpop.f32.mrf.mxu0  ;;  %v3499_v28 = vpop.f32.mrf.mxu1  ;;  %7088 = vmatmul.mubr.bf16.gmra.mxu0 %v12514_v53  ;;  %7201 = vmatmul.mubr.bf16.gmra.mxu1 %v12229_v17  ;;  %v10593_v30 = vld [vmem:[#allocation14 + $0x744] ss:$28 sps:$4 sm:$0xff]   ;;  %v3705_v45 = vmax.f32 %v3603_v58, 0.0 }
 0x3ce   :  { %v3609_v9 = vadd.f32 %v3608_v18, %v3496_v1  ;;  %7270 = vmatpush1.bf16.msra.mxu0 %v10576_v26  ;;  %7210 = vmatprep.mubr.bf16.mxu1 %v12231_v21  ;;  %v3713_v46 = vmax.f32 %v3607_v56, 0.0  ;;  %v3500_v1 = vadd.f32 %v3499_v28, %v12471_v50 }
 0x3cf   :  { %v3612_v47 = vpop.f32.mrf.mxu0  ;;  %7383 = vmatpush1.bf16.msra.mxu1 %v10579_v12  ;;  %v3501_v51 = vpop.f32.mrf.mxu1  ;;  %7271 = vmatprep.subr.bf16.mxu0 %v10584_v40  ;;  %v10588_v12 = vld [vmem:[#allocation14 + $0x3c0] ss:$28 sps:$4 sm:$0xff]  }
 0x3d0   :  { %v3714_v3 = vmax.f32 %v3609_v9, 0.0  ;;  %v3502_v13 = vadd.f32 %v3501_v51, %v12466_v52  ;;  %7384 = vmatprep.subr.bf16.mxu1 %v10587_v6  ;;  %v12526_v40 = vpack.c.bf16 %v3713_v46, %v3705_v45  ;;  %v10591_v9 = vld [vmem:[#allocation14 + $0x740] ss:$28 sps:$4 sm:$0xff]   ;;  %v10596_v6 = vld [vmem:[#allocation14 + $0x38c] ss:$28 sps:$4 sm:$0xff]  }
 0x3d1   :  { %v3614_v26 = vpop.f32.mrf.mxu0  ;;  %v3503_v18 = vpop.f32.mrf.mxu1  ;;  %v10597_v45 = vld [vmem:[#allocation14 + $0x708] ss:$28 sps:$4 sm:$0xff]  }
 0x3d2   :  { %v12523_v21 = vpack.c.bf16 %v3714_v3, %v3706_v54  ;;  %v3504_v56 = vadd.f32 %v3503_v18, %v12471_v50  ;;  %7272 = vmatpush1.bf16.msra.mxu0 %v10582_v11  ;;  %14168 = vst [vmem:[#allocation76_spill] sm:$0xff] %v12526_v40  ;;  %v3615_v51 = vadd.f32 %v3614_v26, %v3502_v13  ;;  %v10599_v54 = vld [vmem:[#allocation14 + $0x70c] ss:$28 sps:$4 sm:$0xff]  }
 0x3d3   :  { %v3616_v17 = vpop.f32.mrf.mxu0  ;;  %7385 = vmatpush1.bf16.msra.mxu1 %v10585_v20  ;;  %v3505_v15 = vpop.f32.mrf.mxu1  ;;  %7273 = vmatprep.subr.bf16.mxu0 %v10590_v49  ;;  %v3613_v3 = vadd.f32 %v3612_v47, %v3500_v1  ;;  %v10594_v20 = vld [vmem:[#allocation14 + $0x388] ss:$28 sps:$4 sm:$0xff]  }
 0x3d4   :  { %14167 = vst [vmem:[#allocation75_spill] sm:$0xff] %v12523_v21  ;;  %v3617_v58 = vadd.f32 %v3616_v17, %v3504_v56  ;;  %v3506_v28 = vadd.f32 %v3505_v15, %v12466_v52  ;;  %7097 = vmatprep.mubr.bf16.mxu0 %v12523_v21  ;;  %7386 = vmatprep.subr.bf16.mxu1 %v10593_v30  ;;  %v10602_v30 = vld [vmem:[#allocation14 + $0x6d4] ss:$28 sps:$4 sm:$0xff]   ;;  %v3722_v26 = vmax.f32 %v3615_v51, 0.0 }
 0x3d5   :  { %v3618_v18 = vpop.f32.mrf.mxu0  ;;  %v3509_v11 = vpop.f32.mrf.mxu1  ;;  %7098 = vmatmul.mubr.bf16.gmra.mxu0 %v12526_v40  ;;  %7211 = vmatmul.mubr.bf16.gmra.mxu1 %v12245_v61  ;;  %v10605_v56 = vld [vmem:[#allocation14 + $0xa54] ss:$28 sps:$4 sm:$0xff]   ;;  %v3721_v15 = vmax.f32 %v3613_v3, 0.0 }
 0x3d6   :  { %v3619_v46 = vadd.f32 %v3618_v18, %v3506_v28  ;;  %7274 = vmatpush1.bf16.msra.mxu0 %v10588_v12  ;;  %7220 = vmatprep.mubr.bf16.mxu1 %v12255_v10  ;;  %v3729_v49 = vmax.f32 %v3617_v58, 0.0  ;;  %v3510_v28 = vadd.f32 %v3509_v11, %v12471_v50 }
 0x3d7   :  { %v3622_v17 = vpop.f32.mrf.mxu0  ;;  %7387 = vmatpush1.bf16.msra.mxu1 %v10591_v9  ;;  %v3511_v13 = vpop.f32.mrf.mxu1  ;;  %7275 = vmatprep.subr.bf16.mxu0 %v10596_v6  ;;  %v10600_v9 = vld [vmem:[#allocation14 + $0x6d0] ss:$28 sps:$4 sm:$0xff]  }
 0x3d8   :  { %v3730_v47 = vmax.f32 %v3619_v46, 0.0  ;;  %v3512_v1 = vadd.f32 %v3511_v13, %v12466_v52  ;;  %7388 = vmatprep.subr.bf16.mxu1 %v10599_v54  ;;  %v12538_v6 = vpack.c.bf16 %v3729_v49, %v3721_v15  ;;  %v10603_v46 = vld [vmem:[#allocation14 + $0xa50] ss:$28 sps:$4 sm:$0xff]   ;;  %v10608_v54 = vld [vmem:[#allocation14 + $0x69c] ss:$28 sps:$4 sm:$0xff]  }
 0x3d9   :  { %v3624_v12 = vpop.f32.mrf.mxu0  ;;  %v3513_v18 = vpop.f32.mrf.mxu1  ;;  %v10609_v15 = vld [vmem:[#allocation14 + $0xa18] ss:$28 sps:$4 sm:$0xff]  }
 0x3da   :  { %v12535_v10 = vpack.c.bf16 %v3730_v47, %v3722_v26  ;;  %v3514_v58 = vadd.f32 %v3513_v18, %v12471_v50  ;;  %7276 = vmatpush1.bf16.msra.mxu0 %v10594_v20  ;;  %14170 = vst [vmem:[#allocation78_spill] sm:$0xff] %v12538_v6  ;;  %v3625_v13 = vadd.f32 %v3624_v12, %v3512_v1  ;;  %v10611_v26 = vld [vmem:[#allocation14 + $0xa1c] ss:$28 sps:$4 sm:$0xff]  }
 0x3db   :  { %v3626_v61 = vpop.f32.mrf.mxu0  ;;  %7389 = vmatpush1.bf16.msra.mxu1 %v10597_v45  ;;  %v3515_v51 = vpop.f32.mrf.mxu1  ;;  %7277 = vmatprep.subr.bf16.mxu0 %v10602_v30  ;;  %v3623_v47 = vadd.f32 %v3622_v17, %v3510_v28  ;;  %v10606_v45 = vld [vmem:[#allocation14 + $0x698] ss:$28 sps:$4 sm:$0xff]  }
 0x3dc   :  { %14169 = vst [vmem:[#allocation77_spill] sm:$0xff] %v12535_v10  ;;  %v3627_v3 = vadd.f32 %v3626_v61, %v3514_v58  ;;  %v3516_v11 = vadd.f32 %v3515_v51, %v12466_v52  ;;  %7107 = vmatprep.mubr.bf16.mxu0 %v12535_v10  ;;  %7390 = vmatprep.subr.bf16.mxu1 %v10605_v56  ;;  %v10614_v56 = vld [vmem:[#allocation14 + $0x664] ss:$28 sps:$4 sm:$0xff]   ;;  %v3738_v12 = vmax.f32 %v3625_v13, 0.0 }
 0x3dd   :  { %v3628_v18 = vpop.f32.mrf.mxu0  ;;  %v3519_v20 = vpop.f32.mrf.mxu1  ;;  %7108 = vmatmul.mubr.bf16.gmra.mxu0 %v12538_v6  ;;  %7221 = vmatmul.mubr.bf16.gmra.mxu1 %v12280_v16  ;;  %v10617_v58 = vld [vmem:[#allocation14 + $0x9e4] ss:$28 sps:$4 sm:$0xff]   ;;  %v3737_v51 = vmax.f32 %v3623_v47, 0.0 }
 0x3de   :  { %v3629_v49 = vadd.f32 %v3628_v18, %v3516_v11  ;;  %7278 = vmatpush2.bf16.msra.mxu0 %v10600_v9  ;;  %7230 = vmatprep.mubr.bf16.mxu1 %v12286_v33  ;;  %v3745_v30 = vmax.f32 %v3627_v3, 0.0  ;;  %v3520_v11 = vadd.f32 %v3519_v20, %v12471_v50 }
 0x3df   :  { %v3632_v61 = vpop.f32.mrf.mxu0  ;;  %7391 = vmatpush2.bf16.msra.mxu1 %v10603_v46  ;;  %v3521_v1 = vpop.f32.mrf.mxu1  ;;  %7279 = vmatprep.subr.bf16.mxu0 %v10608_v54  ;;  %v10612_v46 = vld [vmem:[#allocation14 + $0x660] ss:$28 sps:$4 sm:$0xff]  }
 0x3e0   :  { %v3746_v17 = vmax.f32 %v3629_v49, 0.0  ;;  %v3522_v28 = vadd.f32 %v3521_v1, %v12466_v52  ;;  %7392 = vmatprep.subr.bf16.mxu1 %v10611_v26  ;;  %v12550_v54 = vpack.c.bf16 %v3745_v30, %v3737_v51  ;;  %v10615_v49 = vld [vmem:[#allocation14 + $0x9e0] ss:$28 sps:$4 sm:$0xff]   ;;  %v10620_v26 = vld [vmem:[#allocation14 + $0x62c] ss:$28 sps:$4 sm:$0xff]  }
 0x3e1   :  { %v3634_v9 = vpop.f32.mrf.mxu0  ;;  %v3523_v18 = vpop.f32.mrf.mxu1  ;;  %v10621_v51 = vld [vmem:[#allocation14 + $0x9a8] ss:$28 sps:$4 sm:$0xff]  }
 0x3e2   :  { %v12547_v33 = vpack.c.bf16 %v3746_v17, %v3738_v12  ;;  %v3524_v3 = vadd.f32 %v3523_v18, %v12471_v50  ;;  %7280 = vmatpush2.bf16.msra.mxu0 %v10606_v45  ;;  %14172 = vst [vmem:[#allocation80_spill] sm:$0xff] %v12550_v54  ;;  %v3635_v1 = vadd.f32 %v3634_v9, %v3522_v28  ;;  %v10623_v12 = vld [vmem:[#allocation14 + $0x9ac] ss:$28 sps:$4 sm:$0xff]  }
 0x3e3   :  { %v3636_v16 = vpop.f32.mrf.mxu0  ;;  %7393 = vmatpush2.bf16.msra.mxu1 %v10609_v15  ;;  %v3525_v13 = vpop.f32.mrf.mxu1  ;;  %7281 = vmatprep.subr.bf16.mxu0 %v10614_v56  ;;  %v3633_v17 = vadd.f32 %v3632_v61, %v3520_v11  ;;  %v10618_v15 = vld [vmem:[#allocation14 + $0x628] ss:$28 sps:$4 sm:$0xff]  }
 0x3e4   :  { %14171 = vst [vmem:[#allocation79_spill] sm:$0xff] %v12547_v33  ;;  %v3637_v47 = vadd.f32 %v3636_v16, %v3524_v3  ;;  %v3526_v20 = vadd.f32 %v3525_v13, %v12466_v52  ;;  %7117 = vmatprep.mubr.bf16.mxu0 %v12547_v33  ;;  %7394 = vmatprep.subr.bf16.mxu1 %v10617_v58  ;;  %v10626_v58 = vld [vmem:[#allocation14 + $0x5f4] ss:$28 sps:$4 sm:$0xff]   ;;  %v3754_v9 = vmax.f32 %v3635_v1, 0.0 }
 0x3e5   :  { %v3638_v18 = vpop.f32.mrf.mxu0  ;;  %v3529_v45 = vpop.f32.mrf.mxu1  ;;  %7118 = vmatmul.mubr.bf16.gmra.mxu0 %v12550_v54  ;;  %7231 = vmatmul.mubr.bf16.gmra.mxu1 %v12303_v63  ;;  %v10629_v3 = vld [vmem:[#allocation14 + $0x974] ss:$28 sps:$4 sm:$0xff]   ;;  %v3753_v13 = vmax.f32 %v3633_v17, 0.0 }
 0x3e6   :  { %v3639_v30 = vadd.f32 %v3638_v18, %v3526_v20  ;;  %7282 = vmatpush2.bf16.msra.mxu0 %v10612_v46  ;;  %7240 = vmatprep.mubr.bf16.mxu1 %v12314_v0  ;;  %v3761_v56 = vmax.f32 %v3637_v47, 0.0  ;;  %v3530_v20 = vadd.f32 %v3529_v45, %v12471_v50 }
 0x3e7   :  { %v3642_v16 = vpop.f32.mrf.mxu0  ;;  %7395 = vmatpush2.bf16.msra.mxu1 %v10615_v49  ;;  %v3531_v28 = vpop.f32.mrf.mxu1  ;;  %7283 = vmatprep.subr.bf16.mxu0 %v10620_v26  ;;  %v10624_v49 = vld [vmem:[#allocation14 + $0x5f0] ss:$28 sps:$4 sm:$0xff]  }
 0x3e8   :  { %v3762_v61 = vmax.f32 %v3639_v30, 0.0  ;;  %v3532_v11 = vadd.f32 %v3531_v28, %v12466_v52  ;;  %7396 = vmatprep.subr.bf16.mxu1 %v10623_v12  ;;  %v12562_v26 = vpack.c.bf16 %v3761_v56, %v3753_v13  ;;  %v10627_v30 = vld [vmem:[#allocation14 + $0x970] ss:$28 sps:$4 sm:$0xff]   ;;  %v10632_v12 = vld [vmem:[#allocation14 + $0x5bc] ss:$28 sps:$4 sm:$0xff]  }
 0x3e9   :  { %v3644_v46 = vpop.f32.mrf.mxu0  ;;  %v3533_v18 = vpop.f32.mrf.mxu1  ;;  %v10641_v13 = vld [vmem:[#allocation14 + $0x904] ss:$28 sps:$4 sm:$0xff]  }
 0x3ea   :  { %v12559_v0 = vpack.c.bf16 %v3762_v61, %v3754_v9  ;;  %v3534_v47 = vadd.f32 %v3533_v18, %v12471_v50  ;;  %7284 = vmatpush2.bf16.msra.mxu0 %v10618_v15  ;;  %14174 = vst [vmem:[#allocation82_spill] sm:$0xff] %v12562_v26  ;;  %v3645_v28 = vadd.f32 %v3644_v46, %v3532_v11  ;;  %v10635_v9 = vld [vmem:[#allocation14 + $0x93c] ss:$28 sps:$4 sm:$0xff]   ;;  %v10638_v11 = vld [vmem:[#allocation14 + $0x584] ss:$28 sps:$4 sm:$0xff]  }
 0x3eb   :  { %v3646_v63 = vpop.f32.mrf.mxu0  ;;  %7397 = vmatpush2.bf16.msra.mxu1 %v10621_v51  ;;  %v3535_v1 = vpop.f32.mrf.mxu1  ;;  %7285 = vmatprep.subr.bf16.mxu0 %v10626_v58  ;;  %v3643_v61 = vadd.f32 %v3642_v16, %v3530_v20  ;;  %v10630_v51 = vld [vmem:[#allocation14 + $0x5b8] ss:$28 sps:$4 sm:$0xff]  }
 0x3ec   :  { %14173 = vst [vmem:[#allocation81_spill] sm:$0xff] %v12559_v0  ;;  %v3647_v17 = vadd.f32 %v3646_v63, %v3534_v47  ;;  %v3536_v45 = vadd.f32 %v3535_v1, %v12466_v52  ;;  %7127 = vmatprep.mubr.bf16.mxu0 %v12559_v0  ;;  %7398 = vmatprep.subr.bf16.mxu1 %v10629_v3  ;;  %v10633_v58 = vld [vmem:[#allocation14 + $0x938] ss:$28 sps:$4 sm:$0xff]   ;;  %v3770_v16 = vmax.f32 %v3645_v28, 0.0  ;;  %v10636_v47 = vld [vmem:[#allocation14 + $0x580] ss:$28 sps:$4 sm:$0xff]  }
 0x3ed   :  { %v3648_v50 = vpop.f32.mrf.mxu0  ;;  %v12566_v15 = vpop.f32.mrf.mxu1  ;;  %7128 = vmatmul.mubr.bf16.gmra.mxu0 %v12562_v26  ;;  %7241 = vmatmul.mubr.bf16.gmra.mxu1 %v12331_v60  ;;  %v3769_v20 = vmax.f32 %v3643_v61, 0.0  ;;  %v10647_v28 = vld [vmem:[#allocation14 + $0x8cc] ss:$28 sps:$4 sm:$0xff]  }
 0x3ee   :  { %v3649_v56 = vadd.f32 %v3648_v50, %v3536_v45  ;;  %7286 = vmatpush2.bf16.msra.mxu0 %v10624_v49  ;;  %7250 = vmatprep.mubr.bf16.mxu1 %v12337_v42  ;;  %v3777_v63 = vmax.f32 %v3647_v17, 0.0  ;;  %v10642_v45 = vld [vmem:[#allocation14 + $0x548] ss:$28 sps:$4 sm:$0xff]   ;;  %v10650_v50 = vld [vmem:[#allocation14 + $0xc14] ss:$28 sps:$4 sm:$0xff]  }
 0x3ef   :  { %7399 = vmatpush2.bf16.msra.mxu1 %v10627_v30  ;;  %v12571_v52 = vpop.f32.mrf.mxu1  ;;  %7287 = vmatprep.subr.bf16.mxu0 %v10632_v12  ;;  %v10639_v30 = vld [vmem:[#allocation14 + $0x900] ss:$28 sps:$4 sm:$0xff]   ;;  %v10644_v12 = vld [vmem:[#allocation14 + $0x54c] ss:$28 sps:$4 sm:$0xff]  }
 0x3f0   :  { %v3778_v3 = vmax.f32 %v3649_v56, 0.0  ;;  %7400 = vmatprep.subr.bf16.mxu1 %v10635_v9  ;;  %v12577_v49 = vpack.c.bf16 %v3777_v63, %v3769_v20  ;;  %v10645_v61 = vld [vmem:[#allocation14 + $0x8c8] ss:$28 sps:$4 sm:$0xff]   ;;  %v10653_v56 = vld [vmem:[#allocation14 + $0x19c] ss:$28 sps:$4 sm:$0xff]  }
 0x3f1   :  { %v12573_v46 = vpop.f32.mrf.mxu1  ;;  %v10648_v63 = vld [vmem:[#allocation14 + $0xc10] ss:$28 sps:$4 sm:$0xff]   ;;  %v10654_v20 = vld [vmem:[#allocation14 + $0xbd8] ss:$28 sps:$4 sm:$0xff]  }
 0x3f2   :  { %v12575_v18 = vpack.c.bf16 %v3778_v3, %v3770_v16  ;;  %7288 = vmatpush2.bf16.msra.mxu0 %v10630_v51  ;;  %14176 = vst [vmem:[#allocation84_spill] sm:$0xff] %v12577_v49  ;;  %v10656_v16 = vld [vmem:[#allocation14 + $0xbdc] ss:$28 sps:$4 sm:$0xff]  }
 0x3f3   :  { %7401 = vmatpush2.bf16.msra.mxu1 %v10633_v58  ;;  %v12579_v1 = vpop.f32.mrf.mxu1  ;;  %7289 = vmatprep.subr.bf16.mxu0 %v10638_v11  ;;  %v10651_v11 = vld [vmem:[#allocation14 + $0x198] ss:$28 sps:$4 sm:$0xff]  }
 0x3f4   :  { %14175 = vst [vmem:[#allocation83_spill] sm:$0xff] %v12575_v18  ;;  %7137 = vmatprep.mubr.bf16.mxu0 %v12575_v18  ;;  %7402 = vmatprep.subr.bf16.mxu1 %v10641_v13  ;;  %v10659_v13 = vld [vmem:[#allocation14 + $0x164] ss:$28 sps:$4 sm:$0xff]  }
 0x3f5   :  { %v12582_v17 = vpop.f32.mrf.mxu1  ;;  %7138 = vmatmul.mubr.bf16.gmra.mxu0 %v12577_v49  ;;  %7251 = vmatmul.mubr.bf16.gmra.mxu1 %v12352_v25 }
 0x3f6   :  { %7290 = vmatpush2.bf16.msra.mxu0 %v10636_v47  ;;  %7293 = vmatprep.mubr.bf16.mxu0 %v12226_v44 }
 0x3f7   :  { %7403 = vmatpush2.bf16.msra.mxu1 %v10639_v30  ;;  %7406 = vmatprep.mubr.bf16.mxu1 %v12396_v2  ;;  %v12588_v9 = vpop.f32.mrf.mxu1 }
 0x3f8   :  { %7291 = vmatprep.subr.bf16.mxu0 %v10644_v12  ;;  %7404 = vmatprep.subr.bf16.mxu1 %v10647_v28  ;;  %v10662_v12 = vld [vmem:[#allocation14 + $0xba4] ss:$28 sps:$4 sm:$0xff]  }
 0x3f9   :  { %v12590_v51 = vpop.f32.mrf.mxu1  ;;  %v10657_v28 = vld [vmem:[#allocation14 + $0x160] ss:$28 sps:$4 sm:$0xff]  }
 0x3fa   :  { %14177 = vst [vmem:[#allocation85_spill] sm:$0xff] %v12590_v51  ;;  %7292 = vmatpush2.bf16.msra.mxu0 %v10642_v45 }
 0x3fb   :  { %7405 = vmatpush2.bf16.msra.mxu1 %v10645_v61  ;;  %v12592_v58 = vpop.f32.mrf.mxu1  ;;  %7487 = vmatprep.subr.bf16.mxu0 %v10650_v50  ;;  %v10665_v61 = vld [vmem:[#allocation14 + $0x12c] ss:$28 sps:$4 sm:$0xff]   ;;  %v10660_v50 = vld [vmem:[#allocation14 + $0xba0] ss:$28 sps:$4 sm:$0xff]  }
 0x3fc   :  { %14178 = vst [vmem:[#allocation86_spill] sm:$0xff] %v12592_v58  ;;  %7600 = vmatprep.subr.bf16.mxu1 %v10653_v56  ;;  %v10668_v58 = vld [vmem:[#allocation14 + $0xb6c] ss:$28 sps:$4 sm:$0xff]  }
 0x3fd   :  { %v12594_v3 = vpop.f32.mrf.mxu1  ;;  %7294 = vmatmul.mubr.bf16.vlgmr.msra.gmra.mxu0 %v12233_v14  ;;  %v12598_v47 = vpop.f32.mrf.mxu0 }
 0x3fe   :  { %14179 = vst [vmem:[#allocation87_spill] sm:$0xff] %v12594_v3  ;;  %7407 = vmatmul.mubr.bf16.vlgmr.msra.gmra.mxu1 %v12399_v43  ;;  %7488 = vmatpush1.bf16.msra.mxu0 %v10648_v63  ;;  %v10663_v3 = vld [vmem:[#allocation14 + $0x128] ss:$28 sps:$4 sm:$0xff]  }
 0x3ff   :  { %7303 = vmatprep.mubr.bf16.mxu0 %v12257_v4  ;;  %7416 = vmatprep.mubr.bf16.mxu1 %v12406_v35  ;;  %v12602_v30 = vpop.f32.mrf.mxu1  ;;  %v12606_v56 = vpop.f32.mrf.mxu0 }
 0x400   :  { %14180 = vst [vmem:[#allocation88_spill] sm:$0xff] %v12602_v30  ;;  %7601 = vmatpush1.bf16.msra.mxu1 %v10651_v11  ;;  %7489 = vmatprep.subr.bf16.mxu0 %v10656_v16  ;;  %v10671_v11 = vld [vmem:[#allocation14 + $0xf4] ss:$28 sps:$4 sm:$0xff]   ;;  %v10666_v16 = vld [vmem:[#allocation14 + $0xb68] ss:$28 sps:$4 sm:$0xff]  }
 0x401   :  { %v12604_v45 = vpop.f32.mrf.mxu1  ;;  %7602 = vmatprep.subr.bf16.mxu1 %v10659_v13  ;;  %v12614_v13 = vpop.f32.mrf.mxu0  ;;  %v10675_v30 = vld [vmem:[#allocation14 + $0xb8] ss:$28 sps:$4 sm:$0xff]  }
 0x402   :  { %14181 = vst [vmem:[#allocation89_spill] sm:$0xff] %v12604_v45  ;;  %7490 = vmatpush1.bf16.msra.mxu0 %v10654_v20 }
 0x403   :  { %v12608_v63 = vpop.f32.mrf.mxu1  ;;  %7491 = vmatprep.subr.bf16.mxu0 %v10662_v12  ;;  %v10674_v12 = vld [vmem:[#allocation14 + $0xb34] ss:$28 sps:$4 sm:$0xff]  }
 0x404   :  { %14182 = vst [vmem:[#allocation90_spill] sm:$0xff] %v12608_v63  ;;  %7603 = vmatpush1.bf16.msra.mxu1 %v10657_v28  ;;  %v10669_v28 = vld [vmem:[#allocation14 + $0xf0] ss:$28 sps:$4 sm:$0xff]  }
 0x405   :  { %v12610_v51 = vpop.f32.mrf.mxu1  ;;  %7304 = vmatmul.mubr.bf16.gmra.mxu0 %v12263_v19  ;;  %7604 = vmatprep.subr.bf16.mxu1 %v10665_v61  ;;  %v10677_v61 = vld [vmem:[#allocation14 + $0xbc] ss:$28 sps:$4 sm:$0xff]   ;;  %v10672_v63 = vld [vmem:[#allocation14 + $0xb30] ss:$28 sps:$4 sm:$0xff]  }
 0x406   :  { %14183 = vst [vmem:[#allocation91_spill] sm:$0xff] %v12610_v51  ;;  %7417 = vmatmul.mubr.bf16.gmra.mxu1 %v12409_v22  ;;  %7492 = vmatpush1.bf16.msra.mxu0 %v10660_v50  ;;  %v12622_v50 = vpop.f32.mrf.mxu0 }
 0x407   :  { %7313 = vmatprep.mubr.bf16.mxu0 %v12283_v59  ;;  %7426 = vmatprep.mubr.bf16.mxu1 %v12416_v7  ;;  %v12618_v20 = vpop.f32.mrf.mxu1  ;;  %v10680_v7 = vld [vmem:[#allocation14 + $0xafc] ss:$28 sps:$4 sm:$0xff]  }
 0x408   :  { %14184 = vst [vmem:[#allocation92_spill] sm:$0xff] %v12618_v20  ;;  %7605 = vmatpush1.bf16.msra.mxu1 %v10663_v3  ;;  %7493 = vmatprep.subr.bf16.mxu0 %v10668_v58  ;;  %v10683_v58 = vld [vmem:[#allocation14 + $0x84] ss:$28 sps:$4 sm:$0xff]   ;;  %v10678_v3 = vld [vmem:[#allocation14 + $0xaf8] ss:$28 sps:$4 sm:$0xff]  }
 0x409   :  { %v12620_v51 = vpop.f32.mrf.mxu1  ;;  %7606 = vmatprep.subr.bf16.mxu1 %v10671_v11  ;;  %v12630_v11 = vpop.f32.mrf.mxu0  ;;  %v10687_v20 = vld [vmem:[#allocation14 + $0x48] ss:$28 sps:$4 sm:$0xff]  }
 0x40a   :  { %14185 = vst [vmem:[#allocation93_spill] sm:$0xff] %v12620_v51  ;;  %7494 = vmatpush1.bf16.msra.mxu0 %v10666_v16 }
 0x40b   :  { %v12624_v45 = vpop.f32.mrf.mxu1  ;;  %7495 = vmatprep.subr.bf16.mxu0 %v10674_v12  ;;  %v10686_v12 = vld [vmem:[#allocation14 + $0xac4] ss:$28 sps:$4 sm:$0xff]  }
 0x40c   :  { %14186 = vst [vmem:[#allocation94_spill] sm:$0xff] %v12624_v45  ;;  %7607 = vmatpush1.bf16.msra.mxu1 %v10669_v28  ;;  %v10681_v28 = vld [vmem:[#allocation14 + $0x80] ss:$28 sps:$4 sm:$0xff]  }
 0x40d   :  { %v12626_v22 = vpop.f32.mrf.mxu1  ;;  %7314 = vmatmul.mubr.bf16.gmra.mxu0 %v12289_v37  ;;  %7608 = vmatprep.subr.bf16.mxu1 %v10677_v61  ;;  %v10689_v61 = vld [vmem:[#allocation14 + $0x4c] ss:$28 sps:$4 sm:$0xff]   ;;  %v10684_v45 = vld [vmem:[#allocation14 + $0xac0] ss:$28 sps:$4 sm:$0xff]  }
 0x40e   :  { %14187 = vst [vmem:[#allocation95_spill] sm:$0xff] %v12626_v22  ;;  %7427 = vmatmul.mubr.bf16.gmra.mxu1 %v12419_v55  ;;  %7496 = vmatpush1.bf16.msra.mxu0 %v10672_v63  ;;  %v12638_v63 = vpop.f32.mrf.mxu0 }
 0x40f   :  { %7323 = vmatprep.mubr.bf16.mxu0 %v12311_v23  ;;  %7436 = vmatprep.mubr.bf16.mxu1 %v12426_v27  ;;  %v12634_v16 = vpop.f32.mrf.mxu1  ;;  %v10692_v27 = vld [vmem:[#allocation14 + $0xa8c] ss:$28 sps:$4 sm:$0xff]  }
 0x410   :  { %14188 = vst [vmem:[#allocation96_spill] sm:$0xff] %v12634_v16  ;;  %7609 = vmatpush1.bf16.msra.mxu1 %v10675_v30  ;;  %7497 = vmatprep.subr.bf16.mxu0 %v10680_v7  ;;  %v10695_v7 = vld [vmem:[#allocation14 + $0x14] ss:$28 sps:$4 sm:$0xff]   ;;  %v10690_v30 = vld [vmem:[#allocation14 + $0xa88] ss:$28 sps:$4 sm:$0xff]  }
 0x411   :  { %v12636_v22 = vpop.f32.mrf.mxu1  ;;  %7610 = vmatprep.subr.bf16.mxu1 %v10683_v58  ;;  %v12646_v58 = vpop.f32.mrf.mxu0  ;;  %v10699_v16 = vld [vmem:[#allocation14 + $0x358] ss:$28 sps:$4 sm:$0xff]  }
 0x412   :  { %14189 = vst [vmem:[#allocation97_spill] sm:$0xff] %v12636_v22  ;;  %7498 = vmatpush1.bf16.msra.mxu0 %v10678_v3 }
 0x413   :  { %v12640_v51 = vpop.f32.mrf.mxu1  ;;  %7499 = vmatprep.subr.bf16.mxu0 %v10686_v12  ;;  %v10698_v12 = vld [vmem:[#allocation14 + $0xdd4] ss:$28 sps:$4 sm:$0xff]  }
 0x414   :  { %14190 = vst [vmem:[#allocation98_spill] sm:$0xff] %v12640_v51  ;;  %7611 = vmatpush1.bf16.msra.mxu1 %v10681_v28  ;;  %v10693_v28 = vld [vmem:[#allocation14 + $0x10] ss:$28 sps:$4 sm:$0xff]  }
 0x415   :  { %v12642_v55 = vpop.f32.mrf.mxu1  ;;  %7324 = vmatmul.mubr.bf16.gmra.mxu0 %v12317_v8  ;;  %7612 = vmatprep.subr.bf16.mxu1 %v10689_v61  ;;  %v10701_v61 = vld [vmem:[#allocation14 + $0x35c] ss:$28 sps:$4 sm:$0xff]   ;;  %v10696_v51 = vld [vmem:[#allocation14 + $0xdd0] ss:$28 sps:$4 sm:$0xff]  }
 0x416   :  { %14191 = vst [vmem:[#allocation99_spill] sm:$0xff] %v12642_v55  ;;  %7437 = vmatmul.mubr.bf16.gmra.mxu1 %v12429_v41  ;;  %7500 = vmatpush1.bf16.msra.mxu0 %v10684_v45  ;;  %v12654_v45 = vpop.f32.mrf.mxu0  ;;  %v14213_v41 = vld [vmem:[#allocation37_spill] sm:$0xff] }
 0x417   :  { %7333 = vmatprep.mubr.bf16.mxu0 %v12333_v36  ;;  %7446 = vmatprep.mubr.bf16.mxu1 %v12436_v24  ;;  %v12650_v3 = vpop.f32.mrf.mxu1  ;;  %v10704_v24 = vld [vmem:[#allocation14 + $0xd9c] ss:$28 sps:$4 sm:$0xff]  }
 0x418   :  { %14192 = vst [vmem:[#allocation100_spill] sm:$0xff] %v12650_v3  ;;  %7613 = vmatpush1.bf16.msra.mxu1 %v10687_v20  ;;  %7501 = vmatprep.subr.bf16.mxu0 %v10692_v27  ;;  %v10707_v20 = vld [vmem:[#allocation14 + $0x324] ss:$28 sps:$4 sm:$0xff]   ;;  %v10702_v27 = vld [vmem:[#allocation14 + $0xd98] ss:$28 sps:$4 sm:$0xff]  }
 0x419   :  { %v12652_v55 = vpop.f32.mrf.mxu1  ;;  %7614 = vmatprep.subr.bf16.mxu1 %v10695_v7  ;;  %v12660_v7 = vpop.f32.mrf.mxu0  ;;  %v10711_v3 = vld [vmem:[#allocation14 + $0x2e8] ss:$28 sps:$4 sm:$0xff]  }
 0x41a   :  { %14193 = vst [vmem:[#allocation101_spill] sm:$0xff] %v12652_v55  ;;  %7502 = vmatpush1.bf16.msra.mxu0 %v10690_v30 }
 0x41b   :  { %v12656_v22 = vpop.f32.mrf.mxu1  ;;  %7503 = vmatprep.subr.bf16.mxu0 %v10698_v12  ;;  %v10710_v12 = vld [vmem:[#allocation14 + $0xd64] ss:$28 sps:$4 sm:$0xff]   ;;  %v12666_v55 = vpop.f32.mrf.mxu0 }
 0x41c   :  { %14194 = vst [vmem:[#allocation102_spill] sm:$0xff] %v12656_v22  ;;  %7615 = vmatpush1.bf16.msra.mxu1 %v10693_v28  ;;  %v10705_v28 = vld [vmem:[#allocation14 + $0x320] ss:$28 sps:$4 sm:$0xff]   ;;  %v10713_v22 = vld [vmem:[#allocation14 + $0x2ec] ss:$28 sps:$4 sm:$0xff]  }
 0x41d   :  { %7334 = vmatmul.mubr.bf16.gmra.mxu0 %v12339_v32  ;;  %7616 = vmatprep.subr.bf16.mxu1 %v10701_v61  ;;  %v12662_v30 = vpop.f32.mrf.mxu1  ;;  %v10708_v61 = vld [vmem:[#allocation14 + $0xd60] ss:$28 sps:$4 sm:$0xff]  }
 0x41e   :  { %7447 = vmatmul.mubr.bf16.gmra.mxu1 %v12439_v5  ;;  %7504 = vmatpush2.bf16.msra.mxu0 %v10696_v51  ;;  %14195 = vst [vmem:[#allocation103_spill] sm:$0xff] %v12662_v30  ;;  %v10716_v30 = vld [vmem:[#allocation14 + $0xd2c] ss:$28 sps:$4 sm:$0xff]   ;;  %v14208_v32 = vld [vmem:[#allocation54_spill] sm:$0xff] }
 0x41f   :  { %7343 = vmatprep.mubr.bf16.mxu0 %v12349_v29  ;;  %7456 = vmatprep.mubr.bf16.mxu1 %v12446_v57  ;;  %v12668_v51 = vpop.f32.mrf.mxu1  ;;  %v10719_v57 = vld [vmem:[#allocation14 + $0x2b4] ss:$28 sps:$4 sm:$0xff]   ;;  %v14200_v5 = vld [vmem:[#allocation52_spill] sm:$0xff]  ;;  %v14205_v29 = vld [vmem:[#allocation67_spill] sm:$0xff] }
 0x420   :  { %7617 = vmatpush2.bf16.msra.mxu1 %v10699_v16  ;;  %7505 = vmatprep.subr.bf16.mxu0 %v10704_v24  ;;  %14196 = vst [vmem:[#allocation104_spill] sm:$0xff] %v12668_v51  ;;  %v10714_v24 = vld [vmem:[#allocation14 + $0xd28] ss:$28 sps:$4 sm:$0xff]   ;;  %v12672_v16 = vpop.f32.mrf.mxu0  ;;  %v10725_v51 = vld [vmem:[#allocation14 + $0x27c] ss:$28 sps:$4 sm:$0xff]  }
 0x421   :  { %7618 = vmatprep.subr.bf16.mxu1 %v10707_v20  ;;  %v12674_v20 = vpop.f32.mrf.mxu1 }
 0x422   :  { %7506 = vmatpush2.bf16.msra.mxu0 %v10702_v27  ;;  %14197 = vst [vmem:[#allocation105_spill] sm:$0xff] %v12674_v20  ;;  %v14198_v27 = vld [vmem:[#allocation51_spill] sm:$0xff]  ;;  %v10728_v20 = vld [vmem:[#allocation14 + $0xcbc] ss:$28 sps:$4 sm:$0xff]  }
 0x423   :  { %7507 = vmatprep.subr.bf16.mxu0 %v10710_v12  ;;  %v10722_v12 = vld [vmem:[#allocation14 + $0xcf4] ss:$28 sps:$4 sm:$0xff]  }
 0x424   :  { %7619 = vmatpush2.bf16.msra.mxu1 %v10705_v28  ;;  %v10717_v28 = vld [vmem:[#allocation14 + $0x2b0] ss:$28 sps:$4 sm:$0xff]  }
 0x425   :  { %7344 = vmatmul.mubr.bf16.gmra.mxu0 %v12354_v48  ;;  %7620 = vmatprep.subr.bf16.mxu1 %v10713_v22  ;;  %v10720_v22 = vld [vmem:[#allocation14 + $0xcf0] ss:$28 sps:$4 sm:$0xff]   ;;  %v12678_v48 = vpop.f32.mrf.mxu0 }
 0x426   :  { %7457 = vmatmul.mubr.bf16.gmra.mxu1 %v12449_v62  ;;  %7508 = vmatpush2.bf16.msra.mxu0 %v10708_v61  ;;  %v12680_v61 = vpop.f32.mrf.mxu1  ;;  %v10723_v62 = vld [vmem:[#allocation14 + $0x278] ss:$28 sps:$4 sm:$0xff]  }
 0x427   :  { %7353 = vmatprep.mubr.bf16.mxu0 %v14198_v27  ;;  %7466 = vmatprep.mubr.bf16.mxu1 %v12458_v31  ;;  %14199 = vst [vmem:[#allocation106_spill] sm:$0xff] %v12680_v61  ;;  %v10731_v31 = vld [vmem:[#allocation14 + $0x244] ss:$28 sps:$4 sm:$0xff]   ;;  %v14201_v27 = vld [vmem:[#allocation66_spill] sm:$0xff] }
 0x428   :  { %7621 = vmatpush2.bf16.msra.mxu1 %v10711_v3  ;;  %7509 = vmatprep.subr.bf16.mxu0 %v10716_v30  ;;  %v10726_v3 = vld [vmem:[#allocation14 + $0xcb8] ss:$28 sps:$4 sm:$0xff]   ;;  %v12686_v30 = vpop.f32.mrf.mxu1 }
 0x429   :  { %7622 = vmatprep.subr.bf16.mxu1 %v10719_v57  ;;  %v12684_v57 = vpop.f32.mrf.mxu0  ;;  %14203 = vst [vmem:[#allocation108_spill] sm:$0xff] %v12686_v30  ;;  %v10740_v30 = vld [vmem:[#allocation14 + $0xc4c] ss:$28 sps:$4 sm:$0xff]  }
 0x42a   :  { %7510 = vmatpush2.bf16.msra.mxu0 %v10714_v24  ;;  %14202 = vst [vmem:[#allocation107_spill] sm:$0xff] %v12684_v57  ;;  %v14204_v24 = vld [vmem:[#allocation53_spill] sm:$0xff] }
 0x42b   :  { %7511 = vmatprep.subr.bf16.mxu0 %v10722_v12  ;;  %v10734_v12 = vld [vmem:[#allocation14 + $0xc84] ss:$28 sps:$4 sm:$0xff]   ;;  %v12690_v61 = vpop.f32.mrf.mxu0 }
 0x42c   :  { %7623 = vmatpush2.bf16.msra.mxu1 %v10717_v28  ;;  %v10729_v28 = vld [vmem:[#allocation14 + $0x240] ss:$28 sps:$4 sm:$0xff]   ;;  %14206 = vst [vmem:[#allocation109_spill] sm:$0xff] %v12690_v61 }
 0x42d   :  { %7354 = vmatmul.mubr.bf16.gmra.mxu0 %v14200_v5  ;;  %7624 = vmatprep.subr.bf16.mxu1 %v10725_v51  ;;  %v10737_v5 = vld [vmem:[#allocation14 + $0x20c] ss:$28 sps:$4 sm:$0xff]   ;;  %v10732_v51 = vld [vmem:[#allocation14 + $0xc80] ss:$28 sps:$4 sm:$0xff]  }
 0x42e   :  { %7467 = vmatmul.mubr.bf16.gmra.mxu1 %v14201_v27  ;;  %7512 = vmatpush2.bf16.msra.mxu0 %v10720_v22  ;;  %v12692_v22 = vpop.f32.mrf.mxu1  ;;  %v10735_v27 = vld [vmem:[#allocation14 + $0x208] ss:$28 sps:$4 sm:$0xff]   ;;  %v10777_v61 = vld [vmem:[#allocation14 + $0x780] ss:$28 sps:$4 sm:$0xff]  }
 0x42f   :  { %7363 = vmatprep.mubr.bf16.mxu0 %v14204_v24  ;;  %7476 = vmatprep.mubr.bf16.mxu1 %v14205_v29  ;;  %14207 = vst [vmem:[#allocation110_spill] sm:$0xff] %v12692_v22  ;;  %v10743_v29 = vld [vmem:[#allocation14 + $0x1d4] ss:$28 sps:$4 sm:$0xff]   ;;  %v14209_v24 = vld [vmem:[#allocation68_spill] sm:$0xff] }
 0x430   :  { %7625 = vmatpush2.bf16.msra.mxu1 %v10723_v62  ;;  %7513 = vmatprep.subr.bf16.mxu0 %v10728_v20  ;;  %v10738_v62 = vld [vmem:[#allocation14 + $0xc48] ss:$28 sps:$4 sm:$0xff]   ;;  %v12698_v20 = vpop.f32.mrf.mxu1 }
 0x431   :  { %7626 = vmatprep.subr.bf16.mxu1 %v10731_v31  ;;  %v12696_v31 = vpop.f32.mrf.mxu0  ;;  %14211 = vst [vmem:[#allocation112_spill] sm:$0xff] %v12698_v20  ;;  %v10747_v20 = vld [vmem:[#allocation14 + $0x898] ss:$28 sps:$4 sm:$0xff]  }
 0x432   :  { %7514 = vmatpush2.bf16.msra.mxu0 %v10726_v3  ;;  %14210 = vst [vmem:[#allocation111_spill] sm:$0xff] %v12696_v31  ;;  %v14212_v3 = vld [vmem:[#allocation69_spill] sm:$0xff] }
 0x433   :  { %7515 = vmatprep.subr.bf16.mxu0 %v10734_v12  ;;  %v10746_v12 = vld [vmem:[#allocation14 + $0x51c] ss:$28 sps:$4 sm:$0xff]   ;;  %v12702_v22 = vpop.f32.mrf.mxu0  ;;  %v10765_v31 = vld [vmem:[#allocation14 + $0x7f0] ss:$28 sps:$4 sm:$0xff]  }
 0x434   :  { %7627 = vmatpush2.bf16.msra.mxu1 %v10729_v28  ;;  %v10741_v28 = vld [vmem:[#allocation14 + $0x1d0] ss:$28 sps:$4 sm:$0xff]   ;;  %14214 = vst [vmem:[#allocation113_spill] sm:$0xff] %v12702_v22 }
 0x435   :  { %7364 = vmatmul.mubr.bf16.gmra.mxu0 %v14208_v32  ;;  %7628 = vmatprep.subr.bf16.mxu1 %v10737_v5  ;;  %v10749_v32 = vld [vmem:[#allocation14 + $0x89c] ss:$28 sps:$4 sm:$0xff]  }
 0x436   :  { %7477 = vmatmul.mubr.bf16.gmra.mxu1 %v14209_v24  ;;  %7516 = vmatpush2.bf16.msra.mxu0 %v10732_v51  ;;  %v10744_v5 = vld [vmem:[#allocation14 + $0x518] ss:$28 sps:$4 sm:$0xff]   ;;  %v12704_v51 = vpop.f32.mrf.mxu1  ;;  %v10752_v24 = vld [vmem:[#allocation14 + $0x4e4] ss:$28 sps:$4 sm:$0xff]  }
 0x437   :  { %7519 = vmatprep.mubr.bf16.mxu0 %v14212_v3  ;;  %7632 = vmatprep.mubr.bf16.mxu1 %v14213_v41  ;;  %14215 = vst [vmem:[#allocation114_spill] sm:$0xff] %v12704_v51  ;;  %v14216_v3 = vld [vmem:[#allocation70_spill] sm:$0xff] }
 0x438   :  { %7629 = vmatpush2.bf16.msra.mxu1 %v10735_v27  ;;  %7517 = vmatprep.subr.bf16.mxu0 %v10740_v30  ;;  %v10755_v27 = vld [vmem:[#allocation14 + $0x864] ss:$28 sps:$4 sm:$0xff]   ;;  %v12710_v30 = vpop.f32.mrf.mxu0 }
 0x439   :  { %7630 = vmatprep.subr.bf16.mxu1 %v10743_v29  ;;  %v10750_v29 = vld [vmem:[#allocation14 + $0x4e0] ss:$28 sps:$4 sm:$0xff]   ;;  %14217 = vst [vmem:[#allocation115_spill] sm:$0xff] %v12710_v30  ;;  %v10759_v30 = vld [vmem:[#allocation14 + $0x828] ss:$28 sps:$4 sm:$0xff]  }
 0x43a   :  { %7518 = vmatpush2.bf16.msra.mxu0 %v10738_v62  ;;  %v14218_v62 = vld [vmem:[#allocation38_spill] sm:$0xff] }
 0x43b   :  { %7713 = vmatprep.subr.bf16.mxu0 %v10746_v12  ;;  %v10758_v12 = vld [vmem:[#allocation14 + $0x4ac] ss:$28 sps:$4 sm:$0xff]   ;;  %v10753_v51 = vld [vmem:[#allocation14 + $0x860] ss:$28 sps:$4 sm:$0xff]  }
 0x43c   :  { %7631 = vmatpush2.bf16.msra.mxu1 %v10741_v28  ;;  %v14219_v28 = vld [vmem:[#allocation39_spill] sm:$0xff] }
 0x43d   :  { %v12706_v36 = vpop.f32.mrf.mxu1  ;;  %7520 = vmatmul.mubr.bf16.vlgmr.msra.gmra.mxu0 %v14216_v3  ;;  %7826 = vmatprep.subr.bf16.mxu1 %v10749_v32  ;;  %v10761_v32 = vld [vmem:[#allocation14 + $0x82c] ss:$28 sps:$4 sm:$0xff]  }
 0x43e   :  { %7714 = vmatpush1.bf16.msra.mxu0 %v10744_v5  ;;  %7529 = vmatprep.mubr.bf16.mxu0 %v12499_v38  ;;  %v10756_v5 = vld [vmem:[#allocation14 + $0x4a8] ss:$28 sps:$4 sm:$0xff]   ;;  %v12718_v38 = vpop.f32.mrf.mxu0 }
 0x43f   :  { %7633 = vmatmul.mubr.bf16.vlgmr.msra.gmra.mxu1 %v14218_v62  ;;  %v12713_v41 = vpop.f32.mrf.mxu1  ;;  %7715 = vmatprep.subr.bf16.mxu0 %v10752_v24  ;;  %14220 = vst [vmem:[#allocation116_spill] sm:$0xff] %v12718_v38  ;;  %v10764_v62 = vld [vmem:[#allocation14 + $0x474] ss:$28 sps:$4 sm:$0xff]  }
 0x440   :  { %7642 = vmatprep.mubr.bf16.mxu1 %v14219_v28  ;;  %7827 = vmatpush1.bf16.msra.mxu1 %v10747_v20  ;;  %v10767_v20 = vld [vmem:[#allocation14 + $0x7f4] ss:$28 sps:$4 sm:$0xff]   ;;  %v14222_v28 = vld [vmem:[#allocation40_spill] sm:$0xff] }
 0x441   :  { %v12716_v22 = vpop.f32.mrf.mxu1  ;;  %7828 = vmatprep.subr.bf16.mxu1 %v10755_v27  ;;  %v10762_v27 = vld [vmem:[#allocation14 + $0x470] ss:$28 sps:$4 sm:$0xff]  }
 0x442   :  { %7716 = vmatpush1.bf16.msra.mxu0 %v10750_v29  ;;  %v12726_v29 = vpop.f32.mrf.mxu0 }
 0x443   :  { %v12720_v3 = vpop.f32.mrf.mxu1  ;;  %7717 = vmatprep.subr.bf16.mxu0 %v10758_v12  ;;  %14221 = vst [vmem:[#allocation117_spill] sm:$0xff] %v12726_v29  ;;  %v10770_v12 = vld [vmem:[#allocation14 + $0x43c] ss:$28 sps:$4 sm:$0xff]  }
 0x444   :  { %7829 = vmatpush1.bf16.msra.mxu1 %v10753_v51  ;;  %v14223_v51 = vld [vmem:[#allocation41_spill] sm:$0xff] }
 0x445   :  { %v12722_v24 = vpop.f32.mrf.mxu1  ;;  %7530 = vmatmul.mubr.bf16.gmra.mxu0 %v12502_v39  ;;  %7830 = vmatprep.subr.bf16.mxu1 %v10761_v32  ;;  %v10773_v32 = vld [vmem:[#allocation14 + $0x7bc] ss:$28 sps:$4 sm:$0xff]  }
 0x446   :  { %7718 = vmatpush1.bf16.msra.mxu0 %v10756_v5  ;;  %7539 = vmatprep.mubr.bf16.mxu0 %v12511_v34  ;;  %v10768_v5 = vld [vmem:[#allocation14 + $0x438] ss:$28 sps:$4 sm:$0xff]   ;;  %v12734_v34 = vpop.f32.mrf.mxu0 }
 0x447   :  { %7643 = vmatmul.mubr.bf16.gmra.mxu1 %v14222_v28  ;;  %v12729_v38 = vpop.f32.mrf.mxu1  ;;  %7719 = vmatprep.subr.bf16.mxu0 %v10764_v62  ;;  %14224 = vst [vmem:[#allocation118_spill] sm:$0xff] %v12734_v34  ;;  %v10776_v28 = vld [vmem:[#allocation14 + $0x404] ss:$28 sps:$4 sm:$0xff]   ;;  %v10771_v29 = vld [vmem:[#allocation14 + $0x7b8] ss:$28 sps:$4 sm:$0xff]  }
 0x448   :  { %7652 = vmatprep.mubr.bf16.mxu1 %v14223_v51  ;;  %7831 = vmatpush1.bf16.msra.mxu1 %v10759_v30  ;;  %v10779_v30 = vld [vmem:[#allocation14 + $0x784] ss:$28 sps:$4 sm:$0xff]  }
 0x449   :  { %v12732_v8 = vpop.f32.mrf.mxu1  ;;  %7832 = vmatprep.subr.bf16.mxu1 %v10767_v20  ;;  %v10774_v20 = vld [vmem:[#allocation14 + $0x400] ss:$28 sps:$4 sm:$0xff]  }
 0x44a   :  { %7720 = vmatpush1.bf16.msra.mxu0 %v10762_v27  ;;  %v12742_v27 = vpop.f32.mrf.mxu0  ;;  %v14226_v51 = vld [vmem:[#allocation43_spill] sm:$0xff] }
 0x44b   :  { %v12736_v39 = vpop.f32.mrf.mxu1  ;;  %7721 = vmatprep.subr.bf16.mxu0 %v10770_v12  ;;  %14225 = vst [vmem:[#allocation119_spill] sm:$0xff] %v12742_v27  ;;  %v10782_v12 = vld [vmem:[#allocation14 + $0x3cc] ss:$28 sps:$4 sm:$0xff]  }
 0x44c   :  { %7833 = vmatpush1.bf16.msra.mxu1 %v10765_v31  ;;  %v14227_v31 = vld [vmem:[#allocation44_spill] sm:$0xff] }
 0x44d   :  { %v12738_v62 = vpop.f32.mrf.mxu1  ;;  %7540 = vmatmul.mubr.bf16.gmra.mxu0 %v12514_v53  ;;  %7834 = vmatprep.subr.bf16.mxu1 %v10773_v32  ;;  %v10785_v32 = vld [vmem:[#allocation14 + $0x74c] ss:$28 sps:$4 sm:$0xff]  }
 0x44e   :  { %7722 = vmatpush1.bf16.msra.mxu0 %v10768_v5  ;;  %7549 = vmatprep.mubr.bf16.mxu0 %v12523_v21  ;;  %v10780_v5 = vld [vmem:[#allocation14 + $0x3c8] ss:$28 sps:$4 sm:$0xff]   ;;  %v12750_v21 = vpop.f32.mrf.mxu0 }
 0x44f   :  { %7653 = vmatmul.mubr.bf16.gmra.mxu1 %v14226_v51  ;;  %v12745_v34 = vpop.f32.mrf.mxu1  ;;  %7723 = vmatprep.subr.bf16.mxu0 %v10776_v28  ;;  %14228 = vst [vmem:[#allocation120_spill] sm:$0xff] %v12750_v21  ;;  %v10788_v51 = vld [vmem:[#allocation14 + $0x394] ss:$28 sps:$4 sm:$0xff]   ;;  %v10783_v27 = vld [vmem:[#allocation14 + $0x748] ss:$28 sps:$4 sm:$0xff]  }
 0x450   :  { %7662 = vmatprep.mubr.bf16.mxu1 %v14227_v31  ;;  %7835 = vmatpush1.bf16.msra.mxu1 %v10771_v29  ;;  %v10791_v29 = vld [vmem:[#allocation14 + $0x714] ss:$28 sps:$4 sm:$0xff]  }
 0x451   :  { %v12748_v57 = vpop.f32.mrf.mxu1  ;;  %7836 = vmatprep.subr.bf16.mxu1 %v10779_v30  ;;  %v10786_v30 = vld [vmem:[#allocation14 + $0x390] ss:$28 sps:$4 sm:$0xff]  }
 0x452   :  { %7724 = vmatpush1.bf16.msra.mxu0 %v10774_v20  ;;  %v12758_v20 = vpop.f32.mrf.mxu0  ;;  %v14232_v31 = vld [vmem:[#allocation45_spill] sm:$0xff] }
 0x453   :  { %v12752_v53 = vpop.f32.mrf.mxu1  ;;  %7725 = vmatprep.subr.bf16.mxu0 %v10782_v12  ;;  %14231 = vst [vmem:[#allocation123_spill] sm:$0xff] %v12758_v20  ;;  %v10794_v12 = vld [vmem:[#allocation14 + $0x6dc] ss:$28 sps:$4 sm:$0xff]  }
 0x454   :  { %14229 = vst [vmem:[#allocation121_spill] sm:$0xff] %v12752_v53  ;;  %7837 = vmatpush1.bf16.msra.mxu1 %v10777_v61  ;;  %v14233_v61 = vld [vmem:[#allocation46_spill] sm:$0xff] }
 0x455   :  { %v12754_v28 = vpop.f32.mrf.mxu1  ;;  %7550 = vmatmul.mubr.bf16.gmra.mxu0 %v12526_v40  ;;  %7838 = vmatprep.subr.bf16.mxu1 %v10785_v32  ;;  %v10797_v32 = vld [vmem:[#allocation14 + $0xa5c] ss:$28 sps:$4 sm:$0xff]  }
 0x456   :  { %14230 = vst [vmem:[#allocation122_spill] sm:$0xff] %v12754_v28  ;;  %7726 = vmatpush1.bf16.msra.mxu0 %v10780_v5  ;;  %7559 = vmatprep.mubr.bf16.mxu0 %v12535_v10  ;;  %v10789_v28 = vld [vmem:[#allocation14 + $0x710] ss:$28 sps:$4 sm:$0xff]   ;;  %v10792_v5 = vld [vmem:[#allocation14 + $0x6d8] ss:$28 sps:$4 sm:$0xff]   ;;  %v12766_v10 = vpop.f32.mrf.mxu0 }
 0x457   :  { %7663 = vmatmul.mubr.bf16.gmra.mxu1 %v14232_v31  ;;  %v12761_v21 = vpop.f32.mrf.mxu1  ;;  %7727 = vmatprep.subr.bf16.mxu0 %v10788_v51  ;;  %14234 = vst [vmem:[#allocation124_spill] sm:$0xff] %v12766_v10  ;;  %v10800_v31 = vld [vmem:[#allocation14 + $0x6a4] ss:$28 sps:$4 sm:$0xff]   ;;  %v10795_v20 = vld [vmem:[#allocation14 + $0xa58] ss:$28 sps:$4 sm:$0xff]  }
 0x458   :  { %7672 = vmatprep.mubr.bf16.mxu1 %v14233_v61  ;;  %7839 = vmatpush1.bf16.msra.mxu1 %v10783_v27  ;;  %v10803_v27 = vld [vmem:[#allocation14 + $0xa24] ss:$28 sps:$4 sm:$0xff]   ;;  %v14238_v61 = vld [vmem:[#allocation32_spill] sm:$0xff] }
 0x459   :  { %v12764_v53 = vpop.f32.mrf.mxu1  ;;  %7840 = vmatprep.subr.bf16.mxu1 %v10791_v29  ;;  %v10798_v29 = vld [vmem:[#allocation14 + $0x6a0] ss:$28 sps:$4 sm:$0xff]  }
 0x45a   :  { %7728 = vmatpush1.bf16.msra.mxu0 %v10786_v30  ;;  %v12774_v30 = vpop.f32.mrf.mxu0 }
 0x45b   :  { %v12768_v40 = vpop.f32.mrf.mxu1  ;;  %7729 = vmatprep.subr.bf16.mxu0 %v10794_v12  ;;  %14237 = vst [vmem:[#allocation127_spill] sm:$0xff] %v12774_v30  ;;  %v10806_v12 = vld [vmem:[#allocation14 + $0x66c] ss:$28 sps:$4 sm:$0xff]  }
 0x45c   :  { %14235 = vst [vmem:[#allocation125_spill] sm:$0xff] %v12768_v40  ;;  %7841 = vmatpush1.bf16.msra.mxu1 %v10789_v28  ;;  %v14239_v28 = vld [vmem:[#allocation31_spill] sm:$0xff] }
 0x45d   :  { %v12770_v51 = vpop.f32.mrf.mxu1  ;;  %7560 = vmatmul.mubr.bf16.gmra.mxu0 %v12538_v6  ;;  %7842 = vmatprep.subr.bf16.mxu1 %v10797_v32  ;;  %v10809_v32 = vld [vmem:[#allocation14 + $0x9ec] ss:$28 sps:$4 sm:$0xff]  }
 0x45e   :  { %14236 = vst [vmem:[#allocation126_spill] sm:$0xff] %v12770_v51  ;;  %7730 = vmatpush2.bf16.msra.mxu0 %v10792_v5  ;;  %7569 = vmatprep.mubr.bf16.mxu0 %v12547_v33  ;;  %v10801_v51 = vld [vmem:[#allocation14 + $0xa20] ss:$28 sps:$4 sm:$0xff]   ;;  %v10804_v5 = vld [vmem:[#allocation14 + $0x668] ss:$28 sps:$4 sm:$0xff]   ;;  %v12782_v33 = vpop.f32.mrf.mxu0 }
 0x45f   :  { %7673 = vmatmul.mubr.bf16.gmra.mxu1 %v14238_v61  ;;  %v12777_v10 = vpop.f32.mrf.mxu1  ;;  %7731 = vmatprep.subr.bf16.mxu0 %v10800_v31  ;;  %14240 = vst [vmem:[#allocation128_spill] sm:$0xff] %v12782_v33  ;;  %v10812_v61 = vld [vmem:[#allocation14 + $0x634] ss:$28 sps:$4 sm:$0xff]   ;;  %v10807_v30 = vld [vmem:[#allocation14 + $0x9e8] ss:$28 sps:$4 sm:$0xff]  }
 0x460   :  { %7682 = vmatprep.mubr.bf16.mxu1 %v14239_v28  ;;  %7843 = vmatpush2.bf16.msra.mxu1 %v10795_v20  ;;  %v10815_v20 = vld [vmem:[#allocation14 + $0x9b4] ss:$28 sps:$4 sm:$0xff]  }
 0x461   :  { %v12780_v40 = vpop.f32.mrf.mxu1  ;;  %7844 = vmatprep.subr.bf16.mxu1 %v10803_v27  ;;  %v10810_v27 = vld [vmem:[#allocation14 + $0x630] ss:$28 sps:$4 sm:$0xff]  }
 0x462   :  { %7732 = vmatpush2.bf16.msra.mxu0 %v10798_v29  ;;  %v12790_v29 = vpop.f32.mrf.mxu0  ;;  %v14244_v28 = vld [vmem:[#allocation29_spill] sm:$0xff] }
 0x463   :  { %v12784_v6 = vpop.f32.mrf.mxu1  ;;  %7733 = vmatprep.subr.bf16.mxu0 %v10806_v12  ;;  %14243 = vst [vmem:[#allocation131_spill] sm:$0xff] %v12790_v29  ;;  %v10818_v12 = vld [vmem:[#allocation14 + $0x5fc] ss:$28 sps:$4 sm:$0xff]  }
 0x464   :  { %14241 = vst [vmem:[#allocation129_spill] sm:$0xff] %v12784_v6  ;;  %7845 = vmatpush2.bf16.msra.mxu1 %v10801_v51  ;;  %v14245_v51 = vld [vmem:[#allocation33_spill] sm:$0xff] }
 0x465   :  { %v12786_v31 = vpop.f32.mrf.mxu1  ;;  %7570 = vmatmul.mubr.bf16.gmra.mxu0 %v12550_v54  ;;  %7846 = vmatprep.subr.bf16.mxu1 %v10809_v32  ;;  %v10821_v32 = vld [vmem:[#allocation14 + $0x97c] ss:$28 sps:$4 sm:$0xff]  }
 0x466   :  { %14242 = vst [vmem:[#allocation130_spill] sm:$0xff] %v12786_v31  ;;  %7734 = vmatpush2.bf16.msra.mxu0 %v10804_v5  ;;  %7579 = vmatprep.mubr.bf16.mxu0 %v12559_v0  ;;  %v10813_v31 = vld [vmem:[#allocation14 + $0x9b0] ss:$28 sps:$4 sm:$0xff]   ;;  %v10816_v5 = vld [vmem:[#allocation14 + $0x5f8] ss:$28 sps:$4 sm:$0xff]   ;;  %v12798_v0 = vpop.f32.mrf.mxu0 }
 0x467   :  { %7683 = vmatmul.mubr.bf16.gmra.mxu1 %v14244_v28  ;;  %v12793_v33 = vpop.f32.mrf.mxu1  ;;  %7735 = vmatprep.subr.bf16.mxu0 %v10812_v61  ;;  %14246 = vst [vmem:[#allocation132_spill] sm:$0xff] %v12798_v0  ;;  %v10824_v28 = vld [vmem:[#allocation14 + $0x5c4] ss:$28 sps:$4 sm:$0xff]   ;;  %v10819_v29 = vld [vmem:[#allocation14 + $0x978] ss:$28 sps:$4 sm:$0xff]  }
 0x468   :  { %7692 = vmatprep.mubr.bf16.mxu1 %v14245_v51  ;;  %7847 = vmatpush2.bf16.msra.mxu1 %v10807_v30  ;;  %v10827_v30 = vld [vmem:[#allocation14 + $0x944] ss:$28 sps:$4 sm:$0xff]  }
 0x469   :  { %v12796_v6 = vpop.f32.mrf.mxu1  ;;  %7848 = vmatprep.subr.bf16.mxu1 %v10815_v20  ;;  %v10822_v20 = vld [vmem:[#allocation14 + $0x5c0] ss:$28 sps:$4 sm:$0xff]  }
 0x46a   :  { %7736 = vmatpush2.bf16.msra.mxu0 %v10810_v27  ;;  %v12806_v27 = vpop.f32.mrf.mxu0  ;;  %v4355_v0 = vld [vmem:[#allocation16] sm:$0xff] }
 0x46b   :  { %v12800_v54 = vpop.f32.mrf.mxu1  ;;  %7737 = vmatprep.subr.bf16.mxu0 %v10818_v12  ;;  %14247 = vst [vmem:[#allocation133_spill] sm:$0xff] %v12806_v27  ;;  %v10830_v12 = vld [vmem:[#allocation14 + $0x58c] ss:$28 sps:$4 sm:$0xff]  }
 0x46c   :  { %7849 = vmatpush2.bf16.msra.mxu1 %v10813_v31  ;;  %v10825_v31 = vld [vmem:[#allocation14 + $0x940] ss:$28 sps:$4 sm:$0xff]  }
 0x46d   :  { %v12802_v61 = vpop.f32.mrf.mxu1  ;;  %7580 = vmatmul.mubr.bf16.gmra.mxu0 %v12562_v26  ;;  %7850 = vmatprep.subr.bf16.mxu1 %v10821_v32  ;;  %v10833_v32 = vld [vmem:[#allocation14 + $0x90c] ss:$28 sps:$4 sm:$0xff]  }
 0x46e   :  { %7738 = vmatpush2.bf16.msra.mxu0 %v10816_v5  ;;  %7589 = vmatprep.mubr.bf16.mxu0 %v12575_v18  ;;  %v10828_v5 = vld [vmem:[#allocation14 + $0x588] ss:$28 sps:$4 sm:$0xff]   ;;  %v12814_v18 = vpop.f32.mrf.mxu0 }
 0x46f   :  { %7693 = vmatmul.mubr.bf16.gmra.mxu1 %v12331_v60  ;;  %v12809_v51 = vpop.f32.mrf.mxu1  ;;  %7739 = vmatprep.subr.bf16.mxu0 %v10824_v28  ;;  %14250 = vst [vmem:[#allocation136_spill] sm:$0xff] %v12814_v18  ;;  %v10836_v60 = vld [vmem:[#allocation14 + $0x554] ss:$28 sps:$4 sm:$0xff]  }
 0x470   :  { %14248 = vst [vmem:[#allocation134_spill] sm:$0xff] %v12809_v51  ;;  %7702 = vmatprep.mubr.bf16.mxu1 %v12337_v42  ;;  %7851 = vmatpush2.bf16.msra.mxu1 %v10819_v29  ;;  %v14251_v51 = vld [vmem:[#allocation25_spill] sm:$0xff]  ;;  %v10831_v42 = vld [vmem:[#allocation14 + $0x908] ss:$28 sps:$4 sm:$0xff]  }
 0x471   :  { %v12812_v26 = vpop.f32.mrf.mxu1  ;;  %7852 = vmatprep.subr.bf16.mxu1 %v10827_v30  ;;  %v12819_v28 = vrot.slane %v4355_v0, %v14251_v51  ;;  %v10839_v30 = vld [vmem:[#allocation14 + $0x8d4] ss:$28 sps:$4 sm:$0xff]  }
 0x472   :  { %14249 = vst [vmem:[#allocation135_spill] sm:$0xff] %v12812_v26  ;;  %7740 = vmatpush2.bf16.msra.mxu0 %v10822_v20  ;;  %v14252_v26 = vld [vmem:[#allocation26_spill] sm:$0xff]  ;;  %v10834_v18 = vld [vmem:[#allocation14 + $0x550] ss:$28 sps:$4 sm:$0xff]  }
 0x473   :  { %v12816_v27 = vpop.f32.mrf.mxu1  ;;  %7741 = vmatprep.subr.bf16.mxu0 %v10830_v12  ;;  %v12825_v20 = vrot.slane %v4355_v0, %v14252_v26  ;;  %v12828_v12 = vpop.f32.mrf.mxu0  ;;  %v10837_v0 = vld [vmem:[#allocation14 + $0x8d0] ss:$28 sps:$4 sm:$0xff]  }
 0x474   :  { %7853 = vmatpush2.bf16.msra.mxu1 %v10825_v31  ;;  %v10842_v31 = vld [vmem:[#allocation14 + $0xc1c] ss:$28 sps:$4 sm:$0xff]  }
 0x475   :  { %v12821_v29 = vpop.f32.mrf.mxu1  ;;  %7590 = vmatmul.mubr.bf16.gmra.mxu0 %v12577_v49  ;;  %7854 = vmatprep.subr.bf16.mxu1 %v10833_v32  ;;  %v6731_v49 = vadd.f32 %v12566_v15, %v12819_v28  ;;  %v10867_v32 = vld [vmem:[#allocation14 + $0x360] ss:$28 sps:$4 sm:$0xff]   ;;  %v6735_v15 = vadd.f32 %v12573_v46, %v12819_v28 }
 0x476   :  { %7742 = vmatpush2.bf16.msra.mxu0 %v10828_v5  ;;  %7745 = vmatprep.mubr.bf16.mxu0 %v12226_v44  ;;  %v6733_v5 = vadd.f32 %v12571_v52, %v12825_v20  ;;  %v10840_v44 = vld [vmem:[#allocation14 + $0xc18] ss:$28 sps:$4 sm:$0xff]   ;;  %v6737_v52 = vadd.f32 %v12579_v1, %v12825_v20 }
 0x477   :  { %7703 = vmatmul.mubr.bf16.gmra.mxu1 %v12352_v25  ;;  %v12831_v51 = vpop.f32.mrf.mxu1  ;;  %7743 = vmatprep.subr.bf16.mxu0 %v10836_v60  ;;  %v6844_v25 = vadd.f32 %v12598_v47, %v6731_v49  ;;  %v12841_v60 = vpop.f32.mrf.mxu0  ;;  %v10872_v47 = vld [vmem:[#allocation14 + $0x328] ss:$28 sps:$4 sm:$0xff]  }
 0x478   :  { %14253 = vst [vmem:[#allocation25_spill] sm:$0xff] %v12831_v51  ;;  %7855 = vmatpush2.bf16.msra.mxu1 %v10831_v42  ;;  %7858 = vmatprep.mubr.bf16.mxu1 %v12396_v2  ;;  %v10845_v42 = vld [vmem:[#allocation14 + $0xbe4] ss:$28 sps:$4 sm:$0xff]   ;;  %v6846_v2 = vadd.f32 %v12606_v56, %v6733_v5 }
 0x479   :  { %v12836_v26 = vpop.f32.mrf.mxu1  ;;  %7856 = vmatprep.subr.bf16.mxu1 %v10839_v30  ;;  %v6957_v30 = vadd.f32 %v12706_v36, %v6844_v25  ;;  %v10843_v36 = vld [vmem:[#allocation14 + $0xbe0] ss:$28 sps:$4 sm:$0xff]   ;;  %v6741_v25 = vadd.f32 %v12582_v17, %v12819_v28 }
 0x47a   :  { %14254 = vst [vmem:[#allocation26_spill] sm:$0xff] %v12836_v26  ;;  %7744 = vmatpush2.bf16.msra.mxu0 %v10834_v18  ;;  %v10868_v26 = vld [vmem:[#allocation14 + $0x1a0] ss:$28 sps:$4 sm:$0xff]   ;;  %v6959_v46 = vadd.f32 %v12713_v41, %v6846_v2  ;;  %v10873_v2 = vld [vmem:[#allocation14 + $0x168] ss:$28 sps:$4 sm:$0xff]   ;;  %v6743_v41 = vadd.f32 %v12588_v9, %v12825_v20  ;;  %v14256_v9 = vld [vmem:[#allocation85_spill] sm:$0xff] }
 0x47b   :  { %v12843_v51 = vpop.f32.mrf.mxu1  ;;  %7939 = vmatprep.subr.bf16.mxu0 %v10842_v31  ;;  %v6848_v31 = vadd.f32 %v12614_v13, %v6735_v15  ;;  %v10877_v15 = vld [vmem:[#allocation14 + $0x2f0] ss:$28 sps:$4 sm:$0xff]  }
 0x47c   :  { %14255 = vst [vmem:[#allocation137_spill] sm:$0xff] %v12843_v51  ;;  %7857 = vmatpush2.bf16.msra.mxu1 %v10837_v0  ;;  %v10848_v0 = vld [vmem:[#allocation14 + $0xbac] ss:$28 sps:$4 sm:$0xff]  }
 0x47d   :  { %v7069_v18 = vpop.f32.mrf.mxu0  ;;  %v12851_v49 = vpop.f32.mrf.mxu1  ;;  %7746 = vmatmul.mubr.bf16.vlgmr.msra.gmra.mxu0 %v12233_v14  ;;  %9901 = vmatprep.subr.bf16.mxu1 %v10867_v32  ;;  %v6850_v32 = vadd.f32 %v12622_v50, %v6737_v52  ;;  %v6961_v13 = vadd.f32 %v12716_v22, %v6848_v31  ;;  %v6856_v31 = vadd.f32 %v12638_v63, %v6743_v41  ;;  %v14259_v41 = vld [vmem:[#allocation56_spill] sm:$0xff] }
 0x47e   :  { %v7070_v51 = vadd.f32 %v7069_v18, %v6957_v30  ;;  %7940 = vmatpush1.bf16.msra.mxu0 %v10840_v44  ;;  %7755 = vmatprep.mubr.bf16.mxu0 %v12257_v4  ;;  %v10846_v30 = vld [vmem:[#allocation14 + $0xba8] ss:$28 sps:$4 sm:$0xff]   ;;  %v10851_v18 = vld [vmem:[#allocation14 + $0xb74] ss:$28 sps:$4 sm:$0xff]  }
 0x47f   :  { %7859 = vmatmul.mubr.bf16.vlgmr.msra.gmra.mxu1 %v12399_v43  ;;  %v7071_v1 = vpop.f32.mrf.mxu0  ;;  %v12860_v56 = vpop.f32.mrf.mxu1  ;;  %7941 = vmatprep.subr.bf16.mxu0 %v10845_v42  ;;  %v6854_v42 = vadd.f32 %v12630_v11, %v6741_v25  ;;  %v6963_v50 = vadd.f32 %v12720_v3, %v6850_v32  ;;  %v10878_v11 = vld [vmem:[#allocation14 + $0x130] ss:$28 sps:$4 sm:$0xff]   ;;  %v14257_v3 = vld [vmem:[#allocation86_spill] sm:$0xff]  ;;  %v6969_v63 = vadd.f32 %v12729_v38, %v6856_v31 }
 0x480   :  { %7868 = vmatprep.mubr.bf16.mxu1 %v12406_v35  ;;  %v7072_v44 = vadd.f32 %v7071_v1, %v6959_v46  ;;  %9902 = vmatpush3.bf16.msra.mxu1 %v10868_v26  ;;  %10952 = vtanh.f32 %v7070_v51  ;;  %v6745_v51 = vadd.f32 %v14256_v9, %v12819_v28  ;;  %v6747_v25 = vadd.f32 %v14257_v3, %v12825_v20 }
 0x481   :  { %v7073_v17 = vpop.f32.mrf.mxu0  ;;  %v12867_v5 = vpop.f32.mrf.mxu1  ;;  %9903 = vmatprep.subr.bf16.mxu1 %v10872_v47  ;;  %v6967_v47 = vadd.f32 %v12722_v24, %v6854_v42 }
 0x482   :  { %10954 = vtanh.f32 %v7072_v44  ;;  %v7074_v22 = vadd.f32 %v7073_v17, %v6961_v13  ;;  %7942 = vmatpush1.bf16.msra.mxu0 %v10843_v36  ;;  %v6858_v32 = vadd.f32 %v12646_v58, %v6745_v51  ;;  %v10849_v13 = vld [vmem:[#allocation14 + $0xb70] ss:$28 sps:$4 sm:$0xff]   ;;  %v14258_v44 = vld [vmem:[#allocation87_spill] sm:$0xff]  ;;  %v6860_v58 = vadd.f32 %v12654_v45, %v6747_v25 }
 0x483   :  { %v7075_v52 = vpop.f32.mrf.mxu0  ;;  %v12871_v26 = vpop.f32.mrf.mxu1  ;;  %7943 = vmatprep.subr.bf16.mxu0 %v10848_v0  ;;  %v10882_v0 = vld [vmem:[#allocation14 + $0x2b8] ss:$28 sps:$4 sm:$0xff]   ;;  %v10857_v25 = vld [vmem:[#allocation14 + $0xb04] ss:$28 sps:$4 sm:$0xff]  }
 0x484   :  { %v7076_v46 = vadd.f32 %v7075_v52, %v6963_v50  ;;  %9904 = vmatpush3.bf16.msra.mxu1 %v10873_v2  ;;  %10956 = vtanh.f32 %v7074_v22  ;;  %v6751_v2 = vadd.f32 %v14258_v44, %v12819_v28  ;;  %v6971_v38 = vadd.f32 %v12732_v8, %v6858_v32  ;;  %v14260_v50 = vld [vmem:[#allocation57_spill] sm:$0xff]  ;;  %v14261_v52 = vld [vmem:[#allocation88_spill] sm:$0xff] }
 0x485   :  { %v7079_v36 = vpop.f32.mrf.mxu0  ;;  %v12879_v1 = vpop.f32.mrf.mxu1  ;;  %7756 = vmatmul.mubr.bf16.gmra.mxu0 %v12263_v19  ;;  %9905 = vmatprep.subr.bf16.mxu1 %v10877_v15  ;;  %v10854_v15 = vld [vmem:[#allocation14 + $0xb3c] ss:$28 sps:$4 sm:$0xff]   ;;  %v6753_v9 = vadd.f32 %v14261_v52, %v12825_v20  ;;  %v6973_v45 = vadd.f32 %v12736_v39, %v6860_v58 }
 0x486   :  { %10958 = vtanh.f32 %v7076_v46  ;;  %v7080_v24 = vadd.f32 %v7079_v36, %v6967_v47  ;;  %7944 = vmatpush1.bf16.msra.mxu0 %v10846_v30  ;;  %7765 = vmatprep.mubr.bf16.mxu0 %v12283_v59  ;;  %v10883_v30 = vld [vmem:[#allocation14 + $0xf8] ss:$28 sps:$4 sm:$0xff]   ;;  %v10887_v47 = vld [vmem:[#allocation14 + $0x280] ss:$28 sps:$4 sm:$0xff]  }
 0x487   :  { %7869 = vmatmul.mubr.bf16.gmra.mxu1 %v14259_v41  ;;  %v7081_v17 = vpop.f32.mrf.mxu0  ;;  %v12888_v42 = vpop.f32.mrf.mxu1  ;;  %7945 = vmatprep.subr.bf16.mxu0 %v10851_v18  ;;  %v6864_v18 = vadd.f32 %v12660_v7, %v6751_v2  ;;  %v10852_v46 = vld [vmem:[#allocation14 + $0xb38] ss:$28 sps:$4 sm:$0xff]   ;;  %v10888_v7 = vld [vmem:[#allocation14 + $0xc0] ss:$28 sps:$4 sm:$0xff]  }
 0x488   :  { %7878 = vmatprep.mubr.bf16.mxu1 %v14260_v50  ;;  %v7082_v22 = vadd.f32 %v7081_v17, %v6969_v63  ;;  %9906 = vmatpush3.bf16.msra.mxu1 %v10878_v11  ;;  %10960 = vtanh.f32 %v7080_v24  ;;  %v14262_v36 = vld [vmem:[#allocation89_spill] sm:$0xff]  ;;  %v6866_v63 = vadd.f32 %v12666_v55, %v6753_v9  ;;  %v14263_v39 = vld [vmem:[#allocation90_spill] sm:$0xff]  ;;  %v10892_v17 = vld [vmem:[#allocation14 + $0x248] ss:$28 sps:$4 sm:$0xff]  }
 0x489   :  { %v7083_v51 = vpop.f32.mrf.mxu0  ;;  %v12895_v31 = vpop.f32.mrf.mxu1  ;;  %9907 = vmatprep.subr.bf16.mxu1 %v10882_v0  ;;  %v6755_v32 = vadd.f32 %v14262_v36, %v12819_v28  ;;  %v6977_v0 = vadd.f32 %v12738_v62, %v6864_v18  ;;  %v6757_v44 = vadd.f32 %v14263_v39, %v12825_v20  ;;  %v14267_v36 = vld [vmem:[#allocation92_spill] sm:$0xff] }
 0x48a   :  { %10962 = vtanh.f32 %v7082_v22  ;;  %v7084_v8 = vadd.f32 %v7083_v51, %v6971_v38  ;;  %7946 = vmatpush1.bf16.msra.mxu0 %v10849_v13  ;;  %v6979_v55 = vadd.f32 %v12745_v34, %v6866_v63  ;;  %v10855_v38 = vld [vmem:[#allocation14 + $0xb00] ss:$28 sps:$4 sm:$0xff]  }
 0x48b   :  { %v7085_v3 = vpop.f32.mrf.mxu0  ;;  %v12899_v11 = vpop.f32.mrf.mxu1  ;;  %7947 = vmatprep.subr.bf16.mxu0 %v10854_v15  ;;  %v6868_v58 = vadd.f32 %v12672_v16, %v6755_v32  ;;  %v6870_v9 = vadd.f32 %v12678_v48, %v6757_v44  ;;  %v14265_v51 = vld [vmem:[#allocation58_spill] sm:$0xff]  ;;  %v10860_v16 = vld [vmem:[#allocation14 + $0xacc] ss:$28 sps:$4 sm:$0xff]   ;;  %v6763_v32 = vadd.f32 %v14267_v36, %v12825_v20  ;;  %v14269_v44 = vld [vmem:[#allocation121_spill] sm:$0xff] }
 0x48c   :  { %v7086_v24 = vadd.f32 %v7085_v3, %v6973_v45  ;;  %9908 = vmatpush3.bf16.msra.mxu1 %v10883_v30  ;;  %10964 = vtanh.f32 %v7084_v8  ;;  %v14264_v30 = vld [vmem:[#allocation91_spill] sm:$0xff]  ;;  %v14272_v36 = vld [vmem:[#allocation122_spill] sm:$0xff] }
 0x48d   :  { %v7089_v13 = vpop.f32.mrf.mxu0  ;;  %v12907_v2 = vpop.f32.mrf.mxu1  ;;  %7766 = vmatmul.mubr.bf16.gmra.mxu0 %v12289_v37  ;;  %9909 = vmatprep.subr.bf16.mxu1 %v10887_v47  ;;  %v6761_v52 = vadd.f32 %v14264_v30, %v12819_v28  ;;  %v6981_v34 = vadd.f32 %v12748_v57, %v6868_v58  ;;  %v14266_v8 = vld [vmem:[#allocation59_spill] sm:$0xff]  ;;  %v6983_v57 = vadd.f32 %v14269_v44, %v6870_v9  ;;  %v14270_v58 = vld [vmem:[#allocation93_spill] sm:$0xff]  ;;  %v14274_v44 = vld [vmem:[#allocation30_spill] sm:$0xff] }
 0x48e   :  { %v10953_v15 = vpop.eup %10952  ;;  %10966 = vtanh.f32 %v7086_v24  ;;  %v7090_v62 = vadd.f32 %v7089_v13, %v6977_v0  ;;  %7948 = vmatpush1.bf16.msra.mxu0 %v10852_v46  ;;  %7775 = vmatprep.mubr.bf16.mxu0 %v12311_v23  ;;  %v10893_v3 = vld [vmem:[#allocation14 + $0x88] ss:$28 sps:$4 sm:$0xff]   ;;  %v10897_v0 = vld [vmem:[#allocation14 + $0x210] ss:$28 sps:$4 sm:$0xff]  }
 0x48f   :  { %v10955_v22 = vpop.eup %10954  ;;  %7879 = vmatmul.mubr.bf16.gmra.mxu1 %v14265_v51  ;;  %v7091_v47 = vpop.f32.mrf.mxu0  ;;  %7949 = vmatprep.subr.bf16.mxu0 %v10857_v25  ;;  %v14268_v25 = vld [vmem:[#allocation107_spill] sm:$0xff]  ;;  %v14271_v30 = vld [vmem:[#allocation109_spill] sm:$0xff] }
 0x490   :  { %v12917_v18 = vpop.f32.mrf.mxu1  ;;  %v9837_v45 = vpack.c.bf16 %v10955_v22, %v10953_v15  ;;  %7888 = vmatprep.mubr.bf16.mxu1 %v14266_v8  ;;  %v7092_v46 = vadd.f32 %v7091_v47, %v6979_v55  ;;  %9910 = vmatpush3.bf16.msra.mxu1 %v10888_v7  ;;  %10968 = vtanh.f32 %v7090_v62  ;;  %v6874_v39 = vadd.f32 %v14268_v25, %v6761_v52  ;;  %v10858_v7 = vld [vmem:[#allocation14 + $0xac8] ss:$28 sps:$4 sm:$0xff]  }
 0x491   :  { %v7093_v48 = vpop.f32.mrf.mxu0  ;;  %9911 = vmatprep.subr.bf16.mxu1 %v10892_v17  ;;  %v10957_v24 = vpop.eup %10956  ;;  %v6765_v55 = vadd.f32 %v14270_v58, %v12819_v28  ;;  %v10863_v17 = vld [vmem:[#allocation14 + $0xa94] ss:$28 sps:$4 sm:$0xff]   ;;  %v6876_v47 = vadd.f32 %v14271_v30, %v6763_v32  ;;  %v14275_v8 = vld [vmem:[#allocation111_spill] sm:$0xff] }
 0x492   :  { %v12923_v63 = vpop.f32.mrf.mxu1  ;;  %8904 = vst [vmem:[#allocation17] sm:$0xff] %v9837_v45  ;;  %10970 = vtanh.f32 %v7092_v46  ;;  %v7094_v13 = vadd.f32 %v7093_v48, %v6981_v34  ;;  %7950 = vmatpush1.bf16.msra.mxu0 %v10855_v38  ;;  %v6987_v52 = vadd.f32 %v14272_v36, %v6874_v39  ;;  %v10898_v45 = vld [vmem:[#allocation14 + $0x50] ss:$28 sps:$4 sm:$0xff]   ;;  %v14273_v38 = vld [vmem:[#allocation94_spill] sm:$0xff] }
 0x493   :  { %v10959_v15 = vpop.eup %10958  ;;  %v7095_v62 = vpop.f32.mrf.mxu0  ;;  %7951 = vmatprep.subr.bf16.mxu0 %v10860_v16  ;;  %v6767_v34 = vadd.f32 %v14273_v38, %v12825_v20  ;;  %v10902_v16 = vld [vmem:[#allocation14 + $0x1d8] ss:$28 sps:$4 sm:$0xff]   ;;  %v6878_v32 = vadd.f32 %v14275_v8, %v6765_v55  ;;  %v6989_v39 = vadd.f32 %v12761_v21, %v6876_v47 }
 0x494   :  { %v12929_v22 = vpop.f32.mrf.mxu1  ;;  %v9841_v25 = vpack.c.bf16 %v10959_v15, %v10957_v24  ;;  %v7096_v9 = vadd.f32 %v7095_v62, %v6983_v57  ;;  %9912 = vmatpush3.bf16.msra.mxu1 %v10893_v3  ;;  %10972 = vtanh.f32 %v7094_v13  ;;  %v14276_v24 = vld [vmem:[#allocation34_spill] sm:$0xff]  ;;  %v10861_v57 = vld [vmem:[#allocation14 + $0xa90] ss:$28 sps:$4 sm:$0xff]   ;;  %v14277_v15 = vld [vmem:[#allocation95_spill] sm:$0xff] }
 0x495   :  { %v7099_v46 = vpop.f32.mrf.mxu0  ;;  %7776 = vmatmul.mubr.bf16.gmra.mxu0 %v14274_v44  ;;  %9913 = vmatprep.subr.bf16.mxu1 %v10897_v0  ;;  %v10961_v58 = vpop.eup %10960  ;;  %v6771_v62 = vadd.f32 %v14277_v15, %v12819_v28  ;;  %v14278_v30 = vld [vmem:[#allocation113_spill] sm:$0xff]  ;;  %v14279_v0 = vld [vmem:[#allocation60_spill] sm:$0xff]  ;;  %v10866_v21 = vld [vmem:[#allocation14 + $0xddc] ss:$28 sps:$4 sm:$0xff]   ;;  %v6991_v8 = vadd.f32 %v12764_v53, %v6878_v32 }
 0x496   :  { %v12935_v48 = vpop.f32.mrf.mxu1  ;;  %8908 = vst [vmem:[#allocation17 + $0x1c] sm:$0xff] %v9841_v25  ;;  %10974 = vtanh.f32 %v7096_v9  ;;  %v7100_v3 = vadd.f32 %v7099_v46, %v6987_v52  ;;  %7952 = vmatpush1.bf16.msra.mxu0 %v10858_v7  ;;  %7785 = vmatprep.mubr.bf16.mxu0 %v14276_v24  ;;  %v6880_v36 = vadd.f32 %v14278_v30, %v6767_v34  ;;  %v14280_v7 = vld [vmem:[#allocation61_spill] sm:$0xff]  ;;  %v14281_v25 = vld [vmem:[#allocation96_spill] sm:$0xff]  ;;  %v10913_v15 = vld [vmem:[#allocation14 + $0xa60] ss:$28 sps:$4 sm:$0xff]  }
 0x497   :  { %v10963_v13 = vpop.eup %10962  ;;  %7889 = vmatmul.mubr.bf16.gmra.mxu1 %v14279_v0  ;;  %v7101_v38 = vpop.f32.mrf.mxu0  ;;  %7953 = vmatprep.subr.bf16.mxu0 %v10863_v17  ;;  %v10903_v52 = vld [vmem:[#allocation14 + $0x18] ss:$28 sps:$4 sm:$0xff]   ;;  %v6773_v9 = vadd.f32 %v14281_v25, %v12825_v20  ;;  %v14283_v17 = vld [vmem:[#allocation115_spill] sm:$0xff]  ;;  %v14287_v25 = vld [vmem:[#allocation116_spill] sm:$0xff] }
 0x498   :  { %v12945_v44 = vpop.f32.mrf.mxu1  ;;  %v9845_v55 = vpack.c.bf16 %v10963_v13, %v10961_v58  ;;  %7898 = vmatprep.mubr.bf16.mxu1 %v14280_v7  ;;  %v7102_v47 = vadd.f32 %v7101_v38, %v6989_v39  ;;  %9914 = vmatpush3.bf16.msra.mxu1 %v10898_v45  ;;  %10976 = vtanh.f32 %v7100_v3  ;;  %v6884_v0 = vadd.f32 %v14283_v17, %v6771_v62  ;;  %v14284_v24 = vld [vmem:[#allocation125_spill] sm:$0xff] }
 0x499   :  { %v7103_v34 = vpop.f32.mrf.mxu0  ;;  %9915 = vmatprep.subr.bf16.mxu1 %v10902_v16  ;;  %v10965_v30 = vpop.eup %10964  ;;  %v6993_v53 = vadd.f32 %v14284_v24, %v6880_v36  ;;  %v10864_v45 = vld [vmem:[#allocation14 + $0xdd8] ss:$28 sps:$4 sm:$0xff]   ;;  %v10871_v16 = vld [vmem:[#allocation14 + $0xda4] ss:$28 sps:$4 sm:$0xff]   ;;  %v6886_v7 = vadd.f32 %v14287_v25, %v6773_v9 }
 0x49a   :  { %v12951_v46 = vpop.f32.mrf.mxu1  ;;  %8912 = vst [vmem:[#allocation17 + $0x38] sm:$0xff] %v9845_v55  ;;  %10978 = vtanh.f32 %v7102_v47  ;;  %v7104_v58 = vadd.f32 %v7103_v34, %v6991_v8  ;;  %7954 = vmatpush1.bf16.msra.mxu0 %v10861_v57  ;;  %v14285_v39 = vld [vmem:[#allocation97_spill] sm:$0xff]  ;;  %v14289_v36 = vld [vmem:[#allocation98_spill] sm:$0xff]  ;;  %v14291_v47 = vld [vmem:[#allocation47_spill] sm:$0xff] }
 0x49b   :  { %14282 = vst [vmem:[#allocation85_spill] sm:$0xff] %v12951_v46  ;;  %v10967_v32 = vpop.eup %10966  ;;  %v6775_v13 = vadd.f32 %v14285_v39, %v12819_v28  ;;  %v7105_v3 = vpop.f32.mrf.mxu0  ;;  %7955 = vmatprep.subr.bf16.mxu0 %v10866_v21  ;;  %v14288_v46 = vld [vmem:[#allocation126_spill] sm:$0xff]  ;;  %v6777_v57 = vadd.f32 %v14289_v36, %v12825_v20  ;;  %v14292_v21 = vld [vmem:[#allocation117_spill] sm:$0xff]  ;;  %v6999_v9 = vadd.f32 %v12777_v10, %v6886_v7 }
 0x49c   :  { %v12957_v38 = vpop.f32.mrf.mxu1  ;;  %v6997_v62 = vadd.f32 %v14288_v46, %v6884_v0  ;;  %v9849_v17 = vpack.c.bf16 %v10967_v32, %v10965_v30  ;;  %v7106_v24 = vadd.f32 %v7105_v3, %v6993_v53  ;;  %9916 = vmatpush3.bf16.msra.mxu1 %v10903_v52  ;;  %10980 = vtanh.f32 %v7104_v58  ;;  %v14293_v52 = vld [vmem:[#allocation48_spill] sm:$0xff]  ;;  %v10869_v46 = vld [vmem:[#allocation14 + $0xda0] ss:$28 sps:$4 sm:$0xff]  }
 0x49d   :  { %14286 = vst [vmem:[#allocation86_spill] sm:$0xff] %v12957_v38  ;;  %v7109_v8 = vpop.f32.mrf.mxu0  ;;  %7786 = vmatmul.mubr.bf16.gmra.mxu0 %v14291_v47  ;;  %10029 = vmatprep.subr.bf16.mxu1 %v10913_v15  ;;  %v10969_v34 = vpop.eup %10968  ;;  %v6888_v39 = vadd.f32 %v14292_v21, %v6775_v13  ;;  %v14294_v53 = vld [vmem:[#allocation99_spill] sm:$0xff]  ;;  %v14295_v32 = vld [vmem:[#allocation62_spill] sm:$0xff]  ;;  %v10876_v13 = vld [vmem:[#allocation14 + $0xd6c] ss:$28 sps:$4 sm:$0xff]  }
 0x49e   :  { %v12963_v55 = vpop.f32.mrf.mxu1  ;;  %8916 = vst [vmem:[#allocation17 + $0x54] sm:$0xff] %v9849_v17  ;;  %10982 = vtanh.f32 %v7106_v24  ;;  %v7110_v0 = vadd.f32 %v7109_v8, %v6997_v62  ;;  %7956 = vmatpush2.bf16.msra.mxu0 %v10864_v45  ;;  %7795 = vmatprep.mubr.bf16.mxu0 %v14293_v52  ;;  %v6781_v58 = vadd.f32 %v14294_v53, %v12819_v28  ;;  %v14297_v25 = vld [vmem:[#allocation118_spill] sm:$0xff]  ;;  %v14298_v45 = vld [vmem:[#allocation63_spill] sm:$0xff]  ;;  %v14299_v24 = vld [vmem:[#allocation100_spill] sm:$0xff] }
 0x49f   :  { %14290 = vst [vmem:[#allocation87_spill] sm:$0xff] %v12963_v55  ;;  %v10971_v30 = vpop.eup %10970  ;;  %7899 = vmatmul.mubr.bf16.gmra.mxu1 %v14295_v32  ;;  %v7111_v3 = vpop.f32.mrf.mxu0  ;;  %7957 = vmatprep.subr.bf16.mxu0 %v10871_v16  ;;  %v6890_v10 = vadd.f32 %v14297_v25, %v6777_v57  ;;  %v7001_v7 = vadd.f32 %v12780_v40, %v6888_v39  ;;  %v14301_v32 = vld [vmem:[#allocation119_spill] sm:$0xff]  ;;  %v14302_v16 = vld [vmem:[#allocation129_spill] sm:$0xff]  ;;  %v14305_v25 = vld [vmem:[#allocation120_spill] sm:$0xff] }
 0x4a0   :  { %v12972_v15 = vpop.f32.mrf.mxu1  ;;  %v9853_v62 = vpack.c.bf16 %v10971_v30, %v10969_v34  ;;  %7908 = vmatprep.mubr.bf16.mxu1 %v14298_v45  ;;  %v7112_v17 = vadd.f32 %v7111_v3, %v6999_v9  ;;  %v6783_v36 = vadd.f32 %v14299_v24, %v12825_v20  ;;  %10984 = vtanh.f32 %v7110_v0  ;;  %v10874_v40 = vld [vmem:[#allocation14 + $0xd68] ss:$28 sps:$4 sm:$0xff]   ;;  %v14303_v39 = vld [vmem:[#allocation101_spill] sm:$0xff]  ;;  %v14306_v45 = vld [vmem:[#allocation130_spill] sm:$0xff] }
 0x4a1   :  { %14296 = vst [vmem:[#allocation56_spill] sm:$0xff] %v12972_v15  ;;  %v7113_v8 = vpop.f32.mrf.mxu0  ;;  %v10973_v53 = vpop.eup %10972  ;;  %v6894_v52 = vadd.f32 %v14301_v32, %v6781_v58  ;;  %v7003_v47 = vadd.f32 %v14302_v16, %v6890_v10  ;;  %v6785_v9 = vadd.f32 %v14303_v39, %v12819_v28  ;;  %v10881_v0 = vld [vmem:[#allocation14 + $0xd34] ss:$28 sps:$4 sm:$0xff]   ;;  %v14310_v39 = vld [vmem:[#allocation123_spill] sm:$0xff] }
 0x4a2   :  { %v12979_v21 = vpop.f32.mrf.mxu1  ;;  %8920 = vst [vmem:[#allocation17 + $0x70] sm:$0xff] %v9853_v62  ;;  %10986 = vtanh.f32 %v7112_v17  ;;  %v7114_v57 = vadd.f32 %v7113_v8, %v7001_v7  ;;  %7958 = vmatpush2.bf16.msra.mxu0 %v10869_v46  ;;  %v6896_v24 = vadd.f32 %v14305_v25, %v6783_v36  ;;  %v14307_v62 = vld [vmem:[#allocation102_spill] sm:$0xff]  ;;  %v14368_v15 = vld [vmem:[#allocation45_spill] sm:$0xff] }
 0x4a3   :  { %14300 = vst [vmem:[#allocation57_spill] sm:$0xff] %v12979_v21  ;;  %v10975_v34 = vpop.eup %10974  ;;  %v7115_v30 = vpop.f32.mrf.mxu0  ;;  %7959 = vmatprep.subr.bf16.mxu0 %v10876_v13  ;;  %v7007_v58 = vadd.f32 %v14306_v45, %v6894_v52  ;;  %v6787_v7 = vadd.f32 %v14307_v62, %v12825_v20  ;;  %v14309_v8 = vld [vmem:[#allocation50_spill] sm:$0xff]  ;;  %v14311_v52 = vld [vmem:[#allocation51_spill] sm:$0xff]  ;;  %v14315_v62 = vld [vmem:[#allocation124_spill] sm:$0xff] }
 0x4a4   :  { %v12985_v3 = vpop.f32.mrf.mxu1  ;;  %v9857_v32 = vpack.c.bf16 %v10975_v34, %v10973_v53  ;;  %v7116_v10 = vadd.f32 %v7115_v30, %v7003_v47  ;;  %10988 = vtanh.f32 %v7114_v57  ;;  %v7009_v13 = vadd.f32 %v12793_v33, %v6896_v24  ;;  %v10879_v47 = vld [vmem:[#allocation14 + $0xd30] ss:$28 sps:$4 sm:$0xff]   ;;  %v14312_v53 = vld [vmem:[#allocation103_spill] sm:$0xff] }
 0x4a5   :  { %14304 = vst [vmem:[#allocation88_spill] sm:$0xff] %v12985_v3  ;;  %v7119_v46 = vpop.f32.mrf.mxu0  ;;  %7796 = vmatmul.mubr.bf16.gmra.mxu0 %v14309_v8  ;;  %v10977_v16 = vpop.eup %10976  ;;  %v6898_v3 = vadd.f32 %v14310_v39, %v6785_v9  ;;  %v6791_v57 = vadd.f32 %v14312_v53, %v12819_v28  ;;  %v14313_v34 = vld [vmem:[#allocation64_spill] sm:$0xff]  ;;  %v10886_v9 = vld [vmem:[#allocation14 + $0xcfc] ss:$28 sps:$4 sm:$0xff]   ;;  %v6900_v33 = vadd.f32 %v14315_v62, %v6787_v7  ;;  %v14367_v21 = vld [vmem:[#allocation77_spill] sm:$0xff] }
 0x4a6   :  { %v12991_v17 = vpop.f32.mrf.mxu1  ;;  %8924 = vst [vmem:[#allocation17 + $0x8c] sm:$0xff] %v9857_v32  ;;  %10990 = vtanh.f32 %v7116_v10  ;;  %v7120_v36 = vadd.f32 %v7119_v46, %v7007_v58  ;;  %7960 = vmatpush2.bf16.msra.mxu0 %v10874_v40  ;;  %7805 = vmatprep.mubr.bf16.mxu0 %v14311_v52  ;;  %v14316_v40 = vld [vmem:[#allocation65_spill] sm:$0xff]  ;;  %v14317_v10 = vld [vmem:[#allocation104_spill] sm:$0xff]  ;;  %v14319_v52 = vld [vmem:[#allocation127_spill] sm:$0xff] }
 0x4a7   :  { %14308 = vst [vmem:[#allocation89_spill] sm:$0xff] %v12991_v17  ;;  %v10979_v45 = vpop.eup %10978  ;;  %7909 = vmatmul.mubr.bf16.gmra.mxu1 %v14313_v34  ;;  %v7121_v30 = vpop.f32.mrf.mxu0  ;;  %7961 = vmatprep.subr.bf16.mxu0 %v10881_v0  ;;  %v7011_v24 = vadd.f32 %v12796_v6, %v6898_v3  ;;  %v6793_v46 = vadd.f32 %v14317_v10, %v12825_v20  ;;  %v10884_v6 = vld [vmem:[#allocation14 + $0xcf8] ss:$28 sps:$4 sm:$0xff]   ;;  %v14322_v62 = vld [vmem:[#allocation128_spill] sm:$0xff]  ;;  %v10936_v55 = vld [vmem:[#allocation14 + $0xde0] ss:$28 sps:$4 sm:$0xff]  }
 0x4a8   :  { %v13000_v25 = vpop.f32.mrf.mxu1  ;;  %v9861_v58 = vpack.c.bf16 %v10979_v45, %v10977_v16  ;;  %7918 = vmatprep.mubr.bf16.mxu1 %v14316_v40  ;;  %v7122_v32 = vadd.f32 %v7121_v30, %v7009_v13  ;;  %10992 = vtanh.f32 %v7120_v36  ;;  %v6904_v8 = vadd.f32 %v14319_v52, %v6791_v57  ;;  %v14320_v16 = vld [vmem:[#allocation105_spill] sm:$0xff]  ;;  %v10891_v36 = vld [vmem:[#allocation14 + $0xcc4] ss:$28 sps:$4 sm:$0xff]  }
 0x4a9   :  { %14314 = vst [vmem:[#allocation90_spill] sm:$0xff] %v13000_v25  ;;  %v7123_v39 = vpop.f32.mrf.mxu0  ;;  %v10981_v34 = vpop.eup %10980  ;;  %v7013_v0 = vadd.f32 %v12800_v54, %v6900_v33  ;;  %v6795_v13 = vadd.f32 %v14320_v16, %v12819_v28  ;;  %v6906_v10 = vadd.f32 %v14322_v62, %v6793_v46  ;;  %v14323_v33 = vld [vmem:[#allocation106_spill] sm:$0xff]  ;;  %v14326_v16 = vld [vmem:[#allocation131_spill] sm:$0xff] }
 0x4aa   :  { %v13007_v53 = vpop.f32.mrf.mxu1  ;;  %8928 = vst [vmem:[#allocation17 + $0xa8] sm:$0xff] %v9861_v58  ;;  %10994 = vtanh.f32 %v7122_v32  ;;  %v7124_v7 = vadd.f32 %v7123_v39, %v7011_v24  ;;  %7962 = vmatpush2.bf16.msra.mxu0 %v10879_v47  ;;  %v7017_v52 = vadd.f32 %v12802_v61, %v6904_v8  ;;  %v6797_v24 = vadd.f32 %v14323_v33, %v12825_v20  ;;  %v14325_v32 = vld [vmem:[#allocation52_spill] sm:$0xff]  ;;  %v14328_v61 = vld [vmem:[#allocation53_spill] sm:$0xff]  ;;  %v10889_v8 = vld [vmem:[#allocation14 + $0xcc0] ss:$28 sps:$4 sm:$0xff]  }
 0x4ab   :  { %14318 = vst [vmem:[#allocation91_spill] sm:$0xff] %v13007_v53  ;;  %v10983_v3 = vpop.eup %10982  ;;  %v7125_v45 = vpop.f32.mrf.mxu0  ;;  %7963 = vmatprep.subr.bf16.mxu0 %v10886_v9  ;;  %v6908_v40 = vadd.f32 %v14326_v16, %v6795_v13  ;;  %v14327_v9 = vld [vmem:[#allocation134_spill] sm:$0xff]  ;;  %v10896_v13 = vld [vmem:[#allocation14 + $0xc8c] ss:$28 sps:$4 sm:$0xff]  }
 0x4ac   :  { %v13013_v30 = vpop.f32.mrf.mxu1  ;;  %v9865_v57 = vpack.c.bf16 %v10983_v3, %v10981_v34  ;;  %v7126_v54 = vadd.f32 %v7125_v45, %v7013_v0  ;;  %10996 = vtanh.f32 %v7124_v7  ;;  %v14329_v0 = vld [vmem:[#allocation108_spill] sm:$0xff]  ;;  %v14330_v3 = vld [vmem:[#allocation66_spill] sm:$0xff] }
 0x4ad   :  { %14321 = vst [vmem:[#allocation58_spill] sm:$0xff] %v13013_v30  ;;  %v7129_v47 = vpop.f32.mrf.mxu0  ;;  %7806 = vmatmul.mubr.bf16.gmra.mxu0 %v14325_v32  ;;  %v10985_v39 = vpop.eup %10984  ;;  %v7019_v30 = vadd.f32 %v14327_v9, %v6906_v10  ;;  %v6801_v7 = vadd.f32 %v14329_v0, %v12819_v28  ;;  %v14332_v33 = vld [vmem:[#allocation132_spill] sm:$0xff]  ;;  %v14335_v16 = vld [vmem:[#allocation110_spill] sm:$0xff]  ;;  %v14337_v32 = vld [vmem:[#allocation133_spill] sm:$0xff] }
 0x4ae   :  { %v13019_v58 = vpop.f32.mrf.mxu1  ;;  %8932 = vst [vmem:[#allocation17 + $0xc4] sm:$0xff] %v9865_v57  ;;  %10998 = vtanh.f32 %v7126_v54  ;;  %v7130_v46 = vadd.f32 %v7129_v47, %v7017_v52  ;;  %7964 = vmatpush2.bf16.msra.mxu0 %v10884_v6  ;;  %7815 = vmatprep.mubr.bf16.mxu0 %v14328_v61  ;;  %v6910_v10 = vadd.f32 %v14332_v33, %v6797_v24  ;;  %v14333_v57 = vld [vmem:[#allocation135_spill] sm:$0xff]  ;;  %v10934_v17 = vld [vmem:[#allocation14 + $0x8d8] ss:$28 sps:$4 sm:$0xff]  }
 0x4af   :  { %14324 = vst [vmem:[#allocation92_spill] sm:$0xff] %v13019_v58  ;;  %v10987_v34 = vpop.eup %10986  ;;  %7919 = vmatmul.mubr.bf16.gmra.mxu1 %v14330_v3  ;;  %v7131_v45 = vpop.f32.mrf.mxu0  ;;  %7965 = vmatprep.subr.bf16.mxu0 %v10891_v36  ;;  %v7021_v54 = vadd.f32 %v14333_v57, %v6908_v40  ;;  %v14334_v6 = vld [vmem:[#allocation67_spill] sm:$0xff]  ;;  %v6803_v9 = vadd.f32 %v14335_v16, %v12825_v20  ;;  %v14340_v57 = vld [vmem:[#allocation136_spill] sm:$0xff] }
 0x4b0   :  { %v13028_v62 = vpop.f32.mrf.mxu1  ;;  %v9869_v52 = vpack.c.bf16 %v10987_v34, %v10985_v39  ;;  %7928 = vmatprep.mubr.bf16.mxu1 %v14334_v6  ;;  %v7132_v47 = vadd.f32 %v7131_v45, %v7019_v30  ;;  %11000 = vtanh.f32 %v7130_v46  ;;  %v7023_v36 = vadd.f32 %v12816_v27, %v6910_v10  ;;  %v10894_v40 = vld [vmem:[#allocation14 + $0xc88] ss:$28 sps:$4 sm:$0xff]   ;;  %v10901_v46 = vld [vmem:[#allocation14 + $0xc54] ss:$28 sps:$4 sm:$0xff]   ;;  %v14341_v10 = vld [vmem:[#allocation114_spill] sm:$0xff] }
 0x4b1   :  { %14331 = vst [vmem:[#allocation107_spill] sm:$0xff] %v13028_v62  ;;  %v7133_v0 = vpop.f32.mrf.mxu0  ;;  %v10989_v3 = vpop.eup %10988  ;;  %v6914_v62 = vadd.f32 %v14337_v32, %v6801_v7  ;;  %v14338_v30 = vld [vmem:[#allocation112_spill] sm:$0xff]  ;;  %v6916_v16 = vadd.f32 %v14340_v57, %v6803_v9 }
 0x4b2   :  { %v13035_v61 = vpop.f32.mrf.mxu1  ;;  %8936 = vst [vmem:[#allocation17 + $0xe0] sm:$0xff] %v9869_v52  ;;  %11002 = vtanh.f32 %v7132_v47  ;;  %v7134_v24 = vadd.f32 %v7133_v0, %v7021_v54  ;;  %7966 = vmatpush2.bf16.msra.mxu0 %v10889_v8  ;;  %v6805_v34 = vadd.f32 %v14338_v30, %v12819_v28  ;;  %v6807_v54 = vadd.f32 %v14341_v10, %v12825_v20  ;;  %v14343_v47 = vld [vmem:[#allocation54_spill] sm:$0xff]  ;;  %v14346_v20 = vld [vmem:[#allocation68_spill] sm:$0xff]  ;;  %v14351_v10 = vld [vmem:[#allocation137_spill] sm:$0xff] }
 0x4b3   :  { %14336 = vst [vmem:[#allocation121_spill] sm:$0xff] %v13035_v61  ;;  %v10991_v39 = vpop.eup %10990  ;;  %v7135_v45 = vpop.f32.mrf.mxu0  ;;  %7967 = vmatprep.subr.bf16.mxu0 %v10896_v13  ;;  %v7027_v32 = vadd.f32 %v12821_v29, %v6914_v62  ;;  %v14344_v13 = vld [vmem:[#allocation25_spill] sm:$0xff]  ;;  %v10919_v61 = vld [vmem:[#allocation14 + $0x408] ss:$28 sps:$4 sm:$0xff]  }
 0x4b4   :  { %v13041_v33 = vpop.f32.mrf.mxu1  ;;  %v9873_v7 = vpack.c.bf16 %v10991_v39, %v10989_v3  ;;  %v7136_v27 = vadd.f32 %v7135_v45, %v7023_v36  ;;  %11004 = vtanh.f32 %v7134_v24  ;;  %v6918_v0 = vadd.f32 %v12828_v12, %v6805_v34  ;;  %v14345_v29 = vld [vmem:[#allocation69_spill] sm:$0xff]  ;;  %v10904_v39 = vld [vmem:[#allocation14 + $0x6e0] ss:$28 sps:$4 sm:$0xff]  }
 0x4b5   :  { %14339 = vst [vmem:[#allocation93_spill] sm:$0xff] %v13041_v33  ;;  %v7139_v8 = vpop.f32.mrf.mxu0  ;;  %7816 = vmatmul.mubr.bf16.gmra.mxu0 %v14343_v47  ;;  %v10993_v28 = vpop.eup %10992  ;;  %v7029_v30 = vadd.f32 %v14344_v13, %v6916_v16  ;;  %v10899_v3 = vld [vmem:[#allocation14 + $0xc50] ss:$28 sps:$4 sm:$0xff]   ;;  %v6920_v45 = vadd.f32 %v12841_v60, %v6807_v54  ;;  %v14348_v12 = vld [vmem:[#allocation26_spill] sm:$0xff] }
 0x4b6   :  { %v13047_v52 = vpop.f32.mrf.mxu1  ;;  %8940 = vst [vmem:[#allocation17 + $0xfc] sm:$0xff] %v9873_v7  ;;  %11006 = vtanh.f32 %v7136_v27  ;;  %v7140_v9 = vadd.f32 %v7139_v8, %v7027_v32  ;;  %7968 = vmatpush2.bf16.msra.mxu0 %v10894_v40  ;;  %7971 = vmatprep.mubr.bf16.mxu0 %v14345_v29  ;;  %v7031_v34 = vadd.f32 %v14348_v12, %v6918_v0  ;;  %v14349_v16 = vld [vmem:[#allocation37_spill] sm:$0xff] }
 0x4b7   :  { %14342 = vst [vmem:[#allocation109_spill] sm:$0xff] %v13047_v52  ;;  %v10995_v62 = vpop.eup %10994  ;;  %7929 = vmatmul.mubr.bf16.gmra.mxu1 %v14346_v20  ;;  %v7141_v36 = vpop.f32.mrf.mxu0  ;;  %7969 = vmatprep.subr.bf16.mxu0 %v10901_v46  ;;  %v7033_v8 = vadd.f32 %v14351_v10, %v6920_v45  ;;  %v10905_v46 = vld [vmem:[#allocation14 + $0x520] ss:$28 sps:$4 sm:$0xff]   ;;  %v10916_v45 = vld [vmem:[#allocation14 + $0xa28] ss:$28 sps:$4 sm:$0xff]   ;;  %v14358_v29 = vld [vmem:[#allocation73_spill] sm:$0xff] }
 0x4b8   :  { %v13054_v24 = vpop.f32.mrf.mxu1  ;;  %v9877_v57 = vpack.c.bf16 %v10995_v62, %v10993_v28  ;;  %8084 = vmatprep.mubr.bf16.mxu1 %v14349_v16  ;;  %v7142_v32 = vadd.f32 %v7141_v36, %v7029_v30  ;;  %11008 = vtanh.f32 %v7140_v9  ;;  %v10906_v28 = vld [vmem:[#allocation14 + $0x6a8] ss:$28 sps:$4 sm:$0xff]   ;;  %v10915_v9 = vld [vmem:[#allocation14 + $0x8a0] ss:$28 sps:$4 sm:$0xff]  }
 0x4b9   :  { %14347 = vst [vmem:[#allocation122_spill] sm:$0xff] %v13054_v24  ;;  %v7143_v40 = vpop.f32.mrf.mxu0  ;;  %v10997_v27 = vpop.eup %10996  ;;  %v14353_v36 = vld [vmem:[#allocation70_spill] sm:$0xff] }
 0x4ba   :  { %v13059_v7 = vpop.f32.mrf.mxu1  ;;  %8944 = vst [vmem:[#allocation17 + $0x118] sm:$0xff] %v9877_v57  ;;  %11010 = vtanh.f32 %v7142_v32  ;;  %v7144_v13 = vadd.f32 %v7143_v40, %v7031_v34  ;;  %7970 = vmatpush2.bf16.msra.mxu0 %v10899_v3  ;;  %v14354_v34 = vld [vmem:[#allocation71_spill] sm:$0xff]  ;;  %v14355_v16 = vld [vmem:[#allocation38_spill] sm:$0xff]  ;;  %v10908_v32 = vld [vmem:[#allocation14 + $0x670] ss:$28 sps:$4 sm:$0xff]  }
 0x4bb   :  { %14350 = vst [vmem:[#allocation94_spill] sm:$0xff] %v13059_v7  ;;  %v10999_v20 = vpop.eup %10998  ;;  %v7145_v60 = vpop.f32.mrf.mxu0  ;;  %9965 = vmatprep.subr.bf16.mxu0 %v10904_v39  ;;  %v10907_v57 = vld [vmem:[#allocation14 + $0x4e8] ss:$28 sps:$4 sm:$0xff]   ;;  %v14360_v7 = vld [vmem:[#allocation41_spill] sm:$0xff] }
 0x4bc   :  { %v13062_v54 = vpop.f32.mrf.mxu1  ;;  %v9881_v0 = vpack.c.bf16 %v10999_v20, %v10997_v27  ;;  %v7146_v30 = vadd.f32 %v7145_v60, %v7033_v8  ;;  %11012 = vtanh.f32 %v7144_v13  ;;  %v14356_v27 = vld [vmem:[#allocation39_spill] sm:$0xff] }
 0x4bd   :  { %14352 = vst [vmem:[#allocation111_spill] sm:$0xff] %v13062_v54  ;;  %v13064_v62 = vpop.f32.mrf.mxu0  ;;  %7972 = vmatmul.mubr.bf16.vlgmr.msra.gmra.mxu0 %v14353_v36  ;;  %v11001_v12 = vpop.eup %11000  ;;  %v10917_v8 = vld [vmem:[#allocation14 + $0x868] ss:$28 sps:$4 sm:$0xff]  }
 0x4be   :  { %8948 = vst [vmem:[#allocation17 + $0x134] sm:$0xff] %v9881_v0  ;;  %11014 = vtanh.f32 %v7146_v30  ;;  %v13067_v3 = vpop.f32.mrf.mxu1  ;;  %9966 = vmatpush3.bf16.msra.mxu0 %v10905_v46  ;;  %7981 = vmatprep.mubr.bf16.mxu0 %v14354_v34  ;;  %v10920_v46 = vld [vmem:[#allocation14 + $0x9f0] ss:$28 sps:$4 sm:$0xff]  }
 0x4bf   :  { %v11003_v39 = vpop.eup %11002  ;;  %8085 = vmatmul.mubr.bf16.vlgmr.msra.gmra.mxu1 %v14355_v16  ;;  %v13071_v20 = vpop.f32.mrf.mxu0  ;;  %9967 = vmatprep.subr.bf16.mxu0 %v10906_v28  ;;  %v10909_v30 = vld [vmem:[#allocation14 + $0x4b0] ss:$28 sps:$4 sm:$0xff]  }
 0x4c0   :  { %v9885_v40 = vpack.c.bf16 %v11003_v39, %v11001_v12  ;;  %8092 = vmatprep.mubr.bf16.mxu1 %v14356_v27  ;;  %v13074_v10 = vpop.f32.mrf.mxu1  ;;  %10030 = vmatpush3.bf16.msra.mxu1 %v10915_v9  ;;  %v10910_v12 = vld [vmem:[#allocation14 + $0x638] ss:$28 sps:$4 sm:$0xff]   ;;  %v10921_v9 = vld [vmem:[#allocation14 + $0x830] ss:$28 sps:$4 sm:$0xff]  }
 0x4c1   :  { %v13076_v13 = vpop.f32.mrf.mxu0  ;;  %10031 = vmatprep.subr.bf16.mxu1 %v10916_v45  ;;  %v11005_v60 = vpop.eup %11004  ;;  %v14357_v45 = vld [vmem:[#allocation72_spill] sm:$0xff] }
 0x4c2   :  { %8952 = vst [vmem:[#allocation17 + $0x150] sm:$0xff] %v9885_v40  ;;  %v13078_v0 = vpop.f32.mrf.mxu1  ;;  %9968 = vmatpush3.bf16.msra.mxu0 %v10907_v57  ;;  %v10922_v40 = vld [vmem:[#allocation14 + $0x9b8] ss:$28 sps:$4 sm:$0xff]  }
 0x4c3   :  { %v11007_v16 = vpop.eup %11006  ;;  %v13080_v28 = vpop.f32.mrf.mxu0  ;;  %9969 = vmatprep.subr.bf16.mxu0 %v10908_v32  ;;  %v10911_v32 = vld [vmem:[#allocation14 + $0x478] ss:$28 sps:$4 sm:$0xff]  }
 0x4c4   :  { %v9889_v39 = vpack.c.bf16 %v11007_v16, %v11005_v60  ;;  %v13082_v27 = vpop.f32.mrf.mxu1  ;;  %10032 = vmatpush3.bf16.msra.mxu1 %v10917_v8  ;;  %v14359_v60 = vld [vmem:[#allocation40_spill] sm:$0xff]  ;;  %v10912_v8 = vld [vmem:[#allocation14 + $0x600] ss:$28 sps:$4 sm:$0xff]  }
 0x4c5   :  { %v13084_v34 = vpop.f32.mrf.mxu0  ;;  %7982 = vmatmul.mubr.bf16.gmra.mxu0 %v14357_v45  ;;  %10033 = vmatprep.subr.bf16.mxu1 %v10920_v46  ;;  %v11009_v36 = vpop.eup %11008 }
 0x4c6   :  { %8956 = vst [vmem:[#allocation17 + $0x16c] sm:$0xff] %v9889_v39  ;;  %v13087_v57 = vpop.f32.mrf.mxu1  ;;  %7991 = vmatprep.mubr.bf16.mxu0 %v14358_v29  ;;  %9970 = vmatpush3.bf16.msra.mxu0 %v10909_v30  ;;  %v10923_v39 = vld [vmem:[#allocation14 + $0x7f8] ss:$28 sps:$4 sm:$0xff]   ;;  %v10926_v29 = vld [vmem:[#allocation14 + $0x980] ss:$28 sps:$4 sm:$0xff]  }
 0x4c7   :  { %v11011_v47 = vpop.eup %11010  ;;  %8093 = vmatmul.mubr.bf16.gmra.mxu1 %v14359_v60  ;;  %v13091_v16 = vpop.f32.mrf.mxu0  ;;  %9971 = vmatprep.subr.bf16.mxu0 %v10910_v12  ;;  %v10914_v60 = vld [vmem:[#allocation14 + $0x440] ss:$28 sps:$4 sm:$0xff]  }
 0x4c8   :  { %v9893_v54 = vpack.c.bf16 %v11011_v47, %v11009_v36  ;;  %8100 = vmatprep.mubr.bf16.mxu1 %v14360_v7  ;;  %v13094_v46 = vpop.f32.mrf.mxu1  ;;  %10034 = vmatpush3.bf16.msra.mxu1 %v10921_v9  ;;  %v10918_v47 = vld [vmem:[#allocation14 + $0x5c8] ss:$28 sps:$4 sm:$0xff]   ;;  %v10927_v9 = vld [vmem:[#allocation14 + $0x7c0] ss:$28 sps:$4 sm:$0xff]  }
 0x4c9   :  { %v13096_v45 = vpop.f32.mrf.mxu0  ;;  %10035 = vmatprep.subr.bf16.mxu1 %v10922_v40  ;;  %v11013_v30 = vpop.eup %11012  ;;  %v14361_v40 = vld [vmem:[#allocation74_spill] sm:$0xff] }
 0x4ca   :  { %8960 = vst [vmem:[#allocation17 + $0x188] sm:$0xff] %v9893_v54  ;;  %v13098_v6 = vpop.f32.mrf.mxu1  ;;  %9972 = vmatpush3.bf16.msra.mxu0 %v10911_v32  ;;  %v10928_v54 = vld [vmem:[#allocation14 + $0x948] ss:$28 sps:$4 sm:$0xff]  }
 0x4cb   :  { %v11015_v24 = vpop.eup %11014  ;;  %v13100_v12 = vpop.f32.mrf.mxu0  ;;  %9973 = vmatprep.subr.bf16.mxu0 %v10912_v8  ;;  %v14362_v32 = vld [vmem:[#allocation75_spill] sm:$0xff] }
 0x4cc   :  { %v9897_v7 = vpack.c.bf16 %v11015_v24, %v11013_v30  ;;  %v13102_v36 = vpop.f32.mrf.mxu1  ;;  %10036 = vmatpush3.bf16.msra.mxu1 %v10923_v39  ;;  %v14363_v8 = vld [vmem:[#allocation43_spill] sm:$0xff]  ;;  %v10924_v39 = vld [vmem:[#allocation14 + $0x590] ss:$28 sps:$4 sm:$0xff]  }
 0x4cd   :  { %v13104_v52 = vpop.f32.mrf.mxu0  ;;  %7992 = vmatmul.mubr.bf16.gmra.mxu0 %v14361_v40  ;;  %10037 = vmatprep.subr.bf16.mxu1 %v10926_v29  ;;  %v14364_v30 = vld [vmem:[#allocation44_spill] sm:$0xff] }
 0x4ce   :  { %8964 = vst [vmem:[#allocation17 + $0x1a4] sm:$0xff] %v9897_v7  ;;  %v13107_v33 = vpop.f32.mrf.mxu1  ;;  %8001 = vmatprep.mubr.bf16.mxu0 %v14362_v32  ;;  %9974 = vmatpush3.bf16.msra.mxu0 %v10914_v60  ;;  %v10929_v29 = vld [vmem:[#allocation14 + $0x788] ss:$28 sps:$4 sm:$0xff]   ;;  %v10932_v7 = vld [vmem:[#allocation14 + $0x910] ss:$28 sps:$4 sm:$0xff]  }
 0x4cf   :  { %8101 = vmatmul.mubr.bf16.gmra.mxu1 %v14363_v8  ;;  %v13111_v24 = vpop.f32.mrf.mxu0  ;;  %9975 = vmatprep.subr.bf16.mxu0 %v10918_v47  ;;  %v10925_v60 = vld [vmem:[#allocation14 + $0x3d0] ss:$28 sps:$4 sm:$0xff]   ;;  %v10930_v8 = vld [vmem:[#allocation14 + $0x558] ss:$28 sps:$4 sm:$0xff]  }
 0x4d0   :  { %8108 = vmatprep.mubr.bf16.mxu1 %v14364_v30  ;;  %v13114_v58 = vpop.f32.mrf.mxu1  ;;  %10038 = vmatpush3.bf16.msra.mxu1 %v10927_v9  ;;  %v10933_v30 = vld [vmem:[#allocation14 + $0x750] ss:$28 sps:$4 sm:$0xff]  }
 0x4d1   :  { %v13116_v40 = vpop.f32.mrf.mxu0  ;;  %10039 = vmatprep.subr.bf16.mxu1 %v10928_v54  ;;  %v14365_v9 = vld [vmem:[#allocation76_spill] sm:$0xff] }
 0x4d2   :  { %v13118_v53 = vpop.f32.mrf.mxu1  ;;  %9976 = vmatpush3.bf16.msra.mxu0 %v10919_v61  ;;  %v10931_v61 = vld [vmem:[#allocation14 + $0x398] ss:$28 sps:$4 sm:$0xff]  }
 0x4d3   :  { %v13120_v32 = vpop.f32.mrf.mxu0  ;;  %9977 = vmatprep.subr.bf16.mxu0 %v10924_v39 }
 0x4d4   :  { %v13122_v47 = vpop.f32.mrf.mxu1  ;;  %10040 = vmatpush3.bf16.msra.mxu1 %v10929_v29  ;;  %v14369_v29 = vld [vmem:[#allocation46_spill] sm:$0xff] }
 0x4d5   :  { %v13124_v25 = vpop.f32.mrf.mxu0  ;;  %8002 = vmatmul.mubr.bf16.gmra.mxu0 %v14365_v9  ;;  %10041 = vmatprep.subr.bf16.mxu1 %v10932_v7  ;;  %v10935_v9 = vld [vmem:[#allocation14 + $0x718] ss:$28 sps:$4 sm:$0xff]  }
 0x4d6   :  { %v13127_v54 = vpop.f32.mrf.mxu1  ;;  %8011 = vmatprep.mubr.bf16.mxu0 %v14367_v21  ;;  %9978 = vmatpush3.bf16.msra.mxu0 %v10925_v60  ;;  %v14376_v21 = vld [vmem:[#allocation78_spill] sm:$0xff] }
 0x4d7   :  { %14366 = vst [vmem:[#allocation95_spill] sm:$0xff] %v13127_v54  ;;  %8109 = vmatmul.mubr.bf16.gmra.mxu1 %v14368_v15  ;;  %v13131_v39 = vpop.f32.mrf.mxu0  ;;  %9979 = vmatprep.subr.bf16.mxu0 %v10930_v8 }
 0x4d8   :  { %8116 = vmatprep.mubr.bf16.mxu1 %v14369_v29  ;;  %v13134_v38 = vpop.f32.mrf.mxu1  ;;  %10042 = vmatpush3.bf16.msra.mxu1 %v10933_v30  ;;  %v14378_v30 = vld [vmem:[#allocation79_spill] sm:$0xff] }
 0x4d9   :  { %14370 = vst [vmem:[#allocation113_spill] sm:$0xff] %v13134_v38  ;;  %v13136_v7 = vpop.f32.mrf.mxu0  ;;  %10043 = vmatprep.subr.bf16.mxu1 %v10934_v17  ;;  %v14379_v38 = vld [vmem:[#allocation32_spill] sm:$0xff] }
 0x4da   :  { %14371 = vst [vmem:[#allocation96_spill] sm:$0xff] %v13136_v7  ;;  %v13138_v54 = vpop.f32.mrf.mxu1  ;;  %9980 = vmatpush3.bf16.msra.mxu0 %v10931_v61  ;;  %v14381_v61 = vld [vmem:[#allocation31_spill] sm:$0xff] }
 0x4db   :  { %14372 = vst [vmem:[#allocation115_spill] sm:$0xff] %v13138_v54  ;;  %v13140_v60 = vpop.f32.mrf.mxu0  ;;  %10093 = vmatprep.subr.bf16.mxu0 %v10936_v55  ;;  %v10938_v7 = vld [vmem:[#allocation14 + $0xda8] ss:$28 sps:$4 sm:$0xff]  }
 0x4dc   :  { %14373 = vst [vmem:[#allocation125_spill] sm:$0xff] %v13140_v60  ;;  %v13142_v15 = vpop.f32.mrf.mxu1  ;;  %10044 = vmatpush3.bf16.msra.mxu1 %v10935_v9 }
 0x4dd   :  { %14374 = vst [vmem:[#allocation97_spill] sm:$0xff] %v13142_v15  ;;  %v13144_v8 = vpop.f32.mrf.mxu0  ;;  %8012 = vmatmul.mubr.bf16.gmra.mxu0 %v14376_v21  ;;  %10157 = vmatprep.subr.bf16.mxu1 %v10936_v55 }
 0x4de   :  { %14375 = vst [vmem:[#allocation116_spill] sm:$0xff] %v13144_v8  ;;  %v13147_v29 = vpop.f32.mrf.mxu1  ;;  %8021 = vmatprep.mubr.bf16.mxu0 %v14378_v30 }
 0x4df   :  { %14377 = vst [vmem:[#allocation126_spill] sm:$0xff] %v13147_v29  ;;  %8117 = vmatmul.mubr.bf16.gmra.mxu1 %v14379_v38  ;;  %v13151_v17 = vpop.f32.mrf.mxu0  ;;  %v14388_v29 = vld [vmem:[#allocation80_spill] sm:$0xff]  ;;  %v14390_v38 = vld [vmem:[#allocation81_spill] sm:$0xff] }
 0x4e0   :  { %14380 = vst [vmem:[#allocation98_spill] sm:$0xff] %v13151_v17  ;;  %8124 = vmatprep.mubr.bf16.mxu1 %v14381_v61  ;;  %v13154_v54 = vpop.f32.mrf.mxu1  ;;  %v14391_v17 = vld [vmem:[#allocation29_spill] sm:$0xff] }
 0x4e1   :  { %14382 = vst [vmem:[#allocation117_spill] sm:$0xff] %v13154_v54  ;;  %v13156_v60 = vpop.f32.mrf.mxu0  ;;  %v14393_v54 = vld [vmem:[#allocation33_spill] sm:$0xff] }
 0x4e2   :  { %14383 = vst [vmem:[#allocation99_spill] sm:$0xff] %v13156_v60  ;;  %v13158_v9 = vpop.f32.mrf.mxu1 }
 0x4e3   :  { %14384 = vst [vmem:[#allocation118_spill] sm:$0xff] %v13158_v9  ;;  %v13160_v15 = vpop.f32.mrf.mxu0 }
 0x4e4   :  { %14385 = vst [vmem:[#allocation100_spill] sm:$0xff] %v13160_v15  ;;  %v13162_v21 = vpop.f32.mrf.mxu1 }
 0x4e5   :  { %14386 = vst [vmem:[#allocation119_spill] sm:$0xff] %v13162_v21  ;;  %v13164_v55 = vpop.f32.mrf.mxu0  ;;  %8022 = vmatmul.mubr.bf16.gmra.mxu0 %v14388_v29 }
 0x4e6   :  { %14387 = vst [vmem:[#allocation129_spill] sm:$0xff] %v13164_v55  ;;  %v13167_v30 = vpop.f32.mrf.mxu1  ;;  %8031 = vmatprep.mubr.bf16.mxu0 %v14390_v38 }
 0x4e7   :  { %14389 = vst [vmem:[#allocation101_spill] sm:$0xff] %v13167_v30  ;;  %8125 = vmatmul.mubr.bf16.gmra.mxu1 %v14391_v17  ;;  %v13171_v61 = vpop.f32.mrf.mxu0  ;;  %v14400_v30 = vld [vmem:[#allocation82_spill] sm:$0xff]  ;;  %v14402_v17 = vld [vmem:[#allocation83_spill] sm:$0xff] }
 0x4e8   :  { %14392 = vst [vmem:[#allocation120_spill] sm:$0xff] %v13171_v61  ;;  %8132 = vmatprep.mubr.bf16.mxu1 %v14393_v54  ;;  %v13174_v60 = vpop.f32.mrf.mxu1  ;;  %v14403_v61 = vld [vmem:[#allocation35_spill] sm:$0xff] }
 0x4e9   :  { %14394 = vst [vmem:[#allocation130_spill] sm:$0xff] %v13174_v60  ;;  %v13176_v9 = vpop.f32.mrf.mxu0  ;;  %v14405_v60 = vld [vmem:[#allocation36_spill] sm:$0xff] }
 0x4ea   :  { %14395 = vst [vmem:[#allocation102_spill] sm:$0xff] %v13176_v9  ;;  %v13178_v15 = vpop.f32.mrf.mxu1 }
 0x4eb   :  { %14396 = vst [vmem:[#allocation123_spill] sm:$0xff] %v13178_v15  ;;  %v13180_v21 = vpop.f32.mrf.mxu0 }
 0x4ec   :  { %14397 = vst [vmem:[#allocation103_spill] sm:$0xff] %v13180_v21  ;;  %v13182_v55 = vpop.f32.mrf.mxu1  ;;  %v13198_v21 = vld [vmem:[#allocation16] sm:$0xff] }
 0x4ed   :  { %14398 = vst [vmem:[#allocation124_spill] sm:$0xff] %v13182_v55  ;;  %v13184_v29 = vpop.f32.mrf.mxu0  ;;  %8032 = vmatmul.mubr.bf16.gmra.mxu0 %v14400_v30  ;;  %14408 = vst [vmem:[#allocation131_spill] sm:$0xff] %v13198_v21  ;;  %v14409_v55 = vld [vmem:[#allocation28_spill] sm:$0xff] }
 0x4ee   :  { %14399 = vst [vmem:[#allocation104_spill] sm:$0xff] %v13184_v29  ;;  %v13187_v38 = vpop.f32.mrf.mxu1  ;;  %8041 = vmatprep.mubr.bf16.mxu0 %v14402_v17  ;;  %v13202_v29 = vrot.slane %v13198_v21, %v14409_v55  ;;  %v14412_v17 = vld [vmem:[#allocation27_spill] sm:$0xff]  ;;  %v14417_v55 = vld [vmem:[#allocation42_spill] sm:$0xff] }
 0x4ef   :  { %14401 = vst [vmem:[#allocation127_spill] sm:$0xff] %v13187_v38  ;;  %8133 = vmatmul.mubr.bf16.gmra.mxu1 %v14403_v61  ;;  %v13191_v54 = vpop.f32.mrf.mxu0  ;;  %v13210_v61 = vrot.slane %v13198_v21, %v14412_v17 }
 0x4f0   :  { %14404 = vst [vmem:[#allocation105_spill] sm:$0xff] %v13191_v54  ;;  %8140 = vmatprep.mubr.bf16.mxu1 %v14405_v60  ;;  %v13194_v9 = vpop.f32.mrf.mxu1 }
 0x4f1   :  { %14406 = vst [vmem:[#allocation128_spill] sm:$0xff] %v13194_v9  ;;  %v13196_v15 = vpop.f32.mrf.mxu0  ;;  %v14415_v9 = vld [vmem:[#allocation84_spill] sm:$0xff]  ;;  %v7185_v17 = vadd.f32 %v12860_v56, %v13210_v61  ;;  %v7189_v56 = vadd.f32 %v12871_v26, %v13210_v61 }
 0x4f2   :  { %14407 = vst [vmem:[#allocation106_spill] sm:$0xff] %v13196_v15  ;;  %v13204_v30 = vpop.f32.mrf.mxu1  ;;  %v7183_v15 = vadd.f32 %v12851_v49, %v13202_v29  ;;  %v7187_v49 = vadd.f32 %v12867_v5, %v13202_v29  ;;  %v7193_v5 = vadd.f32 %v12879_v1, %v13202_v29  ;;  %v10939_v26 = vld [vmem:[#allocation14 + $0xbe8] ss:$28 sps:$4 sm:$0xff]  }
 0x4f3   :  { %14410 = vst [vmem:[#allocation134_spill] sm:$0xff] %v13204_v30  ;;  %v13206_v38 = vpop.f32.mrf.mxu0  ;;  %v14418_v30 = vld [vmem:[#allocation49_spill] sm:$0xff] }
 0x4f4   :  { %14411 = vst [vmem:[#allocation108_spill] sm:$0xff] %v13206_v38  ;;  %v13212_v54 = vpop.f32.mrf.mxu1  ;;  %v7296_v21 = vadd.f32 %v13064_v62, %v7183_v15  ;;  %v7300_v15 = vadd.f32 %v13076_v13, %v7187_v49  ;;  %v10940_v13 = vld [vmem:[#allocation14 + $0xd70] ss:$28 sps:$4 sm:$0xff]  }
 0x4f5   :  { %14413 = vst [vmem:[#allocation132_spill] sm:$0xff] %v13212_v54  ;;  %v13214_v60 = vpop.f32.mrf.mxu0  ;;  %8042 = vmatmul.mubr.bf16.gmra.mxu0 %v14415_v9  ;;  %v14420_v54 = vld [vmem:[#allocation55_spill] sm:$0xff] }
 0x4f6   :  { %14414 = vst [vmem:[#allocation135_spill] sm:$0xff] %v13214_v60  ;;  %v13219_v8 = vpop.f32.mrf.mxu1  ;;  %8181 = vmatprep.mubr.bf16.mxu0 %v14417_v55  ;;  %v7298_v55 = vadd.f32 %v13071_v20, %v7185_v17  ;;  %v7409_v62 = vadd.f32 %v13067_v3, %v7296_v21  ;;  %v7302_v17 = vadd.f32 %v13080_v28, %v7189_v56 }
 0x4f7   :  { %14416 = vst [vmem:[#allocation110_spill] sm:$0xff] %v13219_v8  ;;  %8141 = vmatmul.mubr.bf16.gmra.mxu1 %v14418_v30  ;;  %v13223_v38 = vpop.f32.mrf.mxu0  ;;  %v10937_v30 = vld [vmem:[#allocation14 + $0xc20] ss:$28 sps:$4 sm:$0xff]   ;;  %v7195_v21 = vadd.f32 %v12888_v42, %v13210_v61 }
 0x4f8   :  { %14419 = vst [vmem:[#allocation133_spill] sm:$0xff] %v13223_v38  ;;  %8278 = vmatprep.mubr.bf16.mxu1 %v14420_v54  ;;  %v13229_v60 = vpop.f32.mrf.mxu1  ;;  %v7411_v20 = vadd.f32 %v13074_v10, %v7298_v55  ;;  %v7306_v10 = vadd.f32 %v13084_v34, %v7193_v5  ;;  %v10941_v34 = vld [vmem:[#allocation14 + $0xbb0] ss:$28 sps:$4 sm:$0xff]  }
 0x4f9   :  { %14421 = vst [vmem:[#allocation112_spill] sm:$0xff] %v13229_v60  ;;  %v13231_v9 = vpop.f32.mrf.mxu0  ;;  %v7308_v49 = vadd.f32 %v13091_v16, %v7195_v21 }
 0x4fa   :  { %v13236_v8 = vpop.f32.mrf.mxu1 }
 0x4fb   :  { %14422 = vst [vmem:[#allocation136_spill] sm:$0xff] %v13236_v8  ;;  %v13238_v38 = vpop.f32.mrf.mxu0 }
 0x4fc   :  { %v13244_v54 = vpop.f32.mrf.mxu1 }
 0x4fd   :  { %v7521_v60 = vpop.f32.mrf.mxu0  ;;  %8182 = vmatmul.mubr.bf16.vlgmr.msra.gmra.mxu0 %v12233_v14  ;;  %v7413_v14 = vadd.f32 %v13078_v0, %v7300_v15  ;;  %v7421_v15 = vadd.f32 %v13094_v46, %v7308_v49 }
 0x4fe   :  { %v7522_v8 = vadd.f32 %v7521_v60, %v7409_v62  ;;  %10094 = vmatpush3.bf16.msra.mxu0 %v10937_v30  ;;  %8189 = vmatprep.mubr.bf16.mxu0 %v12257_v4  ;;  %v7197_v4 = vadd.f32 %v12895_v31, %v13202_v29  ;;  %v7199_v31 = vadd.f32 %v12899_v11, %v13210_v61 }
 0x4ff   :  { %v13254_v3 = vpop.f32.mrf.mxu1  ;;  %8279 = vmatmul.mubr.bf16.vlgmr.msra.gmra.mxu1 %v12399_v43  ;;  %v7523_v1 = vpop.f32.mrf.mxu0  ;;  %10095 = vmatprep.subr.bf16.mxu0 %v10938_v7  ;;  %v7415_v43 = vadd.f32 %v13082_v27, %v7302_v17  ;;  %v7203_v27 = vadd.f32 %v12907_v2, %v13202_v29  ;;  %v7205_v2 = vadd.f32 %v12917_v18, %v13210_v61 }
 0x500   :  { %8286 = vmatprep.mubr.bf16.mxu1 %v12406_v35  ;;  %v7524_v28 = vadd.f32 %v7523_v1, %v7411_v20  ;;  %10165 = vmatpush3.bf16.msra.mxu1 %v10937_v30  ;;  %11016 = vtanh.f32 %v7522_v8  ;;  %v10942_v30 = vld [vmem:[#allocation14 + $0xd38] ss:$28 sps:$4 sm:$0xff]   ;;  %v7419_v8 = vadd.f32 %v13087_v57, %v7306_v10  ;;  %v7312_v11 = vadd.f32 %v13100_v12, %v7199_v31 }
 0x501   :  { %v13262_v42 = vpop.f32.mrf.mxu1  ;;  %v7525_v60 = vpop.f32.mrf.mxu0  ;;  %10158 = vmatprep.subr.bf16.mxu1 %v10938_v7  ;;  %v7310_v7 = vadd.f32 %v13096_v45, %v7197_v4  ;;  %v10943_v45 = vld [vmem:[#allocation14 + $0xb78] ss:$28 sps:$4 sm:$0xff]   ;;  %v7316_v12 = vadd.f32 %v13104_v52, %v7203_v27  ;;  %v7318_v21 = vadd.f32 %v13111_v24, %v7205_v2  ;;  %v10945_v52 = vld [vmem:[#allocation14 + $0xb40] ss:$28 sps:$4 sm:$0xff]   ;;  %v10949_v27 = vld [vmem:[#allocation14 + $0xad0] ss:$28 sps:$4 sm:$0xff]  }
 0x502   :  { %11018 = vtanh.f32 %v7524_v28  ;;  %v7526_v0 = vadd.f32 %v7525_v60, %v7413_v14  ;;  %10096 = vmatpush3.bf16.msra.mxu0 %v10939_v26  ;;  %v7209_v14 = vadd.f32 %v12929_v22, %v13210_v61  ;;  %v14424_v31 = vld [vmem:[#allocation85_spill] sm:$0xff] }
 0x503   :  { %v13266_v55 = vpop.f32.mrf.mxu1  ;;  %v7527_v35 = vpop.f32.mrf.mxu0  ;;  %10097 = vmatprep.subr.bf16.mxu0 %v10940_v13  ;;  %v7423_v46 = vadd.f32 %v13098_v6, %v7310_v7  ;;  %v7429_v10 = vadd.f32 %v13107_v33, %v7316_v12  ;;  %v7431_v60 = vadd.f32 %v13114_v58, %v7318_v21  ;;  %v10947_v33 = vld [vmem:[#allocation14 + $0xb08] ss:$28 sps:$4 sm:$0xff]   ;;  %v10948_v58 = vld [vmem:[#allocation14 + $0xc90] ss:$28 sps:$4 sm:$0xff]   ;;  %v10950_v2 = vld [vmem:[#allocation14 + $0xc58] ss:$28 sps:$4 sm:$0xff]  }
 0x504   :  { %v7528_v56 = vadd.f32 %v7527_v35, %v7415_v43  ;;  %10166 = vmatpush3.bf16.msra.mxu1 %v10939_v26  ;;  %11020 = vtanh.f32 %v7526_v0  ;;  %v7322_v43 = vadd.f32 %v13120_v32, %v7209_v14  ;;  %v14429_v21 = vld [vmem:[#allocation30_spill] sm:$0xff] }
 0x505   :  { %v13274_v16 = vpop.f32.mrf.mxu1  ;;  %v7531_v62 = vpop.f32.mrf.mxu0  ;;  %8190 = vmatmul.mubr.bf16.gmra.mxu0 %v12263_v19  ;;  %10159 = vmatprep.subr.bf16.mxu1 %v10940_v13  ;;  %v10944_v19 = vld [vmem:[#allocation14 + $0xd00] ss:$28 sps:$4 sm:$0xff]  }
 0x506   :  { %11022 = vtanh.f32 %v7528_v56  ;;  %v7532_v57 = vadd.f32 %v7531_v62, %v7419_v8  ;;  %8197 = vmatprep.mubr.bf16.mxu0 %v12283_v59  ;;  %10098 = vmatpush3.bf16.msra.mxu0 %v10941_v34  ;;  %v7207_v59 = vadd.f32 %v12923_v63, %v13202_v29  ;;  %v10946_v63 = vld [vmem:[#allocation14 + $0xcc8] ss:$28 sps:$4 sm:$0xff]   ;;  %v7217_v8 = vadd.f32 %v14424_v31, %v13202_v29 }
 0x507   :  { %v13282_v5 = vpop.f32.mrf.mxu1  ;;  %8287 = vmatmul.mubr.bf16.gmra.mxu1 %v14259_v41  ;;  %v7533_v20 = vpop.f32.mrf.mxu0  ;;  %10099 = vmatprep.subr.bf16.mxu0 %v10942_v30  ;;  %v7425_v41 = vadd.f32 %v13102_v36, %v7312_v11  ;;  %v7213_v36 = vadd.f32 %v12935_v48, %v13202_v29  ;;  %v7215_v48 = vadd.f32 %v12945_v44, %v13210_v61 }
 0x508   :  { %8294 = vmatprep.mubr.bf16.mxu1 %v14260_v50  ;;  %v7534_v17 = vadd.f32 %v7533_v20, %v7421_v15  ;;  %10167 = vmatpush3.bf16.msra.mxu1 %v10941_v34  ;;  %11024 = vtanh.f32 %v7532_v57  ;;  %v7320_v50 = vadd.f32 %v13116_v40, %v7207_v59  ;;  %v14425_v15 = vld [vmem:[#allocation96_spill] sm:$0xff]  ;;  %v14426_v20 = vld [vmem:[#allocation86_spill] sm:$0xff] }
 0x509   :  { %v13290_v18 = vpop.f32.mrf.mxu1  ;;  %v7535_v26 = vpop.f32.mrf.mxu0  ;;  %10160 = vmatprep.subr.bf16.mxu1 %v10942_v30  ;;  %v7326_v32 = vadd.f32 %v13124_v25, %v7213_v36  ;;  %v14423_v30 = vld [vmem:[#allocation59_spill] sm:$0xff]  ;;  %v7328_v56 = vadd.f32 %v13131_v39, %v7215_v48  ;;  %v7330_v11 = vadd.f32 %v14425_v15, %v7217_v8  ;;  %v14436_v48 = vld [vmem:[#allocation116_spill] sm:$0xff] }
 0x50a   :  { %11026 = vtanh.f32 %v7534_v17  ;;  %v7536_v6 = vadd.f32 %v7535_v26, %v7423_v46  ;;  %10100 = vmatpush3.bf16.msra.mxu0 %v10943_v45  ;;  %v7433_v0 = vadd.f32 %v13118_v53, %v7320_v50  ;;  %v14427_v46 = vld [vmem:[#allocation95_spill] sm:$0xff] }
 0x50b   :  { %v13295_v1 = vpop.f32.mrf.mxu1  ;;  %v7537_v13 = vpop.f32.mrf.mxu0  ;;  %10101 = vmatprep.subr.bf16.mxu0 %v10944_v19  ;;  %v14428_v17 = vld [vmem:[#allocation87_spill] sm:$0xff] }
 0x50c   :  { %v7538_v28 = vadd.f32 %v7537_v13, %v7425_v41  ;;  %10168 = vmatpush3.bf16.msra.mxu1 %v10943_v45  ;;  %11028 = vtanh.f32 %v7536_v6  ;;  %v7223_v59 = vadd.f32 %v14428_v17, %v13202_v29  ;;  %v14431_v13 = vld [vmem:[#allocation125_spill] sm:$0xff] }
 0x50d   :  { %v13302_v24 = vpop.f32.mrf.mxu1  ;;  %v7541_v4 = vpop.f32.mrf.mxu0  ;;  %8198 = vmatmul.mubr.bf16.gmra.mxu0 %v12289_v37  ;;  %10161 = vmatprep.subr.bf16.mxu1 %v10944_v19  ;;  %v7219_v19 = vadd.f32 %v14426_v20, %v13210_v61  ;;  %v14442_v20 = vld [vmem:[#allocation126_spill] sm:$0xff] }
 0x50e   :  { %v11017_v40 = vpop.eup %11016  ;;  %11030 = vtanh.f32 %v7538_v28  ;;  %v7542_v22 = vadd.f32 %v7541_v4, %v7429_v10  ;;  %8205 = vmatprep.mubr.bf16.mxu0 %v12311_v23  ;;  %10102 = vmatpush3.bf16.msra.mxu0 %v10945_v52  ;;  %v14432_v10 = vld [vmem:[#allocation34_spill] sm:$0xff]  ;;  %v14433_v4 = vld [vmem:[#allocation56_spill] sm:$0xff] }
 0x50f   :  { %v11019_v49 = vpop.eup %11018  ;;  %v13311_v34 = vpop.f32.mrf.mxu1  ;;  %8295 = vmatmul.mubr.bf16.gmra.mxu1 %v14265_v51  ;;  %10103 = vmatprep.subr.bf16.mxu0 %v10946_v63  ;;  %v7435_v51 = vadd.f32 %v13122_v47, %v7322_v43  ;;  %v7439_v47 = vadd.f32 %v14427_v46, %v7326_v32  ;;  %v10951_v28 = vld [vmem:[#allocation14 + $0xa98] ss:$28 sps:$4 sm:$0xff]   ;;  %v14443_v46 = vld [vmem:[#allocation99_spill] sm:$0xff] }
 0x510   :  { %v7543_v37 = vpop.f32.mrf.mxu0  ;;  %v9838_v35 = vpack.c.bf16 %v11019_v49, %v11017_v40  ;;  %8302 = vmatprep.mubr.bf16.mxu1 %v14423_v30  ;;  %10169 = vmatpush3.bf16.msra.mxu1 %v10945_v52  ;;  %11032 = vtanh.f32 %v7542_v22  ;;  %v14430_v52 = vld [vmem:[#allocation113_spill] sm:$0xff]  ;;  %v7225_v40 = vadd.f32 %v14433_v4, %v13210_v61 }
 0x511   :  { %v7544_v23 = vadd.f32 %v7543_v37, %v7431_v60  ;;  %v13318_v44 = vpop.f32.mrf.mxu1  ;;  %10162 = vmatprep.subr.bf16.mxu1 %v10946_v63  ;;  %v11021_v7 = vpop.eup %11020  ;;  %v7441_v50 = vadd.f32 %v14430_v52, %v7328_v56  ;;  %v7332_v63 = vadd.f32 %v14431_v13, %v7219_v19  ;;  %v14434_v60 = vld [vmem:[#allocation115_spill] sm:$0xff]  ;;  %v14446_v52 = vld [vmem:[#allocation117_spill] sm:$0xff]  ;;  %v14447_v13 = vld [vmem:[#allocation100_spill] sm:$0xff] }
 0x512   :  { %v7545_v53 = vpop.f32.mrf.mxu0  ;;  %8905 = vst [vmem:[#allocation17 + $0x8] sm:$0xff] %v9838_v35  ;;  %10104 = vmatpush3.bf16.msra.mxu0 %v10947_v33  ;;  %v7443_v43 = vadd.f32 %v14434_v60, %v7330_v11  ;;  %v14438_v35 = vld [vmem:[#allocation57_spill] sm:$0xff]  ;;  %v14450_v60 = vld [vmem:[#allocation62_spill] sm:$0xff] }
 0x513   :  { %11034 = vtanh.f32 %v7544_v23  ;;  %v7546_v25 = vadd.f32 %v7545_v53, %v7433_v0  ;;  %v11023_v62 = vpop.eup %11022  ;;  %v13323_v57 = vpop.f32.mrf.mxu1  ;;  %10105 = vmatprep.subr.bf16.mxu0 %v10948_v58  ;;  %v7336_v0 = vadd.f32 %v14436_v48, %v7223_v59  ;;  %v7227_v30 = vadd.f32 %v14438_v35, %v13202_v29  ;;  %v14439_v53 = vld [vmem:[#allocation97_spill] sm:$0xff]  ;;  %v14454_v35 = vld [vmem:[#allocation91_spill] sm:$0xff] }
 0x514   :  { %v7547_v45 = vpop.f32.mrf.mxu0  ;;  %v9842_v12 = vpack.c.bf16 %v11023_v62, %v11021_v7  ;;  %10170 = vmatpush3.bf16.msra.mxu1 %v10947_v33  ;;  %v14435_v33 = vld [vmem:[#allocation60_spill] sm:$0xff]  ;;  %v7445_v7 = vadd.f32 %v14439_v53, %v7332_v63  ;;  %v14452_v48 = vld [vmem:[#allocation129_spill] sm:$0xff] }
 0x515   :  { %v7548_v39 = vadd.f32 %v7547_v45, %v7435_v51  ;;  %11036 = vtanh.f32 %v7546_v25  ;;  %v13330_v26 = vpop.f32.mrf.mxu1  ;;  %8206 = vmatmul.mubr.bf16.gmra.mxu0 %v14429_v21  ;;  %10163 = vmatprep.subr.bf16.mxu1 %v10948_v58  ;;  %v11025_v6 = vpop.eup %11024  ;;  %v14437_v58 = vld [vmem:[#allocation61_spill] sm:$0xff]  ;;  %v14440_v51 = vld [vmem:[#allocation98_spill] sm:$0xff]  ;;  %v7449_v19 = vadd.f32 %v14442_v20, %v7336_v0  ;;  %v14445_v21 = vld [vmem:[#allocation47_spill] sm:$0xff] }
 0x516   :  { %v7551_v41 = vpop.f32.mrf.mxu0  ;;  %8909 = vst [vmem:[#allocation17 + $0x24] sm:$0xff] %v9842_v12  ;;  %8213 = vmatprep.mubr.bf16.mxu0 %v14432_v10  ;;  %10106 = vmatpush3.bf16.msra.mxu0 %v10949_v27  ;;  %v7338_v56 = vadd.f32 %v14440_v51, %v7225_v40  ;;  %v14448_v10 = vld [vmem:[#allocation48_spill] sm:$0xff] }
 0x517   :  { %11038 = vtanh.f32 %v7548_v39  ;;  %v7552_v14 = vadd.f32 %v7551_v41, %v7439_v47  ;;  %v11027_v36 = vpop.eup %11026  ;;  %v13339_v22 = vpop.f32.mrf.mxu1  ;;  %8303 = vmatmul.mubr.bf16.gmra.mxu1 %v14435_v33  ;;  %10107 = vmatprep.subr.bf16.mxu0 %v10950_v2  ;;  %v14444_v39 = vld [vmem:[#allocation89_spill] sm:$0xff]  ;;  %v14451_v33 = vld [vmem:[#allocation118_spill] sm:$0xff] }
 0x518   :  { %v7553_v49 = vpop.f32.mrf.mxu0  ;;  %v9846_v37 = vpack.c.bf16 %v11027_v36, %v11025_v6  ;;  %8310 = vmatprep.mubr.bf16.mxu1 %v14437_v58  ;;  %10171 = vmatpush3.bf16.msra.mxu1 %v10949_v27  ;;  %v14441_v27 = vld [vmem:[#allocation88_spill] sm:$0xff]  ;;  %v7233_v17 = vadd.f32 %v14444_v39, %v13202_v29  ;;  %v14449_v36 = vld [vmem:[#allocation90_spill] sm:$0xff]  ;;  %v14453_v58 = vld [vmem:[#allocation63_spill] sm:$0xff] }
 0x519   :  { %v7554_v32 = vadd.f32 %v7553_v49, %v7441_v50  ;;  %11040 = vtanh.f32 %v7552_v14  ;;  %v13346_v23 = vpop.f32.mrf.mxu1  ;;  %10164 = vmatprep.subr.bf16.mxu1 %v10950_v2  ;;  %v11029_v8 = vpop.eup %11028  ;;  %v7229_v15 = vadd.f32 %v14441_v27, %v13210_v61  ;;  %v7340_v2 = vadd.f32 %v14443_v46, %v7227_v30  ;;  %v14458_v46 = vld [vmem:[#allocation101_spill] sm:$0xff] }
 0x51a   :  { %v7555_v31 = vpop.f32.mrf.mxu0  ;;  %8913 = vst [vmem:[#allocation17 + $0x40] sm:$0xff] %v9846_v37  ;;  %10108 = vmatpush3.bf16.msra.mxu0 %v10951_v28  ;;  %v7451_v50 = vadd.f32 %v14446_v52, %v7338_v56  ;;  %v7235_v4 = vadd.f32 %v14449_v36, %v13210_v61  ;;  %v7346_v0 = vadd.f32 %v14452_v48, %v7233_v17  ;;  %v14456_v56 = vld [vmem:[#allocation120_spill] sm:$0xff] }
 0x51b   :  { %11042 = vtanh.f32 %v7554_v32  ;;  %v7556_v25 = vadd.f32 %v7555_v31, %v7443_v43  ;;  %v11031_v62 = vpop.eup %11030  ;;  %v13352_v11 = vpop.f32.mrf.mxu1  ;;  %v7342_v63 = vadd.f32 %v14447_v13, %v7229_v15  ;;  %v7453_v49 = vadd.f32 %v14451_v33, %v7340_v2  ;;  %v14457_v15 = vld [vmem:[#allocation58_spill] sm:$0xff]  ;;  %v14468_v48 = vld [vmem:[#allocation64_spill] sm:$0xff] }
 0x51c   :  { %v7557_v45 = vpop.f32.mrf.mxu0  ;;  %v9850_v47 = vpack.c.bf16 %v11031_v62, %v11029_v8  ;;  %10172 = vmatpush3.bf16.msra.mxu1 %v10951_v28  ;;  %v7237_v30 = vadd.f32 %v14454_v35, %v13202_v29  ;;  %v7459_v2 = vadd.f32 %v14458_v46, %v7346_v0 }
 0x51d   :  { %v7558_v12 = vadd.f32 %v7557_v45, %v7445_v7  ;;  %11044 = vtanh.f32 %v7556_v25  ;;  %v13358_v59 = vpop.f32.mrf.mxu1  ;;  %8214 = vmatmul.mubr.bf16.gmra.mxu0 %v14445_v21  ;;  %v11033_v6 = vpop.eup %11032  ;;  %v14455_v7 = vld [vmem:[#allocation119_spill] sm:$0xff]  ;;  %v7348_v25 = vadd.f32 %v14456_v56, %v7235_v4  ;;  %v7239_v45 = vadd.f32 %v14457_v15, %v13210_v61 }
 0x51e   :  { %v7561_v41 = vpop.f32.mrf.mxu0  ;;  %8917 = vst [vmem:[#allocation17 + $0x5c] sm:$0xff] %v9850_v47  ;;  %8221 = vmatprep.mubr.bf16.mxu0 %v14448_v10  ;;  %v7455_v51 = vadd.f32 %v14455_v7, %v7342_v63  ;;  %v14459_v47 = vld [vmem:[#allocation102_spill] sm:$0xff]  ;;  %v14464_v10 = vld [vmem:[#allocation103_spill] sm:$0xff]  ;;  %v14472_v7 = vld [vmem:[#allocation121_spill] sm:$0xff] }
 0x51f   :  { %11046 = vtanh.f32 %v7558_v12  ;;  %v7562_v14 = vadd.f32 %v7561_v41, %v7449_v19  ;;  %v13366_v40 = vpop.f32.mrf.mxu1  ;;  %8311 = vmatmul.mubr.bf16.gmra.mxu1 %v14450_v60  ;;  %v7350_v12 = vadd.f32 %v14459_v47, %v7237_v30  ;;  %v14460_v41 = vld [vmem:[#allocation92_spill] sm:$0xff]  ;;  %v14463_v63 = vld [vmem:[#allocation130_spill] sm:$0xff]  ;;  %v14465_v4 = vld [vmem:[#allocation51_spill] sm:$0xff] }
 0x520   :  { %v11035_v28 = vpop.eup %11034  ;;  %v7563_v43 = vpop.f32.mrf.mxu0  ;;  %8318 = vmatprep.mubr.bf16.mxu1 %v14453_v58  ;;  %v7243_v21 = vadd.f32 %v14460_v41, %v13202_v29  ;;  %v14476_v47 = vld [vmem:[#allocation93_spill] sm:$0xff]  ;;  %v14478_v41 = vld [vmem:[#allocation127_spill] sm:$0xff] }
 0x521   :  { %v9854_v37 = vpack.c.bf16 %v11035_v28, %v11033_v6  ;;  %v7564_v32 = vadd.f32 %v7563_v43, %v7451_v50  ;;  %11048 = vtanh.f32 %v7562_v14  ;;  %v13374_v31 = vpop.f32.mrf.mxu1  ;;  %v14462_v50 = vld [vmem:[#allocation50_spill] sm:$0xff]  ;;  %v7461_v14 = vadd.f32 %v14463_v63, %v7348_v25  ;;  %v14466_v43 = vld [vmem:[#allocation107_spill] sm:$0xff] }
 0x522   :  { %v7565_v8 = vpop.f32.mrf.mxu0  ;;  %v11037_v53 = vpop.eup %11036  ;;  %v7352_v28 = vadd.f32 %v14464_v10, %v7239_v45  ;;  %v7245_v33 = vadd.f32 %v14466_v43, %v13210_v61  ;;  %v14475_v45 = vld [vmem:[#allocation105_spill] sm:$0xff]  ;;  %v14483_v43 = vld [vmem:[#allocation128_spill] sm:$0xff] }
 0x523   :  { %8921 = vst [vmem:[#allocation17 + $0x78] sm:$0xff] %v9854_v37  ;;  %11050 = vtanh.f32 %v7564_v32  ;;  %v7566_v62 = vadd.f32 %v7565_v8, %v7453_v49  ;;  %v13380_v20 = vpop.f32.mrf.mxu1  ;;  %v14469_v37 = vld [vmem:[#allocation123_spill] sm:$0xff]  ;;  %v14470_v32 = vld [vmem:[#allocation104_spill] sm:$0xff]  ;;  %v14471_v8 = vld [vmem:[#allocation65_spill] sm:$0xff] }
 0x524   :  { %v11039_v27 = vpop.eup %11038  ;;  %v7567_v19 = vpop.f32.mrf.mxu0  ;;  %v7463_v58 = vadd.f32 %v14469_v37, %v7350_v12  ;;  %v7356_v35 = vadd.f32 %v14470_v32, %v7243_v21  ;;  %v7249_v12 = vadd.f32 %v14476_v47, %v13210_v61 }
 0x525   :  { %v9858_v39 = vpack.c.bf16 %v11039_v27, %v11037_v53  ;;  %v7568_v17 = vadd.f32 %v7567_v19, %v7455_v51  ;;  %11052 = vtanh.f32 %v7566_v62  ;;  %v13386_v6 = vpop.f32.mrf.mxu1  ;;  %8222 = vmatmul.mubr.bf16.gmra.mxu0 %v14462_v50  ;;  %v7247_v51 = vadd.f32 %v14472_v7, %v13202_v29  ;;  %v14474_v27 = vld [vmem:[#allocation124_spill] sm:$0xff] }
 0x526   :  { %14461 = vst [vmem:[#allocation114_spill] sm:$0xff] %v13386_v6  ;;  %v7571_v52 = vpop.f32.mrf.mxu0  ;;  %v11041_v13 = vpop.eup %11040  ;;  %8229 = vmatprep.mubr.bf16.mxu0 %v14465_v4  ;;  %v7465_v15 = vadd.f32 %v14474_v27, %v7352_v28  ;;  %v7358_v19 = vadd.f32 %v14475_v45, %v7245_v33  ;;  %v7469_v21 = vadd.f32 %v14478_v41, %v7356_v35  ;;  %v14482_v4 = vld [vmem:[#allocation52_spill] sm:$0xff]  ;;  %v14486_v35 = vld [vmem:[#allocation122_spill] sm:$0xff]  ;;  %v14491_v45 = vld [vmem:[#allocation67_spill] sm:$0xff] }
 0x527   :  { %8925 = vst [vmem:[#allocation17 + $0x94] sm:$0xff] %v9858_v39  ;;  %11054 = vtanh.f32 %v7568_v17  ;;  %v7572_v36 = vadd.f32 %v7571_v52, %v7459_v2  ;;  %v13394_v49 = vpop.f32.mrf.mxu1  ;;  %8319 = vmatmul.mubr.bf16.gmra.mxu1 %v14468_v48  ;;  %v14479_v52 = vld [vmem:[#allocation106_spill] sm:$0xff]  ;;  %v14484_v48 = vld [vmem:[#allocation108_spill] sm:$0xff] }
 0x528   :  { %v11043_v60 = vpop.eup %11042  ;;  %14467 = vst [vmem:[#allocation25_spill] sm:$0xff] %v13394_v49  ;;  %v7573_v0 = vpop.f32.mrf.mxu0  ;;  %8326 = vmatprep.mubr.bf16.mxu1 %v14471_v8  ;;  %v7360_v50 = vadd.f32 %v14479_v52, %v7247_v51  ;;  %v7471_v33 = vadd.f32 %v14483_v43, %v7358_v19  ;;  %v14489_v51 = vld [vmem:[#allocation134_spill] sm:$0xff]  ;;  %v14494_v41 = vld [vmem:[#allocation132_spill] sm:$0xff]  ;;  %v14495_v52 = vld [vmem:[#allocation133_spill] sm:$0xff] }
 0x529   :  { %v9862_v30 = vpack.c.bf16 %v11043_v60, %v11041_v13  ;;  %v7574_v53 = vadd.f32 %v7573_v0, %v7461_v14  ;;  %11056 = vtanh.f32 %v7572_v36  ;;  %v13402_v56 = vpop.f32.mrf.mxu1  ;;  %v14480_v14 = vld [vmem:[#allocation109_spill] sm:$0xff]  ;;  %v7362_v0 = vadd.f32 %v14484_v48, %v7249_v12  ;;  %v14531_v49 = vld [vmem:[#allocation80_spill] sm:$0xff] }
 0x52a   :  { %14473 = vst [vmem:[#allocation26_spill] sm:$0xff] %v13402_v56  ;;  %v7575_v25 = vpop.f32.mrf.mxu0  ;;  %v11045_v62 = vpop.eup %11044  ;;  %v7253_v10 = vadd.f32 %v14480_v14, %v13202_v29  ;;  %v14496_v14 = vld [vmem:[#allocation111_spill] sm:$0xff] }
 0x52b   :  { %8929 = vst [vmem:[#allocation17 + $0xb0] sm:$0xff] %v9862_v30  ;;  %11058 = vtanh.f32 %v7574_v53  ;;  %v7576_v46 = vadd.f32 %v7575_v25, %v7463_v58  ;;  %v13408_v39 = vpop.f32.mrf.mxu1  ;;  %v14485_v58 = vld [vmem:[#allocation53_spill] sm:$0xff]  ;;  %v7255_v30 = vadd.f32 %v14486_v35, %v13210_v61  ;;  %v14488_v53 = vld [vmem:[#allocation66_spill] sm:$0xff]  ;;  %v7473_v25 = vadd.f32 %v14489_v51, %v7360_v50  ;;  %v14501_v35 = vld [vmem:[#allocation112_spill] sm:$0xff] }
 0x52c   :  { %v11047_v2 = vpop.eup %11046  ;;  %14477 = vst [vmem:[#allocation37_spill] sm:$0xff] %v13408_v39  ;;  %v7577_v17 = vpop.f32.mrf.mxu0 }
 0x52d   :  { %v9866_v13 = vpack.c.bf16 %v11047_v2, %v11045_v62  ;;  %v7578_v63 = vadd.f32 %v7577_v17, %v7465_v15  ;;  %11060 = vtanh.f32 %v7576_v46  ;;  %v13414_v28 = vpop.f32.mrf.mxu1  ;;  %8230 = vmatmul.mubr.bf16.gmra.mxu0 %v14482_v4  ;;  %v14490_v62 = vld [vmem:[#allocation135_spill] sm:$0xff]  ;;  %v14492_v46 = vld [vmem:[#allocation94_spill] sm:$0xff] }
 0x52e   :  { %14481 = vst [vmem:[#allocation137_spill] sm:$0xff] %v13414_v28  ;;  %v7581_v36 = vpop.f32.mrf.mxu0  ;;  %v11049_v60 = vpop.eup %11048  ;;  %8237 = vmatprep.mubr.bf16.mxu0 %v14485_v58  ;;  %v7366_v27 = vadd.f32 %v14490_v62, %v7253_v10  ;;  %v7257_v2 = vadd.f32 %v14492_v46, %v13202_v29  ;;  %v7259_v10 = vadd.f32 %v14496_v14, %v13210_v61  ;;  %v14498_v29 = vld [vmem:[#allocation110_spill] sm:$0xff] }
 0x52f   :  { %8933 = vst [vmem:[#allocation17 + $0xcc] sm:$0xff] %v9866_v13  ;;  %11062 = vtanh.f32 %v7578_v63  ;;  %v7582_v37 = vadd.f32 %v7581_v36, %v7469_v21  ;;  %v13422_v8 = vpop.f32.mrf.mxu1  ;;  %8327 = vmatmul.mubr.bf16.gmra.mxu1 %v14488_v53  ;;  %v7475_v21 = vadd.f32 %v14494_v41, %v7362_v0  ;;  %v7368_v13 = vadd.f32 %v14495_v52, %v7255_v30  ;;  %v14500_v58 = vld [vmem:[#allocation54_spill] sm:$0xff] }
 0x530   :  { %v11051_v32 = vpop.eup %11050  ;;  %14487 = vst [vmem:[#allocation38_spill] sm:$0xff] %v13422_v8  ;;  %v7583_v7 = vpop.f32.mrf.mxu0  ;;  %8334 = vmatprep.mubr.bf16.mxu1 %v14491_v45  ;;  %v7370_v43 = vadd.f32 %v13231_v9, %v7257_v2  ;;  %v7372_v61 = vadd.f32 %v13238_v38, %v7259_v10 }
 0x531   :  { %v9870_v15 = vpack.c.bf16 %v11051_v32, %v11049_v60  ;;  %v7584_v19 = vadd.f32 %v7583_v7, %v7471_v33  ;;  %11064 = vtanh.f32 %v7582_v37  ;;  %v13430_v47 = vpop.f32.mrf.mxu1  ;;  %v7479_v60 = vadd.f32 %v14498_v29, %v7366_v27  ;;  %v14502_v7 = vld [vmem:[#allocation69_spill] sm:$0xff]  ;;  %v14505_v27 = vld [vmem:[#allocation136_spill] sm:$0xff] }
 0x532   :  { %14493 = vst [vmem:[#allocation39_spill] sm:$0xff] %v13430_v47  ;;  %v7585_v12 = vpop.f32.mrf.mxu0  ;;  %v11053_v17 = vpop.eup %11052  ;;  %v7481_v30 = vadd.f32 %v14501_v35, %v7368_v13 }
 0x533   :  { %8937 = vst [vmem:[#allocation17 + $0xe8] sm:$0xff] %v9870_v15  ;;  %11066 = vtanh.f32 %v7584_v19  ;;  %v7586_v50 = vadd.f32 %v7585_v12, %v7473_v25  ;;  %v13436_v36 = vpop.f32.mrf.mxu1  ;;  %v14504_v25 = vld [vmem:[#allocation68_spill] sm:$0xff]  ;;  %v7483_v15 = vadd.f32 %v14505_v27, %v7370_v43  ;;  %v14506_v19 = vld [vmem:[#allocation81_spill] sm:$0xff] }
 0x534   :  { %v11055_v63 = vpop.eup %11054  ;;  %14497 = vst [vmem:[#allocation40_spill] sm:$0xff] %v13436_v36  ;;  %v7587_v4 = vpop.f32.mrf.mxu0  ;;  %v14514_v27 = vld [vmem:[#allocation72_spill] sm:$0xff] }
 0x535   :  { %v9874_v33 = vpack.c.bf16 %v11055_v63, %v11053_v17  ;;  %v7588_v48 = vadd.f32 %v7587_v4, %v7475_v21  ;;  %11068 = vtanh.f32 %v7586_v50  ;;  %v13440_v0 = vpop.f32.mrf.mxu1  ;;  %8238 = vmatmul.mubr.bf16.gmra.mxu0 %v14500_v58  ;;  %v7485_v17 = vadd.f32 %v13244_v54, %v7372_v61  ;;  %v14510_v4 = vld [vmem:[#allocation70_spill] sm:$0xff]  ;;  %v14511_v54 = vld [vmem:[#allocation71_spill] sm:$0xff] }
 0x536   :  { %14499 = vst [vmem:[#allocation41_spill] sm:$0xff] %v13440_v0  ;;  %v7591_v37 = vpop.f32.mrf.mxu0  ;;  %v11057_v32 = vpop.eup %11056  ;;  %8375 = vmatprep.mubr.bf16.mxu0 %v14502_v7  ;;  %v14513_v58 = vld [vmem:[#allocation83_spill] sm:$0xff] }
 0x537   :  { %8941 = vst [vmem:[#allocation17 + $0x104] sm:$0xff] %v9874_v33  ;;  %11070 = vtanh.f32 %v7588_v48  ;;  %v7592_v53 = vadd.f32 %v7591_v37, %v7479_v60  ;;  %v13446_v9 = vpop.f32.mrf.mxu1  ;;  %8335 = vmatmul.mubr.bf16.gmra.mxu1 %v14504_v25  ;;  %v14512_v33 = vld [vmem:[#allocation82_spill] sm:$0xff] }
 0x538   :  { %v11059_v51 = vpop.eup %11058  ;;  %14503 = vst [vmem:[#allocation43_spill] sm:$0xff] %v13446_v9  ;;  %v7593_v62 = vpop.f32.mrf.mxu0  ;;  %8423 = vmatprep.mubr.bf16.mxu1 %v14506_v19  ;;  %v14522_v9 = vld [vmem:[#allocation78_spill] sm:$0xff] }
 0x539   :  { %v9878_v45 = vpack.c.bf16 %v11059_v51, %v11057_v32  ;;  %v7594_v46 = vadd.f32 %v7593_v62, %v7481_v30  ;;  %11072 = vtanh.f32 %v7592_v53  ;;  %v13451_v2 = vpop.f32.mrf.mxu1 }
 0x53a   :  { %14507 = vst [vmem:[#allocation44_spill] sm:$0xff] %v13451_v2  ;;  %v7595_v38 = vpop.f32.mrf.mxu0  ;;  %v11061_v12 = vpop.eup %11060 }
 0x53b   :  { %8945 = vst [vmem:[#allocation17 + $0x120] sm:$0xff] %v9878_v45  ;;  %11074 = vtanh.f32 %v7594_v46  ;;  %v7596_v41 = vadd.f32 %v7595_v38, %v7483_v15  ;;  %v13454_v52 = vpop.f32.mrf.mxu1  ;;  %v14515_v45 = vld [vmem:[#allocation73_spill] sm:$0xff]  ;;  %v14516_v38 = vld [vmem:[#allocation84_spill] sm:$0xff] }
 0x53c   :  { %v11063_v21 = vpop.eup %11062  ;;  %14508 = vst [vmem:[#allocation45_spill] sm:$0xff] %v13454_v52  ;;  %v7597_v13 = vpop.f32.mrf.mxu0 }
 0x53d   :  { %v9882_v50 = vpack.c.bf16 %v11063_v21, %v11061_v12  ;;  %v7598_v63 = vadd.f32 %v7597_v13, %v7485_v17  ;;  %11076 = vtanh.f32 %v7596_v41  ;;  %v13456_v14 = vpop.f32.mrf.mxu1  ;;  %8376 = vmatmul.mubr.bf16.vlgmr.msra.gmra.mxu0 %v14510_v4 }
 0x53e   :  { %14509 = vst [vmem:[#allocation46_spill] sm:$0xff] %v13456_v14  ;;  %v13458_v10 = vpop.f32.mrf.mxu0  ;;  %v11065_v29 = vpop.eup %11064  ;;  %8383 = vmatprep.mubr.bf16.mxu0 %v14511_v54 }
 0x53f   :  { %8949 = vst [vmem:[#allocation17 + $0x13c] sm:$0xff] %v9882_v50  ;;  %11078 = vtanh.f32 %v7598_v63  ;;  %v13462_v43 = vpop.f32.mrf.mxu1  ;;  %8424 = vmatmul.mubr.bf16.vlgmr.msra.gmra.mxu1 %v14512_v33  ;;  %v14517_v33 = vld [vmem:[#allocation74_spill] sm:$0xff] }
 0x540   :  { %v11067_v60 = vpop.eup %11066  ;;  %v13465_v48 = vpop.f32.mrf.mxu0  ;;  %8431 = vmatprep.mubr.bf16.mxu1 %v14513_v58 }
 0x541   :  { %v9886_v37 = vpack.c.bf16 %v11067_v60, %v11065_v29  ;;  %v13468_v32 = vpop.f32.mrf.mxu1 }
 0x542   :  { %v13470_v35 = vpop.f32.mrf.mxu0  ;;  %v11069_v30 = vpop.eup %11068 }
 0x543   :  { %8953 = vst [vmem:[#allocation17 + $0x158] sm:$0xff] %v9886_v37  ;;  %v13472_v53 = vpop.f32.mrf.mxu1  ;;  %v14518_v37 = vld [vmem:[#allocation75_spill] sm:$0xff] }
 0x544   :  { %v11071_v61 = vpop.eup %11070  ;;  %v13474_v7 = vpop.f32.mrf.mxu0 }
 0x545   :  { %v9890_v51 = vpack.c.bf16 %v11071_v61, %v11069_v30  ;;  %v13476_v25 = vpop.f32.mrf.mxu1  ;;  %8384 = vmatmul.mubr.bf16.gmra.mxu0 %v14514_v27 }
 0x546   :  { %v13478_v62 = vpop.f32.mrf.mxu0  ;;  %v11073_v15 = vpop.eup %11072  ;;  %8391 = vmatprep.mubr.bf16.mxu0 %v14515_v45 }
 0x547   :  { %8957 = vst [vmem:[#allocation17 + $0x174] sm:$0xff] %v9890_v51  ;;  %v13482_v46 = vpop.f32.mrf.mxu1  ;;  %8432 = vmatmul.mubr.bf16.gmra.mxu1 %v14516_v38  ;;  %v14519_v38 = vld [vmem:[#allocation76_spill] sm:$0xff] }
 0x548   :  { %v11075_v19 = vpop.eup %11074  ;;  %v13485_v12 = vpop.f32.mrf.mxu0 }
 0x549   :  { %v9894_v17 = vpack.c.bf16 %v11075_v19, %v11073_v15  ;;  %v13487_v41 = vpop.f32.mrf.mxu1 }
 0x54a   :  { %v13489_v21 = vpop.f32.mrf.mxu0  ;;  %v11077_v13 = vpop.eup %11076 }
 0x54b   :  { %8961 = vst [vmem:[#allocation17 + $0x190] sm:$0xff] %v9894_v17  ;;  %v13491_v63 = vpop.f32.mrf.mxu1  ;;  %v14520_v17 = vld [vmem:[#allocation77_spill] sm:$0xff] }
 0x54c   :  { %v11079_v50 = vpop.eup %11078  ;;  %v13493_v4 = vpop.f32.mrf.mxu0 }
 0x54d   :  { %v9898_v29 = vpack.c.bf16 %v11079_v50, %v11077_v13  ;;  %v13495_v54 = vpop.f32.mrf.mxu1  ;;  %8392 = vmatmul.mubr.bf16.gmra.mxu0 %v14517_v33 }
 0x54e   :  { %v13497_v60 = vpop.f32.mrf.mxu0  ;;  %8399 = vmatprep.mubr.bf16.mxu0 %v14518_v37 }
 0x54f   :  { %8965 = vst [vmem:[#allocation17 + $0x1ac] sm:$0xff] %v9898_v29  ;;  %v13501_v58 = vpop.f32.mrf.mxu1 }
 0x550   :  { %v13503_v30 = vpop.f32.mrf.mxu0 }
 0x551   :  { %v13505_v61 = vpop.f32.mrf.mxu1 }
 0x552   :  { %v13507_v51 = vpop.f32.mrf.mxu0 }
 0x553   :  { %v13509_v27 = vpop.f32.mrf.mxu1 }
 0x554   :  { %v13511_v15 = vpop.f32.mrf.mxu0 }
 0x555   :  { %v13513_v45 = vpop.f32.mrf.mxu1  ;;  %8400 = vmatmul.mubr.bf16.gmra.mxu0 %v14519_v38  ;;  %v14523_v38 = vld [vmem:[#allocation79_spill] sm:$0xff] }
 0x556   :  { %v13515_v19 = vpop.f32.mrf.mxu0  ;;  %8407 = vmatprep.mubr.bf16.mxu0 %v14520_v17 }
 0x557   :  { %v13519_v13 = vpop.f32.mrf.mxu1 }
 0x558   :  { %v13521_v50 = vpop.f32.mrf.mxu0 }
 0x559   :  { %v13523_v29 = vpop.f32.mrf.mxu1 }
 0x55a   :  { %v13525_v33 = vpop.f32.mrf.mxu0 }
 0x55b   :  { %v13527_v37 = vpop.f32.mrf.mxu1 }
 0x55c   :  { %v13529_v14 = vpop.f32.mrf.mxu0 }
 0x55d   :  { %v13531_v52 = vpop.f32.mrf.mxu1  ;;  %8408 = vmatmul.mubr.bf16.gmra.mxu0 %v14522_v9 }
 0x55e   :  { %14521 = vst [vmem:[#allocation32_spill] sm:$0xff] %v13531_v52  ;;  %v13533_v2 = vpop.f32.mrf.mxu0  ;;  %8415 = vmatprep.mubr.bf16.mxu0 %v14523_v38  ;;  %v14546_v52 = vld [vmem:[#allocation131_spill] sm:$0xff] }
 0x55f   :  { %v13537_v17 = vpop.f32.mrf.mxu1 }
 0x560   :  { %14524 = vst [vmem:[#allocation31_spill] sm:$0xff] %v13537_v17  ;;  %v13539_v0 = vpop.f32.mrf.mxu0 }
 0x561   :  { %v13541_v36 = vpop.f32.mrf.mxu1 }
 0x562   :  { %14525 = vst [vmem:[#allocation29_spill] sm:$0xff] %v13541_v36  ;;  %v13543_v47 = vpop.f32.mrf.mxu0 }
 0x563   :  { %14526 = vst [vmem:[#allocation33_spill] sm:$0xff] %v13543_v47  ;;  %v13545_v8 = vpop.f32.mrf.mxu1 }
 0x564   :  { %14527 = vst [vmem:[#allocation35_spill] sm:$0xff] %v13545_v8  ;;  %v13547_v28 = vpop.f32.mrf.mxu0 }
 0x565   :  { %14528 = vst [vmem:[#allocation36_spill] sm:$0xff] %v13547_v28  ;;  %v13549_v39 = vpop.f32.mrf.mxu1  ;;  %8416 = vmatmul.mubr.bf16.gmra.mxu0 %v14531_v49 }
 0x566   :  { %14529 = vst [vmem:[#allocation28_spill] sm:$0xff] %v13549_v39  ;;  %v13551_v56 = vpop.f32.mrf.mxu0 }
 0x567   :  { %14530 = vst [vmem:[#allocation27_spill] sm:$0xff] %v13551_v56  ;;  %v13554_v9 = vpop.f32.mrf.mxu1 }
 0x568   :  { %14532 = vst [vmem:[#allocation42_spill] sm:$0xff] %v13554_v9  ;;  %v13556_v38 = vpop.f32.mrf.mxu0 }
 0x569   :  { %14533 = vst [vmem:[#allocation49_spill] sm:$0xff] %v13556_v38  ;;  %v13558_v17 = vpop.f32.mrf.mxu1  ;;  %v14544_v38 = vld [vmem:[#allocation24_spill] sm:$0xff] }
 0x56a   :  { %14534 = vst [vmem:[#allocation55_spill] sm:$0xff] %v13558_v17  ;;  %v13560_v6 = vpop.f32.mrf.mxu0  ;;  %v14545_v17 = vsub.s32 4, %v14544_v38 }
 0x56b   :  { %14535 = vst [vmem:[#allocation59_spill] sm:$0xff] %v13560_v6  ;;  %v13562_v36 = vpop.f32.mrf.mxu1 }
 0x56c   :  { %14536 = vst [vmem:[#allocation85_spill] sm:$0xff] %v13562_v36  ;;  %v13564_v47 = vpop.f32.mrf.mxu0  ;;  %v13581_v6 = vrot.slane %v14546_v52, %v14545_v17 }
 0x56d   :  { %14537 = vst [vmem:[#allocation96_spill] sm:$0xff] %v13564_v47  ;;  %v13566_v8 = vpop.f32.mrf.mxu1 }
 0x56e   :  { %14538 = vst [vmem:[#allocation86_spill] sm:$0xff] %v13566_v8  ;;  %v13568_v28 = vpop.f32.mrf.mxu0  ;;  %v14549_v8 = vsub.s32 5, %v14544_v38 }
 0x56f   :  { %14539 = vst [vmem:[#allocation95_spill] sm:$0xff] %v13568_v28  ;;  %v13570_v39 = vpop.f32.mrf.mxu1 }
 0x570   :  { %14540 = vst [vmem:[#allocation87_spill] sm:$0xff] %v13570_v39  ;;  %v13572_v56 = vpop.f32.mrf.mxu0  ;;  %v13590_v28 = vrot.slane %v14546_v52, %v14549_v8  ;;  %v7639_v52 = vadd.f32 %v13266_v55, %v13581_v6 }
 0x571   :  { %14541 = vst [vmem:[#allocation30_spill] sm:$0xff] %v13572_v56  ;;  %v13574_v49 = vpop.f32.mrf.mxu1 }
 0x572   :  { %14542 = vst [vmem:[#allocation113_spill] sm:$0xff] %v13574_v49  ;;  %v13576_v9 = vpop.f32.mrf.mxu0  ;;  %v7635_v49 = vadd.f32 %v13254_v3, %v13581_v6 }
 0x573   :  { %14543 = vst [vmem:[#allocation125_spill] sm:$0xff] %v13576_v9  ;;  %v13583_v36 = vpop.f32.mrf.mxu1 }
 0x574   :  { %14547 = vst [vmem:[#allocation34_spill] sm:$0xff] %v13583_v36  ;;  %v13585_v47 = vpop.f32.mrf.mxu0  ;;  %v7637_v36 = vadd.f32 %v13262_v42, %v13590_v28 }
 0x575   :  { %14548 = vst [vmem:[#allocation56_spill] sm:$0xff] %v13585_v47  ;;  %v13592_v39 = vpop.f32.mrf.mxu1  ;;  %v7748_v47 = vadd.f32 %v13458_v10, %v7635_v49  ;;  %v7752_v10 = vadd.f32 %v13470_v35, %v7639_v52  ;;  %v7649_v52 = vadd.f32 %v13295_v1, %v13581_v6 }
 0x576   :  { %14550 = vst [vmem:[#allocation115_spill] sm:$0xff] %v13592_v39  ;;  %v13594_v56 = vpop.f32.mrf.mxu0  ;;  %v7750_v39 = vadd.f32 %v13465_v48, %v7637_v36 }
 0x577   :  { %14551 = vst [vmem:[#allocation60_spill] sm:$0xff] %v13594_v56  ;;  %v13598_v9 = vpop.f32.mrf.mxu1  ;;  %v7861_v42 = vadd.f32 %v13462_v43, %v7748_v47  ;;  %v7865_v47 = vadd.f32 %v13472_v53, %v7752_v10  ;;  %v7651_v53 = vadd.f32 %v13302_v24, %v13590_v28  ;;  %v7762_v1 = vadd.f32 %v13489_v21, %v7649_v52 }
 0x578   :  { %14552 = vst [vmem:[#allocation116_spill] sm:$0xff] %v13598_v9  ;;  %v13600_v17 = vpop.f32.mrf.mxu0  ;;  %v7641_v9 = vadd.f32 %v13274_v16, %v13590_v28  ;;  %v7863_v55 = vadd.f32 %v13468_v32, %v7750_v39  ;;  %v7657_v24 = vadd.f32 %v13318_v44, %v13590_v28 }
 0x579   :  { %v13605_v38 = vpop.f32.mrf.mxu1  ;;  %v7764_v10 = vadd.f32 %v13493_v4, %v7651_v53 }
 0x57a   :  { %14553 = vst [vmem:[#allocation61_spill] sm:$0xff] %v13605_v38  ;;  %v13607_v8 = vpop.f32.mrf.mxu0  ;;  %v7754_v36 = vadd.f32 %v13474_v7, %v7641_v9 }
 0x57b   :  { %14554 = vst [vmem:[#allocation57_spill] sm:$0xff] %v13607_v8  ;;  %v13612_v56 = vpop.f32.mrf.mxu1  ;;  %v7645_v8 = vadd.f32 %v13282_v5, %v13581_v6 }
 0x57c   :  { %14555 = vst [vmem:[#allocation97_spill] sm:$0xff] %v13612_v56  ;;  %v13614_v3 = vpop.f32.mrf.mxu0  ;;  %v7647_v56 = vadd.f32 %v13290_v18, %v13590_v28  ;;  %v7867_v7 = vadd.f32 %v13476_v25, %v7754_v36 }
 0x57d   :  { %14556 = vst [vmem:[#allocation98_spill] sm:$0xff] %v13614_v3  ;;  %v13620_v49 = vpop.f32.mrf.mxu1  ;;  %v7758_v43 = vadd.f32 %v13478_v62, %v7645_v8 }
 0x57e   :  { %v7973_v38 = vpop.f32.mrf.mxu0  ;;  %v7760_v5 = vadd.f32 %v13485_v12, %v7647_v56  ;;  %v7655_v56 = vadd.f32 %v13311_v34, %v13581_v6 }
 0x57f   :  { %v7974_v48 = vadd.f32 %v7973_v38, %v7861_v42  ;;  %v9917_v3 = vpop.f32.mrf.mxu1  ;;  %v7871_v62 = vadd.f32 %v13482_v46, %v7758_v43 }
 0x580   :  { %v7975_v16 = vpop.f32.mrf.mxu0  ;;  %v7873_v12 = vadd.f32 %v13487_v41, %v7760_v5  ;;  %v7768_v34 = vadd.f32 %v13497_v60, %v7655_v56  ;;  %v7659_v41 = vadd.f32 %v13323_v57, %v13581_v6 }
 0x581   :  { %v7976_v35 = vadd.f32 %v7975_v16, %v7863_v55  ;;  %11080 = vtanh.f32 %v7974_v48  ;;  %v9918_v39 = vpop.f32.mrf.mxu1  ;;  %v7875_v48 = vadd.f32 %v13491_v63, %v7762_v1  ;;  %v7661_v63 = vadd.f32 %v13330_v26, %v13590_v28 }
 0x582   :  { %v7977_v32 = vpop.f32.mrf.mxu0  ;;  %v13634_v9 = vadd.f32 %v9918_v39, %v9917_v3  ;;  %v7881_v60 = vadd.f32 %v13501_v58, %v7768_v34  ;;  %v7772_v57 = vadd.f32 %v13507_v51, %v7659_v41  ;;  %v7667_v58 = vadd.f32 %v13346_v23, %v13590_v28 }
 0x583   :  { %11082 = vtanh.f32 %v7976_v35  ;;  %v7978_v18 = vadd.f32 %v7977_v32, %v7865_v47  ;;  %v9920_v38 = vpop.f32.mrf.mxu1  ;;  %v7770_v47 = vadd.f32 %v13503_v30, %v7657_v24  ;;  %v7877_v35 = vadd.f32 %v13495_v54, %v7764_v10 }
 0x584   :  { %v7979_v42 = vpop.f32.mrf.mxu0  ;;  %v7665_v30 = vadd.f32 %v13339_v22, %v13581_v6  ;;  %v7885_v22 = vadd.f32 %v13509_v27, %v7772_v57 }
 0x585   :  { %v7980_v8 = vadd.f32 %v7979_v42, %v7867_v7  ;;  %11084 = vtanh.f32 %v7978_v18  ;;  %v9921_v25 = vpop.f32.mrf.mxu1  ;;  %v7883_v7 = vadd.f32 %v13505_v61, %v7770_v47  ;;  %v7774_v42 = vadd.f32 %v13511_v15, %v7661_v63 }
 0x586   :  { %v7983_v3 = vpop.f32.mrf.mxu0  ;;  %v13644_v55 = vadd.f32 %v9921_v25, %v9920_v38  ;;  %v7778_v61 = vadd.f32 %v13515_v19, %v7665_v30  ;;  %v7780_v15 = vadd.f32 %v13521_v50, %v7667_v58  ;;  %v7671_v19 = vadd.f32 %v13358_v59, %v13590_v28 }
 0x587   :  { %11086 = vtanh.f32 %v7980_v8  ;;  %v7984_v36 = vadd.f32 %v7983_v3, %v7871_v62  ;;  %v9923_v46 = vpop.f32.mrf.mxu1 }
 0x588   :  { %v7985_v21 = vpop.f32.mrf.mxu0 }
 0x589   :  { %v7986_v16 = vadd.f32 %v7985_v21, %v7873_v12  ;;  %11088 = vtanh.f32 %v7984_v36  ;;  %v9924_v4 = vpop.f32.mrf.mxu1  ;;  %v7669_v12 = vadd.f32 %v13352_v11, %v13581_v6  ;;  %v7887_v36 = vadd.f32 %v13513_v45, %v7774_v42 }
 0x58a   :  { %v7987_v43 = vpop.f32.mrf.mxu0  ;;  %v13654_v52 = vadd.f32 %v9924_v4, %v9923_v46  ;;  %v7891_v11 = vadd.f32 %v13519_v13, %v7778_v61  ;;  %v7675_v45 = vadd.f32 %v13366_v40, %v13581_v6 }
 0x58b   :  { %11090 = vtanh.f32 %v7986_v16  ;;  %v7988_v44 = vadd.f32 %v7987_v43, %v7875_v48  ;;  %v9926_v5 = vpop.f32.mrf.mxu1  ;;  %v7782_v50 = vadd.f32 %v13525_v33, %v7669_v12  ;;  %v7893_v16 = vadd.f32 %v13523_v29, %v7780_v15 }
 0x58c   :  { %v7989_v39 = vpop.f32.mrf.mxu0  ;;  %v7784_v43 = vadd.f32 %v13529_v14, %v7671_v19  ;;  %v7677_v33 = vadd.f32 %v13374_v31, %v13590_v28  ;;  %v7788_v29 = vadd.f32 %v13533_v2, %v7675_v45  ;;  %v7679_v14 = vadd.f32 %v13380_v20, %v13581_v6  ;;  %v14558_v2 = vld [vmem:[#allocation114_spill] sm:$0xff]  ;;  %v14559_v20 = vld [vmem:[#allocation31_spill] sm:$0xff] }
 0x58d   :  { %v7990_v32 = vadd.f32 %v7989_v39, %v7877_v35  ;;  %11092 = vtanh.f32 %v7988_v44  ;;  %v9927_v54 = vpop.f32.mrf.mxu1  ;;  %v7895_v40 = vadd.f32 %v13527_v37, %v7782_v50  ;;  %v14565_v19 = vld [vmem:[#allocation26_spill] sm:$0xff]  ;;  %v14566_v50 = vld [vmem:[#allocation35_spill] sm:$0xff] }
 0x58e   :  { %v7993_v18 = vpop.f32.mrf.mxu0  ;;  %v11081_v38 = vpop.eup %11080  ;;  %v13664_v53 = vadd.f32 %v9927_v54, %v9926_v5 }
 0x58f   :  { %11094 = vtanh.f32 %v7990_v32  ;;  %v7994_v26 = vadd.f32 %v7993_v18, %v7881_v60  ;;  %v9929_v51 = vpop.f32.mrf.mxu1  ;;  %v7790_v60 = vadd.f32 %v13539_v0, %v7677_v33  ;;  %v14560_v0 = vld [vmem:[#allocation33_spill] sm:$0xff] }
 0x590   :  { %v11083_v62 = vpop.eup %11082  ;;  %v7995_v1 = vpop.f32.mrf.mxu0  ;;  %v7792_v58 = vadd.f32 %v14560_v0, %v7679_v14  ;;  %v14572_v14 = vld [vmem:[#allocation137_spill] sm:$0xff] }
 0x591   :  { %v9839_v8 = vpack.c.bf16 %v11083_v62, %v11081_v38  ;;  %v7996_v56 = vadd.f32 %v7995_v1, %v7883_v7  ;;  %11096 = vtanh.f32 %v7994_v26  ;;  %v9930_v25 = vpop.f32.mrf.mxu1  ;;  %v14557_v7 = vld [vmem:[#allocation32_spill] sm:$0xff]  ;;  %v7681_v38 = vadd.f32 %v14558_v2, %v13590_v28 }
 0x592   :  { %v7997_v3 = vpop.f32.mrf.mxu0  ;;  %v11085_v10 = vpop.eup %11084  ;;  %v13674_v23 = vadd.f32 %v9930_v25, %v9929_v51  ;;  %v7897_v54 = vadd.f32 %v14557_v7, %v7784_v43  ;;  %v7901_v62 = vadd.f32 %v14559_v20, %v7788_v29  ;;  %v14569_v43 = vld [vmem:[#allocation49_spill] sm:$0xff] }
 0x593   :  { %8906 = vst [vmem:[#allocation17 + $0x10] sm:$0xff] %v9839_v8  ;;  %11098 = vtanh.f32 %v7996_v56  ;;  %v7998_v27 = vadd.f32 %v7997_v3, %v7885_v22  ;;  %v9932_v46 = vpop.f32.mrf.mxu1  ;;  %v14561_v22 = vld [vmem:[#allocation25_spill] sm:$0xff]  ;;  %v14563_v3 = vld [vmem:[#allocation36_spill] sm:$0xff] }
 0x594   :  { %v11087_v24 = vpop.eup %11086  ;;  %v7999_v21 = vpop.f32.mrf.mxu0  ;;  %v7685_v61 = vadd.f32 %v14561_v22, %v13581_v6  ;;  %v14562_v8 = vld [vmem:[#allocation29_spill] sm:$0xff] }
 0x595   :  { %v9843_v48 = vpack.c.bf16 %v11087_v24, %v11085_v10  ;;  %v8000_v34 = vadd.f32 %v7999_v21, %v7887_v36  ;;  %11100 = vtanh.f32 %v7998_v27  ;;  %v9933_v41 = vpop.f32.mrf.mxu1  ;;  %v7903_v56 = vadd.f32 %v14562_v8, %v7790_v60 }
 0x596   :  { %v8003_v47 = vpop.f32.mrf.mxu0  ;;  %v11089_v4 = vpop.eup %11088  ;;  %v13684_v59 = vadd.f32 %v9933_v41, %v9932_v46  ;;  %v7794_v10 = vadd.f32 %v14563_v3, %v7681_v38  ;;  %v7687_v46 = vadd.f32 %v14565_v19, %v13590_v28  ;;  %v7691_v60 = vadd.f32 %v14572_v14, %v13590_v28  ;;  %v14575_v38 = vld [vmem:[#allocation38_spill] sm:$0xff]  ;;  %v14580_v3 = vld [vmem:[#allocation85_spill] sm:$0xff] }
 0x597   :  { %8910 = vst [vmem:[#allocation17 + $0x2c] sm:$0xff] %v9843_v48  ;;  %11102 = vtanh.f32 %v8000_v34  ;;  %v8004_v13 = vadd.f32 %v8003_v47, %v7891_v11  ;;  %v9935_v44 = vpop.f32.mrf.mxu1  ;;  %v7905_v48 = vadd.f32 %v14566_v50, %v7792_v58  ;;  %v14567_v34 = vld [vmem:[#allocation27_spill] sm:$0xff]  ;;  %v14568_v47 = vld [vmem:[#allocation37_spill] sm:$0xff]  ;;  %v14583_v50 = vld [vmem:[#allocation30_spill] sm:$0xff] }
 0x598   :  { %v11091_v35 = vpop.eup %11090  ;;  %v8005_v5 = vpop.f32.mrf.mxu0  ;;  %v7798_v45 = vadd.f32 %v14567_v34, %v7685_v61 }
 0x599   :  { %v9847_v39 = vpack.c.bf16 %v11091_v35, %v11089_v4  ;;  %v8006_v63 = vadd.f32 %v8005_v5, %v7893_v16  ;;  %11104 = vtanh.f32 %v8004_v13  ;;  %v9936_v57 = vpop.f32.mrf.mxu1  ;;  %v7689_v4 = vadd.f32 %v14568_v47, %v13581_v6  ;;  %v14570_v5 = vld [vmem:[#allocation28_spill] sm:$0xff] }
 0x59a   :  { %v8007_v32 = vpop.f32.mrf.mxu0  ;;  %v11093_v30 = vpop.eup %11092  ;;  %v13694_v31 = vadd.f32 %v9936_v57, %v9935_v44  ;;  %v7800_v13 = vadd.f32 %v14569_v43, %v7687_v46 }
 0x59b   :  { %8914 = vst [vmem:[#allocation17 + $0x48] sm:$0xff] %v9847_v39  ;;  %11106 = vtanh.f32 %v8006_v63  ;;  %v8008_v37 = vadd.f32 %v8007_v32, %v7895_v40  ;;  %v9938_v42 = vpop.f32.mrf.mxu1  ;;  %v7907_v40 = vadd.f32 %v14570_v5, %v7794_v10 }
 0x59c   :  { %v11095_v18 = vpop.eup %11094  ;;  %v8009_v26 = vpop.f32.mrf.mxu0 }
 0x59d   :  { %v9851_v51 = vpack.c.bf16 %v11095_v18, %v11093_v30  ;;  %v8010_v1 = vadd.f32 %v8009_v26, %v7897_v54  ;;  %11108 = vtanh.f32 %v8008_v37  ;;  %v9939_v12 = vpop.f32.mrf.mxu1  ;;  %v14573_v30 = vld [vmem:[#allocation42_spill] sm:$0xff]  ;;  %v14574_v54 = vld [vmem:[#allocation59_spill] sm:$0xff] }
 0x59e   :  { %v8013_v15 = vpop.f32.mrf.mxu0  ;;  %v11097_v25 = vpop.eup %11096  ;;  %v13704_v36 = vadd.f32 %v9939_v12, %v9938_v42  ;;  %v7911_v7 = vadd.f32 %v14573_v30, %v7798_v45  ;;  %v7802_v37 = vadd.f32 %v14574_v54, %v7689_v4  ;;  %v7695_v42 = vadd.f32 %v14575_v38, %v13581_v6  ;;  %v14576_v26 = vld [vmem:[#allocation55_spill] sm:$0xff]  ;;  %v14591_v38 = vld [vmem:[#allocation56_spill] sm:$0xff] }
 0x59f   :  { %8918 = vst [vmem:[#allocation17 + $0x64] sm:$0xff] %v9851_v51  ;;  %11110 = vtanh.f32 %v8010_v1  ;;  %v8014_v27 = vadd.f32 %v8013_v15, %v7901_v62  ;;  %v9941_v21 = vpop.f32.mrf.mxu1  ;;  %v7913_v20 = vadd.f32 %v14576_v26, %v7800_v13  ;;  %v14577_v51 = vld [vmem:[#allocation96_spill] sm:$0xff] }
 0x5a0   :  { %14564 = vst [vmem:[#allocation88_spill] sm:$0xff] %v13704_v36  ;;  %v11099_v24 = vpop.eup %11098  ;;  %v8015_v11 = vpop.f32.mrf.mxu0  ;;  %v7804_v1 = vadd.f32 %v14577_v51, %v7691_v60  ;;  %v7915_v10 = vadd.f32 %v14580_v3, %v7802_v37  ;;  %v14596_v3 = vld [vmem:[#allocation45_spill] sm:$0xff] }
 0x5a1   :  { %v9855_v16 = vpack.c.bf16 %v11099_v24, %v11097_v25  ;;  %v8016_v41 = vadd.f32 %v8015_v11, %v7903_v56  ;;  %11112 = vtanh.f32 %v8014_v27  ;;  %v9942_v35 = vpop.f32.mrf.mxu1  ;;  %v14579_v56 = vld [vmem:[#allocation39_spill] sm:$0xff] }
 0x5a2   :  { %v8017_v33 = vpop.f32.mrf.mxu0  ;;  %v11101_v44 = vpop.eup %11100  ;;  %v13714_v29 = vadd.f32 %v9942_v35, %v9941_v21  ;;  %v7697_v12 = vadd.f32 %v14579_v56, %v13590_v28  ;;  %v14581_v27 = vld [vmem:[#allocation95_spill] sm:$0xff]  ;;  %v14582_v21 = vld [vmem:[#allocation40_spill] sm:$0xff]  ;;  %v14586_v35 = vld [vmem:[#allocation41_spill] sm:$0xff] }
 0x5a3   :  { %8922 = vst [vmem:[#allocation17 + $0x80] sm:$0xff] %v9855_v16  ;;  %11114 = vtanh.f32 %v8016_v41  ;;  %v8018_v39 = vadd.f32 %v8017_v33, %v7905_v48  ;;  %v9944_v57 = vpop.f32.mrf.mxu1  ;;  %v7808_v24 = vadd.f32 %v14581_v27, %v7695_v42  ;;  %v7699_v11 = vadd.f32 %v14582_v21, %v13581_v6  ;;  %v14584_v41 = vld [vmem:[#allocation86_spill] sm:$0xff]  ;;  %v14595_v56 = vld [vmem:[#allocation60_spill] sm:$0xff]  ;;  %v14597_v21 = vld [vmem:[#allocation115_spill] sm:$0xff] }
 0x5a4   :  { %14571 = vst [vmem:[#allocation126_spill] sm:$0xff] %v13714_v29  ;;  %v11103_v63 = vpop.eup %11102  ;;  %v8019_v32 = vpop.f32.mrf.mxu0  ;;  %v7810_v48 = vadd.f32 %v14583_v50, %v7697_v12  ;;  %v7917_v47 = vadd.f32 %v14584_v41, %v7804_v1  ;;  %v7701_v33 = vadd.f32 %v14586_v35, %v13590_v28 }
 0x5a5   :  { %v9859_v18 = vpack.c.bf16 %v11103_v63, %v11101_v44  ;;  %v8020_v2 = vadd.f32 %v8019_v32, %v7907_v40  ;;  %11116 = vtanh.f32 %v8018_v39  ;;  %v9945_v62 = vpop.f32.mrf.mxu1  ;;  %v14587_v40 = vld [vmem:[#allocation87_spill] sm:$0xff]  ;;  %v14588_v63 = vld [vmem:[#allocation125_spill] sm:$0xff] }
 0x5a6   :  { %v8023_v0 = vpop.f32.mrf.mxu0  ;;  %v11105_v58 = vpop.eup %11104  ;;  %v13724_v22 = vadd.f32 %v9945_v62, %v9944_v57  ;;  %v7921_v39 = vadd.f32 %v14587_v40, %v7808_v24  ;;  %v7812_v14 = vadd.f32 %v14588_v63, %v7699_v11  ;;  %v14589_v32 = vld [vmem:[#allocation43_spill] sm:$0xff]  ;;  %v7814_v42 = vadd.f32 %v14591_v38, %v7701_v33 }
 0x5a7   :  { %8926 = vst [vmem:[#allocation17 + $0x9c] sm:$0xff] %v9859_v18  ;;  %11118 = vtanh.f32 %v8020_v2  ;;  %v8024_v61 = vadd.f32 %v8023_v0, %v7911_v7  ;;  %v9947_v15 = vpop.f32.mrf.mxu1  ;;  %v7705_v30 = vadd.f32 %v14589_v32, %v13581_v6  ;;  %v14590_v7 = vld [vmem:[#allocation113_spill] sm:$0xff]  ;;  %v14593_v0 = vld [vmem:[#allocation44_spill] sm:$0xff] }
 0x5a8   :  { %14578 = vst [vmem:[#allocation99_spill] sm:$0xff] %v13724_v22  ;;  %v11107_v8 = vpop.eup %11106  ;;  %v8025_v25 = vpop.f32.mrf.mxu0  ;;  %v7923_v54 = vadd.f32 %v14590_v7, %v7810_v48  ;;  %v7927_v11 = vadd.f32 %v14597_v21, %v7814_v42 }
 0x5a9   :  { %v9863_v19 = vpack.c.bf16 %v11107_v8, %v11105_v58  ;;  %v8026_v46 = vadd.f32 %v8025_v25, %v7913_v20  ;;  %11120 = vtanh.f32 %v8024_v61  ;;  %v9948_v34 = vpop.f32.mrf.mxu1  ;;  %v7707_v58 = vadd.f32 %v14593_v0, %v13590_v28  ;;  %v14594_v61 = vld [vmem:[#allocation34_spill] sm:$0xff] }
 0x5aa   :  { %v8027_v45 = vpop.f32.mrf.mxu0  ;;  %v11109_v16 = vpop.eup %11108  ;;  %v13734_v4 = vadd.f32 %v9948_v34, %v9947_v15  ;;  %v7925_v8 = vadd.f32 %v14594_v61, %v7812_v14  ;;  %v7818_v12 = vadd.f32 %v14595_v56, %v7705_v30  ;;  %v14602_v14 = vld [vmem:[#allocation98_spill] sm:$0xff] }
 0x5ab   :  { %8930 = vst [vmem:[#allocation17 + $0xb8] sm:$0xff] %v9863_v19  ;;  %11122 = vtanh.f32 %v8026_v46  ;;  %v8028_v43 = vadd.f32 %v8027_v45, %v7915_v10  ;;  %v9950_v44 = vpop.f32.mrf.mxu1  ;;  %v7709_v10 = vadd.f32 %v14596_v3, %v13581_v6  ;;  %v7820_v27 = vadd.f32 %v13600_v17, %v7707_v58  ;;  %v14598_v45 = vld [vmem:[#allocation46_spill] sm:$0xff]  ;;  %v14599_v6 = vld [vmem:[#allocation116_spill] sm:$0xff]  ;;  %v14600_v17 = vld [vmem:[#allocation57_spill] sm:$0xff] }
 0x5ac   :  { %14585 = vst [vmem:[#allocation89_spill] sm:$0xff] %v13734_v4  ;;  %v11111_v13 = vpop.eup %11110  ;;  %v8029_v5 = vpop.f32.mrf.mxu0 }
 0x5ad   :  { %v9867_v60 = vpack.c.bf16 %v11111_v13, %v11109_v16  ;;  %v8030_v57 = vadd.f32 %v8029_v5, %v7917_v47  ;;  %11124 = vtanh.f32 %v8028_v43  ;;  %v9951_v37 = vpop.f32.mrf.mxu1  ;;  %v7711_v16 = vadd.f32 %v14598_v45, %v13590_v28 }
 0x5ae   :  { %v8033_v18 = vpop.f32.mrf.mxu0  ;;  %v11113_v2 = vpop.eup %11112  ;;  %v13744_v26 = vadd.f32 %v9951_v37, %v9950_v44  ;;  %v7931_v43 = vadd.f32 %v14599_v6, %v7818_v12  ;;  %v7822_v13 = vadd.f32 %v14600_v17, %v7709_v10  ;;  %v14601_v44 = vld [vmem:[#allocation61_spill] sm:$0xff] }
 0x5af   :  { %8934 = vst [vmem:[#allocation17 + $0xd4] sm:$0xff] %v9867_v60  ;;  %11126 = vtanh.f32 %v8030_v57  ;;  %v8034_v20 = vadd.f32 %v8033_v18, %v7921_v39  ;;  %v9953_v51 = vpop.f32.mrf.mxu1  ;;  %v7933_v5 = vadd.f32 %v14601_v44, %v7820_v27  ;;  %v7824_v60 = vadd.f32 %v14602_v14, %v7711_v16 }
 0x5b0   :  { %14592 = vst [vmem:[#allocation47_spill] sm:$0xff] %v13744_v26  ;;  %v11115_v62 = vpop.eup %11114  ;;  %v8035_v1 = vpop.f32.mrf.mxu0 }
 0x5b1   :  { %v9871_v15 = vpack.c.bf16 %v11115_v62, %v11113_v2  ;;  %v8036_v25 = vadd.f32 %v8035_v1, %v7923_v54  ;;  %11128 = vtanh.f32 %v8034_v20  ;;  %v9954_v24 = vpop.f32.mrf.mxu1  ;;  %v14603_v54 = vld [vmem:[#allocation97_spill] sm:$0xff]  ;;  %v7937_v62 = vadd.f32 %v13620_v49, %v7824_v60 }
 0x5b2   :  { %v8037_v19 = vpop.f32.mrf.mxu0  ;;  %v11117_v46 = vpop.eup %11116  ;;  %v13754_v50 = vadd.f32 %v9954_v24, %v9953_v51  ;;  %v7935_v37 = vadd.f32 %v14603_v54, %v7822_v13 }
 0x5b3   :  { %8938 = vst [vmem:[#allocation17 + $0xf0] sm:$0xff] %v9871_v15  ;;  %11130 = vtanh.f32 %v8036_v25  ;;  %v8038_v48 = vadd.f32 %v8037_v19, %v7925_v8  ;;  %v9956_v41 = vpop.f32.mrf.mxu1 }
 0x5b4   :  { %v11119_v34 = vpop.eup %11118  ;;  %v8039_v47 = vpop.f32.mrf.mxu0 }
 0x5b5   :  { %v9875_v35 = vpack.c.bf16 %v11119_v34, %v11117_v46  ;;  %v8040_v33 = vadd.f32 %v8039_v47, %v7927_v11  ;;  %11132 = vtanh.f32 %v8038_v48  ;;  %v9957_v40 = vpop.f32.mrf.mxu1 }
 0x5b6   :  { %v8043_v39 = vpop.f32.mrf.mxu0  ;;  %v11121_v63 = vpop.eup %11120  ;;  %v13762_v57 = vadd.f32 %v9957_v40, %v9956_v41 }
 0x5b7   :  { %8942 = vst [vmem:[#allocation17 + $0x10c] sm:$0xff] %v9875_v35  ;;  %11134 = vtanh.f32 %v8040_v33  ;;  %v8044_v28 = vadd.f32 %v8043_v39, %v7931_v43  ;;  %v9959_v30 = vpop.f32.mrf.mxu1 }
 0x5b8   :  { %v11123_v32 = vpop.eup %11122  ;;  %v8045_v7 = vpop.f32.mrf.mxu0 }
 0x5b9   :  { %v9879_v18 = vpack.c.bf16 %v11123_v32, %v11121_v63  ;;  %v8046_v2 = vadd.f32 %v8045_v7, %v7933_v5  ;;  %11136 = vtanh.f32 %v8044_v28  ;;  %v9960_v38 = vpop.f32.mrf.mxu1 }
 0x5ba   :  { %v8047_v42 = vpop.f32.mrf.mxu0  ;;  %v11125_v20 = vpop.eup %11124  ;;  %v13766_v0 = vadd.f32 %v9960_v38, %v9959_v30 }
 0x5bb   :  { %8946 = vst [vmem:[#allocation17 + $0x128] sm:$0xff] %v9879_v18  ;;  %11138 = vtanh.f32 %v8046_v2  ;;  %v8048_v58 = vadd.f32 %v8047_v42, %v7935_v37  ;;  %v9962_v1 = vpop.f32.mrf.mxu1 }
 0x5bc   :  { %v11127_v51 = vpop.eup %11126  ;;  %v8049_v61 = vpop.f32.mrf.mxu0 }
 0x5bd   :  { %v9883_v8 = vpack.c.bf16 %v11127_v51, %v11125_v20  ;;  %v8050_v56 = vadd.f32 %v8049_v61, %v7937_v62  ;;  %11140 = vtanh.f32 %v8048_v58  ;;  %v9963_v12 = vpop.f32.mrf.mxu1 }
 0x5be   :  { %v13768_v15 = vpop.f32.mrf.mxu0  ;;  %v11129_v25 = vpop.eup %11128  ;;  %v13770_v3 = vadd.f32 %v9963_v12, %v9962_v1 }
 0x5bf   :  { %8950 = vst [vmem:[#allocation17 + $0x144] sm:$0xff] %v9883_v8  ;;  %11142 = vtanh.f32 %v8050_v56  ;;  %v13772_v10 = vpop.f32.mrf.mxu1 }
 0x5c0   :  { %v11131_v49 = vpop.eup %11130  ;;  %v13774_v27 = vpop.f32.mrf.mxu0 }
 0x5c1   :  { %v9887_v24 = vpack.c.bf16 %v11131_v49, %v11129_v25  ;;  %v13776_v19 = vpop.f32.mrf.mxu1 }
 0x5c2   :  { %v13778_v46 = vpop.f32.mrf.mxu0  ;;  %v11133_v21 = vpop.eup %11132 }
 0x5c3   :  { %8954 = vst [vmem:[#allocation17 + $0x160] sm:$0xff] %v9887_v24  ;;  %v13780_v48 = vpop.f32.mrf.mxu1 }
 0x5c4   :  { %v11135_v11 = vpop.eup %11134  ;;  %v13782_v34 = vpop.f32.mrf.mxu0 }
 0x5c5   :  { %v9891_v45 = vpack.c.bf16 %v11135_v11, %v11133_v21  ;;  %v13784_v16 = vpop.f32.mrf.mxu1 }
 0x5c6   :  { %v13786_v41 = vpop.f32.mrf.mxu0  ;;  %v11137_v47 = vpop.eup %11136 }
 0x5c7   :  { %8958 = vst [vmem:[#allocation17 + $0x17c] sm:$0xff] %v9891_v45  ;;  %v13788_v43 = vpop.f32.mrf.mxu1 }
 0x5c8   :  { %v11139_v6 = vpop.eup %11138  ;;  %v13790_v17 = vpop.f32.mrf.mxu0 }
 0x5c9   :  { %v9895_v13 = vpack.c.bf16 %v11139_v6, %v11137_v47  ;;  %v13792_v35 = vpop.f32.mrf.mxu1 }
 0x5ca   :  { %v13794_v33 = vpop.f32.mrf.mxu0  ;;  %v11141_v44 = vpop.eup %11140 }
 0x5cb   :  { %8962 = vst [vmem:[#allocation17 + $0x198] sm:$0xff] %v9895_v13  ;;  %v13796_v40 = vpop.f32.mrf.mxu1 }
 0x5cc   :  { %v11143_v5 = vpop.eup %11142  ;;  %v13798_v39 = vpop.f32.mrf.mxu0 }
 0x5cd   :  { %v9899_v63 = vpack.c.bf16 %v11143_v5, %v11141_v44  ;;  %v13800_v14 = vpop.f32.mrf.mxu1 }
 0x5ce   :  { %v13802_v60 = vpop.f32.mrf.mxu0 }
 0x5cf   :  { %8966 = vst [vmem:[#allocation17 + $0x1b4] sm:$0xff] %v9899_v63  ;;  %v13804_v28 = vpop.f32.mrf.mxu1 }
 0x5d0   :  { %v13806_v32 = vpop.f32.mrf.mxu0 }
 0x5d1   :  { %v13808_v30 = vpop.f32.mrf.mxu1 }
 0x5d2   :  { %v13810_v7 = vpop.f32.mrf.mxu0 }
 0x5d3   :  { %v13812_v54 = vpop.f32.mrf.mxu1 }
 0x5d4   :  { %v13814_v37 = vpop.f32.mrf.mxu0 }
 0x5d5   :  { %v13816_v18 = vpop.f32.mrf.mxu1 }
 0x5d6   :  { %v13818_v2 = vpop.f32.mrf.mxu0 }
 0x5d7   :  { %v13820_v38 = vpop.f32.mrf.mxu1 }
 0x5d8   :  { %14604 = vst [vmem:[#allocation117_spill] sm:$0xff] %v13820_v38  ;;  %v13822_v42 = vpop.f32.mrf.mxu0 }
 0x5d9   :  { %v13824_v20 = vpop.f32.mrf.mxu1 }
 0x5da   :  { %14605 = vst [vmem:[#allocation100_spill] sm:$0xff] %v13824_v20  ;;  %v13826_v62 = vpop.f32.mrf.mxu0 }
 0x5db   :  { %14606 = vst [vmem:[#allocation48_spill] sm:$0xff] %v13826_v62  ;;  %v13828_v58 = vpop.f32.mrf.mxu1 }
 0x5dc   :  { %14607 = vst [vmem:[#allocation90_spill] sm:$0xff] %v13828_v58  ;;  %v13830_v51 = vpop.f32.mrf.mxu0 }
 0x5dd   :  { %14608 = vst [vmem:[#allocation62_spill] sm:$0xff] %v13830_v51  ;;  %v13832_v1 = vpop.f32.mrf.mxu1 }
 0x5de   :  { %14609 = vst [vmem:[#allocation118_spill] sm:$0xff] %v13832_v1  ;;  %v13834_v61 = vpop.f32.mrf.mxu0 }
 0x5df   :  { %14610 = vst [vmem:[#allocation129_spill] sm:$0xff] %v13834_v61  ;;  %v13836_v8 = vpop.f32.mrf.mxu1 }
 0x5e0   :  { %14611 = vst [vmem:[#allocation63_spill] sm:$0xff] %v13836_v8  ;;  %v13838_v56 = vpop.f32.mrf.mxu0 }
 0x5e1   :  { %14612 = vst [vmem:[#allocation91_spill] sm:$0xff] %v13838_v56  ;;  %v13840_v12 = vpop.f32.mrf.mxu1  ;;  %v9986_v56 = vadd.f32 %v13782_v34, %v13778_v46 }
 0x5e2   :  { %14613 = vst [vmem:[#allocation119_spill] sm:$0xff] %v13840_v12  ;;  %v13842_v25 = vpop.f32.mrf.mxu0 }
 0x5e3   :  { %14614 = vst [vmem:[#allocation120_spill] sm:$0xff] %v13842_v25  ;;  %v13844_v49 = vpop.f32.mrf.mxu1 }
 0x5e4   :  { %14615 = vst [vmem:[#allocation58_spill] sm:$0xff] %v13844_v49  ;;  %v13846_v24 = vpop.f32.mrf.mxu0 }
 0x5e5   :  { %14616 = vst [vmem:[#allocation101_spill] sm:$0xff] %v13846_v24  ;;  %v13848_v21 = vpop.f32.mrf.mxu1  ;;  %v14626_v24 = vld [vmem:[#allocation24_spill] sm:$0xff] }
 0x5e6   :  { %14617 = vst [vmem:[#allocation102_spill] sm:$0xff] %v13848_v21  ;;  %v13850_v11 = vpop.f32.mrf.mxu0 }
 0x5e7   :  { %14618 = vst [vmem:[#allocation92_spill] sm:$0xff] %v13850_v11  ;;  %v13852_v45 = vpop.f32.mrf.mxu1 }
 0x5e8   :  { %14619 = vst [vmem:[#allocation50_spill] sm:$0xff] %v13852_v45  ;;  %v13854_v47 = vpop.f32.mrf.mxu0 }
 0x5e9   :  { %14620 = vst [vmem:[#allocation130_spill] sm:$0xff] %v13854_v47  ;;  %v13856_v6 = vpop.f32.mrf.mxu1  ;;  %v11178_v47 = vld [vmem:[#allocation16] sm:$0xff] }
 0x5ea   :  { %14621 = vst [vmem:[#allocation103_spill] sm:$0xff] %v13856_v6  ;;  %v13858_v13 = vpop.f32.mrf.mxu0  ;;  %v14627_v6 = vsub.s32 6, %v14626_v24 }
 0x5eb   :  { %14622 = vst [vmem:[#allocation51_spill] sm:$0xff] %v13858_v13  ;;  %v13860_v44 = vpop.f32.mrf.mxu1 }
 0x5ec   :  { %14623 = vst [vmem:[#allocation107_spill] sm:$0xff] %v13860_v44  ;;  %v13862_v5 = vpop.f32.mrf.mxu0  ;;  %v13868_v25 = vrot.slane %v11178_v47, %v14627_v6 }
 0x5ed   :  { %14624 = vst [vmem:[#allocation64_spill] sm:$0xff] %v13862_v5  ;;  %v13864_v63 = vpop.f32.mrf.mxu1  ;;  %v9983_v5 = vadd.f32 %v13774_v27, %v13768_v15 }
 0x5ee   :  { %14625 = vst [vmem:[#allocation123_spill] sm:$0xff] %v13864_v63  ;;  %v10017_v26 = vpop.f32.mrf.mxu0  ;;  %v8087_v58 = vadd.f32 %v13634_v9, %v13868_v25  ;;  %v8135_v24 = vadd.f32 %v13754_v50, %v13868_v25  ;;  %v8090_v6 = vadd.f32 %v13644_v55, %v13868_v25  ;;  %v10047_v9 = vadd.f32 %v13776_v19, %v13772_v10 }
 0x5ef   :  { %v10081_v4 = vpop.f32.mrf.mxu1  ;;  %v8138_v46 = vadd.f32 %v13762_v57, %v13868_v25  ;;  %v9989_v50 = vadd.f32 %v13790_v17, %v13786_v41 }
 0x5f0   :  { %v10018_v49 = vpop.f32.mrf.mxu0  ;;  %v8184_v47 = vadd.f32 %v9983_v5, %v8087_v58  ;;  %v8187_v34 = vadd.f32 %v9986_v56, %v8090_v6  ;;  %v9995_v6 = vadd.f32 %v13806_v32, %v13802_v60 }
 0x5f1   :  { %v10082_v21 = vpop.f32.mrf.mxu1  ;;  %v10019_v29 = vadd.f32 %v10018_v49, %v10017_v26 }
 0x5f2   :  { %v10020_v12 = vpop.f32.mrf.mxu0  ;;  %v8281_v51 = vadd.f32 %v10047_v9, %v8184_v47  ;;  %v10083_v58 = vadd.f32 %v10082_v21, %v10081_v4  ;;  %v9992_v4 = vadd.f32 %v13798_v39, %v13794_v33 }
 0x5f3   :  { %v10084_v11 = vpop.f32.mrf.mxu1  ;;  %v8232_v26 = vadd.f32 %v10019_v29, %v8135_v24  ;;  %v8095_v29 = vadd.f32 %v13654_v52, %v13868_v25  ;;  %v8143_v24 = vadd.f32 %v13766_v0, %v13868_v25  ;;  %v8098_v52 = vadd.f32 %v13664_v53, %v13868_v25 }
 0x5f4   :  { %v10021_v8 = vpop.f32.mrf.mxu0 }
 0x5f5   :  { %v10085_v45 = vpop.f32.mrf.mxu1  ;;  %v10022_v15 = vadd.f32 %v10021_v8, %v10020_v12  ;;  %v10050_v8 = vadd.f32 %v13784_v16, %v13780_v48  ;;  %v8329_v57 = vadd.f32 %v10083_v58, %v8232_v26  ;;  %v8192_v16 = vadd.f32 %v9989_v50, %v8095_v29 }
 0x5f6   :  { %v10023_v22 = vpop.f32.mrf.mxu0  ;;  %v10086_v41 = vadd.f32 %v10085_v45, %v10084_v11  ;;  %v8146_v11 = vadd.f32 %v13770_v3, %v13868_v25  ;;  %v8195_v45 = vadd.f32 %v9992_v4, %v8098_v52 }
 0x5f7   :  { %v10087_v13 = vpop.f32.mrf.mxu1  ;;  %v8235_v12 = vadd.f32 %v10022_v15, %v8138_v46  ;;  %v8284_v47 = vadd.f32 %v10050_v8, %v8187_v34 }
 0x5f8   :  { %v10024_v44 = vpop.f32.mrf.mxu0 }
 0x5f9   :  { %v10088_v63 = vpop.f32.mrf.mxu1  ;;  %v10025_v5 = vadd.f32 %v10024_v44, %v10023_v22 }
 0x5fa   :  { %v10026_v1 = vpop.f32.mrf.mxu0  ;;  %v10089_v15 = vadd.f32 %v10088_v63, %v10087_v13  ;;  %v9998_v63 = vadd.f32 %v13814_v37, %v13810_v7 }
 0x5fb   :  { %v13876_v61 = vpop.f32.mrf.mxu1 }
 0x5fc   :  { %v10027_v36 = vpop.f32.mrf.mxu0 }
 0x5fd   :  { %v13882_v27 = vpop.f32.mrf.mxu1  ;;  %v10028_v44 = vadd.f32 %v10027_v36, %v10026_v1  ;;  %v8103_v36 = vadd.f32 %v13674_v23, %v13868_v25  ;;  %v10056_v1 = vadd.f32 %v13800_v14, %v13796_v40  ;;  %v8106_v14 = vadd.f32 %v13684_v59, %v13868_v25 }
 0x5fe   :  { %v10109_v20 = vpop.f32.mrf.mxu0  ;;  %v10092_v23 = vadd.f32 %v13882_v27, %v13876_v61  ;;  %v8111_v59 = vadd.f32 %v13694_v31, %v13868_v25  ;;  %v14630_v31 = vld [vmem:[#allocation117_spill] sm:$0xff] }
 0x5ff   :  { %v10145_v49 = vpop.f32.mrf.mxu1  ;;  %v8292_v32 = vadd.f32 %v10056_v1, %v8195_v45  ;;  %v8200_v13 = vadd.f32 %v9995_v6, %v8103_v36  ;;  %v8203_v37 = vadd.f32 %v9998_v63, %v8106_v14  ;;  %v14633_v45 = vld [vmem:[#allocation129_spill] sm:$0xff]  ;;  %v14634_v6 = vld [vmem:[#allocation91_spill] sm:$0xff]  ;;  %v14635_v36 = vld [vmem:[#allocation126_spill] sm:$0xff] }
 0x600   :  { %v10110_v38 = vpop.f32.mrf.mxu0  ;;  %v8119_v1 = vadd.f32 %v14635_v36, %v13868_v25  ;;  %v14638_v63 = vld [vmem:[#allocation120_spill] sm:$0xff] }
 0x601   :  { %v10111_v55 = vadd.f32 %v10110_v38, %v10109_v20  ;;  %v10146_v62 = vpop.f32.mrf.mxu1  ;;  %v10053_v20 = vadd.f32 %v13792_v35, %v13788_v43 }
 0x602   :  { %v10112_v10 = vpop.f32.mrf.mxu0  ;;  %v10147_v56 = vadd.f32 %v10146_v62, %v10145_v49  ;;  %v8332_v62 = vadd.f32 %v10086_v41, %v8235_v12  ;;  %v8243_v49 = vadd.f32 %v10028_v44, %v8146_v11  ;;  %v10059_v12 = vadd.f32 %v13808_v30, %v13804_v28 }
 0x603   :  { %v8378_v19 = vadd.f32 %v10111_v55, %v8281_v51  ;;  %v10148_v17 = vpop.f32.mrf.mxu1  ;;  %v8240_v51 = vadd.f32 %v10025_v5, %v8143_v24  ;;  %v8289_v26 = vadd.f32 %v10053_v20, %v8192_v16  ;;  %v10062_v28 = vadd.f32 %v13816_v18, %v13812_v54  ;;  %v14632_v18 = vld [vmem:[#allocation88_spill] sm:$0xff] }
 0x604   :  { %v10113_v48 = vpop.f32.mrf.mxu0  ;;  %v8426_v22 = vadd.f32 %v10147_v56, %v8329_v57  ;;  %v8340_v29 = vadd.f32 %v10092_v23, %v8243_v49  ;;  %v8297_v27 = vadd.f32 %v10059_v12, %v8200_v13 }
 0x605   :  { %11144 = vtanh.f32 %v8378_v19  ;;  %v10114_v38 = vadd.f32 %v10113_v48, %v10112_v10  ;;  %v10149_v0 = vpop.f32.mrf.mxu1  ;;  %v8337_v46 = vadd.f32 %v10089_v15, %v8240_v51  ;;  %v10001_v19 = vadd.f32 %v13822_v42, %v13818_v2  ;;  %v14628_v42 = vld [vmem:[#allocation48_spill] sm:$0xff] }
 0x606   :  { %v10115_v21 = vpop.f32.mrf.mxu0  ;;  %11146 = vtanh.f32 %v8426_v22  ;;  %v10150_v39 = vadd.f32 %v10149_v0, %v10148_v17  ;;  %v8300_v48 = vadd.f32 %v10062_v28, %v8203_v37  ;;  %v14629_v22 = vld [vmem:[#allocation62_spill] sm:$0xff]  ;;  %v14631_v51 = vld [vmem:[#allocation100_spill] sm:$0xff]  ;;  %v10007_v15 = vadd.f32 %v14634_v6, %v14633_v45  ;;  %v14652_v6 = vld [vmem:[#allocation103_spill] sm:$0xff] }
 0x607   :  { %v8381_v33 = vadd.f32 %v10114_v38, %v8284_v47  ;;  %v10151_v53 = vpop.f32.mrf.mxu1  ;;  %v8208_v16 = vadd.f32 %v10001_v19, %v8111_v59  ;;  %v10004_v38 = vadd.f32 %v14629_v22, %v14628_v42  ;;  %v10065_v0 = vadd.f32 %v14631_v51, %v14630_v31  ;;  %v14643_v59 = vld [vmem:[#allocation92_spill] sm:$0xff]  ;;  %v14644_v28 = vld [vmem:[#allocation130_spill] sm:$0xff]  ;;  %v14647_v22 = vld [vmem:[#allocation89_spill] sm:$0xff] }
 0x608   :  { %v10116_v9 = vpop.f32.mrf.mxu0  ;;  %v8429_v43 = vadd.f32 %v10150_v39, %v8332_v62  ;;  %v8216_v13 = vadd.f32 %v10007_v15, %v8119_v1  ;;  %v14651_v45 = vld [vmem:[#allocation50_spill] sm:$0xff] }
 0x609   :  { %11148 = vtanh.f32 %v8381_v33  ;;  %v10117_v35 = vadd.f32 %v10116_v9, %v10115_v21  ;;  %v10152_v34 = vpop.f32.mrf.mxu1  ;;  %v8114_v21 = vadd.f32 %v14632_v18, %v13868_v25  ;;  %v8305_v11 = vadd.f32 %v10065_v0, %v8208_v16  ;;  %v14646_v16 = vld [vmem:[#allocation102_spill] sm:$0xff]  ;;  %v14648_v0 = vld [vmem:[#allocation51_spill] sm:$0xff] }
 0x60a   :  { %v10118_v3 = vpop.f32.mrf.mxu0  ;;  %11150 = vtanh.f32 %v8429_v43  ;;  %v10153_v60 = vadd.f32 %v10152_v34, %v10151_v53  ;;  %v14636_v34 = vld [vmem:[#allocation90_spill] sm:$0xff]  ;;  %v10077_v15 = vadd.f32 %v14652_v6, %v14651_v45 }
 0x60b   :  { %v8386_v50 = vadd.f32 %v10117_v35, %v8289_v26  ;;  %v10154_v58 = vpop.f32.mrf.mxu1  ;;  %v8211_v9 = vadd.f32 %v10004_v38, %v8114_v21  ;;  %v8127_v38 = vadd.f32 %v14647_v22, %v13868_v25 }
 0x60c   :  { %v10119_v55 = vpop.f32.mrf.mxu0  ;;  %v8434_v8 = vadd.f32 %v10153_v60, %v8337_v46 }
 0x60d   :  { %11152 = vtanh.f32 %v8386_v50  ;;  %v10120_v40 = vadd.f32 %v10119_v55, %v10118_v3  ;;  %v10155_v5 = vpop.f32.mrf.mxu1  ;;  %v14637_v3 = vld [vmem:[#allocation118_spill] sm:$0xff] }
 0x60e   :  { %v10121_v10 = vpop.f32.mrf.mxu0  ;;  %11154 = vtanh.f32 %v8434_v8  ;;  %v10156_v7 = vadd.f32 %v10155_v5, %v10154_v58  ;;  %v10068_v49 = vadd.f32 %v14637_v3, %v14636_v34  ;;  %v14639_v58 = vld [vmem:[#allocation101_spill] sm:$0xff]  ;;  %v14640_v5 = vld [vmem:[#allocation99_spill] sm:$0xff] }
 0x60f   :  { %v8389_v57 = vadd.f32 %v10120_v40, %v8292_v32  ;;  %v10010_v55 = vadd.f32 %v14639_v58, %v14638_v63  ;;  %v14653_v34 = vld [vmem:[#allocation107_spill] sm:$0xff] }
 0x610   :  { %v10122_v61 = vpop.f32.mrf.mxu0  ;;  %v8437_v56 = vadd.f32 %v10156_v7, %v8340_v29  ;;  %v8308_v8 = vadd.f32 %v10068_v49, %v8211_v9  ;;  %v14641_v29 = vld [vmem:[#allocation63_spill] sm:$0xff] }
 0x611   :  { %11156 = vtanh.f32 %v8389_v57  ;;  %v10123_v24 = vadd.f32 %v10122_v61, %v10121_v10  ;;  %v8122_v10 = vadd.f32 %v14640_v5, %v13868_v25  ;;  %v14642_v57 = vld [vmem:[#allocation119_spill] sm:$0xff] }
 0x612   :  { %v11145_v47 = vpop.eup %11144  ;;  %v10124_v30 = vpop.f32.mrf.mxu0  ;;  %11158 = vtanh.f32 %v8437_v56  ;;  %v10071_v7 = vadd.f32 %v14642_v57, %v14641_v29  ;;  %v14654_v3 = vld [vmem:[#allocation123_spill] sm:$0xff] }
 0x613   :  { %v9840_v4 = vpack.c.bf16 %v11145_v47, %v11145_v47  ;;  %v8394_v41 = vadd.f32 %v10123_v24, %v8297_v27  ;;  %v11147_v17 = vpop.eup %11146  ;;  %v8219_v24 = vadd.f32 %v10010_v55, %v8122_v10  ;;  %v10080_v49 = vadd.f32 %v14654_v3, %v14653_v34 }
 0x614   :  { %v10125_v2 = vpop.f32.mrf.mxu0  ;;  %v9888_v52 = vpack.c.bf16 %v11147_v17, %v11147_v17  ;;  %v8313_v56 = vadd.f32 %v10071_v7, %v8216_v13 }
 0x615   :  { %8907 = vst [vmem:[#allocation17 + $0x18] sm:$0xf] %v9840_v4  ;;  %11160 = vtanh.f32 %v8394_v41  ;;  %v10126_v20 = vadd.f32 %v10125_v2, %v10124_v30  ;;  %v10013_v30 = vadd.f32 %v14644_v28, %v14643_v59 }
 0x616   :  { %v11149_v62 = vpop.eup %11148  ;;  %v10127_v54 = vpop.f32.mrf.mxu0  ;;  %8955 = vst [vmem:[#allocation17 + $0x168] sm:$0xf] %v9888_v52 }
 0x617   :  { %v9844_v44 = vpack.c.bf16 %v11149_v62, %v11149_v62  ;;  %v8397_v33 = vadd.f32 %v10126_v20, %v8300_v48  ;;  %v11151_v39 = vpop.eup %11150  ;;  %v14645_v48 = vld [vmem:[#allocation58_spill] sm:$0xff]  ;;  %v8224_v51 = vadd.f32 %v10013_v30, %v8127_v38 }
 0x618   :  { %v10128_v53 = vpop.f32.mrf.mxu0  ;;  %v9892_v26 = vpack.c.bf16 %v11151_v39, %v11151_v39  ;;  %v10074_v2 = vadd.f32 %v14646_v16, %v14645_v48  ;;  %v14650_v39 = vld [vmem:[#allocation47_spill] sm:$0xff] }
 0x619   :  { %8911 = vst [vmem:[#allocation17 + $0x34] sm:$0xf] %v9844_v44  ;;  %11162 = vtanh.f32 %v8397_v33  ;;  %v10129_v43 = vadd.f32 %v10128_v53, %v10127_v54  ;;  %v14649_v54 = vld [vmem:[#allocation64_spill] sm:$0xff] }
 0x61a   :  { %v11153_v35 = vpop.eup %11152  ;;  %v10130_v46 = vpop.f32.mrf.mxu0  ;;  %8959 = vst [vmem:[#allocation17 + $0x184] sm:$0xf] %v9892_v26  ;;  %v8316_v62 = vadd.f32 %v10074_v2, %v8219_v24  ;;  %v10016_v18 = vadd.f32 %v14649_v54, %v14648_v0 }
 0x61b   :  { %v9848_v50 = vpack.c.bf16 %v11153_v35, %v11153_v35  ;;  %v8402_v60 = vadd.f32 %v10129_v43, %v8305_v11  ;;  %v11155_v32 = vpop.eup %11154  ;;  %v8130_v11 = vadd.f32 %v14650_v39, %v13868_v25  ;;  %v8321_v43 = vadd.f32 %v10077_v15, %v8224_v51 }
 0x61c   :  { %v10131_v23 = vpop.f32.mrf.mxu0  ;;  %v9896_v40 = vpack.c.bf16 %v11155_v32, %v11155_v32 }
 0x61d   :  { %8915 = vst [vmem:[#allocation17 + $0x50] sm:$0xf] %v9848_v50  ;;  %11164 = vtanh.f32 %v8402_v60  ;;  %v10132_v14 = vadd.f32 %v10131_v23, %v10130_v46  ;;  %v8227_v35 = vadd.f32 %v10016_v18, %v8130_v11 }
 0x61e   :  { %v11157_v12 = vpop.eup %11156  ;;  %v10133_v37 = vpop.f32.mrf.mxu0  ;;  %8963 = vst [vmem:[#allocation17 + $0x1a0] sm:$0xf] %v9896_v40 }
 0x61f   :  { %v9852_v19 = vpack.c.bf16 %v11157_v12, %v11157_v12  ;;  %v8405_v61 = vadd.f32 %v10132_v14, %v8308_v8  ;;  %v11159_v27 = vpop.eup %11158  ;;  %v8324_v25 = vadd.f32 %v10080_v49, %v8227_v35 }
 0x620   :  { %v10134_v47 = vpop.f32.mrf.mxu0  ;;  %v9900_v4 = vpack.c.bf16 %v11159_v27, %v11159_v27 }
 0x621   :  { %8919 = vst [vmem:[#allocation17 + $0x6c] sm:$0xf] %v9852_v19  ;;  %11166 = vtanh.f32 %v8405_v61  ;;  %v10135_v41 = vadd.f32 %v10134_v47, %v10133_v37 }
 0x622   :  { %v11161_v17 = vpop.eup %11160  ;;  %v10136_v42 = vpop.f32.mrf.mxu0  ;;  %8967 = vst [vmem:[#allocation17 + $0x1bc] sm:$0xf] %v9900_v4 }
 0x623   :  { %v9856_v52 = vpack.c.bf16 %v11161_v17, %v11161_v17  ;;  %v8410_v20 = vadd.f32 %v10135_v41, %v8313_v56 }
 0x624   :  { %v10137_v31 = vpop.f32.mrf.mxu0 }
 0x625   :  { %8923 = vst [vmem:[#allocation17 + $0x88] sm:$0xf] %v9856_v52  ;;  %11168 = vtanh.f32 %v8410_v20  ;;  %v10138_v21 = vadd.f32 %v10137_v31, %v10136_v42 }
 0x626   :  { %v11163_v44 = vpop.eup %11162  ;;  %v10139_v33 = vpop.f32.mrf.mxu0 }
 0x627   :  { %v9860_v53 = vpack.c.bf16 %v11163_v44, %v11163_v44  ;;  %v8413_v9 = vadd.f32 %v10138_v21, %v8316_v62 }
 0x628   :  { %v10140_v26 = vpop.f32.mrf.mxu0 }
 0x629   :  { %8927 = vst [vmem:[#allocation17 + $0xa4] sm:$0xf] %v9860_v53  ;;  %11170 = vtanh.f32 %v8413_v9  ;;  %v10141_v36 = vadd.f32 %v10140_v26, %v10139_v33 }
 0x62a   :  { %v11165_v1 = vpop.eup %11164  ;;  %v10142_v46 = vpop.f32.mrf.mxu0 }
 0x62b   :  { %v9864_v50 = vpack.c.bf16 %v11165_v1, %v11165_v1  ;;  %v8418_v60 = vadd.f32 %v10141_v36, %v8321_v43 }
 0x62c   :  { %v10143_v32 = vpop.f32.mrf.mxu0 }
 0x62d   :  { %8931 = vst [vmem:[#allocation17 + $0xc0] sm:$0xf] %v9864_v50  ;;  %11172 = vtanh.f32 %v8418_v60  ;;  %v10144_v13 = vadd.f32 %v10143_v32, %v10142_v46 }
 0x62e   :  { %v11167_v63 = vpop.eup %11166 }
 0x62f   :  { %v9868_v58 = vpack.c.bf16 %v11167_v63, %v11167_v63  ;;  %v8421_v55 = vadd.f32 %v10144_v13, %v8324_v25 }
 0x631   :  { %8935 = vst [vmem:[#allocation17 + $0xdc] sm:$0xf] %v9868_v58  ;;  %11174 = vtanh.f32 %v8421_v55 }
 0x632   :  { %v11169_v23 = vpop.eup %11168 }
 0x633   :  { %v9872_v8 = vpack.c.bf16 %v11169_v23, %v11169_v23 }
 0x635   :  { %8939 = vst [vmem:[#allocation17 + $0xf8] sm:$0xf] %v9872_v8 }
 0x636   :  { %v11171_v40 = vpop.eup %11170 }
 0x637   :  { %v9876_v14 = vpack.c.bf16 %v11171_v40, %v11171_v40 }
 0x639   :  { %8943 = vst [vmem:[#allocation17 + $0x114] sm:$0xf] %v9876_v14 }
 0x63a   :  { %v11173_v12 = vpop.eup %11172 }
 0x63b   :  { %v9880_v5 = vpack.c.bf16 %v11173_v12, %v11173_v12 }
 0x63d   :  { %8947 = vst [vmem:[#allocation17 + $0x130] sm:$0xf] %v9880_v5 }
 0x63e   :  { %v11175_v10 = vpop.eup %11174 }
 0x63f   :  { %v9884_v29 = vpack.c.bf16 %v11175_v10, %v11175_v10 }
 0x641   :  { %8951 = vst [vmem:[#allocation17 + $0x14c] sm:$0xf] %v9884_v29 }
 0x642   :  { %11370 = shalt.err (!%p11367_p7)
}
 0x643   :  { %8979 = dma.vmem_to_hbm [thread:$0]  %s8974_s8, 7168, %s13971_s9, [#allocation4], %s11401_s10, %s11401_s10, %s11402_s11  }
 0x644   :  { %11389 = dma.done.wait [#allocation4], 7168  }
 0x645   :  { %11390 = vsyncadd [#allocation4], 4294960128 }
 0x646   :  { %8983 = vsyncpa [#allocation3], 1 }
 0x647   :  { %8984 = vsyncpa [#allocation6], 1 }
 0x648   :  { %8985 = vsyncpa [#allocation9], 1 }
 0x649   :  { %8986 = vsyncpa [#allocation12], 1 }
 0x64a   :  { %8987 = vsyncpa [#allocation15], 1 }
 0x64b   :  { %8988 = vsyncpa [#allocation4], 1 }

</bundles_post_ra>
